<compile_context>
chip_gen: v6e
topology: v6e:2x2x1
jax: 0.10.0
libtpu: 0.0.40
codegen_flags: <defaults>
</compile_context>

<pallas_src>
import jax
import jax.numpy as jnp
from jax.experimental import pallas as pl
from jax.experimental.pallas import tpu as pltpu

LAYERS = (32, 64, 32, 16)                        # layers_hidden
BATCH = 256                                      # rows per call (amortizes dispatch)
BATCH_TILE = 128                                 # sublane-full batch tile
GRID_SIZE = 5
SPLINE_ORDER = 3
NUM_COEF = GRID_SIZE + SPLINE_ORDER              # 8
NUM_GRID_PTS = GRID_SIZE + 2 * SPLINE_ORDER + 1  # 12
GRID_MIN, GRID_MAX = -1.0, 1.0
H = (GRID_MAX - GRID_MIN) / GRID_SIZE            # 0.4 (uniform knot spacing)
BN_EPS = 1e-5


def _knot(t):
    """Uniform knot position t (Python float, baked into the kernel)."""
    return (t - SPLINE_ORDER) * H + GRID_MIN


def mlp_kan_kernel(x_ref, w1_ref, w2_ref, wk_ref, bias_ref, o_ref):
    in_f, h1, h2, out_f = LAYERS
    # Packed biases (f32): row 0 -> folded Linear1+BN1 bias (64),
    # row 1 -> Linear2 bias (32), row 2 -> folded KAN-output-BN bias (16).
    b1 = bias_ref[0:1, 0:h1]
    b2 = bias_ref[1:2, 0:h2]
    bo = bias_ref[2:3, 0:out_f]

    x = x_ref[...]                                               # (BT, 32) f32

    # ---- MLP layer 0: Linear(32->64) with BN folded, then ReLU ----
    # bf16 operands on the MXU, f32 accumulation; elementwise stays f32.
    h = jnp.dot(x.astype(jnp.bfloat16), w1_ref[...],
                preferred_element_type=jnp.float32) + b1
    h = jnp.maximum(h, 0.0)

    # ---- MLP layer 1 (last): Linear(64->32) ----
    z = jnp.dot(h.astype(jnp.bfloat16), w2_ref[...],
                preferred_element_type=jnp.float32) + b2         # (BT, 32) f32

    # ---- KANLinear(32->16): B-spline bases via Cox-de-Boor recursion ----
    # Degree-0 bases from 12 compares: [z>=knot(j)] - [z>=knot(j+1)]
    # (equivalent to (z>=knot(j)) & (z<knot(j+1)) since knots are increasing).
    ge = [(z >= _knot(j)).astype(jnp.float32) for j in range(NUM_GRID_PTS)]
    bases = [ge[j] - ge[j + 1] for j in range(NUM_GRID_PTS - 1)]  # 11 arrays
    for k in range(1, SPLINE_ORDER + 1):
        inv = 1.0 / (k * H)                                      # constant denominator
        t = (z - _knot(0)) * inv                                 # shared per level
        rk = (k + 1.0) / k
        nxt = []
        for j in range(len(bases) - 1):
            left = t - (j / k)
            right = rk - left
            nxt.append(left * bases[j] + right * bases[j + 1])
        bases = nxt
    # bases: NUM_COEF (=8) arrays of shape (BT, 32), f32

    # ---- Fused base + spline output as 9 accumulated small MXU matmuls ----
    # wk_ref: (9, 32, 16) bf16; slot 0 = folded base weight, slots 1..8 = coef k.
    silu_z = z * jax.nn.sigmoid(z)
    acc = jnp.dot(silu_z.astype(jnp.bfloat16), wk_ref[0],
                  preferred_element_type=jnp.float32)
    for j in range(NUM_COEF):
        acc += jnp.dot(bases[j].astype(jnp.bfloat16), wk_ref[j + 1],
                       preferred_element_type=jnp.float32)
    o_ref[...] = acc + bo                                        # (BT, 16) f32


def init_raw_params(key):
    """Raw (unfolded) parameters mirroring the PyTorch module in eval mode."""
    in_f, h1, h2, out_f = LAYERS
    ks = jax.random.split(key, 16)
    # MLP layer 0 (Linear + BatchNorm1d)
    w1 = 0.1 * jax.random.normal(ks[0], (h1, in_f), jnp.float32)
    b1 = 0.1 * jax.random.normal(ks[1], (1, h1), jnp.float32)
    g1 = 1.0 + 0.1 * jax.random.normal(ks[2], (1, h1), jnp.float32)
    be1 = 0.1 * jax.random.normal(ks[3], (1, h1), jnp.float32)
    m1 = 0.05 * jax.random.normal(ks[4], (1, h1), jnp.float32)
    v1 = 0.5 + 0.5 * jnp.abs(jax.random.normal(ks[5], (1, h1), jnp.float32))
    # MLP layer 1 (Linear only)
    w2 = 0.1 * jax.random.normal(ks[6], (h2, h1), jnp.float32)
    b2 = 0.1 * jax.random.normal(ks[7], (1, h2), jnp.float32)
    # KANLinear(h2 -> out_f)
    grid_1d = jnp.arange(-SPLINE_ORDER, GRID_SIZE + SPLINE_ORDER + 1,
                         dtype=jnp.float32) * H + GRID_MIN       # (12,)
    grid = jnp.tile(grid_1d[None, :], (h2, 1))                   # (in, 12)
    base_w = 0.1 * jax.random.normal(ks[8], (out_f, h2), jnp.float32)
    spline_w = 0.1 * jax.random.normal(ks[9], (out_f, h2, NUM_COEF), jnp.float32)
    spline_scaler = 1.0 + 0.3 * jax.random.normal(ks[10], (out_f, h2), jnp.float32)
    scaled_spline_w = spline_w * spline_scaler[:, :, None]       # (out, in, K)
    # KANLinear's BatchNorm1d(out_f)
    g2 = 1.0 + 0.1 * jax.random.normal(ks[11], (1, out_f), jnp.float32)
    be2 = 0.1 * jax.random.normal(ks[12], (1, out_f), jnp.float32)
    m2 = 0.05 * jax.random.normal(ks[13], (1, out_f), jnp.float32)
    v2 = 0.5 + 0.5 * jnp.abs(jax.random.normal(ks[14], (1, out_f), jnp.float32))

    return dict(
        w1t=w1.T, b1=b1, g1=g1, be1=be1, m1=m1, v1=v1,
        w2t=w2.T, b2=b2,
        grid=grid, basewt=base_w.T,
        spw=jnp.transpose(scaled_spline_w, (2, 1, 0)),           # (K, in, out)
        g2=g2, be2=be2, m2=m2, v2=v2,
    )


def fold_params(p):
    """Fold both eval BatchNorms into weights; pack kernel args (bf16 weights)."""
    in_f, h1, h2, out_f = LAYERS
    # BN1 folded into Linear(32->64): ReLU((x@W+b-m)*s*g+beta) == ReLU(x@W' + b')
    s1 = p["g1"] * jax.lax.rsqrt(p["v1"] + BN_EPS)               # (1, 64)
    w1f = (p["w1t"] * s1).astype(jnp.bfloat16)                   # (32, 64) bf16
    b1f = (p["b1"] - p["m1"]) * s1 + p["be1"]                    # (1, 64) f32
    # BN2 folded into the KAN weight stack and an output bias.
    s2 = p["g2"] * jax.lax.rsqrt(p["v2"] + BN_EPS)               # (1, 16)
    basew_f = p["basewt"] * s2                                   # (32, 16)
    spw_f = p["spw"] * s2                                        # (8, 32, 16)
    wk = jnp.concatenate([basew_f[None], spw_f], axis=0).astype(jnp.bfloat16)  # (9,32,16)
    bo = p["be2"] - p["m2"] * s2                                 # (1, 16)
    # Pack the three bias vectors into one (3, 128) slab (single VMEM buffer).
    bias = jnp.zeros((3, 128), jnp.float32)
    bias = bias.at[0, :h1].set(b1f[0])
    bias = bias.at[1, :h2].set(p["b2"][0])
    bias = bias.at[2, :out_f].set(bo[0])
    return dict(w1f=w1f, w2t=p["w2t"].astype(jnp.bfloat16), wk=wk, bias=bias)


@jax.jit
def mlp_kan_forward(x, folded):
    in_f, h1, h2, out_f = LAYERS
    b = x.shape[0]
    bt = BATCH_TILE if b % BATCH_TILE == 0 else b
    return pl.pallas_call(
        mlp_kan_kernel,
        out_shape=jax.ShapeDtypeStruct((b, out_f), jnp.float32),
        grid_spec=pltpu.PrefetchScalarGridSpec(
            num_scalar_prefetch=0,
            grid=(b // bt,),
            in_specs=[
                pl.BlockSpec((bt, in_f), lambda i: (i, 0)),             # x: batch-tiled
                pl.BlockSpec((in_f, h1), lambda i: (0, 0)),             # weights: resident
                pl.BlockSpec((h1, h2), lambda i: (0, 0)),
                pl.BlockSpec((NUM_COEF + 1, h2, out_f), lambda i: (0, 0, 0)),
                pl.BlockSpec((3, 128), lambda i: (0, 0)),
            ],
            out_specs=pl.BlockSpec((bt, out_f), lambda i: (i, 0)),
        ),
        compiler_params=pltpu.CompilerParams(
            dimension_semantics=("parallel",)),
    )(x, folded["w1f"], folded["w2t"], folded["wk"], folded["bias"])


def mlp_kan_reference(x, p):
    """Pure-JAX f32 reference mirroring the PyTorch eval-mode forward (unfolded)."""
    h = x @ p["w1t"] + p["b1"]
    h = (h - p["m1"]) / jnp.sqrt(p["v1"] + BN_EPS) * p["g1"] + p["be1"]
    h = jnp.maximum(h, 0.0)
    z = h @ p["w2t"] + p["b2"]
    grid = p["grid"]
    xk = z[:, :, None]
    bases = ((xk >= grid[None, :, :-1]) & (xk < grid[None, :, 1:])).astype(jnp.float32)
    for k in range(1, SPLINE_ORDER + 1):
        left = (xk - grid[None, :, :-(k + 1)]) / (grid[None, :, k:-1] - grid[None, :, :-(k + 1)])
        right = (grid[None, :, k + 1:] - xk) / (grid[None, :, k + 1:] - grid[None, :, 1:-k])
        bases = left * bases[:, :, :-1] + right * bases[:, :, 1:]
    spline_out = jnp.einsum("bik,kio->bo", bases, p["spw"])
    base_out = (z * jax.nn.sigmoid(z)) @ p["basewt"]
    out = base_out + spline_out
    out = (out - p["m2"]) / jnp.sqrt(p["v2"] + BN_EPS) * p["g2"] + p["be2"]
    return out


if __name__ == "__main__":
    key = jax.random.PRNGKey(0)
    k_x, k_p = jax.random.split(key)
    x = jax.random.normal(k_x, (BATCH, LAYERS[0]), jnp.float32)
    raw = init_raw_params(k_p)
    folded = fold_params(raw)

    out = mlp_kan_forward(x, folded)
    out = jax.block_until_ready(out)

    ref = mlp_kan_reference(x, raw)
    assert out.shape == (BATCH, LAYERS[-1])
    assert bool(jnp.all(jnp.isfinite(out)))
    # bf16 matmul operands -> loosened tolerance vs the f32 unfolded reference.
    assert bool(jnp.allclose(out, ref, rtol=2e-2, atol=3e-2)), "mismatch vs JAX reference"
    print("KERNEL_OK")
</pallas_src>

<mosaic_0001>
module attributes {stable_mosaic.version = 11 : i64} {
  func.func @mlp_kan_kernel(%arg0: i32, %arg1: memref<128x32xf32, #tpu.memory_space<vmem>>, %arg2: memref<32x64xbf16, #tpu.memory_space<vmem>>, %arg3: memref<64x32xbf16, #tpu.memory_space<vmem>>, %arg4: memref<9x32x16xbf16, #tpu.memory_space<vmem>>, %arg5: memref<3x128xf32, #tpu.memory_space<vmem>>, %arg6: memref<128x16xf32, #tpu.memory_space<vmem>>) attributes {dimension_semantics = [#tpu.dimension_semantics<parallel>], iteration_bounds = array<i64: 2>, scalar_prefetch = 0 : i64, scratch_operands = 0 : i64, tpu.core_type = #tpu.core_type<tc>, window_params = [{transform_indices = @transform_0, window_bounds = array<i64: 128, 32>}, {pipeline_mode = #tpu.pipeline_mode<synchronous>, transform_indices = @transform_1, window_bounds = array<i64: 32, 64>}, {pipeline_mode = #tpu.pipeline_mode<synchronous>, transform_indices = @transform_2, window_bounds = array<i64: 64, 32>}, {pipeline_mode = #tpu.pipeline_mode<synchronous>, transform_indices = @transform_3, window_bounds = array<i64: 9, 32, 16>}, {pipeline_mode = #tpu.pipeline_mode<synchronous>, transform_indices = @transform_4, window_bounds = array<i64: 3, 128>}, {transform_indices = @transform_5, window_bounds = array<i64: 128, 16>}]} {
    %c0 = arith.constant 0 : index
    %c0_0 = arith.constant 0 : index
    %0 = vector.load %arg5[%c0, %c0_0] : memref<3x128xf32, #tpu.memory_space<vmem>>, vector<1x64xf32>
    %c1 = arith.constant 1 : index
    %c0_1 = arith.constant 0 : index
    %1 = vector.load %arg5[%c1, %c0_1] : memref<3x128xf32, #tpu.memory_space<vmem>>, vector<1x32xf32>
    %c2 = arith.constant 2 : index
    %c0_2 = arith.constant 0 : index
    %2 = vector.load %arg5[%c2, %c0_2] : memref<3x128xf32, #tpu.memory_space<vmem>>, vector<1x16xf32>
    %c0_3 = arith.constant 0 : index
    %c0_4 = arith.constant 0 : index
    %3 = vector.load %arg1[%c0_3, %c0_4] : memref<128x32xf32, #tpu.memory_space<vmem>>, vector<128x32xf32>
    %4 = arith.truncf %3 : vector<128x32xf32> to vector<128x32xbf16>
    %c0_5 = arith.constant 0 : index
    %c0_6 = arith.constant 0 : index
    %5 = vector.load %arg2[%c0_5, %c0_6] : memref<32x64xbf16, #tpu.memory_space<vmem>>, vector<32x64xbf16>
    %cst = arith.constant dense<0.000000e+00> : vector<128x64xf32>
    %6 = tpu.matmul %4, %5, %cst {dimension_numbers = #tpu.dot_dimension_numbers<[1], [0], [0], [1], [0, 0, 1, 1], [], []>} : vector<128x32xbf16>, vector<32x64xbf16>, vector<128x64xf32> -> vector<128x64xf32>
    %7 = vector.broadcast %0 : vector<1x64xf32> to vector<128x64xf32>
    %8 = arith.addf %6, %7 : vector<128x64xf32>
    %cst_7 = arith.constant 0.000000e+00 : f32
    %9 = vector.broadcast %cst_7 : f32 to vector<128x64xf32>
    %10 = arith.maximumf %8, %9 : vector<128x64xf32>
    %11 = arith.truncf %10 : vector<128x64xf32> to vector<128x64xbf16>
    %c0_8 = arith.constant 0 : index
    %c0_9 = arith.constant 0 : index
    %12 = vector.load %arg3[%c0_8, %c0_9] : memref<64x32xbf16, #tpu.memory_space<vmem>>, vector<64x32xbf16>
    %cst_10 = arith.constant dense<0.000000e+00> : vector<128x32xf32>
    %13 = tpu.matmul %11, %12, %cst_10 {dimension_numbers = #tpu.dot_dimension_numbers<[1], [0], [0], [1], [0, 0, 1, 1], [], []>} : vector<128x64xbf16>, vector<64x32xbf16>, vector<128x32xf32> -> vector<128x32xf32>
    %14 = vector.broadcast %1 : vector<1x32xf32> to vector<128x32xf32>
    %15 = arith.addf %13, %14 : vector<128x32xf32>
    %cst_11 = arith.constant -2.200000e+00 : f32
    %16 = vector.broadcast %cst_11 : f32 to vector<128x32xf32>
    %17 = arith.cmpf oge, %15, %16 : vector<128x32xf32>
    %18 = arith.extui %17 : vector<128x32xi1> to vector<128x32xi32>
    %19 = arith.sitofp %18 : vector<128x32xi32> to vector<128x32xf32>
    %cst_12 = arith.constant -1.800000e+00 : f32
    %20 = vector.broadcast %cst_12 : f32 to vector<128x32xf32>
    %21 = arith.cmpf oge, %15, %20 : vector<128x32xf32>
    %22 = arith.extui %21 : vector<128x32xi1> to vector<128x32xi32>
    %23 = arith.sitofp %22 : vector<128x32xi32> to vector<128x32xf32>
    %cst_13 = arith.constant -1.400000e+00 : f32
    %24 = vector.broadcast %cst_13 : f32 to vector<128x32xf32>
    %25 = arith.cmpf oge, %15, %24 : vector<128x32xf32>
    %26 = arith.extui %25 : vector<128x32xi1> to vector<128x32xi32>
    %27 = arith.sitofp %26 : vector<128x32xi32> to vector<128x32xf32>
    %cst_14 = arith.constant -1.000000e+00 : f32
    %28 = vector.broadcast %cst_14 : f32 to vector<128x32xf32>
    %29 = arith.cmpf oge, %15, %28 : vector<128x32xf32>
    %30 = arith.extui %29 : vector<128x32xi1> to vector<128x32xi32>
    %31 = arith.sitofp %30 : vector<128x32xi32> to vector<128x32xf32>
    %cst_15 = arith.constant -6.000000e-01 : f32
    %32 = vector.broadcast %cst_15 : f32 to vector<128x32xf32>
    %33 = arith.cmpf oge, %15, %32 : vector<128x32xf32>
    %34 = arith.extui %33 : vector<128x32xi1> to vector<128x32xi32>
    %35 = arith.sitofp %34 : vector<128x32xi32> to vector<128x32xf32>
    %cst_16 = arith.constant -2.000000e-01 : f32
    %36 = vector.broadcast %cst_16 : f32 to vector<128x32xf32>
    %37 = arith.cmpf oge, %15, %36 : vector<128x32xf32>
    %38 = arith.extui %37 : vector<128x32xi1> to vector<128x32xi32>
    %39 = arith.sitofp %38 : vector<128x32xi32> to vector<128x32xf32>
    %cst_17 = arith.constant 2.000000e-01 : f32
    %40 = vector.broadcast %cst_17 : f32 to vector<128x32xf32>
    %41 = arith.cmpf oge, %15, %40 : vector<128x32xf32>
    %42 = arith.extui %41 : vector<128x32xi1> to vector<128x32xi32>
    %43 = arith.sitofp %42 : vector<128x32xi32> to vector<128x32xf32>
    %cst_18 = arith.constant 6.000000e-01 : f32
    %44 = vector.broadcast %cst_18 : f32 to vector<128x32xf32>
    %45 = arith.cmpf oge, %15, %44 : vector<128x32xf32>
    %46 = arith.extui %45 : vector<128x32xi1> to vector<128x32xi32>
    %47 = arith.sitofp %46 : vector<128x32xi32> to vector<128x32xf32>
    %cst_19 = arith.constant 1.000000e+00 : f32
    %48 = vector.broadcast %cst_19 : f32 to vector<128x32xf32>
    %49 = arith.cmpf oge, %15, %48 : vector<128x32xf32>
    %50 = arith.extui %49 : vector<128x32xi1> to vector<128x32xi32>
    %51 = arith.sitofp %50 : vector<128x32xi32> to vector<128x32xf32>
    %cst_20 = arith.constant 1.400000e+00 : f32
    %52 = vector.broadcast %cst_20 : f32 to vector<128x32xf32>
    %53 = arith.cmpf oge, %15, %52 : vector<128x32xf32>
    %54 = arith.extui %53 : vector<128x32xi1> to vector<128x32xi32>
    %55 = arith.sitofp %54 : vector<128x32xi32> to vector<128x32xf32>
    %cst_21 = arith.constant 1.800000e+00 : f32
    %56 = vector.broadcast %cst_21 : f32 to vector<128x32xf32>
    %57 = arith.cmpf oge, %15, %56 : vector<128x32xf32>
    %58 = arith.extui %57 : vector<128x32xi1> to vector<128x32xi32>
    %59 = arith.sitofp %58 : vector<128x32xi32> to vector<128x32xf32>
    %cst_22 = arith.constant 2.200000e+00 : f32
    %60 = vector.broadcast %cst_22 : f32 to vector<128x32xf32>
    %61 = arith.cmpf oge, %15, %60 : vector<128x32xf32>
    %62 = arith.extui %61 : vector<128x32xi1> to vector<128x32xi32>
    %63 = arith.sitofp %62 : vector<128x32xi32> to vector<128x32xf32>
    %64 = arith.subf %19, %23 : vector<128x32xf32>
    %65 = arith.subf %23, %27 : vector<128x32xf32>
    %66 = arith.subf %27, %31 : vector<128x32xf32>
    %67 = arith.subf %31, %35 : vector<128x32xf32>
    %68 = arith.subf %35, %39 : vector<128x32xf32>
    %69 = arith.subf %39, %43 : vector<128x32xf32>
    %70 = arith.subf %43, %47 : vector<128x32xf32>
    %71 = arith.subf %47, %51 : vector<128x32xf32>
    %72 = arith.subf %51, %55 : vector<128x32xf32>
    %73 = arith.subf %55, %59 : vector<128x32xf32>
    %74 = arith.subf %59, %63 : vector<128x32xf32>
    %cst_23 = arith.constant -2.200000e+00 : f32
    %75 = vector.broadcast %cst_23 : f32 to vector<128x32xf32>
    %76 = arith.subf %15, %75 : vector<128x32xf32>
    %cst_24 = arith.constant 2.500000e+00 : f32
    %77 = vector.broadcast %cst_24 : f32 to vector<128x32xf32>
    %78 = arith.mulf %76, %77 : vector<128x32xf32>
    %cst_25 = arith.constant 0.000000e+00 : f32
    %79 = vector.broadcast %cst_25 : f32 to vector<128x32xf32>
    %80 = arith.subf %78, %79 : vector<128x32xf32>
    %cst_26 = arith.constant 2.000000e+00 : f32
    %81 = vector.broadcast %cst_26 : f32 to vector<128x32xf32>
    %82 = arith.subf %81, %80 : vector<128x32xf32>
    %83 = arith.mulf %80, %64 : vector<128x32xf32>
    %84 = arith.mulf %82, %65 : vector<128x32xf32>
    %85 = arith.addf %83, %84 : vector<128x32xf32>
    %cst_27 = arith.constant 1.000000e+00 : f32
    %86 = vector.broadcast %cst_27 : f32 to vector<128x32xf32>
    %87 = arith.subf %78, %86 : vector<128x32xf32>
    %cst_28 = arith.constant 2.000000e+00 : f32
    %88 = vector.broadcast %cst_28 : f32 to vector<128x32xf32>
    %89 = arith.subf %88, %87 : vector<128x32xf32>
    %90 = arith.mulf %87, %65 : vector<128x32xf32>
    %91 = arith.mulf %89, %66 : vector<128x32xf32>
    %92 = arith.addf %90, %91 : vector<128x32xf32>
    %cst_29 = arith.constant 2.000000e+00 : f32
    %93 = vector.broadcast %cst_29 : f32 to vector<128x32xf32>
    %94 = arith.subf %78, %93 : vector<128x32xf32>
    %cst_30 = arith.constant 2.000000e+00 : f32
    %95 = vector.broadcast %cst_30 : f32 to vector<128x32xf32>
    %96 = arith.subf %95, %94 : vector<128x32xf32>
    %97 = arith.mulf %94, %66 : vector<128x32xf32>
    %98 = arith.mulf %96, %67 : vector<128x32xf32>
    %99 = arith.addf %97, %98 : vector<128x32xf32>
    %cst_31 = arith.constant 3.000000e+00 : f32
    %100 = vector.broadcast %cst_31 : f32 to vector<128x32xf32>
    %101 = arith.subf %78, %100 : vector<128x32xf32>
    %cst_32 = arith.constant 2.000000e+00 : f32
    %102 = vector.broadcast %cst_32 : f32 to vector<128x32xf32>
    %103 = arith.subf %102, %101 : vector<128x32xf32>
    %104 = arith.mulf %101, %67 : vector<128x32xf32>
    %105 = arith.mulf %103, %68 : vector<128x32xf32>
    %106 = arith.addf %104, %105 : vector<128x32xf32>
    %cst_33 = arith.constant 4.000000e+00 : f32
    %107 = vector.broadcast %cst_33 : f32 to vector<128x32xf32>
    %108 = arith.subf %78, %107 : vector<128x32xf32>
    %cst_34 = arith.constant 2.000000e+00 : f32
    %109 = vector.broadcast %cst_34 : f32 to vector<128x32xf32>
    %110 = arith.subf %109, %108 : vector<128x32xf32>
    %111 = arith.mulf %108, %68 : vector<128x32xf32>
    %112 = arith.mulf %110, %69 : vector<128x32xf32>
    %113 = arith.addf %111, %112 : vector<128x32xf32>
    %cst_35 = arith.constant 5.000000e+00 : f32
    %114 = vector.broadcast %cst_35 : f32 to vector<128x32xf32>
    %115 = arith.subf %78, %114 : vector<128x32xf32>
    %cst_36 = arith.constant 2.000000e+00 : f32
    %116 = vector.broadcast %cst_36 : f32 to vector<128x32xf32>
    %117 = arith.subf %116, %115 : vector<128x32xf32>
    %118 = arith.mulf %115, %69 : vector<128x32xf32>
    %119 = arith.mulf %117, %70 : vector<128x32xf32>
    %120 = arith.addf %118, %119 : vector<128x32xf32>
    %cst_37 = arith.constant 6.000000e+00 : f32
    %121 = vector.broadcast %cst_37 : f32 to vector<128x32xf32>
    %122 = arith.subf %78, %121 : vector<128x32xf32>
    %cst_38 = arith.constant 2.000000e+00 : f32
    %123 = vector.broadcast %cst_38 : f32 to vector<128x32xf32>
    %124 = arith.subf %123, %122 : vector<128x32xf32>
    %125 = arith.mulf %122, %70 : vector<128x32xf32>
    %126 = arith.mulf %124, %71 : vector<128x32xf32>
    %127 = arith.addf %125, %126 : vector<128x32xf32>
    %cst_39 = arith.constant 7.000000e+00 : f32
    %128 = vector.broadcast %cst_39 : f32 to vector<128x32xf32>
    %129 = arith.subf %78, %128 : vector<128x32xf32>
    %cst_40 = arith.constant 2.000000e+00 : f32
    %130 = vector.broadcast %cst_40 : f32 to vector<128x32xf32>
    %131 = arith.subf %130, %129 : vector<128x32xf32>
    %132 = arith.mulf %129, %71 : vector<128x32xf32>
    %133 = arith.mulf %131, %72 : vector<128x32xf32>
    %134 = arith.addf %132, %133 : vector<128x32xf32>
    %cst_41 = arith.constant 8.000000e+00 : f32
    %135 = vector.broadcast %cst_41 : f32 to vector<128x32xf32>
    %136 = arith.subf %78, %135 : vector<128x32xf32>
    %cst_42 = arith.constant 2.000000e+00 : f32
    %137 = vector.broadcast %cst_42 : f32 to vector<128x32xf32>
    %138 = arith.subf %137, %136 : vector<128x32xf32>
    %139 = arith.mulf %136, %72 : vector<128x32xf32>
    %140 = arith.mulf %138, %73 : vector<128x32xf32>
    %141 = arith.addf %139, %140 : vector<128x32xf32>
    %cst_43 = arith.constant 9.000000e+00 : f32
    %142 = vector.broadcast %cst_43 : f32 to vector<128x32xf32>
    %143 = arith.subf %78, %142 : vector<128x32xf32>
    %cst_44 = arith.constant 2.000000e+00 : f32
    %144 = vector.broadcast %cst_44 : f32 to vector<128x32xf32>
    %145 = arith.subf %144, %143 : vector<128x32xf32>
    %146 = arith.mulf %143, %73 : vector<128x32xf32>
    %147 = arith.mulf %145, %74 : vector<128x32xf32>
    %148 = arith.addf %146, %147 : vector<128x32xf32>
    %cst_45 = arith.constant -2.200000e+00 : f32
    %149 = vector.broadcast %cst_45 : f32 to vector<128x32xf32>
    %150 = arith.subf %15, %149 : vector<128x32xf32>
    %cst_46 = arith.constant 1.250000e+00 : f32
    %151 = vector.broadcast %cst_46 : f32 to vector<128x32xf32>
    %152 = arith.mulf %150, %151 : vector<128x32xf32>
    %cst_47 = arith.constant 0.000000e+00 : f32
    %153 = vector.broadcast %cst_47 : f32 to vector<128x32xf32>
    %154 = arith.subf %152, %153 : vector<128x32xf32>
    %cst_48 = arith.constant 1.500000e+00 : f32
    %155 = vector.broadcast %cst_48 : f32 to vector<128x32xf32>
    %156 = arith.subf %155, %154 : vector<128x32xf32>
    %157 = arith.mulf %154, %85 : vector<128x32xf32>
    %158 = arith.mulf %156, %92 : vector<128x32xf32>
    %159 = arith.addf %157, %158 : vector<128x32xf32>
    %cst_49 = arith.constant 5.000000e-01 : f32
    %160 = vector.broadcast %cst_49 : f32 to vector<128x32xf32>
    %161 = arith.subf %152, %160 : vector<128x32xf32>
    %cst_50 = arith.constant 1.500000e+00 : f32
    %162 = vector.broadcast %cst_50 : f32 to vector<128x32xf32>
    %163 = arith.subf %162, %161 : vector<128x32xf32>
    %164 = arith.mulf %161, %92 : vector<128x32xf32>
    %165 = arith.mulf %163, %99 : vector<128x32xf32>
    %166 = arith.addf %164, %165 : vector<128x32xf32>
    %cst_51 = arith.constant 1.000000e+00 : f32
    %167 = vector.broadcast %cst_51 : f32 to vector<128x32xf32>
    %168 = arith.subf %152, %167 : vector<128x32xf32>
    %cst_52 = arith.constant 1.500000e+00 : f32
    %169 = vector.broadcast %cst_52 : f32 to vector<128x32xf32>
    %170 = arith.subf %169, %168 : vector<128x32xf32>
    %171 = arith.mulf %168, %99 : vector<128x32xf32>
    %172 = arith.mulf %170, %106 : vector<128x32xf32>
    %173 = arith.addf %171, %172 : vector<128x32xf32>
    %cst_53 = arith.constant 1.500000e+00 : f32
    %174 = vector.broadcast %cst_53 : f32 to vector<128x32xf32>
    %175 = arith.subf %152, %174 : vector<128x32xf32>
    %cst_54 = arith.constant 1.500000e+00 : f32
    %176 = vector.broadcast %cst_54 : f32 to vector<128x32xf32>
    %177 = arith.subf %176, %175 : vector<128x32xf32>
    %178 = arith.mulf %175, %106 : vector<128x32xf32>
    %179 = arith.mulf %177, %113 : vector<128x32xf32>
    %180 = arith.addf %178, %179 : vector<128x32xf32>
    %cst_55 = arith.constant 2.000000e+00 : f32
    %181 = vector.broadcast %cst_55 : f32 to vector<128x32xf32>
    %182 = arith.subf %152, %181 : vector<128x32xf32>
    %cst_56 = arith.constant 1.500000e+00 : f32
    %183 = vector.broadcast %cst_56 : f32 to vector<128x32xf32>
    %184 = arith.subf %183, %182 : vector<128x32xf32>
    %185 = arith.mulf %182, %113 : vector<128x32xf32>
    %186 = arith.mulf %184, %120 : vector<128x32xf32>
    %187 = arith.addf %185, %186 : vector<128x32xf32>
    %cst_57 = arith.constant 2.500000e+00 : f32
    %188 = vector.broadcast %cst_57 : f32 to vector<128x32xf32>
    %189 = arith.subf %152, %188 : vector<128x32xf32>
    %cst_58 = arith.constant 1.500000e+00 : f32
    %190 = vector.broadcast %cst_58 : f32 to vector<128x32xf32>
    %191 = arith.subf %190, %189 : vector<128x32xf32>
    %192 = arith.mulf %189, %120 : vector<128x32xf32>
    %193 = arith.mulf %191, %127 : vector<128x32xf32>
    %194 = arith.addf %192, %193 : vector<128x32xf32>
    %cst_59 = arith.constant 3.000000e+00 : f32
    %195 = vector.broadcast %cst_59 : f32 to vector<128x32xf32>
    %196 = arith.subf %152, %195 : vector<128x32xf32>
    %cst_60 = arith.constant 1.500000e+00 : f32
    %197 = vector.broadcast %cst_60 : f32 to vector<128x32xf32>
    %198 = arith.subf %197, %196 : vector<128x32xf32>
    %199 = arith.mulf %196, %127 : vector<128x32xf32>
    %200 = arith.mulf %198, %134 : vector<128x32xf32>
    %201 = arith.addf %199, %200 : vector<128x32xf32>
    %cst_61 = arith.constant 3.500000e+00 : f32
    %202 = vector.broadcast %cst_61 : f32 to vector<128x32xf32>
    %203 = arith.subf %152, %202 : vector<128x32xf32>
    %cst_62 = arith.constant 1.500000e+00 : f32
    %204 = vector.broadcast %cst_62 : f32 to vector<128x32xf32>
    %205 = arith.subf %204, %203 : vector<128x32xf32>
    %206 = arith.mulf %203, %134 : vector<128x32xf32>
    %207 = arith.mulf %205, %141 : vector<128x32xf32>
    %208 = arith.addf %206, %207 : vector<128x32xf32>
    %cst_63 = arith.constant 4.000000e+00 : f32
    %209 = vector.broadcast %cst_63 : f32 to vector<128x32xf32>
    %210 = arith.subf %152, %209 : vector<128x32xf32>
    %cst_64 = arith.constant 1.500000e+00 : f32
    %211 = vector.broadcast %cst_64 : f32 to vector<128x32xf32>
    %212 = arith.subf %211, %210 : vector<128x32xf32>
    %213 = arith.mulf %210, %141 : vector<128x32xf32>
    %214 = arith.mulf %212, %148 : vector<128x32xf32>
    %215 = arith.addf %213, %214 : vector<128x32xf32>
    %cst_65 = arith.constant -2.200000e+00 : f32
    %216 = vector.broadcast %cst_65 : f32 to vector<128x32xf32>
    %217 = arith.subf %15, %216 : vector<128x32xf32>
    %cst_66 = arith.constant 0.833333313 : f32
    %218 = vector.broadcast %cst_66 : f32 to vector<128x32xf32>
    %219 = arith.mulf %217, %218 : vector<128x32xf32>
    %cst_67 = arith.constant 0.000000e+00 : f32
    %220 = vector.broadcast %cst_67 : f32 to vector<128x32xf32>
    %221 = arith.subf %219, %220 : vector<128x32xf32>
    %cst_68 = arith.constant 1.33333337 : f32
    %222 = vector.broadcast %cst_68 : f32 to vector<128x32xf32>
    %223 = arith.subf %222, %221 : vector<128x32xf32>
    %224 = arith.mulf %221, %159 : vector<128x32xf32>
    %225 = arith.mulf %223, %166 : vector<128x32xf32>
    %226 = arith.addf %224, %225 : vector<128x32xf32>
    %cst_69 = arith.constant 0.333333343 : f32
    %227 = vector.broadcast %cst_69 : f32 to vector<128x32xf32>
    %228 = arith.subf %219, %227 : vector<128x32xf32>
    %cst_70 = arith.constant 1.33333337 : f32
    %229 = vector.broadcast %cst_70 : f32 to vector<128x32xf32>
    %230 = arith.subf %229, %228 : vector<128x32xf32>
    %231 = arith.mulf %228, %166 : vector<128x32xf32>
    %232 = arith.mulf %230, %173 : vector<128x32xf32>
    %233 = arith.addf %231, %232 : vector<128x32xf32>
    %cst_71 = arith.constant 0.666666686 : f32
    %234 = vector.broadcast %cst_71 : f32 to vector<128x32xf32>
    %235 = arith.subf %219, %234 : vector<128x32xf32>
    %cst_72 = arith.constant 1.33333337 : f32
    %236 = vector.broadcast %cst_72 : f32 to vector<128x32xf32>
    %237 = arith.subf %236, %235 : vector<128x32xf32>
    %238 = arith.mulf %235, %173 : vector<128x32xf32>
    %239 = arith.mulf %237, %180 : vector<128x32xf32>
    %240 = arith.addf %238, %239 : vector<128x32xf32>
    %cst_73 = arith.constant 1.000000e+00 : f32
    %241 = vector.broadcast %cst_73 : f32 to vector<128x32xf32>
    %242 = arith.subf %219, %241 : vector<128x32xf32>
    %cst_74 = arith.constant 1.33333337 : f32
    %243 = vector.broadcast %cst_74 : f32 to vector<128x32xf32>
    %244 = arith.subf %243, %242 : vector<128x32xf32>
    %245 = arith.mulf %242, %180 : vector<128x32xf32>
    %246 = arith.mulf %244, %187 : vector<128x32xf32>
    %247 = arith.addf %245, %246 : vector<128x32xf32>
    %cst_75 = arith.constant 1.33333337 : f32
    %248 = vector.broadcast %cst_75 : f32 to vector<128x32xf32>
    %249 = arith.subf %219, %248 : vector<128x32xf32>
    %cst_76 = arith.constant 1.33333337 : f32
    %250 = vector.broadcast %cst_76 : f32 to vector<128x32xf32>
    %251 = arith.subf %250, %249 : vector<128x32xf32>
    %252 = arith.mulf %249, %187 : vector<128x32xf32>
    %253 = arith.mulf %251, %194 : vector<128x32xf32>
    %254 = arith.addf %252, %253 : vector<128x32xf32>
    %cst_77 = arith.constant 1.66666663 : f32
    %255 = vector.broadcast %cst_77 : f32 to vector<128x32xf32>
    %256 = arith.subf %219, %255 : vector<128x32xf32>
    %cst_78 = arith.constant 1.33333337 : f32
    %257 = vector.broadcast %cst_78 : f32 to vector<128x32xf32>
    %258 = arith.subf %257, %256 : vector<128x32xf32>
    %259 = arith.mulf %256, %194 : vector<128x32xf32>
    %260 = arith.mulf %258, %201 : vector<128x32xf32>
    %261 = arith.addf %259, %260 : vector<128x32xf32>
    %cst_79 = arith.constant 2.000000e+00 : f32
    %262 = vector.broadcast %cst_79 : f32 to vector<128x32xf32>
    %263 = arith.subf %219, %262 : vector<128x32xf32>
    %cst_80 = arith.constant 1.33333337 : f32
    %264 = vector.broadcast %cst_80 : f32 to vector<128x32xf32>
    %265 = arith.subf %264, %263 : vector<128x32xf32>
    %266 = arith.mulf %263, %201 : vector<128x32xf32>
    %267 = arith.mulf %265, %208 : vector<128x32xf32>
    %268 = arith.addf %266, %267 : vector<128x32xf32>
    %cst_81 = arith.constant 2.33333325 : f32
    %269 = vector.broadcast %cst_81 : f32 to vector<128x32xf32>
    %270 = arith.subf %219, %269 : vector<128x32xf32>
    %cst_82 = arith.constant 1.33333337 : f32
    %271 = vector.broadcast %cst_82 : f32 to vector<128x32xf32>
    %272 = arith.subf %271, %270 : vector<128x32xf32>
    %273 = arith.mulf %270, %208 : vector<128x32xf32>
    %274 = arith.mulf %272, %215 : vector<128x32xf32>
    %275 = arith.addf %273, %274 : vector<128x32xf32>
    %276 = arith.negf %15 : vector<128x32xf32>
    %277 = math.exp %276 : vector<128x32xf32>
    %cst_83 = arith.constant 1.000000e+00 : f32
    %278 = vector.broadcast %cst_83 : f32 to vector<128x32xf32>
    %279 = arith.addf %278, %277 : vector<128x32xf32>
    %280 = arith.divf %278, %279 : vector<128x32xf32>
    %281 = arith.mulf %15, %280 : vector<128x32xf32>
    %282 = arith.truncf %281 : vector<128x32xf32> to vector<128x32xbf16>
    %c0_84 = arith.constant 0 : index
    %c0_85 = arith.constant 0 : index
    %c0_86 = arith.constant 0 : index
    %283 = vector.load %arg4[%c0_84, %c0_85, %c0_86] : memref<9x32x16xbf16, #tpu.memory_space<vmem>>, vector<1x32x16xbf16>
    %284 = vector.shape_cast %283 : vector<1x32x16xbf16> to vector<32x16xbf16>
    %cst_87 = arith.constant dense<0.000000e+00> : vector<128x16xf32>
    %285 = tpu.matmul %282, %284, %cst_87 {dimension_numbers = #tpu.dot_dimension_numbers<[1], [0], [0], [1], [0, 0, 1, 1], [], []>} : vector<128x32xbf16>, vector<32x16xbf16>, vector<128x16xf32> -> vector<128x16xf32>
    %286 = arith.truncf %226 : vector<128x32xf32> to vector<128x32xbf16>
    %c1_88 = arith.constant 1 : index
    %c0_89 = arith.constant 0 : index
    %c0_90 = arith.constant 0 : index
    %287 = vector.load %arg4[%c1_88, %c0_89, %c0_90] : memref<9x32x16xbf16, #tpu.memory_space<vmem>>, vector<1x32x16xbf16>
    %288 = vector.shape_cast %287 : vector<1x32x16xbf16> to vector<32x16xbf16>
    %cst_91 = arith.constant dense<0.000000e+00> : vector<128x16xf32>
    %289 = tpu.matmul %286, %288, %cst_91 {dimension_numbers = #tpu.dot_dimension_numbers<[1], [0], [0], [1], [0, 0, 1, 1], [], []>} : vector<128x32xbf16>, vector<32x16xbf16>, vector<128x16xf32> -> vector<128x16xf32>
    %290 = arith.addf %285, %289 : vector<128x16xf32>
    %291 = arith.truncf %233 : vector<128x32xf32> to vector<128x32xbf16>
    %c2_92 = arith.constant 2 : index
    %c0_93 = arith.constant 0 : index
    %c0_94 = arith.constant 0 : index
    %292 = vector.load %arg4[%c2_92, %c0_93, %c0_94] : memref<9x32x16xbf16, #tpu.memory_space<vmem>>, vector<1x32x16xbf16>
    %293 = vector.shape_cast %292 : vector<1x32x16xbf16> to vector<32x16xbf16>
    %cst_95 = arith.constant dense<0.000000e+00> : vector<128x16xf32>
    %294 = tpu.matmul %291, %293, %cst_95 {dimension_numbers = #tpu.dot_dimension_numbers<[1], [0], [0], [1], [0, 0, 1, 1], [], []>} : vector<128x32xbf16>, vector<32x16xbf16>, vector<128x16xf32> -> vector<128x16xf32>
    %295 = arith.addf %290, %294 : vector<128x16xf32>
    %296 = arith.truncf %240 : vector<128x32xf32> to vector<128x32xbf16>
    %c3 = arith.constant 3 : index
    %c0_96 = arith.constant 0 : index
    %c0_97 = arith.constant 0 : index
    %297 = vector.load %arg4[%c3, %c0_96, %c0_97] : memref<9x32x16xbf16, #tpu.memory_space<vmem>>, vector<1x32x16xbf16>
    %298 = vector.shape_cast %297 : vector<1x32x16xbf16> to vector<32x16xbf16>
    %cst_98 = arith.constant dense<0.000000e+00> : vector<128x16xf32>
    %299 = tpu.matmul %296, %298, %cst_98 {dimension_numbers = #tpu.dot_dimension_numbers<[1], [0], [0], [1], [0, 0, 1, 1], [], []>} : vector<128x32xbf16>, vector<32x16xbf16>, vector<128x16xf32> -> vector<128x16xf32>
    %300 = arith.addf %295, %299 : vector<128x16xf32>
    %301 = arith.truncf %247 : vector<128x32xf32> to vector<128x32xbf16>
    %c4 = arith.constant 4 : index
    %c0_99 = arith.constant 0 : index
    %c0_100 = arith.constant 0 : index
    %302 = vector.load %arg4[%c4, %c0_99, %c0_100] : memref<9x32x16xbf16, #tpu.memory_space<vmem>>, vector<1x32x16xbf16>
    %303 = vector.shape_cast %302 : vector<1x32x16xbf16> to vector<32x16xbf16>
    %cst_101 = arith.constant dense<0.000000e+00> : vector<128x16xf32>
    %304 = tpu.matmul %301, %303, %cst_101 {dimension_numbers = #tpu.dot_dimension_numbers<[1], [0], [0], [1], [0, 0, 1, 1], [], []>} : vector<128x32xbf16>, vector<32x16xbf16>, vector<128x16xf32> -> vector<128x16xf32>
    %305 = arith.addf %300, %304 : vector<128x16xf32>
    %306 = arith.truncf %254 : vector<128x32xf32> to vector<128x32xbf16>
    %c5 = arith.constant 5 : index
    %c0_102 = arith.constant 0 : index
    %c0_103 = arith.constant 0 : index
    %307 = vector.load %arg4[%c5, %c0_102, %c0_103] : memref<9x32x16xbf16, #tpu.memory_space<vmem>>, vector<1x32x16xbf16>
    %308 = vector.shape_cast %307 : vector<1x32x16xbf16> to vector<32x16xbf16>
    %cst_104 = arith.constant dense<0.000000e+00> : vector<128x16xf32>
    %309 = tpu.matmul %306, %308, %cst_104 {dimension_numbers = #tpu.dot_dimension_numbers<[1], [0], [0], [1], [0, 0, 1, 1], [], []>} : vector<128x32xbf16>, vector<32x16xbf16>, vector<128x16xf32> -> vector<128x16xf32>
    %310 = arith.addf %305, %309 : vector<128x16xf32>
    %311 = arith.truncf %261 : vector<128x32xf32> to vector<128x32xbf16>
    %c6 = arith.constant 6 : index
    %c0_105 = arith.constant 0 : index
    %c0_106 = arith.constant 0 : index
    %312 = vector.load %arg4[%c6, %c0_105, %c0_106] : memref<9x32x16xbf16, #tpu.memory_space<vmem>>, vector<1x32x16xbf16>
    %313 = vector.shape_cast %312 : vector<1x32x16xbf16> to vector<32x16xbf16>
    %cst_107 = arith.constant dense<0.000000e+00> : vector<128x16xf32>
    %314 = tpu.matmul %311, %313, %cst_107 {dimension_numbers = #tpu.dot_dimension_numbers<[1], [0], [0], [1], [0, 0, 1, 1], [], []>} : vector<128x32xbf16>, vector<32x16xbf16>, vector<128x16xf32> -> vector<128x16xf32>
    %315 = arith.addf %310, %314 : vector<128x16xf32>
    %316 = arith.truncf %268 : vector<128x32xf32> to vector<128x32xbf16>
    %c7 = arith.constant 7 : index
    %c0_108 = arith.constant 0 : index
    %c0_109 = arith.constant 0 : index
    %317 = vector.load %arg4[%c7, %c0_108, %c0_109] : memref<9x32x16xbf16, #tpu.memory_space<vmem>>, vector<1x32x16xbf16>
    %318 = vector.shape_cast %317 : vector<1x32x16xbf16> to vector<32x16xbf16>
    %cst_110 = arith.constant dense<0.000000e+00> : vector<128x16xf32>
    %319 = tpu.matmul %316, %318, %cst_110 {dimension_numbers = #tpu.dot_dimension_numbers<[1], [0], [0], [1], [0, 0, 1, 1], [], []>} : vector<128x32xbf16>, vector<32x16xbf16>, vector<128x16xf32> -> vector<128x16xf32>
    %320 = arith.addf %315, %319 : vector<128x16xf32>
    %321 = arith.truncf %275 : vector<128x32xf32> to vector<128x32xbf16>
    %c8 = arith.constant 8 : index
    %c0_111 = arith.constant 0 : index
    %c0_112 = arith.constant 0 : index
    %322 = vector.load %arg4[%c8, %c0_111, %c0_112] : memref<9x32x16xbf16, #tpu.memory_space<vmem>>, vector<1x32x16xbf16>
    %323 = vector.shape_cast %322 : vector<1x32x16xbf16> to vector<32x16xbf16>
    %cst_113 = arith.constant dense<0.000000e+00> : vector<128x16xf32>
    %324 = tpu.matmul %321, %323, %cst_113 {dimension_numbers = #tpu.dot_dimension_numbers<[1], [0], [0], [1], [0, 0, 1, 1], [], []>} : vector<128x32xbf16>, vector<32x16xbf16>, vector<128x16xf32> -> vector<128x16xf32>
    %325 = arith.addf %320, %324 : vector<128x16xf32>
    %326 = vector.broadcast %2 : vector<1x16xf32> to vector<128x16xf32>
    %327 = arith.addf %325, %326 : vector<128x16xf32>
    %c0_114 = arith.constant 0 : index
    %c0_115 = arith.constant 0 : index
    %328 = vector.load %arg6[%c0_114, %c0_115] : memref<128x16xf32, #tpu.memory_space<vmem>>, vector<128x16xf32>
    tpu.vector_store %arg6[%c0_114, %c0_115], %327 {strides = array<i32>} : memref<128x16xf32, #tpu.memory_space<vmem>>, vector<128x16xf32>,
    return
  }
  func.func @transform_0(%arg0: i32) -> (i32, i32) {
    %c0_i32 = arith.constant 0 : i32
    %c0_i32_0 = arith.constant 0 : i32
    return %arg0, %c0_i32 : i32, i32
  }
  func.func @transform_1(%arg0: i32) -> (i32, i32) {
    %c0_i32 = arith.constant 0 : i32
    %c0_i32_0 = arith.constant 0 : i32
    %c0_i32_1 = arith.constant 0 : i32
    return %c0_i32, %c0_i32_0 : i32, i32
  }
  func.func @transform_2(%arg0: i32) -> (i32, i32) {
    %c0_i32 = arith.constant 0 : i32
    %c0_i32_0 = arith.constant 0 : i32
    %c0_i32_1 = arith.constant 0 : i32
    return %c0_i32, %c0_i32_0 : i32, i32
  }
  func.func @transform_3(%arg0: i32) -> (i32, i32, i32) {
    %c0_i32 = arith.constant 0 : i32
    %c0_i32_0 = arith.constant 0 : i32
    %c0_i32_1 = arith.constant 0 : i32
    %c0_i32_2 = arith.constant 0 : i32
    return %c0_i32, %c0_i32_0, %c0_i32_1 : i32, i32, i32
  }
  func.func @transform_4(%arg0: i32) -> (i32, i32) {
    %c0_i32 = arith.constant 0 : i32
    %c0_i32_0 = arith.constant 0 : i32
    %c0_i32_1 = arith.constant 0 : i32
    return %c0_i32, %c0_i32_0 : i32, i32
  }
  func.func @transform_5(%arg0: i32) -> (i32, i32) {
    %c0_i32 = arith.constant 0 : i32
    %c0_i32_0 = arith.constant 0 : i32
    return %arg0, %c0_i32 : i32, i32
  }
}

</mosaic_0001>

<bundles_post_ra>
// kernel: mlp_kan_forward.1
= control target key start
LH: loop header
LB: loop body
LE: loop exit
PB: predicated region body
PF: predicated region fallthrough
CT: control target
= control target key end

     0   :  { %s6383_s18 = smov 0   ;;  %s9891_s0 = inlined_call_operand.vmem [shape: f32[256,32], index: 0, kind: input, shape index: {}]   ;;  %s9892_s1 = inlined_call_operand.vmem [shape: bf16[32,64], index: 1, kind: input, shape index: {}]   ;;  %s9893_s2 = inlined_call_operand.vmem [shape: bf16[64,32], index: 2, kind: input, shape index: {}]   ;;  %s9894_s3 = inlined_call_operand.vmem [shape: bf16[9,32,16], index: 3, kind: input, shape index: {}]   ;;  %s9895_s4 = inlined_call_operand.vmem [shape: f32[3,128], index: 4, kind: input, shape index: {}]   ;;  %s9896_s5 = inlined_call_operand.vmem [shape: f32[256,16], index: 5, kind: output, shape index: {}]  }
   0x1 LB: > { %s5138_s19 = sadd.s32 4294967295, %s6350_s18   ;;  %p5142_p0 = scmp.ge.s32.totalorder %s6350_s18, 1  ;;  %s6350_s18 = sphi %s6383_s18, %s15_s18  }
   0x2   : > { %p188_p1 = scmp.lt.s32.totalorder %s6350_s18, 3 }
   0x4   : > { %p189_p2 = pnand %p5142_p0, %p188_p1 }
   0x6   : > { %192 = sbr.rel (%p189_p2) target bundleno = 1364 (0x554), region = 40 }
   0xb   : > { %v6253_v0 = vld [vmem:[%s9892_s1 + $0x8] sm:$0xff]   ;;  %s5143_s22 = sshll.u32 %s5138_s19, 4  ;;  %v6254_v1 = vld [vmem:[%s9892_s1] sm:$0xff]   ;;  %v6255_v2 = vld [vmem:[%s9893_s2 + $0x18] sm:$0xff]   ;;  %vm276_vm0 = vcmask 261120   ;;  %vm458_vm1 = vcmask 523264  }
   0xc   : > { %p217_p3 = scmp.lt.s32.totalorder %s5143_s22, 31  ;;  %6016 = vmatprep.subr.bf16.mxu0 %v6253_v0  ;;  %6240 = vmatprep.subr.bf16.mxu1 %v6253_v0  ;;  %v6256_v27 = vld [vmem:[%s9893_s2 + $0x10] sm:$0xff]   ;;  %v6257_v28 = vld [vmem:[%s9893_s2 + $0x8] sm:$0xff]   ;;  %v6258_v29 = vld [vmem:[%s9893_s2] sm:$0xff]  }
   0xd   : > { %6017 = vmatpush3.bf16.msra.mxu0 %v6253_v0  ;;  %6242 = vmatpush3.bf16.msra.mxu1 %v6253_v0  ;;  %v5147_v32 = vld [vmem:[%s9895_s4] ss:$0 sm:$0xff] }
   0xe   : > { %s11546_s22 = smov (!%p217_p3, %s5143_s22), 31  ;;  %6018 = vmatprep.subr.bf16.mxu0 %v6254_v1  ;;  %6241 = vmatprep.subr.bf16.mxu1 %v6254_v1 }
   0xf   : > { %s5144_s27 = sshll.u32 %s11546_s22, 3 }
  0x10   : > { %s220_s30 = scalar_lea.vmem %s9891_s0, %s5144_s27  ;;  %s9778_s19 = scalar_lea.vmem %s9896_s5, %s5144_s27 }
  0x11   : > { %6019 = vmatpush3.bf16.msra.mxu0 %v6254_v1  ;;  %v232_v3 = vld [vmem:[%s220_s30] sm:$0xff]  ;;  %v233_v4 = vld [vmem:[%s220_s30 + $0x8] sm:$0xff]  ;;  %v234_v5 = vld [vmem:[%s220_s30 + $0x10] sm:$0xff]  ;;  %6243 = vmatpush3.bf16.msra.mxu1 %v6254_v1 }
  0x12   : > { %v248_v6 = vpack.c.bf16 %v233_v4, %v232_v3  ;;  %v235_v7 = vld [vmem:[%s220_s30 + $0x18] sm:$0xff]  ;;  %v236_v8 = vld [vmem:[%s220_s30 + $0x20] sm:$0xff]  ;;  %v237_v9 = vld [vmem:[%s220_s30 + $0x28] sm:$0xff]  ;;  %6036 = vmatprep.subr.bf16.mxu1 %v6255_v2 }
  0x13   : > { %v249_v10 = vpack.c.bf16 %v235_v7, %v234_v5  ;;  %v250_v11 = vpack.c.bf16 %v237_v9, %v236_v8  ;;  %v240_v12 = vld [vmem:[%s220_s30 + $0x40] sm:$0xff]  ;;  %v241_v13 = vld [vmem:[%s220_s30 + $0x48] sm:$0xff]  ;;  %v242_v14 = vld [vmem:[%s220_s30 + $0x50] sm:$0xff] }
  0x14   : > { %6020 = vmatprep.mubr.msk.bf16.mxu0 %vm276_vm0, %v248_v6  ;;  %v243_v15 = vld [vmem:[%s220_s30 + $0x58] sm:$0xff]  ;;  %v238_v16 = vld [vmem:[%s220_s30 + $0x30] sm:$0xff]  ;;  %v252_v17 = vpack.c.bf16 %v241_v13, %v240_v12  ;;  %v244_v19 = vld [vmem:[%s220_s30 + $0x60] sm:$0xff] }
  0x15   : > { %6021 = vmatmul.mubr.msk.bf16.vlgmr.msra.gmra.mxu0 %vm276_vm0, %v249_v10  ;;  %v253_v18 = vpack.c.bf16 %v243_v15, %v242_v14  ;;  %v245_v20 = vld [vmem:[%s220_s30 + $0x68] sm:$0xff]  ;;  %v239_v21 = vld [vmem:[%s220_s30 + $0x38] sm:$0xff]  ;;  %v246_v23 = vld [vmem:[%s220_s30 + $0x70] sm:$0xff] }
  0x16   : > { %6024 = vmatprep.mubr.msk.bf16.mxu0 %vm276_vm0, %v250_v11  ;;  %v254_v22 = vpack.c.bf16 %v245_v20, %v244_v19  ;;  %6028 = vmatprep.mubr.msk.bf16.mxu1 %vm276_vm0, %v252_v17  ;;  %v247_v24 = vld [vmem:[%s220_s30 + $0x78] sm:$0xff]  ;;  %v251_v25 = vpack.c.bf16 %v239_v21, %v238_v16 }
  0x17   : > { %6029 = vmatmul.mubr.msk.bf16.vlgmr.msra.gmra.mxu1 %vm276_vm0, %v253_v18  ;;  %v255_v26 = vpack.c.bf16 %v247_v24, %v246_v23  ;;  %v6259_v23 = vld [vmem:[%s9894_s3 + $0x18] sm:$0xff]   ;;  %v6260_v24 = vld [vmem:[%s9894_s3 + $0x10] sm:$0xff]  }
  0x18   : > { %6032 = vmatprep.mubr.msk.bf16.mxu1 %vm276_vm0, %v254_v22  ;;  %6037 = vmatpush3.bf16.msra.mxu1 %v6255_v2 }
  0x19   : > { %6038 = vmatprep.subr.bf16.mxu1 %v6256_v27  ;;  %6060 = vmatprep.subr.bf16.mxu0 %v6259_v23 }
  0x1a   : > { %6061 = vmatpush3.bf16.msra.mxu0 %v6259_v23 }
  0x1b   : > { %6062 = vmatprep.subr.bf16.mxu0 %v6260_v24 }
  0x1c   : > { %6039 = vmatpush3.bf16.msra.mxu1 %v6256_v27  ;;  %v6263_v27 = vld [vmem:[%s9894_s3] sm:$0xff]  }
  0x1d   : > { %6025 = vmatmul.mubr.msk.bf16.gmra.mxu0 %vm276_vm0, %v251_v25  ;;  %6040 = vmatprep.subr.bf16.mxu1 %v6257_v28  ;;  %v6261_v25 = vld [vmem:[%s9894_s3 + $0x8] sm:$0xff]  }
  0x1e   : > { %6063 = vmatpush3.bf16.msra.mxu0 %v6260_v24 }
  0x1f   : > { %6033 = vmatmul.mubr.msk.bf16.gmra.mxu1 %vm276_vm0, %v255_v26  ;;  %v6448_v26 = vld [vmem:[%s9894_s3 + $0x28] sm:$0xff]  }
  0x20   : > { %6041 = vmatpush3.bf16.msra.mxu1 %v6257_v28  ;;  %6100 = vmatprep.subr.bf16.mxu0 %v6448_v26  ;;  %v6457_v28 = vld [vmem:[%s9895_s4 + $0x1] ss:$0 sm:$0xff] }
  0x21   : > { %6042 = vmatprep.subr.bf16.mxu1 %v6258_v29 }
  0x24   : > { %6043 = vmatpush3.bf16.msra.mxu1 %v6258_v29 }
  0x25   : > { %6080 = vmatprep.subr.bf16.mxu1 %v6261_v25 }
  0xd5   : > { %v6022_v30 = vpop.f32.mrf.mxu0 }
  0xd6   : > { %v344_v38 = vadd.f32 %v6022_v30, %v5147_v32 }
  0xd7   : > { %v335_v31 = vpop.f32.mrf.mxu0  ;;  %v6030_v33 = vpop.f32.mrf.mxu1 }
  0xd8   : > { %v336_v35 = vadd.f32 %v5147_v32, %v335_v31  ;;  %v400_v47 = vmax.f32 %v344_v38, 0.0  ;;  %v376_v9 = vadd.f32 %v6030_v33, %v5147_v32 }
  0xd9   : > { %v6023_v34 = vpop.f32.mrf.mxu0  ;;  %v367_v37 = vpop.f32.mrf.mxu1 }
  0xda   : > { %v347_v36 = vadd.f32 %v6023_v34, %v5147_v32  ;;  %v398_v44 = vmax.f32 %v336_v35, 0.0  ;;  %v368_v50 = vadd.f32 %v5147_v32, %v367_v37  ;;  %v408_v14 = vmax.f32 %v376_v9, 0.0 }
  0xdb   : > { %v338_v39 = vpop.f32.mrf.mxu0  ;;  %v6031_v41 = vpop.f32.mrf.mxu1  ;;  %v9897_v35 = vmov 0.0  }
  0xdc   : > { %v339_v40 = vadd.f32 %v5147_v32, %v338_v39  ;;  %v401_v42 = vmax.f32 %v347_v36, 0.0  ;;  %v406_v60 = vmax.f32 %v368_v50, 0.0  ;;  %v379_v11 = vadd.f32 %v6031_v41, %v5147_v32 }
  0xdd   : > { %v6026_v43 = vpop.f32.mrf.mxu0  ;;  %v370_v46 = vpop.f32.mrf.mxu1 }
  0xde   : > { %v399_v45 = vmax.f32 %v339_v40, 0.0  ;;  %v371_v51 = vadd.f32 %v5147_v32, %v370_v46  ;;  %v415_v53 = vpack.c.bf16 %v401_v42, %v400_v47  ;;  %v360_v58 = vadd.f32 %v6026_v43, %v5147_v32 }
  0xdf   : > { %v351_v48 = vpop.f32.mrf.mxu0  ;;  %v6034_v52 = vpop.f32.mrf.mxu1  ;;  %v409_v15 = vmax.f32 %v379_v11, 0.0 }
  0xe0   : > { %v414_v49 = vpack.c.bf16 %v399_v45, %v398_v44  ;;  %v352_v55 = vadd.f32 %v5147_v32, %v351_v48  ;;  %v407_v62 = vmax.f32 %v371_v51, 0.0  ;;  %v404_v4 = vmax.f32 %v360_v58, 0.0 }
  0xe1   : > { %v6027_v54 = vpop.f32.mrf.mxu0  ;;  %v383_v57 = vpop.f32.mrf.mxu1  ;;  %v419_v17 = vpack.c.bf16 %v409_v15, %v408_v14  ;;  %v392_v18 = vadd.f32 %v6034_v52, %v5147_v32 }
  0xe2   : > { %v363_v56 = vadd.f32 %v6027_v54, %v5147_v32  ;;  %6044 = vmatprep.mubr.msk.bf16.mxu1 %vm458_vm1, %v414_v49  ;;  %v402_v1 = vmax.f32 %v352_v55, 0.0  ;;  %v418_v6 = vpack.c.bf16 %v407_v62, %v406_v60  ;;  %v384_v7 = vadd.f32 %v5147_v32, %v383_v57 }
  0xe3   : > { %v354_v59 = vpop.f32.mrf.mxu0  ;;  %6045 = vmatmul.mubr.msk.bf16.vlgmr.msra.gmra.mxu1 %vm458_vm1, %v415_v53  ;;  %v6035_v63 = vpop.f32.mrf.mxu1  ;;  %v412_v20 = vmax.f32 %v392_v18, 0.0 }
  0xe4   : > { %v355_v61 = vadd.f32 %v5147_v32, %v354_v59  ;;  %v405_v0 = vmax.f32 %v363_v56, 0.0  ;;  %v410_v12 = vmax.f32 %v384_v7, 0.0  ;;  %v395_v19 = vadd.f32 %v6035_v63, %v5147_v32  ;;  %6081 = vmatpush3.bf16.msra.mxu1 %v6261_v25 }
  0xe5   : > { %v386_v3 = vpop.f32.mrf.mxu1  ;;  %6082 = vmatprep.subr.bf16.mxu1 %v6263_v27 }
  0xe6   : > { %v403_v2 = vmax.f32 %v355_v61, 0.0  ;;  %v387_v8 = vadd.f32 %v5147_v32, %v386_v3  ;;  %v417_v10 = vpack.c.bf16 %v405_v0, %v404_v4  ;;  %v413_v21 = vmax.f32 %v395_v19, 0.0 }
  0xe8   : > { %v416_v5 = vpack.c.bf16 %v403_v2, %v402_v1  ;;  %v411_v13 = vmax.f32 %v387_v8, 0.0  ;;  %v421_v22 = vpack.c.bf16 %v413_v21, %v412_v20  ;;  %6083 = vmatpush3.bf16.msra.mxu1 %v6263_v27 }
  0xea   : > { %6048 = vmatprep.mubr.msk.bf16.mxu1 %vm458_vm1, %v416_v5  ;;  %v420_v16 = vpack.c.bf16 %v411_v13, %v410_v12 }
  0xeb   : > { %6049 = vmatmul.mubr.msk.bf16.gmra.mxu1 %vm458_vm1, %v417_v10 }
  0xec   : > { %6052 = vmatprep.mubr.msk.bf16.mxu1 %vm458_vm1, %v418_v6 }
  0xf3   : > { %6053 = vmatmul.mubr.msk.bf16.gmra.mxu1 %vm458_vm1, %v419_v17 }
  0xf4   : > { %6056 = vmatprep.mubr.msk.bf16.mxu1 %vm458_vm1, %v420_v16 }
  0xfb   : > { %6057 = vmatmul.mubr.msk.bf16.gmra.mxu1 %vm458_vm1, %v421_v22 }
 0x1a3   : > { %v6046_v29 = vpop.f32.mrf.mxu1 }
 0x1a4   : > { %v6460_v30 = vadd.f32 %v6046_v29, %v6457_v28 }
 0x1a5   : > { %v517_v31 = vpop.f32.mrf.mxu1 }
 0x1a6   : > { %10420 = vst [vmem:[#allocation2_spill] sm:$0xff] %v6460_v30  ;;  %v6463_v32 = vadd.f32 %v6457_v28, %v517_v31  ;;  %vm582_vm2 = vcmp.ge.f32.partialorder %v6460_v30, -2.2  ;;  %vm630_vm3 = vcmp.ge.f32.partialorder %v6460_v30, -1.8  ;;  %vm726_vm15 = vcmp.ge.f32.partialorder %v6460_v30, -1.0 }
 0x1a7   : > { %v6047_v33 = vpop.f32.mrf.mxu1  ;;  %v6472_v36 = vsel %vm582_vm2, 1.0, %v9897_v35  ;;  %vm678_vm8 = vcmp.ge.f32.partialorder %v6460_v30, -1.4  ;;  %v6481_v40 = vsel %vm630_vm3, 1.0, %v9897_v35 }
 0x1a8   : > { %10421 = vst [vmem:[#allocation3_spill] sm:$0xff] %v6463_v32  ;;  %vm580_vm4 = vcmp.ge.f32.partialorder %v6463_v32, -2.2  ;;  %vm628_vm5 = vcmp.ge.f32.partialorder %v6463_v32, -1.8  ;;  %vm724_vm7 = vcmp.ge.f32.partialorder %v6463_v32, -1.0  ;;  %v6491_v45 = vadd.f32 %v6047_v33, %v6457_v28 }
 0x1a9   : > { %vm676_vm6 = vcmp.ge.f32.partialorder %v6463_v32, -1.4  ;;  %v520_v34 = vpop.f32.mrf.mxu1  ;;  %v5171_v38 = vsel %vm580_vm4, 1.0, %v9897_v35  ;;  %v5187_v39 = vsel %vm628_vm5, 1.0, %v9897_v35  ;;  %v5219_v43 = vsel %vm724_vm7, 1.0, %v9897_v35 }
 0x1aa   : > { %v6476_v37 = vadd.f32 %v6457_v28, %v520_v34  ;;  %v5203_v42 = vsel %vm676_vm6, 1.0, %v9897_v35  ;;  %vm772_vm9 = vcmp.ge.f32.partialorder %v6463_v32, -0.6  ;;  %v5363_v44 = vadd.f32 2.2, %v6463_v32  ;;  %10423 = vst [vmem:[#allocation5_spill] sm:$0xff] %v6491_v45 }
 0x1ab   : > { %v6050_v41 = vpop.f32.mrf.mxu1  ;;  %v6498_v48 = vsel %vm678_vm8, 1.0, %v9897_v35  ;;  %v6505_v53 = vsel %vm772_vm9, 1.0, %v9897_v35  ;;  %v1156_v54 = vsub.f32 %v5171_v38, %v5187_v39  ;;  %v1172_v55 = vsub.f32 %v5187_v39, %v5203_v42 }
 0x1ac   : > { %10422 = vst [vmem:[#allocation4_spill] sm:$0xff] %v6476_v37  ;;  %vm581_vm10 = vcmp.ge.f32.partialorder %v6476_v37, -2.2  ;;  %vm629_vm11 = vcmp.ge.f32.partialorder %v6476_v37, -1.8  ;;  %vm725_vm13 = vcmp.ge.f32.partialorder %v6476_v37, -1.0  ;;  %v1188_v56 = vsub.f32 %v5203_v42, %v5219_v43 }
 0x1ad   : > { %vm677_vm12 = vcmp.ge.f32.partialorder %v6476_v37, -1.4  ;;  %v533_v46 = vpop.f32.mrf.mxu1  ;;  %v5172_v47 = vsel %vm581_vm10, 1.0, %v9897_v35  ;;  %v5188_v49 = vsel %vm629_vm11, 1.0, %v9897_v35  ;;  %v5220_v51 = vsel %vm725_vm13, 1.0, %v9897_v35 }
 0x1ae   : > { %v5204_v50 = vsel %vm677_vm12, 1.0, %v9897_v35  ;;  %vm773_vm14 = vcmp.ge.f32.partialorder %v6476_v37, -0.6  ;;  %v6508_v57 = vadd.f32 %v6050_v41, %v6457_v28  ;;  %v5364_v59 = vadd.f32 2.2, %v6476_v37 }
 0x1af   : > { %v6051_v52 = vpop.f32.mrf.mxu1  ;;  %v6511_v58 = vsel %vm773_vm14, 1.0, %v9897_v35  ;;  %v6514_v60 = vmul.f32 2.5, %v5363_v44  ;;  %v6517_v61 = vadd.f32 %v6457_v28, %v533_v46  ;;  %v1157_v62 = vsub.f32 %v5172_v47, %v5188_v49 }
 0x1b0   : > { %10424 = vst [vmem:[#allocation6_spill] sm:$0xff] %v6508_v57  ;;  %v1173_v63 = vsub.f32 %v5188_v49, %v5204_v50  ;;  %v1189_v0 = vsub.f32 %v5204_v50, %v5220_v51  ;;  %v6520_v1 = vadd.f32 %v6051_v52, %v6457_v28  ;;  %v6523_v2 = vsub.f32 %v5219_v43, %v6505_v53 }
 0x1b1   : > { %10425 = vst [vmem:[#allocation7_spill] sm:$0xff] %v6514_v60  ;;  %10426 = vst [vmem:[#allocation8_spill] sm:$0xff] %v6517_v61  ;;  %v6525_v3 = vmul.f32 2.5, %v5364_v59  ;;  %v1364_v4 = vsub.f32 2.0, %v6514_v60  ;;  %v6529_v5 = vsub.f32 %v5220_v51, %v6511_v58  ;;  %v5379_v6 = vadd.f32 -1.0, %v6514_v60  ;;  %v536_v21 = vpop.f32.mrf.mxu1 }
 0x1b2   : > { %10427 = vst [vmem:[#allocation9_spill] sm:$0xff] %v6520_v1  ;;  %v5395_v7 = vadd.f32 -2.0, %v6514_v60  ;;  %v6533_v8 = vmul.f32 1.25, %v5363_v44  ;;  %v1380_v10 = vmul.f32 %v6514_v60, %v1156_v54  ;;  %v6537_v12 = vmul.f32 0.8333333, %v5363_v44 }
 0x1b3   : > { %10428 = vst [vmem:[#allocation10_spill] sm:$0xff] %v6525_v3  ;;  %v1365_v9 = vsub.f32 2.0, %v6525_v3  ;;  %v1396_v11 = vmul.f32 %v1364_v4, %v1172_v55  ;;  %v5380_v13 = vadd.f32 -1.0, %v6525_v3  ;;  %v1444_v14 = vsub.f32 2.0, %v5379_v6  ;;  %v6054_v44 = vpop.f32.mrf.mxu1 }
 0x1b4   : > { %10429 = vst [vmem:[#allocation11_spill] sm:$0xff] %v6533_v8  ;;  %10430 = vst [vmem:[#allocation12_spill] sm:$0xff] %v6537_v12  ;;  %v5396_v15 = vadd.f32 -2.0, %v6525_v3  ;;  %v6541_v16 = vmul.f32 1.25, %v5364_v59  ;;  %v1381_v17 = vmul.f32 %v6525_v3, %v1157_v62  ;;  %v1460_v19 = vmul.f32 %v5379_v6, %v1172_v55 }
 0x1b5   : > { %v1397_v18 = vmul.f32 %v1365_v9, %v1173_v63  ;;  %v1524_v20 = vsub.f32 2.0, %v5395_v7  ;;  %v1412_v22 = vadd.f32 %v1396_v11, %v1380_v10  ;;  %v1445_v23 = vsub.f32 2.0, %v5380_v13 }
 0x1b6   : > { %10431 = vst [vmem:[#allocation13_spill] sm:$0xff] %v6541_v16  ;;  %v1476_v24 = vmul.f32 %v1444_v14, %v1188_v56  ;;  %v1525_v25 = vsub.f32 2.0, %v5396_v15  ;;  %v1461_v29 = vmul.f32 %v5380_v13, %v1173_v63  ;;  %v1540_v31 = vmul.f32 %v5395_v7, %v1188_v56 }
 0x1b7   : > { %v1413_v27 = vadd.f32 %v1397_v18, %v1381_v17  ;;  %v2164_v33 = vsub.f32 1.5, %v6533_v8  ;;  %v1477_v34 = vmul.f32 %v1445_v23, %v1189_v0  ;;  %v1556_v39 = vmul.f32 %v1524_v20, %v6523_v2 }
 0x1b8   : > { %v1492_v38 = vadd.f32 %v1476_v24, %v1460_v19  ;;  %v1557_v41 = vmul.f32 %v1525_v25, %v6529_v5  ;;  %v1541_v42 = vmul.f32 %v5396_v15, %v1189_v0  ;;  %v2165_v43 = vsub.f32 1.5, %v6541_v16 }
 0x1b9   : > { %vm583_vm1 = vcmp.ge.f32.partialorder %v6491_v45, -2.2  ;;  %vm727_vm2 = vcmp.ge.f32.partialorder %v6491_v45, -1.0  ;;  %v1493_v46 = vadd.f32 %v1477_v34, %v1461_v29  ;;  %v6551_v47 = vadd.f32 %v1556_v39, %v1540_v31 }
 0x1ba   : > { %v2180_v49 = vmul.f32 %v6533_v8, %v1412_v22  ;;  %v2196_v50 = vmul.f32 %v2164_v33, %v1492_v38  ;;  %v6554_v51 = vadd.f32 %v1557_v41, %v1541_v42  ;;  %v5523_v52 = vadd.f32 -0.5, %v6533_v8 }
 0x1bb   : > { %v5524_v54 = vadd.f32 -0.5, %v6541_v16  ;;  %v6558_v55 = vmul.f32 0.8333333, %v5364_v59  ;;  %v6561_v56 = vadd.f32 %v6457_v28, %v536_v21  ;;  %v2181_v62 = vmul.f32 %v6541_v16, %v1413_v27 }
 0x1bc   : > { %v2197_v63 = vmul.f32 %v2165_v43, %v1493_v46  ;;  %v2212_v0 = vadd.f32 %v2196_v50, %v2180_v49  ;;  %v6565_v4 = vadd.f32 %v6054_v44, %v6457_v28  ;;  %v2244_v6 = vsub.f32 1.5, %v5523_v52 }
 0x1bd   : > { %10432 = vst [vmem:[#allocation14_spill] sm:$0xff] %v6558_v55  ;;  %10433 = vst [vmem:[#allocation15_spill] sm:$0xff] %v6561_v56  ;;  %v2245_v7 = vsub.f32 1.5, %v5524_v54  ;;  %v2260_v9 = vmul.f32 %v5523_v52, %v1492_v38  ;;  %v2261_v11 = vmul.f32 %v5524_v54, %v1493_v46  ;;  %v2884_v13 = vsub.f32 1.3333334, %v6537_v12 }
 0x1be   : > { %10434 = vst [vmem:[#allocation16_spill] sm:$0xff] %v6565_v4  ;;  %v2213_v10 = vadd.f32 %v2197_v63, %v2181_v62  ;;  %v5174_v59 = vsel %vm583_vm1, 1.0, %v9897_v35  ;;  %v2276_v14 = vmul.f32 %v2244_v6, %v6551_v47  ;;  %v2885_v17 = vsub.f32 1.3333334, %v6558_v55 }
 0x1bf   : > { %v2277_v15 = vmul.f32 %v2245_v7, %v6554_v51  ;;  %vm631_vm3 = vcmp.ge.f32.partialorder %v6491_v45, -1.8  ;;  %v2900_v18 = vmul.f32 %v6537_v12, %v2212_v0  ;;  %vm679_vm4 = vcmp.ge.f32.partialorder %v6491_v45, -1.4 }
 0x1c0   : > { %v2901_v19 = vmul.f32 %v6558_v55, %v2213_v10  ;;  %v5190_v20 = vsel %vm631_vm3, 1.0, %v9897_v35  ;;  %v6579_v21 = vadd.f32 %v2276_v14, %v2260_v9  ;;  %v5206_v23 = vsel %vm679_vm4, 1.0, %v9897_v35 }
 0x1c1   : > { %v6581_v22 = vadd.f32 %v2277_v15, %v2261_v11  ;;  %v5221_v24 = vsel %vm726_vm15, 1.0, %v9897_v35  ;;  %v5222_v25 = vsel %vm727_vm2, 1.0, %v9897_v35  ;;  %vm774_vm5 = vcmp.ge.f32.partialorder %v6460_v30, -0.6 }
 0x1c2   : > { %10435 = vst [vmem:[#allocation17_spill] sm:$0xff] %v6579_v21  ;;  %vm775_vm6 = vcmp.ge.f32.partialorder %v6491_v45, -0.6  ;;  %v1158_v27 = vsub.f32 %v6472_v36, %v6481_v40  ;;  %v2916_v29 = vmul.f32 %v2884_v13, %v6579_v21  ;;  %v6597_v33 = vsel %vm774_vm5, 1.0, %v9897_v35 }
 0x1c3   : > { %10436 = vst [vmem:[#allocation18_spill] sm:$0xff] %v6581_v22  ;;  %v2917_v31 = vmul.f32 %v2885_v17, %v6581_v22  ;;  %10437 = vst [vmem:[#allocation19_spill] sm:$0xff] %v6597_v33  ;;  %v6600_v34 = vsel %vm775_vm6, 1.0, %v9897_v35  ;;  %v1159_v38 = vsub.f32 %v5174_v59, %v5190_v20  ;;  %v1174_v39 = vsub.f32 %v6481_v40, %v6498_v48 }
 0x1c4   : > { %10438 = vst [vmem:[#allocation20_spill] sm:$0xff] %v6600_v34  ;;  %v1175_v41 = vsub.f32 %v5190_v20, %v5206_v23  ;;  %v1190_v42 = vsub.f32 %v6498_v48, %v5221_v24  ;;  %v2932_v43 = vadd.f32 %v2916_v29, %v2900_v18  ;;  %v1191_v36 = vsub.f32 %v5206_v23, %v5222_v25 }
 0x1c5   : > { %v2933_v44 = vadd.f32 %v2917_v31, %v2901_v19  ;;  %v6606_v46 = vsub.f32 %v5221_v24, %v6597_v33  ;;  %v6609_v49 = vsub.f32 %v5222_v25, %v6600_v34  ;;  %v5365_v50 = vadd.f32 2.2, %v6460_v30 }
 0x1c6   : > { %v5366_v52 = vadd.f32 2.2, %v6491_v45  ;;  %vm584_vm7 = vcmp.ge.f32.partialorder %v6517_v61, -2.2  ;;  %vm585_vm8 = vcmp.ge.f32.partialorder %v6561_v56, -2.2 }
 0x1c7   : > { %10439 = vst [vmem:[#allocation21_spill] sm:$0xff] %v6606_v46  ;;  %10440 = vst [vmem:[#allocation22_spill] sm:$0xff] %v6609_v49  ;;  %v3632_v54 = vpack.c.bf16 %v2933_v44, %v2932_v43  ;;  %v6616_v40 = vsel %vm584_vm7, 1.0, %v9897_v35  ;;  %vm632_vm9 = vcmp.ge.f32.partialorder %v6517_v61, -1.8  ;;  %v6619_v48 = vmul.f32 2.5, %v5365_v50 }
 0x1c8   : > { %v6621_v62 = vmul.f32 2.5, %v5366_v52  ;;  %v6623_v63 = vmul.f32 1.25, %v5365_v50  ;;  %v6625_v0 = vmul.f32 1.25, %v5366_v52  ;;  %v6628_v6 = vmul.f32 0.8333333, %v5365_v50 }
 0x1c9   : > { %10441 = vst [vmem:[#allocation23_spill] sm:$0xff] %v6619_v48  ;;  %6064 = vmatprep.mubr.msk.bf16.mxu0 %vm276_vm0, %v3632_v54  ;;  %v6630_v7 = vmul.f32 0.8333333, %v5366_v52  ;;  %v6633_v9 = vsel %vm585_vm8, 1.0, %v9897_v35  ;;  %v6636_v10 = vsel %vm632_vm9, 1.0, %v9897_v35  ;;  %v1366_v11 = vsub.f32 2.0, %v6619_v48 }
 0x1ca   : > { %10442 = vst [vmem:[#allocation24_spill] sm:$0xff] %v6621_v62  ;;  %10443 = vst [vmem:[#allocation25_spill] sm:$0xff] %v6623_v63  ;;  %v1367_v13 = vsub.f32 2.0, %v6621_v62  ;;  %v1382_v59 = vmul.f32 %v6619_v48, %v1158_v27  ;;  %v1383_v14 = vmul.f32 %v6621_v62, %v1159_v38  ;;  %v5381_v15 = vadd.f32 -1.0, %v6619_v48 }
 0x1cb   : > { %10444 = vst [vmem:[#allocation26_spill] sm:$0xff] %v6625_v0  ;;  %10445 = vst [vmem:[#allocation27_spill] sm:$0xff] %v6628_v6  ;;  %v5382_v17 = vadd.f32 -1.0, %v6621_v62  ;;  %v5397_v18 = vadd.f32 -2.0, %v6619_v48  ;;  %v5398_v19 = vadd.f32 -2.0, %v6621_v62  ;;  %v1398_v20 = vmul.f32 %v1366_v11, %v1174_v39 }
 0x1cc   : > { %10446 = vst [vmem:[#allocation28_spill] sm:$0xff] %v6630_v7  ;;  %v1399_v23 = vmul.f32 %v1367_v13, %v1175_v41  ;;  %v2166_v24 = vsub.f32 1.5, %v6623_v63  ;;  %v2167_v25 = vsub.f32 1.5, %v6625_v0  ;;  %v1446_v29 = vsub.f32 2.0, %v5381_v15 }
 0x1cd   : > { %v1447_v31 = vsub.f32 2.0, %v5382_v17  ;;  %v1462_v43 = vmul.f32 %v5381_v15, %v1174_v39  ;;  %v1463_v27 = vmul.f32 %v5382_v17, %v1175_v41  ;;  %v1414_v44 = vadd.f32 %v1398_v20, %v1382_v59 }
 0x1ce   : > { %v1415_v38 = vadd.f32 %v1399_v23, %v1383_v14  ;;  %v1526_v50 = vsub.f32 2.0, %v5397_v18  ;;  %v1527_v52 = vsub.f32 2.0, %v5398_v19  ;;  %v1478_v54 = vmul.f32 %v1446_v29, %v1190_v42 }
 0x1cf   : > { %v1479_v35 = vmul.f32 %v1447_v31, %v1191_v36  ;;  %v1542_v34 = vmul.f32 %v5397_v18, %v1190_v42  ;;  %v1543_v48 = vmul.f32 %v5398_v19, %v1191_v36  ;;  %v2182_v13 = vmul.f32 %v6623_v63, %v1414_v44 }
 0x1d0   : > { %v1558_v62 = vmul.f32 %v1526_v50, %v6606_v46  ;;  %v1559_v11 = vmul.f32 %v1527_v52, %v6609_v49  ;;  %v2183_v33 = vmul.f32 %v6625_v0, %v1415_v38  ;;  %v1494_v22 = vadd.f32 %v1478_v54, %v1462_v43 }
 0x1d1   : > { %v1495_v21 = vadd.f32 %v1479_v35, %v1463_v27  ;;  %v5525_v39 = vadd.f32 -0.5, %v6623_v63  ;;  %v5526_v41 = vadd.f32 -0.5, %v6625_v0  ;;  %v2886_v42 = vsub.f32 1.3333334, %v6628_v6 }
 0x1d2   : > { %v6654_v59 = vadd.f32 %v1558_v62, %v1542_v34  ;;  %v6656_v14 = vadd.f32 %v1559_v11, %v1543_v48  ;;  %v2887_v36 = vsub.f32 1.3333334, %v6630_v7  ;;  %v2198_v15 = vmul.f32 %v2166_v24, %v1494_v22 }
 0x1d3   : > { %v2199_v17 = vmul.f32 %v2167_v25, %v1495_v21  ;;  %v2246_v18 = vsub.f32 1.5, %v5525_v39  ;;  %v2247_v19 = vsub.f32 1.5, %v5526_v41  ;;  %v2262_v20 = vmul.f32 %v5525_v39, %v1494_v22  ;;  %v549_v22 = vpop.f32.mrf.mxu1 }
 0x1d4   : > { %10447 = vst [vmem:[#allocation29_spill] sm:$0xff] %v6654_v59  ;;  %10448 = vst [vmem:[#allocation30_spill] sm:$0xff] %v6656_v14  ;;  %v2263_v23 = vmul.f32 %v5526_v41, %v1495_v21  ;;  %vm633_vm10 = vcmp.ge.f32.partialorder %v6561_v56, -1.8  ;;  %vm680_vm11 = vcmp.ge.f32.partialorder %v6517_v61, -1.4  ;;  %v2214_v35 = vadd.f32 %v2198_v15, %v2182_v13 }
 0x1d5   : > { %v2215_v29 = vadd.f32 %v2199_v17, %v2183_v33  ;;  %v2278_v34 = vmul.f32 %v2246_v18, %v6654_v59  ;;  %v2279_v48 = vmul.f32 %v2247_v19, %v6656_v14  ;;  %v10449_v62 = vmov 0.0  }
 0x1d6   : > { %v5192_v31 = vsel %vm633_vm10, 1.0, %v10449_v62  ;;  %vm681_vm12 = vcmp.ge.f32.partialorder %v6561_v56, -1.4  ;;  %v5207_v24 = vsel %vm680_vm11, 1.0, %v10449_v62  ;;  %vm728_vm13 = vcmp.ge.f32.partialorder %v6517_v61, -1.0 }
 0x1d7   : > { %v6668_v21 = vadd.f32 %v2278_v34, %v2262_v20  ;;  %v6670_v25 = vadd.f32 %v2279_v48, %v2263_v23  ;;  %v2902_v43 = vmul.f32 %v6628_v6, %v2214_v35  ;;  %v2903_v33 = vmul.f32 %v6630_v7, %v2215_v29  ;;  %v6264_v23 = vld [vmem:[%s9894_s3 + $0x20] sm:$0xff]  }
 0x1d8   : > { %v5208_v27 = vsel %vm681_vm12, 1.0, %v10449_v62  ;;  %vm729_vm14 = vcmp.ge.f32.partialorder %v6561_v56, -1.0  ;;  %v5223_v44 = vsel %vm728_vm13, 1.0, %v10449_v62  ;;  %vm776_vm15 = vcmp.ge.f32.partialorder %v6517_v61, -0.6 }
 0x1d9   : > { %10450 = vst [vmem:[#allocation31_spill] sm:$0xff] %v6668_v21  ;;  %10451 = vst [vmem:[#allocation32_spill] sm:$0xff] %v6670_v25  ;;  %v2918_v38 = vmul.f32 %v2886_v42, %v6668_v21  ;;  %v2919_v50 = vmul.f32 %v2887_v36, %v6670_v25  ;;  %v5224_v52 = vsel %vm729_vm14, 1.0, %v10449_v62  ;;  %vm777_vm1 = vcmp.ge.f32.partialorder %v6561_v56, -0.6 }
 0x1da   : > { %v6683_v54 = vadd.f32 %v6457_v28, %v549_v22  ;;  %v6686_v11 = vsel %vm776_vm15, 1.0, %v10449_v62  ;;  %v6689_v13 = vsel %vm777_vm1, 1.0, %v10449_v62  ;;  %v1160_v39 = vsub.f32 %v6616_v40, %v6636_v10 }
 0x1db   : > { %10453 = vst [vmem:[#allocation34_spill] sm:$0xff] %v6686_v11  ;;  %10454 = vst [vmem:[#allocation35_spill] sm:$0xff] %v6689_v13  ;;  %v2934_v41 = vadd.f32 %v2918_v38, %v2902_v43  ;;  %v2935_v42 = vadd.f32 %v2919_v50, %v2903_v33  ;;  %v1161_v36 = vsub.f32 %v6633_v9, %v5192_v31  ;;  %v5367_v29 = vadd.f32 2.2, %v6517_v61 }
 0x1dc   : > { %10452 = vst [vmem:[#allocation33_spill] sm:$0xff] %v6683_v54  ;;  %v1176_v15 = vsub.f32 %v6636_v10, %v5207_v24  ;;  %v1177_v17 = vsub.f32 %v5192_v31, %v5208_v27  ;;  %v1192_v18 = vsub.f32 %v5207_v24, %v5223_v44  ;;  %v1193_v19 = vsub.f32 %v5208_v27, %v5224_v52 }
 0x1dd   : > { %v6696_v20 = vsub.f32 %v5223_v44, %v6686_v11  ;;  %v3633_v35 = vpack.c.bf16 %v2935_v42, %v2934_v41  ;;  %v5368_v40 = vadd.f32 2.2, %v6561_v56  ;;  %vm586_vm2 = vcmp.ge.f32.partialorder %v6508_v57, -2.2 }
 0x1de   : > { %v6705_v9 = vsub.f32 %v5224_v52, %v6689_v13  ;;  %vm587_vm3 = vcmp.ge.f32.partialorder %v6520_v1, -2.2  ;;  %v6709_v10 = vsel %vm586_vm2, 1.0, %v10449_v62  ;;  %vm634_vm4 = vcmp.ge.f32.partialorder %v6508_v57, -1.8 }
 0x1df   : > { %10455 = vst [vmem:[#allocation36_spill] sm:$0xff] %v6696_v20  ;;  %6065 = vmatmul.mubr.msk.bf16.vlgmr.msra.gmra.mxu0 %vm276_vm0, %v3633_v35  ;;  %v6713_v34 = vmul.f32 2.5, %v5367_v29  ;;  %v6715_v48 = vmul.f32 2.5, %v5368_v40  ;;  %v6717_v31 = vmul.f32 1.25, %v5367_v29  ;;  %v6719_v24 = vmul.f32 1.25, %v5368_v40 }
 0x1e0   : > { %10456 = vst [vmem:[#allocation37_spill] sm:$0xff] %v6705_v9  ;;  %6101 = vmatpush3.bf16.msra.mxu0 %v6448_v26  ;;  %v6722_v22 = vmul.f32 0.8333333, %v5367_v29  ;;  %v6724_v43 = vmul.f32 0.8333333, %v5368_v40  ;;  %v6727_v33 = vsel %vm587_vm3, 1.0, %v10449_v62 }
 0x1e1   : > { %10457 = vst [vmem:[#allocation38_spill] sm:$0xff] %v6713_v34  ;;  %10458 = vst [vmem:[#allocation39_spill] sm:$0xff] %v6715_v48  ;;  %v6730_v27 = vsel %vm634_vm4, 1.0, %v10449_v62  ;;  %v1368_v44 = vsub.f32 2.0, %v6713_v34  ;;  %v1369_v38 = vsub.f32 2.0, %v6715_v48  ;;  %v1384_v50 = vmul.f32 %v6713_v34, %v1160_v39  ;;  %6102 = vmatprep.subr.bf16.mxu0 %v6264_v23 }
 0x1e2   : > { %10459 = vst [vmem:[#allocation40_spill] sm:$0xff] %v6717_v31  ;;  %10460 = vst [vmem:[#allocation41_spill] sm:$0xff] %v6719_v24  ;;  %v1385_v52 = vmul.f32 %v6715_v48, %v1161_v36  ;;  %v5383_v26 = vadd.f32 -1.0, %v6713_v34  ;;  %v5384_v41 = vadd.f32 -1.0, %v6715_v48  ;;  %v5399_v42 = vadd.f32 -2.0, %v6713_v34 }
 0x1e3   : > { %10461 = vst [vmem:[#allocation42_spill] sm:$0xff] %v6722_v22  ;;  %10462 = vst [vmem:[#allocation43_spill] sm:$0xff] %v6724_v43  ;;  %v5400_v35 = vadd.f32 -2.0, %v6715_v48  ;;  %v1400_v29 = vmul.f32 %v1368_v44, %v1176_v15  ;;  %v1401_v40 = vmul.f32 %v1369_v38, %v1177_v17  ;;  %v2168_v13 = vsub.f32 1.5, %v6717_v31 }
 0x1e4   : > { %v2169_v11 = vsub.f32 1.5, %v6719_v24  ;;  %v1448_v25 = vsub.f32 2.0, %v5383_v26  ;;  %v1449_v21 = vsub.f32 2.0, %v5384_v41  ;;  %v1464_v39 = vmul.f32 %v5383_v26, %v1176_v15  ;;  %6103 = vmatpush3.bf16.msra.mxu0 %v6264_v23 }
 0x1e5   : > { %v1465_v7 = vmul.f32 %v5384_v41, %v1177_v17  ;;  %vm730_vm5 = vcmp.ge.f32.partialorder %v6508_v57, -1.0  ;;  %v1416_v36 = vadd.f32 %v1400_v29, %v1384_v50  ;;  %v1417_v14 = vadd.f32 %v1401_v40, %v1385_v52 }
 0x1e6   : > { %v1528_v59 = vsub.f32 2.0, %v5399_v42  ;;  %v1529_v6 = vsub.f32 2.0, %v5400_v35  ;;  %v1480_v34 = vmul.f32 %v1448_v25, %v1192_v18  ;;  %v1481_v49 = vmul.f32 %v1449_v21, %v1193_v19 }
 0x1e7   : > { %v1544_v48 = vmul.f32 %v5399_v42, %v1192_v18  ;;  %v1545_v44 = vmul.f32 %v5400_v35, %v1193_v19  ;;  %v2184_v63 = vmul.f32 %v6717_v31, %v1416_v36  ;;  %v2185_v15 = vmul.f32 %v6719_v24, %v1417_v14  ;;  %v6755_v18 = vpop.f32.mrf.mxu1 }
 0x1e8   : > { %v1560_v38 = vmul.f32 %v1528_v59, %v6696_v20  ;;  %v1561_v0 = vmul.f32 %v1529_v6, %v6705_v9  ;;  %v1496_v17 = vadd.f32 %v1480_v34, %v1464_v39  ;;  %v1497_v26 = vadd.f32 %v1481_v49, %v1465_v7 }
 0x1e9   : > { %v5527_v23 = vadd.f32 -0.5, %v6717_v31  ;;  %v5528_v50 = vadd.f32 -0.5, %v6719_v24  ;;  %v2888_v21 = vsub.f32 1.3333334, %v6722_v22  ;;  %v2889_v59 = vsub.f32 1.3333334, %v6724_v43 }
 0x1ea   : > { %v6749_v52 = vadd.f32 %v1560_v38, %v1544_v48  ;;  %v6751_v25 = vadd.f32 %v1561_v0, %v1545_v44  ;;  %v2200_v6 = vmul.f32 %v2168_v13, %v1496_v17  ;;  %v2201_v19 = vmul.f32 %v2169_v11, %v1497_v26  ;;  %v552_v13 = vpop.f32.mrf.mxu1 }
 0x1eb   : > { %v2248_v41 = vsub.f32 1.5, %v5527_v23  ;;  %v2249_v14 = vsub.f32 1.5, %v5528_v50  ;;  %v2264_v34 = vmul.f32 %v5527_v23, %v1496_v17  ;;  %v2265_v49 = vmul.f32 %v5528_v50, %v1497_v26 }
 0x1ec   : > { %10463 = vst [vmem:[#allocation44_spill] sm:$0xff] %v6749_v52  ;;  %10464 = vst [vmem:[#allocation45_spill] sm:$0xff] %v6751_v25  ;;  %vm635_vm6 = vcmp.ge.f32.partialorder %v6520_v1, -1.8  ;;  %vm682_vm7 = vcmp.ge.f32.partialorder %v6508_v57, -1.4  ;;  %v2216_v7 = vadd.f32 %v2200_v6, %v2184_v63  ;;  %v2217_v48 = vadd.f32 %v2201_v19, %v2185_v15 }
 0x1ed   : > { %v2280_v0 = vmul.f32 %v2248_v41, %v6749_v52  ;;  %v2281_v42 = vmul.f32 %v2249_v14, %v6751_v25  ;;  %v5194_v35 = vsel %vm635_vm6, 1.0, %v10449_v62  ;;  %vm683_vm8 = vcmp.ge.f32.partialorder %v6520_v1, -1.4 }
 0x1ee   : > { %v5209_v11 = vsel %vm682_vm7, 1.0, %v10449_v62  ;;  %vm731_vm9 = vcmp.ge.f32.partialorder %v6520_v1, -1.0  ;;  %v2904_v63 = vmul.f32 %v6722_v22, %v2216_v7  ;;  %v2905_v39 = vmul.f32 %v6724_v43, %v2217_v48 }
 0x1ef   : > { %v6765_v29 = vadd.f32 %v2280_v0, %v2264_v34  ;;  %v6767_v40 = vadd.f32 %v2281_v42, %v2265_v49  ;;  %v5210_v36 = vsel %vm683_vm8, 1.0, %v10449_v62  ;;  %v5225_v44 = vsel %vm730_vm5, 1.0, %v10449_v62 }
 0x1f0   : > { %v5226_v38 = vsel %vm731_vm9, 1.0, %v10449_v62  ;;  %vm778_vm10 = vcmp.ge.f32.partialorder %v6508_v57, -0.6  ;;  %vm779_vm11 = vcmp.ge.f32.partialorder %v6520_v1, -0.6  ;;  %v6784_v23 = vadd.f32 %v6457_v28, %v552_v13 }
 0x1f1   : > { %10465 = vst [vmem:[#allocation46_spill] sm:$0xff] %v6765_v29  ;;  %10466 = vst [vmem:[#allocation47_spill] sm:$0xff] %v6767_v40  ;;  %v2920_v15 = vmul.f32 %v2888_v21, %v6765_v29  ;;  %v2921_v17 = vmul.f32 %v2889_v59, %v6767_v40  ;;  %v6781_v26 = vsel %vm778_vm10, 1.0, %v10449_v62  ;;  %v6787_v50 = vsel %vm779_vm11, 1.0, %v10449_v62 }
 0x1f2   : > { %10467 = vst [vmem:[#allocation48_spill] sm:$0xff] %v6781_v26  ;;  %10468 = vst [vmem:[#allocation49_spill] sm:$0xff] %v6784_v23  ;;  %v1162_v6 = vsub.f32 %v6709_v10, %v6730_v27  ;;  %v1163_v19 = vsub.f32 %v6727_v33, %v5194_v35  ;;  %v1178_v59 = vsub.f32 %v6730_v27, %v5209_v11  ;;  %v5369_v48 = vadd.f32 2.2, %v6508_v57 }
 0x1f3   : > { %10469 = vst [vmem:[#allocation50_spill] sm:$0xff] %v6787_v50  ;;  %v2936_v41 = vadd.f32 %v2920_v15, %v2904_v63  ;;  %v2937_v21 = vadd.f32 %v2921_v17, %v2905_v39  ;;  %v1179_v14 = vsub.f32 %v5194_v35, %v5210_v36  ;;  %v1194_v34 = vsub.f32 %v5209_v11, %v5225_v44 }
 0x1f4   : > { %v1195_v49 = vsub.f32 %v5210_v36, %v5226_v38  ;;  %v6794_v7 = vsub.f32 %v5225_v44, %v6781_v26  ;;  %v6798_v42 = vsub.f32 %v5226_v38, %v6787_v50  ;;  %v5370_v10 = vadd.f32 2.2, %v6520_v1 }
 0x1f5   : > { %v3634_v0 = vpack.c.bf16 %v2937_v21, %v2936_v41  ;;  %v5763_v33 = vmul.f32 -1.442695, %v6463_v32  ;;  %v6802_v13 = vmul.f32 2.5, %v5369_v48  ;;  %v6804_v63 = vmul.f32 1.25, %v5369_v48 }
 0x1f6   : > { %10470 = vst [vmem:[#allocation51_spill] sm:$0xff] %v6794_v7  ;;  %10471 = vst [vmem:[#allocation52_spill] sm:$0xff] %v6798_v42  ;;  %v6806_v27 = vmul.f32 0.8333333, %v5369_v48  ;;  %v5764_v35 = vmul.f32 -1.442695, %v6476_v37 }
 0x1f7   : > { %10472 = vst [vmem:[#allocation53_spill] sm:$0xff] %v6802_v13  ;;  %10473 = vst [vmem:[#allocation54_spill] sm:$0xff] %v6804_v63  ;;  %6068 = vmatprep.mubr.msk.bf16.mxu0 %vm276_vm0, %v3634_v0  ;;  %v6810_v11 = vmul.f32 2.5, %v5370_v10  ;;  %v6812_v39 = vmul.f32 1.25, %v5370_v10  ;;  %6277 = vpow2.f32 %v5763_v33  ;;  %v5765_v36 = vmul.f32 -1.442695, %v6460_v30 }
 0x1f8   : > { %10474 = vst [vmem:[#allocation55_spill] sm:$0xff] %v6806_v27  ;;  %v1370_v44 = vsub.f32 2.0, %v6802_v13  ;;  %v1386_v38 = vmul.f32 %v6802_v13, %v1162_v6  ;;  %v5385_v15 = vadd.f32 -1.0, %v6802_v13  ;;  %v5401_v17 = vadd.f32 -2.0, %v6802_v13 }
 0x1f9   : > { %10475 = vst [vmem:[#allocation56_spill] sm:$0xff] %v6810_v11  ;;  %10476 = vst [vmem:[#allocation57_spill] sm:$0xff] %v6812_v39  ;;  %v1371_v41 = vsub.f32 2.0, %v6810_v11  ;;  %v1387_v21 = vmul.f32 %v6810_v11, %v1163_v19  ;;  %v5386_v48 = vadd.f32 -1.0, %v6810_v11  ;;  %v5402_v0 = vadd.f32 -2.0, %v6810_v11 }
 0x1fa   : > { %v1402_v50 = vmul.f32 %v1370_v44, %v1178_v59  ;;  %v1450_v33 = vsub.f32 2.0, %v5385_v15  ;;  %v1466_v26 = vmul.f32 %v5385_v15, %v1178_v59  ;;  %v1530_v40 = vsub.f32 2.0, %v5401_v17 }
 0x1fb   : > { %v1403_v29 = vmul.f32 %v1371_v41, %v1179_v14  ;;  %v1451_v43 = vsub.f32 2.0, %v5386_v48  ;;  %v1467_v22 = vmul.f32 %v5386_v48, %v1179_v14  ;;  %v1531_v6 = vsub.f32 2.0, %v5402_v0 }
 0x1fc   : > { %v1418_v25 = vadd.f32 %v1402_v50, %v1386_v38  ;;  %v1482_v52 = vmul.f32 %v1450_v33, %v1194_v34  ;;  %v1546_v24 = vmul.f32 %v5401_v17, %v1194_v34  ;;  %v1547_v13 = vmul.f32 %v5402_v0, %v1195_v49 }
 0x1fd   : > { %v1419_v9 = vadd.f32 %v1403_v29, %v1387_v21  ;;  %v1483_v20 = vmul.f32 %v1451_v43, %v1195_v49  ;;  %v1562_v19 = vmul.f32 %v1530_v40, %v6794_v7  ;;  %v1563_v31 = vmul.f32 %v1531_v6, %v6798_v42 }
 0x1fe   : > { %v1498_v46 = vadd.f32 %v1482_v52, %v1466_v26  ;;  %v2170_v44 = vsub.f32 1.5, %v6804_v63  ;;  %v2171_v59 = vsub.f32 1.5, %v6812_v39  ;;  %v6827_v15 = vmul.f32 0.8333333, %v5370_v10 }
 0x1ff   : > { %v1499_v41 = vadd.f32 %v1483_v20, %v1467_v22  ;;  %v6829_v14 = vadd.f32 %v1562_v19, %v1546_v24  ;;  %v6831_v50 = vadd.f32 %v1563_v31, %v1547_v13  ;;  %v2186_v34 = vmul.f32 %v6804_v63, %v1418_v25 }
 0x200   : > { %10477 = vst [vmem:[#allocation58_spill] sm:$0xff] %v6827_v15  ;;  %v2187_v43 = vmul.f32 %v6812_v39, %v1419_v9  ;;  %v2202_v29 = vmul.f32 %v2170_v44, %v1498_v46  ;;  %v5529_v40 = vadd.f32 -0.5, %v6804_v63  ;;  %v5530_v52 = vadd.f32 -0.5, %v6812_v39 }
 0x201   : > { %10478 = vst [vmem:[#allocation59_spill] sm:$0xff] %v6829_v14  ;;  %10479 = vst [vmem:[#allocation60_spill] sm:$0xff] %v6831_v50  ;;  %v2203_v26 = vmul.f32 %v2171_v59, %v1499_v41  ;;  %v2890_v49 = vsub.f32 1.3333334, %v6806_v27  ;;  %6279 = vpow2.f32 %v5764_v35  ;;  %v5766_v10 = vmul.f32 -1.442695, %v6491_v45 }
 0x202   : > { %v2218_v20 = vadd.f32 %v2202_v29, %v2186_v34  ;;  %v2250_v24 = vsub.f32 1.5, %v5529_v40  ;;  %v2251_v22 = vsub.f32 1.5, %v5530_v52  ;;  %v2266_v31 = vmul.f32 %v5529_v40, %v1498_v46 }
 0x203   : > { %v2219_v13 = vadd.f32 %v2203_v26, %v2187_v43  ;;  %v2267_v38 = vmul.f32 %v5530_v52, %v1499_v41  ;;  %6281 = vpow2.f32 %v5765_v36  ;;  %vm588_vm12 = vcmp.ge.f32.partialorder %v6683_v54, -2.2 }
 0x204   : > { %v6278_v9 = vpop.eup %6277  ;;  %v2282_v25 = vmul.f32 %v2250_v24, %v6829_v14  ;;  %v2283_v17 = vmul.f32 %v2251_v22, %v6831_v50  ;;  %v2891_v21 = vsub.f32 1.3333334, %v6827_v15  ;;  %6283 = vpow2.f32 %v5766_v10 }
 0x205   : > { %v2906_v35 = vmul.f32 %v6806_v27, %v2218_v20  ;;  %v2907_v48 = vmul.f32 %v6827_v15, %v2219_v13  ;;  %v3556_v0 = vadd.f32 1.0, %v6278_v9  ;;  %vm589_vm13 = vcmp.ge.f32.partialorder %v6784_v23, -2.2 }
 0x206   : > { %v6846_v46 = vadd.f32 %v2282_v25, %v2266_v31  ;;  %v6848_v36 = vadd.f32 %v2283_v17, %v2267_v38  ;;  %v5179_v33 = vsel %vm588_vm12, 1.0, %v10449_v62  ;;  %vm636_vm14 = vcmp.ge.f32.partialorder %v6683_v54, -1.8 }
 0x207   : > { %6285 = vrcp.f32 %v3556_v0  ;;  %v5180_v6 = vsel %vm589_vm13, 1.0, %v10449_v62  ;;  %vm637_vm15 = vcmp.ge.f32.partialorder %v6784_v23, -1.8  ;;  %vm684_vm1 = vcmp.ge.f32.partialorder %v6683_v54, -1.4 }
 0x208   : > { %10480 = vst [vmem:[#allocation61_spill] sm:$0xff] %v6846_v46  ;;  %10481 = vst [vmem:[#allocation62_spill] sm:$0xff] %v6848_v36  ;;  %v2922_v19 = vmul.f32 %v2890_v49, %v6846_v46  ;;  %v2923_v44 = vmul.f32 %v2891_v21, %v6848_v36  ;;  %v5195_v59 = vsel %vm636_vm14, 1.0, %v10449_v62  ;;  %vm685_vm2 = vcmp.ge.f32.partialorder %v6784_v23, -1.4  ;;  %v6915_v36 = vpop.f32.mrf.mxu1 }
 0x209   : > { %v5196_v41 = vsel %vm637_vm15, 1.0, %v10449_v62  ;;  %v5211_v34 = vsel %vm684_vm1, 1.0, %v10449_v62  ;;  %vm732_vm3 = vcmp.ge.f32.partialorder %v6683_v54, -1.0  ;;  %vm733_vm4 = vcmp.ge.f32.partialorder %v6784_v23, -1.0 }
 0x20a   : > { %v2938_v43 = vadd.f32 %v2922_v19, %v2906_v35  ;;  %v2939_v29 = vadd.f32 %v2923_v44, %v2907_v48  ;;  %v5212_v40 = vsel %vm685_vm2, 1.0, %v10449_v62  ;;  %v5227_v52 = vsel %vm732_vm3, 1.0, %v10449_v62 }
 0x20b   : > { %v6867_v26 = vadd.f32 %v6755_v18, %v6457_v28  ;;  %v5228_v49 = vsel %vm733_vm4, 1.0, %v10449_v62  ;;  %vm780_vm5 = vcmp.ge.f32.partialorder %v6683_v54, -0.6  ;;  %vm781_vm6 = vcmp.ge.f32.partialorder %v6784_v23, -0.6 }
 0x20c   : > { %v3635_v10 = vpack.c.bf16 %v2939_v29, %v2938_v43  ;;  %v6873_v20 = vsel %vm780_vm5, 1.0, %v10449_v62  ;;  %v6876_v24 = vsel %vm781_vm6, 1.0, %v10449_v62  ;;  %v1164_v22 = vsub.f32 %v5179_v33, %v5195_v59 }
 0x20d   : > { %10482 = vst [vmem:[#allocation63_spill] sm:$0xff] %v6867_v26  ;;  %10483 = vst [vmem:[#allocation64_spill] sm:$0xff] %v6873_v20  ;;  %v1165_v31 = vsub.f32 %v5180_v6, %v5196_v41  ;;  %v1180_v13 = vsub.f32 %v5195_v59, %v5211_v34  ;;  %v1181_v38 = vsub.f32 %v5196_v41, %v5212_v40  ;;  %v5371_v25 = vadd.f32 2.2, %v6683_v54 }
 0x20e   : > { %10484 = vst [vmem:[#allocation65_spill] sm:$0xff] %v6876_v24  ;;  %v1196_v9 = vsub.f32 %v5211_v34, %v5227_v52  ;;  %v6280_v28 = vpop.eup %6279  ;;  %6069 = vmatmul.mubr.msk.bf16.gmra.mxu0 %vm276_vm0, %v3635_v10  ;;  %v1197_v18 = vsub.f32 %v5212_v40, %v5228_v49  ;;  %v5372_v17 = vadd.f32 2.2, %v6784_v23  ;;  %vm590_vm7 = vcmp.ge.f32.partialorder %v6565_v4, -2.2 }
 0x20f   : > { %v3557_v21 = vadd.f32 1.0, %v6280_v28  ;;  %v6883_v35 = vsub.f32 %v5227_v52, %v6873_v20  ;;  %v6886_v48 = vsub.f32 %v5228_v49, %v6876_v24  ;;  %v6889_v0 = vsel %vm590_vm7, 1.0, %v10449_v62 }
 0x210   : > { %v6282_v33 = vpop.eup %6281  ;;  %v6891_v6 = vmul.f32 2.5, %v5371_v25  ;;  %v6893_v19 = vmul.f32 2.5, %v5372_v17  ;;  %v6895_v44 = vmul.f32 1.25, %v5371_v25  ;;  %v6897_v59 = vmul.f32 1.25, %v5372_v17 }
 0x211   : > { %10485 = vst [vmem:[#allocation66_spill] sm:$0xff] %v6883_v35  ;;  %10486 = vst [vmem:[#allocation67_spill] sm:$0xff] %v6886_v48  ;;  %v6284_v41 = vpop.eup %6283  ;;  %6287 = vrcp.f32 %v3557_v21  ;;  %v3558_v34 = vadd.f32 1.0, %v6282_v33  ;;  %v6899_v43 = vmul.f32 0.8333333, %v5371_v25  ;;  %vm734_vm13 = vcmp.ge.f32.partialorder %v6565_v4, -1.0 }
 0x212   : > { %10487 = vst [vmem:[#allocation68_spill] sm:$0xff] %v6891_v6  ;;  %10488 = vst [vmem:[#allocation69_spill] sm:$0xff] %v6893_v19  ;;  %v6901_v29 = vmul.f32 0.8333333, %v5372_v17  ;;  %v3559_v40 = vadd.f32 1.0, %v6284_v41  ;;  %v1372_v52 = vsub.f32 2.0, %v6891_v6  ;;  %v1388_v10 = vmul.f32 %v6891_v6, %v1164_v22 }
 0x213   : > { %10489 = vst [vmem:[#allocation70_spill] sm:$0xff] %v6895_v44  ;;  %10490 = vst [vmem:[#allocation71_spill] sm:$0xff] %v6897_v59  ;;  %v1373_v49 = vsub.f32 2.0, %v6893_v19  ;;  %6289 = vrcp.f32 %v3558_v34  ;;  %v1389_v28 = vmul.f32 %v6893_v19, %v1165_v31  ;;  %v5387_v24 = vadd.f32 -1.0, %v6891_v6 }
 0x214   : > { %10491 = vst [vmem:[#allocation72_spill] sm:$0xff] %v6899_v43  ;;  %10492 = vst [vmem:[#allocation73_spill] sm:$0xff] %v6901_v29  ;;  %v5388_v20 = vadd.f32 -1.0, %v6893_v19  ;;  %vm591_vm8 = vcmp.ge.f32.partialorder %v6867_v26, -2.2  ;;  %v6286_v25 = vpop.eup %6285  ;;  %6291 = vrcp.f32 %v3559_v40  ;;  %v1404_v17 = vmul.f32 %v1372_v52, %v1180_v13  ;;  %v6921_v40 = vld [vmem:[%s9894_s3 + $0x38] sm:$0xff]  }
 0x215   : > { %v1405_v21 = vmul.f32 %v1373_v49, %v1181_v38  ;;  %v5403_v33 = vadd.f32 -2.0, %v6891_v6  ;;  %vm638_vm9 = vcmp.ge.f32.partialorder %v6565_v4, -1.8  ;;  %v6913_v41 = vmul.f32 %v6286_v25, %v6463_v32  ;;  %6120 = vmatprep.subr.bf16.mxu1 %v6921_v40 }
 0x216   : > { %v1452_v22 = vsub.f32 2.0, %v5387_v24  ;;  %v1453_v34 = vsub.f32 2.0, %v5388_v20  ;;  %v1468_v31 = vmul.f32 %v5387_v24, %v1180_v13  ;;  %v1420_v46 = vadd.f32 %v1404_v17, %v1388_v10  ;;  %v6931_v17 = vld [vmem:[%s9894_s3 + $0x48] sm:$0xff]  }
 0x217   : > { %v1421_v15 = vadd.f32 %v1405_v21, %v1389_v28  ;;  %v1469_v50 = vmul.f32 %v5388_v20, %v1181_v38  ;;  %v5404_v14 = vadd.f32 -2.0, %v6893_v19  ;;  %v1532_v6 = vsub.f32 2.0, %v5403_v33  ;;  %10493 = vst [vmem:[#allocation74_spill] sm:$0xff] %v6931_v17  ;;  %6140 = vmatprep.subr.bf16.mxu0 %v6931_v17 }
 0x218   : > { %v1484_v52 = vmul.f32 %v1452_v22, %v1196_v9  ;;  %v1485_v49 = vmul.f32 %v1453_v34, %v1197_v18  ;;  %v1548_v25 = vmul.f32 %v5403_v33, %v1196_v9  ;;  %v2172_v24 = vsub.f32 1.5, %v6895_v44  ;;  %v565_v9 = vpop.f32.mrf.mxu1 }
 0x219   : > { %v1533_v27 = vsub.f32 2.0, %v5404_v14  ;;  %v1549_v39 = vmul.f32 %v5404_v14, %v1197_v18  ;;  %v2173_v13 = vsub.f32 1.5, %v6897_v59  ;;  %v1564_v10 = vmul.f32 %v1532_v6, %v6883_v35 }
 0x21a   : > { %v1500_v20 = vadd.f32 %v1484_v52, %v1468_v31  ;;  %v1501_v38 = vadd.f32 %v1485_v49, %v1469_v50  ;;  %v2188_v28 = vmul.f32 %v6895_v44, %v1420_v46  ;;  %v2189_v18 = vmul.f32 %v6897_v59, %v1421_v15 }
 0x21b   : > { %v1565_v14 = vmul.f32 %v1533_v27, %v6886_v48  ;;  %v5531_v21 = vadd.f32 -0.5, %v6895_v44  ;;  %v5532_v33 = vadd.f32 -0.5, %v6897_v59  ;;  %v6937_v22 = vadd.f32 %v1564_v10, %v1548_v25  ;;  %v6944_v59 = vpop.f32.mrf.mxu1 }
 0x21c   : > { %v2204_v50 = vmul.f32 %v2172_v24, %v1500_v20  ;;  %v2205_v6 = vmul.f32 %v2173_v13, %v1501_v38  ;;  %v2892_v46 = vsub.f32 1.3333334, %v6899_v43  ;;  %v2893_v35 = vsub.f32 1.3333334, %v6901_v29 }
 0x21d   : > { %10494 = vst [vmem:[#allocation75_spill] sm:$0xff] %v6937_v22  ;;  %v6941_v34 = vadd.f32 %v1565_v14, %v1549_v39  ;;  %v2252_v31 = vsub.f32 1.5, %v5531_v21  ;;  %v2253_v52 = vsub.f32 1.5, %v5532_v33  ;;  %v2268_v49 = vmul.f32 %v5531_v21, %v1500_v20 }
 0x21e   : > { %v2220_v27 = vadd.f32 %v2204_v50, %v2188_v28  ;;  %v2221_v48 = vadd.f32 %v2205_v6, %v2189_v18  ;;  %v2269_v15 = vmul.f32 %v5532_v33, %v1501_v38  ;;  %v6288_v44 = vpop.eup %6287  ;;  %v6951_v39 = vsel %vm591_vm8, 1.0, %v10449_v62  ;;  %v568_v6 = vpop.f32.mrf.mxu1 }
 0x21f   : > { %10495 = vst [vmem:[#allocation76_spill] sm:$0xff] %v6941_v34  ;;  %v2284_v25 = vmul.f32 %v2252_v31, %v6937_v22  ;;  %v2285_v24 = vmul.f32 %v2253_v52, %v6941_v34  ;;  %vm639_vm10 = vcmp.ge.f32.partialorder %v6867_v26, -1.8  ;;  %v3605_v13 = vmul.f32 %v6288_v44, %v6476_v37 }
 0x220   : > { %v2908_v20 = vmul.f32 %v6899_v43, %v2220_v27  ;;  %v2909_v38 = vmul.f32 %v6901_v29, %v2221_v48  ;;  %v5197_v10 = vsel %vm638_vm9, 1.0, %v10449_v62  ;;  %v6290_v28 = vpop.eup %6289  ;;  %v5198_v21 = vsel %vm639_vm10, 1.0, %v10449_v62 }
 0x221   : > { %v6960_v14 = vadd.f32 %v2284_v25, %v2268_v49  ;;  %v6962_v18 = vadd.f32 %v2285_v24, %v2269_v15  ;;  %vm686_vm11 = vcmp.ge.f32.partialorder %v6565_v4, -1.4  ;;  %v6292_v33 = vpop.eup %6291  ;;  %v3620_v44 = vpack.c.bf16 %v3605_v13, %v6913_v41 }
 0x222   : > { %v3606_v50 = vmul.f32 %v6290_v28, %v6460_v30  ;;  %vm687_vm12 = vcmp.ge.f32.partialorder %v6867_v26, -1.4  ;;  %v5213_v48 = vsel %vm686_vm11, 1.0, %v10449_v62  ;;  %v3607_v31 = vmul.f32 %v6292_v33, %v6491_v45 }
 0x223   : > { %10496 = vst [vmem:[#allocation77_spill] sm:$0xff] %v6960_v14  ;;  %10497 = vst [vmem:[#allocation78_spill] sm:$0xff] %v6962_v18  ;;  %v2924_v52 = vmul.f32 %v2892_v46, %v6960_v14  ;;  %v2925_v49 = vmul.f32 %v2893_v35, %v6962_v18  ;;  %v5214_v27 = vsel %vm687_vm12, 1.0, %v10449_v62  ;;  %6084 = vmatprep.mubr.msk.bf16.mxu1 %vm276_vm0, %v3620_v44  ;;  %vm735_vm14 = vcmp.ge.f32.partialorder %v6867_v26, -1.0  ;;  %v6983_v35 = vld [vmem:[%s9895_s4 + $0x1] ss:$0 sm:$0xff] }
 0x224   : > { %vm782_vm15 = vcmp.ge.f32.partialorder %v6565_v4, -0.6  ;;  %vm783_vm1 = vcmp.ge.f32.partialorder %v6867_v26, -0.6  ;;  %v3621_v41 = vpack.c.bf16 %v3607_v31, %v3606_v50  ;;  %v5229_v24 = vsel %vm734_vm13, 1.0, %v10449_v62 }
 0x225   : > { %v2940_v15 = vadd.f32 %v2924_v52, %v2908_v20  ;;  %v2941_v25 = vadd.f32 %v2925_v49, %v2909_v38  ;;  %v6987_v46 = vadd.f32 %v6983_v35, %v6915_v36  ;;  %v6990_v13 = vadd.f32 %v6983_v35, %v565_v9 }
 0x226   : > { %v6993_v28 = vadd.f32 %v6983_v35, %v568_v6  ;;  %v5230_v20 = vsel %vm735_vm14, 1.0, %v10449_v62  ;;  %6085 = vmatmul.mubr.msk.bf16.vlgmr.msra.gmra.mxu1 %vm276_vm0, %v3621_v41  ;;  %v6998_v33 = vsel %vm782_vm15, 1.0, %v10449_v62  ;;  %v7001_v44 = vsel %vm783_vm1, 1.0, %v10449_v62 }
 0x227   : > { %10498 = vst [vmem:[#allocation79_spill] sm:$0xff] %v6987_v46  ;;  %10499 = vst [vmem:[#allocation80_spill] sm:$0xff] %v6990_v13  ;;  %v3636_v38 = vpack.c.bf16 %v2941_v25, %v2940_v15  ;;  %v1166_v36 = vsub.f32 %v6889_v0, %v5197_v10  ;;  %v1167_v50 = vsub.f32 %v6951_v39, %v5198_v21  ;;  %6121 = vmatpush3.bf16.msra.mxu1 %v6921_v40 }
 0x228   : > { %10500 = vst [vmem:[#allocation81_spill] sm:$0xff] %v6993_v28  ;;  %10501 = vst [vmem:[#allocation82_spill] sm:$0xff] %v6998_v33  ;;  %v1182_v9 = vsub.f32 %v5197_v10, %v5213_v48  ;;  %v1183_v31 = vsub.f32 %v5198_v21, %v5214_v27  ;;  %v1198_v52 = vsub.f32 %v5213_v48, %v5229_v24  ;;  %v5373_v49 = vadd.f32 2.2, %v6565_v4 }
 0x229   : > { %10502 = vst [vmem:[#allocation83_spill] sm:$0xff] %v7001_v44  ;;  %6072 = vmatprep.mubr.msk.bf16.mxu0 %vm276_vm0, %v3636_v38  ;;  %v1199_v6 = vsub.f32 %v5214_v27, %v5230_v20  ;;  %v5374_v41 = vadd.f32 2.2, %v6867_v26  ;;  %v5767_v15 = vmul.f32 -1.442695, %v6517_v61  ;;  %v7011_v25 = vsub.f32 %v5229_v24, %v6998_v33 }
 0x22a   : > { %v7014_v0 = vsub.f32 %v5230_v20, %v7001_v44  ;;  %v5768_v39 = vmul.f32 -1.442695, %v6561_v56  ;;  %v5769_v10 = vmul.f32 -1.442695, %v6508_v57  ;;  %v7018_v40 = vmul.f32 2.5, %v5373_v49 }
 0x22b   : > { %10503 = vst [vmem:[#allocation84_spill] sm:$0xff] %v7011_v25  ;;  %v7020_v21 = vmul.f32 2.5, %v5374_v41  ;;  %v7022_v48 = vmul.f32 1.25, %v5373_v49  ;;  %v7024_v27 = vmul.f32 1.25, %v5374_v41  ;;  %v7026_v38 = vmul.f32 0.8333333, %v5373_v49 }
 0x22c   : > { %10504 = vst [vmem:[#allocation85_spill] sm:$0xff] %v7014_v0  ;;  %10505 = vst [vmem:[#allocation86_spill] sm:$0xff] %v7018_v40  ;;  %v7028_v18 = vmul.f32 0.8333333, %v5374_v41  ;;  %6293 = vpow2.f32 %v5767_v15  ;;  %v5770_v24 = vmul.f32 -1.442695, %v6520_v1  ;;  %v1390_v33 = vmul.f32 %v7018_v40, %v1166_v36 }
 0x22d   : > { %10506 = vst [vmem:[#allocation87_spill] sm:$0xff] %v7020_v21  ;;  %10507 = vst [vmem:[#allocation88_spill] sm:$0xff] %v7022_v48  ;;  %v1374_v20 = vsub.f32 2.0, %v7018_v40  ;;  %v1375_v44 = vsub.f32 2.0, %v7020_v21  ;;  %v1391_v14 = vmul.f32 %v7020_v21, %v1167_v50  ;;  %v5389_v34 = vadd.f32 -1.0, %v7018_v40 }
 0x22e   : > { %10508 = vst [vmem:[#allocation89_spill] sm:$0xff] %v7024_v27  ;;  %10509 = vst [vmem:[#allocation90_spill] sm:$0xff] %v7026_v38  ;;  %v5390_v22 = vadd.f32 -1.0, %v7020_v21  ;;  %v5405_v49 = vadd.f32 -2.0, %v7018_v40  ;;  %v5406_v41 = vadd.f32 -2.0, %v7020_v21  ;;  %v2174_v43 = vsub.f32 1.5, %v7022_v48 }
 0x22f   : > { %10510 = vst [vmem:[#allocation91_spill] sm:$0xff] %v7028_v18  ;;  %vm592_vm2 = vcmp.ge.f32.partialorder %v6990_v13, -2.2  ;;  %v1406_v15 = vmul.f32 %v1374_v20, %v1182_v9  ;;  %v1407_v29 = vmul.f32 %v1375_v44, %v1183_v31  ;;  %v2175_v19 = vsub.f32 1.5, %v7024_v27 }
 0x230   : > { %v1454_v63 = vsub.f32 2.0, %v5389_v34  ;;  %v1455_v36 = vsub.f32 2.0, %v5390_v22  ;;  %v1470_v42 = vmul.f32 %v5389_v34, %v1182_v9  ;;  %v1471_v50 = vmul.f32 %v5390_v22, %v1183_v31 }
 0x231   : > { %v1422_v7 = vadd.f32 %v1406_v15, %v1390_v33  ;;  %v1423_v11 = vadd.f32 %v1407_v29, %v1391_v14  ;;  %v1534_v17 = vsub.f32 2.0, %v5405_v49  ;;  %v1535_v45 = vsub.f32 2.0, %v5406_v41 }
 0x232   : > { %v1486_v30 = vmul.f32 %v1454_v63, %v1198_v52  ;;  %v1487_v40 = vmul.f32 %v1455_v36, %v1199_v6  ;;  %v1550_v26 = vmul.f32 %v5405_v49, %v1198_v52  ;;  %v1551_v21 = vmul.f32 %v5406_v41, %v1199_v6 }
 0x233   : > { %v1566_v4 = vmul.f32 %v1534_v17, %v7011_v25  ;;  %v1567_v44 = vmul.f32 %v1535_v45, %v7014_v0  ;;  %v2190_v20 = vmul.f32 %v7022_v48, %v1422_v7  ;;  %v2191_v23 = vmul.f32 %v7024_v27, %v1423_v11 }
 0x234   : > { %v1502_v54 = vadd.f32 %v1486_v30, %v1470_v42  ;;  %v1503_v55 = vadd.f32 %v1487_v40, %v1471_v50  ;;  %v5533_v22 = vadd.f32 -0.5, %v7022_v48  ;;  %v5534_v29 = vadd.f32 -0.5, %v7024_v27  ;;  %v6267_v30 = vld [vmem:[%s9894_s3 + $0x30] sm:$0xff]  }
 0x235   : > { %v7048_v34 = vadd.f32 %v1566_v4, %v1550_v26  ;;  %v7050_v63 = vadd.f32 %v1567_v44, %v1551_v21  ;;  %v2894_v14 = vsub.f32 1.3333334, %v7026_v38  ;;  %v2895_v17 = vsub.f32 1.3333334, %v7028_v18  ;;  %6122 = vmatprep.subr.bf16.mxu1 %v6267_v30  ;;  %v10565_v27 = vld [vmem:[#allocation28_spill] sm:$0xff] }
 0x236   : > { %v2206_v33 = vmul.f32 %v2174_v43, %v1502_v54  ;;  %v2207_v45 = vmul.f32 %v2175_v19, %v1503_v55  ;;  %v2254_v9 = vsub.f32 1.5, %v5533_v22  ;;  %v2255_v7 = vsub.f32 1.5, %v5534_v29  ;;  %6123 = vmatpush3.bf16.msra.mxu1 %v6267_v30 }
 0x237   : > { %10511 = vst [vmem:[#allocation92_spill] sm:$0xff] %v7048_v34  ;;  %10512 = vst [vmem:[#allocation93_spill] sm:$0xff] %v7050_v63  ;;  %v2270_v31 = vmul.f32 %v5533_v22, %v1502_v54  ;;  %v2271_v11 = vmul.f32 %v5534_v29, %v1503_v55  ;;  %6295 = vpow2.f32 %v5768_v39  ;;  %vm593_vm3 = vcmp.ge.f32.partialorder %v6993_v28, -2.2 }
 0x238   : > { %v2222_v4 = vadd.f32 %v2206_v33, %v2190_v20  ;;  %v2223_v42 = vadd.f32 %v2207_v45, %v2191_v23  ;;  %v2286_v26 = vmul.f32 %v2254_v9, %v7048_v34  ;;  %v2287_v52 = vmul.f32 %v2255_v7, %v7050_v63 }
 0x239   : > { %v6294_v6 = vpop.eup %6293  ;;  %6297 = vpow2.f32 %v5769_v10  ;;  %v5183_v54 = vsel %vm592_vm2, 1.0, %v10449_v62  ;;  %v5184_v55 = vsel %vm593_vm3, 1.0, %v10449_v62  ;;  %vm640_vm4 = vcmp.ge.f32.partialorder %v6990_v13, -1.8 }
 0x23a   : > { %v7065_v19 = vadd.f32 %v2286_v26, %v2270_v31  ;;  %v7067_v43 = vadd.f32 %v2287_v52, %v2271_v11  ;;  %v2910_v23 = vmul.f32 %v7026_v38, %v2222_v4  ;;  %v2911_v39 = vmul.f32 %v7028_v18, %v2223_v42 }
 0x23b   : > { %v3560_v40 = vadd.f32 1.0, %v6294_v6  ;;  %6299 = vpow2.f32 %v5770_v24  ;;  %vm641_vm5 = vcmp.ge.f32.partialorder %v6993_v28, -1.8  ;;  %v5199_v10 = vsel %vm640_vm4, 1.0, %v10449_v62 }
 0x23c   : > { %10513 = vst [vmem:[#allocation94_spill] sm:$0xff] %v7065_v19  ;;  %10514 = vst [vmem:[#allocation95_spill] sm:$0xff] %v7067_v43  ;;  %v2926_v21 = vmul.f32 %v2894_v14, %v7065_v19  ;;  %v2927_v49 = vmul.f32 %v2895_v17, %v7067_v43  ;;  %v5200_v41 = vsel %vm641_vm5, 1.0, %v10449_v62  ;;  %vm688_vm6 = vcmp.ge.f32.partialorder %v6990_v13, -1.4 }
 0x23d   : > { %6301 = vrcp.f32 %v3560_v40  ;;  %vm689_vm7 = vcmp.ge.f32.partialorder %v6993_v28, -1.4  ;;  %v5215_v15 = vsel %vm688_vm6, 1.0, %v10449_v62  ;;  %vm736_vm8 = vcmp.ge.f32.partialorder %v6990_v13, -1.0 }
 0x23e   : > { %v2942_v24 = vadd.f32 %v2926_v21, %v2910_v23  ;;  %v2943_v36 = vadd.f32 %v2927_v49, %v2911_v39  ;;  %v5216_v50 = vsel %vm689_vm7, 1.0, %v10449_v62  ;;  %vm737_vm9 = vcmp.ge.f32.partialorder %v6993_v28, -1.0 }
 0x23f   : > { %v5231_v44 = vsel %vm736_vm8, 1.0, %v10449_v62  ;;  %v5232_v20 = vsel %vm737_vm9, 1.0, %v10449_v62  ;;  %vm784_vm10 = vcmp.ge.f32.partialorder %v6990_v13, -0.6  ;;  %vm785_vm11 = vcmp.ge.f32.partialorder %v6993_v28, -0.6 }
 0x240   : > { %v3637_v22 = vpack.c.bf16 %v2943_v36, %v2942_v24  ;;  %v7087_v29 = vsel %vm784_vm10, 1.0, %v10449_v62  ;;  %v7090_v14 = vsel %vm785_vm11, 1.0, %v10449_v62  ;;  %v7094_v17 = vadd.f32 %v6983_v35, %v6944_v59 }
 0x241   : > { %10515 = vst [vmem:[#allocation96_spill] sm:$0xff] %v7087_v29  ;;  %10516 = vst [vmem:[#allocation97_spill] sm:$0xff] %v7090_v14  ;;  %v1168_v33 = vsub.f32 %v5183_v54, %v5199_v10  ;;  %v1169_v45 = vsub.f32 %v5184_v55, %v5200_v41  ;;  %v1184_v9 = vsub.f32 %v5199_v10, %v5215_v15  ;;  %v5375_v30 = vadd.f32 2.2, %v6990_v13 }
 0x242   : > { %10517 = vst [vmem:[#allocation98_spill] sm:$0xff] %v7094_v17  ;;  %6073 = vmatmul.mubr.msk.bf16.gmra.mxu0 %vm276_vm0, %v3637_v22  ;;  %v1185_v7 = vsub.f32 %v5200_v41, %v5216_v50  ;;  %v1200_v31 = vsub.f32 %v5215_v15, %v5231_v44  ;;  %v1201_v11 = vsub.f32 %v5216_v50, %v5232_v20  ;;  %v5376_v26 = vadd.f32 2.2, %v6993_v28 }
 0x243   : > { %v7099_v4 = vsub.f32 %v5231_v44, %v7087_v29  ;;  %v7102_v42 = vsub.f32 %v5232_v20, %v7090_v14  ;;  %vm594_vm12 = vcmp.ge.f32.partialorder %v6987_v46, -2.2  ;;  %v7106_v35 = vmul.f32 2.5, %v5375_v30 }
 0x244   : > { %v6296_v59 = vpop.eup %6295  ;;  %v7108_v52 = vmul.f32 1.25, %v5375_v30  ;;  %v7110_v6 = vmul.f32 0.8333333, %v5375_v30  ;;  %v7113_v54 = vsel %vm594_vm12, 1.0, %v10449_v62  ;;  %v7115_v23 = vmul.f32 2.5, %v5376_v26 }
 0x245   : > { %10518 = vst [vmem:[#allocation99_spill] sm:$0xff] %v7099_v4  ;;  %10519 = vst [vmem:[#allocation100_spill] sm:$0xff] %v7102_v42  ;;  %v3561_v55 = vadd.f32 1.0, %v6296_v59  ;;  %v7117_v39 = vmul.f32 1.25, %v5376_v26  ;;  %v7119_v40 = vmul.f32 0.8333333, %v5376_v26  ;;  %v1392_v49 = vmul.f32 %v7106_v35, %v1168_v33 }
 0x246   : > { %10520 = vst [vmem:[#allocation101_spill] sm:$0xff] %v7106_v35  ;;  %10521 = vst [vmem:[#allocation102_spill] sm:$0xff] %v7108_v52  ;;  %v6298_v10 = vpop.eup %6297  ;;  %v1376_v21 = vsub.f32 2.0, %v7106_v35  ;;  %v5391_v41 = vadd.f32 -1.0, %v7106_v35  ;;  %v5407_v15 = vadd.f32 -2.0, %v7106_v35  ;;  %v1377_v36 = vsub.f32 2.0, %v7115_v23 }
 0x247   : > { %10522 = vst [vmem:[#allocation103_spill] sm:$0xff] %v7110_v6  ;;  %10523 = vst [vmem:[#allocation104_spill] sm:$0xff] %v7115_v23  ;;  %6303 = vrcp.f32 %v3561_v55  ;;  %v3562_v24 = vadd.f32 1.0, %v6298_v10  ;;  %v1393_v50 = vmul.f32 %v7115_v23, %v1169_v45  ;;  %vm595_vm13 = vcmp.ge.f32.partialorder %v7094_v17, -2.2 }
 0x248   : > { %10524 = vst [vmem:[#allocation105_spill] sm:$0xff] %v7117_v39  ;;  %10525 = vst [vmem:[#allocation106_spill] sm:$0xff] %v7119_v40  ;;  %v6300_v44 = vpop.eup %6299  ;;  %v1408_v20 = vmul.f32 %v1376_v21, %v1184_v9  ;;  %v5392_v22 = vadd.f32 -1.0, %v7115_v23  ;;  %v1456_v30 = vsub.f32 2.0, %v5391_v41  ;;  %v1472_v26 = vmul.f32 %v5391_v41, %v1184_v9 }
 0x249   : > { %v3563_v59 = vadd.f32 1.0, %v6300_v44  ;;  %6305 = vrcp.f32 %v3562_v24  ;;  %v1409_v33 = vmul.f32 %v1377_v36, %v1185_v7  ;;  %v5408_v14 = vadd.f32 -2.0, %v7115_v23 }
 0x24a   : > { %v6302_v35 = vpop.eup %6301  ;;  %v1424_v55 = vadd.f32 %v1408_v20, %v1392_v49  ;;  %v1457_v10 = vsub.f32 2.0, %v5392_v22  ;;  %v1473_v29 = vmul.f32 %v5392_v22, %v1185_v7  ;;  %v1488_v43 = vmul.f32 %v1456_v30, %v1200_v31 }
 0x24b   : > { %v3608_v45 = vmul.f32 %v6302_v35, %v6517_v61  ;;  %6307 = vrcp.f32 %v3563_v59  ;;  %v1425_v19 = vadd.f32 %v1409_v33, %v1393_v50  ;;  %v1536_v18 = vsub.f32 2.0, %v5407_v15 }
 0x24c   : > { %v1489_v21 = vmul.f32 %v1457_v10, %v1201_v11  ;;  %v1504_v63 = vadd.f32 %v1488_v43, %v1472_v26  ;;  %v1537_v34 = vsub.f32 2.0, %v5408_v14  ;;  %v1552_v38 = vmul.f32 %v5407_v15, %v1200_v31 }
 0x24d   : > { %v1553_v9 = vmul.f32 %v5408_v14, %v1201_v11  ;;  %v1568_v41 = vmul.f32 %v1536_v18, %v7099_v4  ;;  %v2176_v24 = vsub.f32 1.5, %v7108_v52  ;;  %v2177_v36 = vsub.f32 1.5, %v7117_v39 }
 0x24e   : > { %v1505_v49 = vadd.f32 %v1489_v21, %v1473_v29  ;;  %v1569_v7 = vmul.f32 %v1537_v34, %v7102_v42  ;;  %v2192_v44 = vmul.f32 %v7108_v52, %v1424_v55  ;;  %v2193_v35 = vmul.f32 %v7117_v39, %v1425_v19 }
 0x24f   : > { %v7137_v50 = vadd.f32 %v1568_v41, %v1552_v38  ;;  %v2208_v20 = vmul.f32 %v2176_v24, %v1504_v63  ;;  %v5535_v43 = vadd.f32 -0.5, %v7108_v52  ;;  %v5536_v14 = vadd.f32 -0.5, %v7117_v39 }
 0x250   : > { %v7141_v31 = vadd.f32 %v1569_v7, %v1553_v9  ;;  %v2209_v18 = vmul.f32 %v2177_v36, %v1505_v49  ;;  %v2896_v11 = vsub.f32 1.3333334, %v7110_v6  ;;  %v2897_v29 = vsub.f32 1.3333334, %v7119_v40 }
 0x251   : > { %10526 = vst [vmem:[#allocation107_spill] sm:$0xff] %v7137_v50  ;;  %v2224_v15 = vadd.f32 %v2208_v20, %v2192_v44  ;;  %v2256_v34 = vsub.f32 1.5, %v5535_v43  ;;  %v2257_v22 = vsub.f32 1.5, %v5536_v14  ;;  %v2272_v30 = vmul.f32 %v5535_v43, %v1504_v63 }
 0x252   : > { %10527 = vst [vmem:[#allocation108_spill] sm:$0xff] %v7141_v31  ;;  %v2225_v26 = vadd.f32 %v2209_v18, %v2193_v35  ;;  %v2273_v19 = vmul.f32 %v5536_v14, %v1505_v49  ;;  %v7148_v38 = vsel %vm595_vm13, 1.0, %v10449_v62  ;;  %vm642_vm14 = vcmp.ge.f32.partialorder %v6987_v46, -1.8 }
 0x253   : > { %v2288_v59 = vmul.f32 %v2256_v34, %v7137_v50  ;;  %v2289_v33 = vmul.f32 %v2257_v22, %v7141_v31  ;;  %v2912_v55 = vmul.f32 %v7110_v6, %v2224_v15  ;;  %vm643_vm15 = vcmp.ge.f32.partialorder %v7094_v17, -1.8 }
 0x254   : > { %v6304_v10 = vpop.eup %6303  ;;  %v2913_v63 = vmul.f32 %v7119_v40, %v2225_v26  ;;  %v5201_v21 = vsel %vm642_vm14, 1.0, %v10449_v62  ;;  %v5202_v9 = vsel %vm643_vm15, 1.0, %v10449_v62  ;;  %vm690_vm1 = vcmp.ge.f32.partialorder %v6987_v46, -1.4 }
 0x255   : > { %v3609_v41 = vmul.f32 %v6304_v10, %v6561_v56  ;;  %v7160_v24 = vadd.f32 %v2288_v59, %v2272_v30  ;;  %v7162_v36 = vadd.f32 %v2289_v33, %v2273_v19  ;;  %vm691_vm2 = vcmp.ge.f32.partialorder %v7094_v17, -1.4 }
 0x256   : > { %v6306_v49 = vpop.eup %6305  ;;  %v5217_v7 = vsel %vm690_vm1, 1.0, %v10449_v62  ;;  %v5218_v44 = vsel %vm691_vm2, 1.0, %v10449_v62  ;;  %vm738_vm3 = vcmp.ge.f32.partialorder %v6987_v46, -1.0  ;;  %vm739_vm4 = vcmp.ge.f32.partialorder %v7094_v17, -1.0 }
 0x257   : > { %10528 = vst [vmem:[#allocation109_spill] sm:$0xff] %v7160_v24  ;;  %10529 = vst [vmem:[#allocation110_spill] sm:$0xff] %v7162_v36  ;;  %v3622_v35 = vpack.c.bf16 %v3609_v41, %v3608_v45  ;;  %v3610_v20 = vmul.f32 %v6306_v49, %v6508_v57  ;;  %v2928_v43 = vmul.f32 %v2896_v11, %v7160_v24  ;;  %v5233_v15 = vsel %vm738_vm3, 1.0, %v10449_v62 }
 0x258   : > { %v2929_v14 = vmul.f32 %v2897_v29, %v7162_v36  ;;  %v6308_v18 = vpop.eup %6307  ;;  %v5234_v34 = vsel %vm739_vm4, 1.0, %v10449_v62  ;;  %vm786_vm5 = vcmp.ge.f32.partialorder %v6987_v46, -0.6  ;;  %vm787_vm6 = vcmp.ge.f32.partialorder %v7094_v17, -0.6 }
 0x259   : > { %6088 = vmatprep.mubr.msk.bf16.mxu1 %vm276_vm0, %v3622_v35  ;;  %v3611_v22 = vmul.f32 %v6308_v18, %v6520_v1  ;;  %v2944_v45 = vadd.f32 %v2928_v43, %v2912_v55  ;;  %v7179_v26 = vsel %vm786_vm5, 1.0, %v10449_v62  ;;  %v7182_v11 = vsel %vm787_vm6, 1.0, %v10449_v62 }
 0x25a   : > { %v2945_v30 = vadd.f32 %v2929_v14, %v2913_v63  ;;  %10530 = vst [vmem:[#allocation111_spill] sm:$0xff] %v7179_v26  ;;  %10531 = vst [vmem:[#allocation112_spill] sm:$0xff] %v7182_v11  ;;  %v1170_v29 = vsub.f32 %v7113_v54, %v5201_v21  ;;  %v1171_v19 = vsub.f32 %v7148_v38, %v5202_v9  ;;  %v5377_v55 = vadd.f32 2.2, %v6987_v46 }
 0x25b   : > { %v3623_v59 = vpack.c.bf16 %v3611_v22, %v3610_v20  ;;  %v1186_v10 = vsub.f32 %v5201_v21, %v5217_v7  ;;  %v1187_v41 = vsub.f32 %v5202_v9, %v5218_v44  ;;  %v1202_v49 = vsub.f32 %v5217_v7, %v5233_v15 }
 0x25c   : > { %v3638_v33 = vpack.c.bf16 %v2945_v30, %v2944_v45  ;;  %v1203_v35 = vsub.f32 %v5218_v44, %v5234_v34  ;;  %v7187_v18 = vsub.f32 %v5233_v15, %v7179_v26  ;;  %v7193_v63 = vsub.f32 %v5234_v34, %v7182_v11 }
 0x25d   : > { %6089 = vmatmul.mubr.msk.bf16.gmra.mxu1 %vm276_vm0, %v3623_v59  ;;  %v5378_v54 = vadd.f32 2.2, %v7094_v17  ;;  %vm820_vm7 = vcmp.ge.f32.partialorder %v6463_v32, -0.2  ;;  %vm821_vm8 = vcmp.ge.f32.partialorder %v6476_v37, -0.2 }
 0x25e   : > { %10532 = vst [vmem:[#allocation113_spill] sm:$0xff] %v7187_v18  ;;  %6076 = vmatprep.mubr.msk.bf16.mxu0 %vm276_vm0, %v3638_v33  ;;  %10533 = vst [vmem:[#allocation114_spill] sm:$0xff] %v7193_v63  ;;  %v7198_v38 = vmul.f32 2.5, %v5377_v55  ;;  %v7200_v21 = vmul.f32 1.25, %v5377_v55  ;;  %v7202_v9 = vmul.f32 0.8333333, %v5377_v55 }
 0x25f   : > { %v7205_v7 = vsel %vm820_vm7, 1.0, %v10449_v62  ;;  %v7207_v44 = vmul.f32 2.5, %v5378_v54  ;;  %v7209_v20 = vmul.f32 1.25, %v5378_v54  ;;  %v7211_v43 = vmul.f32 0.8333333, %v5378_v54 }
 0x260   : > { %10534 = vst [vmem:[#allocation115_spill] sm:$0xff] %v7198_v38  ;;  %10535 = vst [vmem:[#allocation116_spill] sm:$0xff] %v7200_v21  ;;  %v7214_v14 = vsel %vm821_vm8, 1.0, %v10449_v62  ;;  %v1378_v15 = vsub.f32 2.0, %v7198_v38  ;;  %v1394_v34 = vmul.f32 %v7198_v38, %v1170_v29  ;;  %v5393_v22 = vadd.f32 -1.0, %v7198_v38 }
 0x261   : > { %10536 = vst [vmem:[#allocation117_spill] sm:$0xff] %v7202_v9  ;;  %10537 = vst [vmem:[#allocation118_spill] sm:$0xff] %v7207_v44  ;;  %v5409_v45 = vadd.f32 -2.0, %v7198_v38  ;;  %v1379_v30 = vsub.f32 2.0, %v7207_v44  ;;  %v1395_v59 = vmul.f32 %v7207_v44, %v1171_v19  ;;  %v5394_v33 = vadd.f32 -1.0, %v7207_v44 }
 0x262   : > { %10538 = vst [vmem:[#allocation119_spill] sm:$0xff] %v7209_v20  ;;  %10539 = vst [vmem:[#allocation120_spill] sm:$0xff] %v7211_v43  ;;  %v5410_v55 = vadd.f32 -2.0, %v7207_v44  ;;  %v1410_v54 = vmul.f32 %v1378_v15, %v1186_v10  ;;  %v1458_v11 = vsub.f32 2.0, %v5393_v22  ;;  %v1474_v26 = vmul.f32 %v5393_v22, %v1186_v10 }
 0x263   : > { %v1538_v36 = vsub.f32 2.0, %v5409_v45  ;;  %v1411_v24 = vmul.f32 %v1379_v30, %v1187_v41  ;;  %v1459_v40 = vsub.f32 2.0, %v5394_v33  ;;  %v1475_v6 = vmul.f32 %v5394_v33, %v1187_v41 }
 0x264   : > { %v1539_v29 = vsub.f32 2.0, %v5410_v55  ;;  %v1426_v31 = vadd.f32 %v1410_v54, %v1394_v34  ;;  %v1490_v50 = vmul.f32 %v1458_v11, %v1202_v49  ;;  %v1554_v42 = vmul.f32 %v5409_v45, %v1202_v49 }
 0x265   : > { %v1555_v38 = vmul.f32 %v5410_v55, %v1203_v35  ;;  %v1427_v4 = vadd.f32 %v1411_v24, %v1395_v59  ;;  %v1491_v39 = vmul.f32 %v1459_v40, %v1203_v35  ;;  %v1570_v19 = vmul.f32 %v1538_v36, %v7187_v18  ;;  %v10562_v18 = vld [vmem:[#allocation27_spill] sm:$0xff] }
 0x266   : > { %v1571_v52 = vmul.f32 %v1539_v29, %v7193_v63  ;;  %v1506_v23 = vadd.f32 %v1490_v50, %v1474_v26  ;;  %v2178_v15 = vsub.f32 1.5, %v7200_v21  ;;  %v2179_v10 = vsub.f32 1.5, %v7209_v20 }
 0x267   : > { %v2194_v22 = vmul.f32 %v7200_v21, %v1426_v31  ;;  %v1507_v30 = vadd.f32 %v1491_v39, %v1475_v6  ;;  %v7229_v41 = vadd.f32 %v1570_v19, %v1554_v42  ;;  %v2195_v11 = vmul.f32 %v7209_v20, %v1427_v4 }
 0x268   : > { %v7231_v34 = vadd.f32 %v1571_v52, %v1555_v38  ;;  %v2210_v24 = vmul.f32 %v2178_v15, %v1506_v23  ;;  %v5537_v40 = vadd.f32 -0.5, %v7200_v21  ;;  %v5538_v36 = vadd.f32 -0.5, %v7209_v20  ;;  %v10561_v20 = vld [vmem:[#allocation22_spill] sm:$0xff] }
 0x269   : > { %10540 = vst [vmem:[#allocation121_spill] sm:$0xff] %v7229_v41  ;;  %v2898_v50 = vsub.f32 1.3333334, %v7202_v9  ;;  %v2211_v26 = vmul.f32 %v2179_v10, %v1507_v30  ;;  %v2899_v49 = vsub.f32 1.3333334, %v7211_v43  ;;  %v7240_v31 = vsub.f32 %v6505_v53, %v7205_v7 }
 0x26a   : > { %10541 = vst [vmem:[#allocation122_spill] sm:$0xff] %v7231_v34  ;;  %v7244_v42 = vsub.f32 %v6511_v58, %v7214_v14  ;;  %v2226_v52 = vadd.f32 %v2210_v24, %v2194_v22  ;;  %v2258_v4 = vsub.f32 1.5, %v5537_v40  ;;  %v2259_v6 = vsub.f32 1.5, %v5538_v36 }
 0x26b   : > { %v2274_v39 = vmul.f32 %v5537_v40, %v1506_v23  ;;  %v2227_v35 = vadd.f32 %v2211_v26, %v2195_v11  ;;  %v2275_v38 = vmul.f32 %v5538_v36, %v1507_v30  ;;  %v5411_v45 = vadd.f32 -3.0, %v6514_v60 }
 0x26c   : > { %v5412_v59 = vadd.f32 -3.0, %v6525_v3  ;;  %v2290_v33 = vmul.f32 %v2258_v4, %v7229_v41  ;;  %v2291_v55 = vmul.f32 %v2259_v6, %v7231_v34  ;;  %v2914_v53 = vmul.f32 %v7202_v9, %v2226_v52  ;;  %v10560_v34 = vld [vmem:[#allocation26_spill] sm:$0xff] }
 0x26d   : > { %v5539_v54 = vadd.f32 -1.0, %v6533_v8  ;;  %v2915_v58 = vmul.f32 %v7211_v43, %v2227_v35  ;;  %v1604_v29 = vsub.f32 2.0, %v5411_v45  ;;  %v1620_v23 = vmul.f32 %v5411_v45, %v6523_v2  ;;  %v10544_v35 = vld [vmem:[#allocation14_spill] sm:$0xff] }
 0x26e   : > { %v1605_v19 = vsub.f32 2.0, %v5412_v59  ;;  %v7254_v15 = vadd.f32 %v2290_v33, %v2274_v39  ;;  %v7256_v10 = vadd.f32 %v2291_v55, %v2275_v38  ;;  %v1621_v22 = vmul.f32 %v5412_v59, %v6529_v5  ;;  %v10545_v33 = vld [vmem:[#allocation33_spill] sm:$0xff] }
 0x26f   : > { %v5540_v30 = vadd.f32 -1.0, %v6541_v16  ;;  %v1636_v11 = vmul.f32 %v1604_v29, %v7240_v31  ;;  %v2324_v40 = vsub.f32 1.5, %v5539_v54  ;;  %v2340_v36 = vmul.f32 %v5539_v54, %v6551_v47  ;;  %v10546_v47 = vld [vmem:[#allocation49_spill] sm:$0xff] }
 0x270   : > { %10542 = vst [vmem:[#allocation123_spill] sm:$0xff] %v7254_v15  ;;  %10543 = vst [vmem:[#allocation124_spill] sm:$0xff] %v7256_v10  ;;  %v1637_v24 = vmul.f32 %v1605_v19, %v7244_v42  ;;  %v2930_v26 = vmul.f32 %v2898_v50, %v7254_v15  ;;  %v2931_v52 = vmul.f32 %v2899_v49, %v7256_v10  ;;  %v5651_v5 = vadd.f32 -0.33333334, %v6537_v12  ;;  %v10552_v10 = vld [vmem:[#allocation5_spill] sm:$0xff] }
 0x271   : > { %v2325_v2 = vsub.f32 1.5, %v5540_v30  ;;  %v2341_v4 = vmul.f32 %v5540_v30, %v6554_v51  ;;  %v7266_v6 = vadd.f32 %v1636_v11, %v1620_v23  ;;  %v5652_v38 = vadd.f32 -0.33333334, %v10544_v35  ;;  %v10547_v23 = vld [vmem:[#allocation17_spill] sm:$0xff]  ;;  %v10548_v30 = vld [vmem:[#allocation18_spill] sm:$0xff] }
 0x272   : > { %v7268_v39 = vadd.f32 %v1637_v24, %v1621_v22  ;;  %v2946_v45 = vadd.f32 %v2930_v26, %v2914_v53  ;;  %v2947_v59 = vadd.f32 %v2931_v52, %v2915_v58  ;;  %v5771_v55 = vmul.f32 -1.442695, %v10545_v33  ;;  %v10549_v58 = vld [vmem:[#allocation16_spill] sm:$0xff]  ;;  %v10559_v15 = vld [vmem:[#allocation25_spill] sm:$0xff] }
 0x273   : > { %v5772_v54 = vmul.f32 -1.442695, %v10546_v47  ;;  %v2356_v50 = vmul.f32 %v2324_v40, %v7266_v6  ;;  %v2964_v29 = vsub.f32 1.3333334, %v5651_v5  ;;  %v2965_v51 = vsub.f32 1.3333334, %v5652_v38 }
 0x274   : > { %v2357_v49 = vmul.f32 %v2325_v2, %v7268_v39  ;;  %v3639_v19 = vpack.c.bf16 %v2947_v59, %v2946_v45  ;;  %v2980_v22 = vmul.f32 %v5651_v5, %v10547_v23  ;;  %v2981_v11 = vmul.f32 %v5652_v38, %v10548_v30  ;;  %v10550_v40 = vld [vmem:[#allocation63_spill] sm:$0xff]  ;;  %v10551_v2 = vld [vmem:[#allocation2_spill] sm:$0xff] }
 0x275   : > { %6309 = vpow2.f32 %v5771_v55  ;;  %v7278_v24 = vadd.f32 %v2356_v50, %v2340_v36  ;;  %v5773_v26 = vmul.f32 -1.442695, %v10549_v58  ;;  %v5774_v52 = vmul.f32 -1.442695, %v10550_v40  ;;  %v10553_v45 = vld [vmem:[#allocation19_spill] sm:$0xff] }
 0x276   : > { %v7280_v53 = vadd.f32 %v2357_v49, %v2341_v4  ;;  %6311 = vpow2.f32 %v5772_v54  ;;  %6077 = vmatmul.mubr.msk.bf16.gmra.mxu0 %vm276_vm0, %v3639_v19  ;;  %vm822_vm9 = vcmp.ge.f32.partialorder %v10551_v2, -0.2  ;;  %vm823_vm10 = vcmp.ge.f32.partialorder %v10552_v10, -0.2  ;;  %v10554_v55 = vld [vmem:[#allocation23_spill] sm:$0xff] }
 0x277   : > { %v2996_v5 = vmul.f32 %v2964_v29, %v7278_v24  ;;  %6313 = vpow2.f32 %v5773_v26  ;;  %v7290_v36 = vsel %vm822_vm9, 1.0, %v10449_v62  ;;  %v7293_v4 = vsel %vm823_vm10, 1.0, %v10449_v62  ;;  %v10555_v29 = vld [vmem:[#allocation20_spill] sm:$0xff]  ;;  %v10558_v26 = vld [vmem:[#allocation21_spill] sm:$0xff] }
 0x278   : > { %v2997_v38 = vmul.f32 %v2965_v51, %v7280_v53  ;;  %6315 = vpow2.f32 %v5774_v52  ;;  %v7297_v59 = vsub.f32 %v10553_v45, %v7290_v36  ;;  %v5413_v54 = vadd.f32 -3.0, %v10554_v55  ;;  %v10557_v51 = vld [vmem:[#allocation24_spill] sm:$0xff] }
 0x279   : > { %v3012_v50 = vadd.f32 %v2996_v5, %v2980_v22  ;;  %v7302_v19 = vsub.f32 %v10555_v29, %v7293_v4  ;;  %v5414_v23 = vadd.f32 -3.0, %v10557_v51  ;;  %v5541_v43 = vadd.f32 -1.0, %v10559_v15  ;;  %v10563_v29 = vld [vmem:[#allocation29_spill] sm:$0xff] }
 0x27a   : > { %v3013_v49 = vadd.f32 %v2997_v38, %v2981_v11  ;;  %v1606_v30 = vsub.f32 2.0, %v5413_v54  ;;  %v1622_v52 = vmul.f32 %v5413_v54, %v10558_v26  ;;  %v5542_v9 = vadd.f32 -1.0, %v10560_v34  ;;  %v10564_v26 = vld [vmem:[#allocation30_spill] sm:$0xff] }
 0x27b   : > { %10556 = vst [vmem:[#allocation17_spill] sm:$0xff] %v7302_v19  ;;  %v1607_v45 = vsub.f32 2.0, %v5414_v23  ;;  %v1623_v63 = vmul.f32 %v5414_v23, %v10561_v20  ;;  %v5653_v22 = vadd.f32 -0.33333334, %v10562_v18  ;;  %v2326_v5 = vsub.f32 1.5, %v5541_v43  ;;  %v10567_v20 = vld [vmem:[#allocation31_spill] sm:$0xff] }
 0x27c   : > { %v3911_v41 = vpack.c.bf16 %v3013_v49, %v3012_v50  ;;  %v1638_v11 = vmul.f32 %v1606_v30, %v7297_v59  ;;  %v2327_v38 = vsub.f32 1.5, %v5542_v9  ;;  %v2342_v21 = vmul.f32 %v5541_v43, %v10563_v29  ;;  %v10569_v29 = vld [vmem:[#allocation32_spill] sm:$0xff] }
 0x27d   : > { %v1639_v54 = vmul.f32 %v1607_v45, %v7302_v19  ;;  %v2343_v44 = vmul.f32 %v5542_v9, %v10564_v26  ;;  %v5654_v48 = vadd.f32 -0.33333334, %v10565_v27  ;;  %v2966_v50 = vsub.f32 1.3333334, %v5653_v22 }
 0x27e   : > { %6104 = vmatprep.mubr.msk.bf16.mxu0 %vm276_vm0, %v3911_v41  ;;  %v7316_v49 = vadd.f32 %v1638_v11, %v1622_v52  ;;  %v2982_v23 = vmul.f32 %v5653_v22, %v10567_v20  ;;  %vm824_vm11 = vcmp.ge.f32.partialorder %v6517_v61, -0.2  ;;  %vm825_vm12 = vcmp.ge.f32.partialorder %v6561_v56, -0.2  ;;  %v10572_v52 = vld [vmem:[#allocation34_spill] sm:$0xff]  ;;  %v10577_v56 = vld [vmem:[#allocation40_spill] sm:$0xff] }
 0x27f   : > { %v7321_v30 = vadd.f32 %v1639_v54, %v1623_v63  ;;  %v2967_v43 = vsub.f32 1.3333334, %v5654_v48  ;;  %v2983_v41 = vmul.f32 %v5654_v48, %v10569_v29  ;;  %v7325_v45 = vsel %vm824_vm11, 1.0, %v10449_v62  ;;  %v10574_v11 = vld [vmem:[#allocation38_spill] sm:$0xff]  ;;  %v10575_v54 = vld [vmem:[#allocation35_spill] sm:$0xff]  ;;  %v7346_v61 = vld [vmem:[%s9894_s3 + $0x58] sm:$0xff]  }
 0x280   : > { %10566 = vst [vmem:[#allocation18_spill] sm:$0xff] %v7316_v49  ;;  %10570 = vst [vmem:[#allocation20_spill] sm:$0xff] %v7325_v45  ;;  %v2358_v9 = vmul.f32 %v2326_v5, %v7316_v49  ;;  %v7329_v26 = vsel %vm825_vm12, 1.0, %v10449_v62  ;;  %v7333_v22 = vsub.f32 %v10572_v52, %v7325_v45  ;;  %v5415_v20 = vadd.f32 -3.0, %v10574_v11  ;;  %v10576_v29 = vld [vmem:[#allocation39_spill] sm:$0xff]  ;;  %v10579_v49 = vld [vmem:[#allocation36_spill] sm:$0xff]  ;;  %6160 = vmatprep.subr.bf16.mxu1 %v7346_v61 }
 0x281   : > { %10568 = vst [vmem:[#allocation19_spill] sm:$0xff] %v7321_v30  ;;  %10571 = vst [vmem:[#allocation21_spill] sm:$0xff] %v7329_v26  ;;  %v2359_v63 = vmul.f32 %v2327_v38, %v7321_v30  ;;  %v7339_v48 = vsub.f32 %v10575_v54, %v7329_v26  ;;  %v5416_v25 = vadd.f32 -3.0, %v10576_v29  ;;  %v5543_v5 = vadd.f32 -1.0, %v10577_v56  ;;  %v10580_v26 = vld [vmem:[#allocation37_spill] sm:$0xff] }
 0x282   : > { %10573 = vst [vmem:[#allocation22_spill] sm:$0xff] %v7333_v22  ;;  %v6310_v0 = vpop.eup %6309  ;;  %10578 = vst [vmem:[#allocation29_spill] sm:$0xff] %v7346_v61  ;;  %v7348_v27 = vadd.f32 %v2358_v9, %v2342_v21  ;;  %v1608_v11 = vsub.f32 2.0, %v5415_v20  ;;  %v1624_v38 = vmul.f32 %v5415_v20, %v10579_v49  ;;  %vm868_vm13 = vcmp.ge.f32.partialorder %v6463_v32, 0.2 }
 0x283   : > { %v6312_v52 = vpop.eup %6311  ;;  %v3564_v45 = vadd.f32 1.0, %v6310_v0  ;;  %v7351_v18 = vadd.f32 %v2359_v63, %v2343_v44  ;;  %v1609_v54 = vsub.f32 2.0, %v5416_v25  ;;  %v1625_v29 = vmul.f32 %v5416_v25, %v10580_v26  ;;  %v10581_v0 = vld [vmem:[#allocation41_spill] sm:$0xff] }
 0x284   : > { %v3565_v30 = vadd.f32 1.0, %v6312_v52  ;;  %v6314_v56 = vpop.eup %6313  ;;  %v2998_v34 = vmul.f32 %v2966_v50, %v7348_v27  ;;  %v1640_v15 = vmul.f32 %v1608_v11, %v7333_v22  ;;  %v5544_v21 = vadd.f32 -1.0, %v10581_v0  ;;  %v10582_v11 = vld [vmem:[#allocation44_spill] sm:$0xff]  ;;  %v10583_v22 = vld [vmem:[#allocation45_spill] sm:$0xff] }
 0x285   : > { %6317 = vrcp.f32 %v3564_v45  ;;  %v6316_v9 = vpop.eup %6315  ;;  %v3566_v19 = vadd.f32 1.0, %v6314_v56  ;;  %v2999_v49 = vmul.f32 %v2967_v43, %v7351_v18  ;;  %v1641_v44 = vmul.f32 %v1609_v54, %v7339_v48 }
 0x286   : > { %6319 = vrcp.f32 %v3565_v30  ;;  %v3567_v20 = vadd.f32 1.0, %v6316_v9  ;;  %v3014_v63 = vadd.f32 %v2998_v34, %v2982_v23  ;;  %v7360_v25 = vadd.f32 %v1640_v15, %v1624_v38  ;;  %v10584_v9 = vld [vmem:[#allocation42_spill] sm:$0xff]  ;;  %v10585_v15 = vld [vmem:[#allocation43_spill] sm:$0xff] }
 0x287   : > { %v2328_v26 = vsub.f32 1.5, %v5543_v5  ;;  %6321 = vrcp.f32 %v3566_v19  ;;  %v3015_v45 = vadd.f32 %v2999_v49, %v2983_v41  ;;  %v7362_v52 = vadd.f32 %v1641_v44, %v1625_v29  ;;  %v6268_v19 = vld [vmem:[%s9894_s3 + $0x40] sm:$0xff]  }
 0x288   : > { %v2329_v50 = vsub.f32 1.5, %v5544_v21  ;;  %6323 = vrcp.f32 %v3567_v20  ;;  %v2344_v61 = vmul.f32 %v5543_v5, %v10582_v11  ;;  %v2345_v30 = vmul.f32 %v5544_v21, %v10583_v22  ;;  %v10586_v44 = vld [vmem:[#allocation46_spill] sm:$0xff] }
 0x289   : > { %v2360_v56 = vmul.f32 %v2328_v26, %v7360_v25  ;;  %v3912_v43 = vpack.c.bf16 %v3015_v45, %v3014_v63  ;;  %v5655_v34 = vadd.f32 -0.33333334, %v10584_v9  ;;  %v5656_v23 = vadd.f32 -0.33333334, %v10585_v15  ;;  %v10587_v63 = vld [vmem:[#allocation74_spill] sm:$0xff]  ;;  %v10588_v26 = vld [vmem:[#allocation47_spill] sm:$0xff] }
 0x28a   : > { %v2361_v54 = vmul.f32 %v2329_v50, %v7362_v52  ;;  %v5775_v29 = vmul.f32 -1.442695, %v6990_v13  ;;  %v5776_v5 = vmul.f32 -1.442695, %v6993_v28  ;;  %v5777_v22 = vmul.f32 -1.442695, %v6987_v46 }
 0x28b   : > { %v7373_v41 = vadd.f32 %v2360_v56, %v2344_v61  ;;  %6105 = vmatmul.mubr.msk.bf16.vlgmr.msra.gmra.mxu0 %vm276_vm0, %v3912_v43  ;;  %v2968_v21 = vsub.f32 1.3333334, %v5655_v34  ;;  %v2969_v49 = vsub.f32 1.3333334, %v5656_v23  ;;  %v2984_v20 = vmul.f32 %v5655_v34, %v10586_v44 }
 0x28c   : > { %v7379_v38 = vadd.f32 %v2361_v54, %v2345_v30  ;;  %6141 = vmatpush3.bf16.msra.mxu0 %v10587_v63  ;;  %v2985_v45 = vmul.f32 %v5656_v23, %v10588_v26  ;;  %6325 = vpow2.f32 %v5775_v29  ;;  %v5778_v61 = vmul.f32 -1.442695, %v7094_v17 }
 0x28d   : > { %v3000_v50 = vmul.f32 %v2968_v21, %v7373_v41  ;;  %6327 = vpow2.f32 %v5776_v5  ;;  %vm869_vm14 = vcmp.ge.f32.partialorder %v6476_v37, 0.2  ;;  %6142 = vmatprep.subr.bf16.mxu0 %v6268_v19  ;;  %v7390_v30 = vsel %vm868_vm13, 1.0, %v10449_v62  ;;  %v10623_v37 = vld [vmem:[#allocation70_spill] sm:$0xff] }
 0x28e   : > { %v3001_v11 = vmul.f32 %v2969_v49, %v7379_v38  ;;  %6329 = vpow2.f32 %v5777_v22  ;;  %10589 = vst [vmem:[#allocation30_spill] sm:$0xff] %v7390_v30  ;;  %v7393_v56 = vsel %vm869_vm14, 1.0, %v10449_v62  ;;  %v5427_v43 = vadd.f32 -4.0, %v6514_v60 }
 0x28f   : > { %10590 = vst [vmem:[#allocation31_spill] sm:$0xff] %v7393_v56  ;;  %v3016_v54 = vadd.f32 %v3000_v50, %v2984_v20  ;;  %6331 = vpow2.f32 %v5778_v61  ;;  %v7398_v23 = vsub.f32 %v7205_v7, %v7390_v30  ;;  %v7402_v29 = vsub.f32 %v7214_v14, %v7393_v56 }
 0x290   : > { %v3017_v34 = vadd.f32 %v3001_v11, %v2985_v45  ;;  %v5428_v5 = vadd.f32 -4.0, %v6525_v3  ;;  %v1684_v22 = vsub.f32 2.0, %v5427_v43  ;;  %v1700_v21 = vmul.f32 %v5427_v43, %v7240_v31  ;;  %6143 = vmatpush3.bf16.msra.mxu0 %v6268_v19  ;;  %v10621_v3 = vld [vmem:[#allocation68_spill] sm:$0xff] }
 0x291   : > { %10591 = vst [vmem:[#allocation32_spill] sm:$0xff] %v7398_v23  ;;  %10592 = vst [vmem:[#allocation34_spill] sm:$0xff] %v7402_v29  ;;  %v5555_v20 = vadd.f32 -1.5, %v6533_v8  ;;  %v5556_v63 = vadd.f32 -1.5, %v6541_v16  ;;  %v5667_v26 = vadd.f32 -0.6666667, %v6537_v12 }
 0x292   : > { %v6318_v49 = vpop.eup %6317  ;;  %v3913_v44 = vpack.c.bf16 %v3017_v34, %v3016_v54  ;;  %v1685_v61 = vsub.f32 2.0, %v5428_v5  ;;  %v1701_v14 = vmul.f32 %v5428_v5, %v7244_v42  ;;  %v1716_v50 = vmul.f32 %v1684_v22, %v7398_v23 }
 0x293   : > { %v6320_v7 = vpop.eup %6319  ;;  %v3612_v45 = vmul.f32 %v6318_v49, %v10545_v33  ;;  %v2404_v31 = vsub.f32 1.5, %v5555_v20  ;;  %v2405_v19 = vsub.f32 1.5, %v5556_v63  ;;  %v2420_v43 = vmul.f32 %v5555_v20, %v7266_v6  ;;  %v6270_v6 = vld [vmem:[%s9894_s3 + $0x68] sm:$0xff]  }
 0x294   : > { %v3613_v11 = vmul.f32 %v6320_v7, %v10546_v47  ;;  %6108 = vmatprep.mubr.msk.bf16.mxu0 %vm276_vm0, %v3913_v44  ;;  %v6322_v54 = vpop.eup %6321  ;;  %v1717_v34 = vmul.f32 %v1685_v61, %v7402_v29  ;;  %v7416_v12 = vadd.f32 %v1716_v50, %v1700_v21  ;;  %v2421_v49 = vmul.f32 %v5556_v63, %v7268_v39  ;;  %v10604_v29 = vld [vmem:[#allocation52_spill] sm:$0xff] }
 0x295   : > { %v5668_v16 = vadd.f32 -0.6666667, %v10544_v35  ;;  %v6324_v42 = vpop.eup %6323  ;;  %v3614_v22 = vmul.f32 %v6322_v54, %v10549_v58  ;;  %v3044_v7 = vsub.f32 1.3333334, %v5667_v26  ;;  %v3060_v44 = vmul.f32 %v5667_v26, %v7278_v24  ;;  %v10595_v24 = vld [vmem:[#allocation53_spill] sm:$0xff]  ;;  %6180 = vmatprep.subr.bf16.mxu0 %v6270_v6 }
 0x296   : > { %10593 = vst [vmem:[#allocation35_spill] sm:$0xff] %v7416_v12  ;;  %v3624_v5 = vpack.c.bf16 %v3613_v11, %v3612_v45  ;;  %v3615_v20 = vmul.f32 %v6324_v42, %v10550_v40  ;;  %v7426_v61 = vadd.f32 %v1717_v34, %v1701_v14  ;;  %v2436_v21 = vmul.f32 %v2404_v31, %v7416_v12  ;;  %v10599_v34 = vld [vmem:[#allocation56_spill] sm:$0xff] }
 0x297   : > { %v3045_v39 = vsub.f32 1.3333334, %v5668_v16  ;;  %v3061_v63 = vmul.f32 %v5668_v16, %v7280_v53  ;;  %vm826_vm15 = vcmp.ge.f32.partialorder %v6508_v57, -0.2  ;;  %vm827_vm1 = vcmp.ge.f32.partialorder %v6520_v1, -0.2 }
 0x298   : > { %10594 = vst [vmem:[#allocation36_spill] sm:$0xff] %v7426_v61  ;;  %6092 = vmatprep.mubr.msk.bf16.mxu1 %vm276_vm0, %v3624_v5  ;;  %v5417_v26 = vadd.f32 -3.0, %v10595_v24  ;;  %v3625_v45 = vpack.c.bf16 %v3615_v20, %v3614_v22  ;;  %v2437_v50 = vmul.f32 %v2405_v19, %v7426_v61  ;;  %v7435_v11 = vadd.f32 %v2436_v21, %v2420_v43  ;;  %v10597_v16 = vld [vmem:[#allocation48_spill] sm:$0xff]  ;;  %v10601_v20 = vld [vmem:[#allocation50_spill] sm:$0xff] }
 0x299   : > { %v7438_v14 = vsel %vm826_vm15, 1.0, %v10449_v62  ;;  %v6326_v31 = vpop.eup %6325  ;;  %v7441_v54 = vsel %vm827_vm1, 1.0, %v10449_v62  ;;  %v5418_v42 = vadd.f32 -3.0, %v10599_v34  ;;  %vm828_vm2 = vcmp.ge.f32.partialorder %v10545_v33, -0.2 }
 0x29a   : > { %10596 = vst [vmem:[#allocation37_spill] sm:$0xff] %v7435_v11  ;;  %v7445_v53 = vsub.f32 %v10597_v16, %v7438_v14  ;;  %v1610_v5 = vsub.f32 2.0, %v5417_v26  ;;  %v6328_v6 = vpop.eup %6327  ;;  %6093 = vmatmul.mubr.msk.bf16.gmra.mxu1 %vm276_vm0, %v3625_v45  ;;  %v3568_v19 = vadd.f32 1.0, %v6326_v31  ;;  %v7449_v43 = vadd.f32 %v2437_v50, %v2421_v49  ;;  %v10603_v16 = vld [vmem:[#allocation51_spill] sm:$0xff] }
 0x29b   : > { %v3076_v22 = vmul.f32 %v3044_v7, %v7435_v11  ;;  %v7454_v21 = vsub.f32 %v10601_v20, %v7441_v54  ;;  %v6330_v61 = vpop.eup %6329  ;;  %v3569_v12 = vadd.f32 1.0, %v6328_v6  ;;  %v1611_v35 = vsub.f32 2.0, %v5418_v42  ;;  %v10605_v20 = vld [vmem:[#allocation54_spill] sm:$0xff]  ;;  %v10613_v11 = vld [vmem:[#allocation61_spill] sm:$0xff] }
 0x29c   : > { %10598 = vst [vmem:[#allocation44_spill] sm:$0xff] %v7445_v53  ;;  %10600 = vst [vmem:[#allocation45_spill] sm:$0xff] %v7449_v43  ;;  %v1626_v8 = vmul.f32 %v5417_v26, %v10603_v16  ;;  %v1627_v23 = vmul.f32 %v5418_v42, %v10604_v29  ;;  %v6332_v56 = vpop.eup %6331  ;;  %6333 = vrcp.f32 %v3568_v19  ;;  %v3570_v30 = vadd.f32 1.0, %v6330_v61  ;;  %v10606_v16 = vld [vmem:[#allocation57_spill] sm:$0xff] }
 0x29d   : > { %10602 = vst [vmem:[#allocation46_spill] sm:$0xff] %v7454_v21  ;;  %v3077_v45 = vmul.f32 %v3045_v39, %v7449_v43  ;;  %v7459_v49 = vadd.f32 %v3076_v22, %v3060_v44  ;;  %6335 = vrcp.f32 %v3569_v12  ;;  %v3571_v7 = vadd.f32 1.0, %v6332_v56  ;;  %v10609_v44 = vld [vmem:[#allocation55_spill] sm:$0xff]  ;;  %v10612_v22 = vld [vmem:[#allocation58_spill] sm:$0xff] }
 0x29e   : > { %v1642_v50 = vmul.f32 %v1610_v5, %v7445_v53  ;;  %v1643_v31 = vmul.f32 %v1611_v35, %v7454_v21  ;;  %6337 = vrcp.f32 %v3570_v30  ;;  %v5545_v26 = vadd.f32 -1.0, %v10605_v20  ;;  %v10610_v35 = vld [vmem:[#allocation59_spill] sm:$0xff] }
 0x29f   : > { %v7463_v6 = vadd.f32 %v3077_v45, %v3061_v63  ;;  %v5546_v29 = vadd.f32 -1.0, %v10606_v16  ;;  %6339 = vrcp.f32 %v3571_v7  ;;  %v5657_v39 = vadd.f32 -0.33333334, %v10609_v44  ;;  %v10611_v63 = vld [vmem:[#allocation60_spill] sm:$0xff] }
 0x2a0   : > { %v7467_v42 = vadd.f32 %v1642_v50, %v1626_v8  ;;  %v7469_v61 = vadd.f32 %v1643_v31, %v1627_v23  ;;  %v2330_v56 = vsub.f32 1.5, %v5545_v26  ;;  %v2346_v30 = vmul.f32 %v5545_v26, %v10610_v35  ;;  %v10614_v31 = vld [vmem:[#allocation62_spill] sm:$0xff] }
 0x2a1   : > { %v2331_v5 = vsub.f32 1.5, %v5546_v29  ;;  %v2347_v19 = vmul.f32 %v5546_v29, %v10611_v63  ;;  %v5658_v45 = vadd.f32 -0.33333334, %v10612_v22  ;;  %v2970_v43 = vsub.f32 1.3333334, %v5657_v39 }
 0x2a2   : > { %10607 = vst [vmem:[#allocation74_spill] sm:$0xff] %v7467_v42  ;;  %10608 = vst [vmem:[#allocation47_spill] sm:$0xff] %v7469_v61  ;;  %v2986_v7 = vmul.f32 %v5657_v39, %v10613_v11  ;;  %v2362_v8 = vmul.f32 %v2330_v56, %v7467_v42  ;;  %vm829_vm3 = vcmp.ge.f32.partialorder %v10546_v47, -0.2  ;;  %v7484_v26 = vsel %vm828_vm2, 1.0, %v10449_v62  ;;  %v10619_v39 = vld [vmem:[#allocation64_spill] sm:$0xff] }
 0x2a3   : > { %v2363_v23 = vmul.f32 %v2331_v5, %v7469_v61  ;;  %v2971_v50 = vsub.f32 1.3333334, %v5658_v45  ;;  %v2987_v12 = vmul.f32 %v5658_v45, %v10614_v31  ;;  %10615 = vst [vmem:[#allocation48_spill] sm:$0xff] %v7484_v26  ;;  %v7487_v29 = vsel %vm829_vm3, 1.0, %v10449_v62  ;;  %v10620_v5 = vld [vmem:[#allocation65_spill] sm:$0xff]  ;;  %v10624_v47 = vld [vmem:[#allocation71_spill] sm:$0xff] }
 0x2a4   : > { %10616 = vst [vmem:[#allocation50_spill] sm:$0xff] %v7487_v29  ;;  %v7489_v35 = vadd.f32 %v2362_v8, %v2346_v30  ;;  %v7495_v56 = vsub.f32 %v10619_v39, %v7484_v26  ;;  %v7499_v63 = vsub.f32 %v10620_v5, %v7487_v29  ;;  %v5419_v45 = vadd.f32 -3.0, %v10621_v3  ;;  %v10622_v31 = vld [vmem:[#allocation69_spill] sm:$0xff]  ;;  %v10625_v8 = vld [vmem:[#allocation72_spill] sm:$0xff]  ;;  %v10627_v5 = vld [vmem:[#allocation66_spill] sm:$0xff] }
 0x2a5   : > { %v7491_v11 = vadd.f32 %v2363_v23, %v2347_v19  ;;  %v5420_v60 = vadd.f32 -3.0, %v10622_v31  ;;  %v5547_v32 = vadd.f32 -1.0, %v10623_v37  ;;  %v5548_v33 = vadd.f32 -1.0, %v10624_v47  ;;  %v10626_v39 = vld [vmem:[#allocation73_spill] sm:$0xff]  ;;  %v10628_v42 = vld [vmem:[#allocation67_spill] sm:$0xff] }
 0x2a6   : > { %10617 = vst [vmem:[#allocation51_spill] sm:$0xff] %v7489_v35  ;;  %v3002_v30 = vmul.f32 %v2970_v43, %v7489_v35  ;;  %v5659_v23 = vadd.f32 -0.33333334, %v10625_v8  ;;  %v5660_v26 = vadd.f32 -0.33333334, %v10626_v39  ;;  %v1612_v22 = vsub.f32 2.0, %v5419_v45 }
 0x2a7   : > { %10618 = vst [vmem:[#allocation52_spill] sm:$0xff] %v7491_v11  ;;  %v3003_v19 = vmul.f32 %v2971_v50, %v7491_v11  ;;  %v1613_v61 = vsub.f32 2.0, %v5420_v60  ;;  %v1628_v29 = vmul.f32 %v5419_v45, %v10627_v5  ;;  %v1629_v3 = vmul.f32 %v5420_v60, %v10628_v42  ;;  %v10629_v50 = vld [vmem:[#allocation75_spill] sm:$0xff]  ;;  %v10630_v8 = vld [vmem:[#allocation76_spill] sm:$0xff] }
 0x2a8   : > { %v3018_v21 = vadd.f32 %v3002_v30, %v2986_v7  ;;  %v2332_v53 = vsub.f32 1.5, %v5547_v32  ;;  %v2333_v37 = vsub.f32 1.5, %v5548_v33  ;;  %v1644_v47 = vmul.f32 %v1612_v22, %v7495_v56  ;;  %v10631_v22 = vld [vmem:[#allocation77_spill] sm:$0xff] }
 0x2a9   : > { %v3019_v31 = vadd.f32 %v3003_v19, %v2987_v12  ;;  %v6334_v44 = vpop.eup %6333  ;;  %v1645_v43 = vmul.f32 %v1613_v61, %v7499_v63  ;;  %v2348_v11 = vmul.f32 %v5547_v32, %v10629_v50  ;;  %v2349_v35 = vmul.f32 %v5548_v33, %v10630_v8  ;;  %v10632_v33 = vld [vmem:[#allocation78_spill] sm:$0xff] }
 0x2aa   : > { %v6336_v39 = vpop.eup %6335  ;;  %v3616_v16 = vmul.f32 %v6334_v44, %v6990_v13  ;;  %v2972_v45 = vsub.f32 1.3333334, %v5659_v23  ;;  %v2973_v5 = vsub.f32 1.3333334, %v5660_v26  ;;  %v7517_v12 = vadd.f32 %v1644_v47, %v1628_v29 }
 0x2ab   : > { %v3914_v20 = vpack.c.bf16 %v3019_v31, %v3018_v21  ;;  %v6338_v60 = vpop.eup %6337  ;;  %v3617_v42 = vmul.f32 %v6336_v39, %v6993_v28  ;;  %v7519_v7 = vadd.f32 %v1645_v43, %v1629_v3  ;;  %v2988_v30 = vmul.f32 %v5659_v23, %v10631_v22  ;;  %v10638_v22 = vld [vmem:[#allocation25_spill] sm:$0xff] }
 0x2ac   : > { %v6340_v61 = vpop.eup %6339  ;;  %v3618_v32 = vmul.f32 %v6338_v60, %v6987_v46  ;;  %v2989_v19 = vmul.f32 %v5660_v26, %v10632_v33  ;;  %vm870_vm4 = vcmp.ge.f32.partialorder %v10551_v2, 0.2  ;;  %vm871_vm5 = vcmp.ge.f32.partialorder %v10552_v10, 0.2  ;;  %v10689_v10 = vld [vmem:[#allocation107_spill] sm:$0xff] }
 0x2ad   : > { %6109 = vmatmul.mubr.msk.bf16.gmra.mxu0 %vm276_vm0, %v3914_v20  ;;  %v3626_v21 = vpack.c.bf16 %v3617_v42, %v3616_v16  ;;  %v3619_v44 = vmul.f32 %v6340_v61, %v7094_v17  ;;  %v2364_v47 = vmul.f32 %v2332_v53, %v7517_v12  ;;  %v2365_v3 = vmul.f32 %v2333_v37, %v7519_v7 }
 0x2ae   : > { %v7531_v29 = vsel %vm870_vm4, 1.0, %v10449_v62  ;;  %v7534_v31 = vsel %vm871_vm5, 1.0, %v10449_v62  ;;  %v5429_v20 = vadd.f32 -4.0, %v10554_v55  ;;  %v5430_v26 = vadd.f32 -4.0, %v10557_v51 }
 0x2af   : > { %10633 = vst [vmem:[#allocation59_spill] sm:$0xff] %v7531_v29  ;;  %10634 = vst [vmem:[#allocation60_spill] sm:$0xff] %v7534_v31  ;;  %6096 = vmatprep.mubr.msk.bf16.mxu1 %vm276_vm0, %v3626_v21  ;;  %v3627_v8 = vpack.c.bf16 %v3619_v44, %v3618_v32  ;;  %v7539_v16 = vadd.f32 %v2364_v47, %v2348_v11  ;;  %v7541_v23 = vadd.f32 %v2365_v3, %v2349_v35  ;;  %v10637_v35 = vld [vmem:[#allocation17_spill] sm:$0xff]  ;;  %v10641_v21 = vld [vmem:[#allocation27_spill] sm:$0xff] }
 0x2b0   : > { %v7545_v37 = vsub.f32 %v7290_v36, %v7531_v29  ;;  %v7549_v53 = vsub.f32 %v7293_v4, %v7534_v31  ;;  %v1686_v39 = vsub.f32 2.0, %v5429_v20  ;;  %v1687_v43 = vsub.f32 2.0, %v5430_v26  ;;  %v10642_v3 = vld [vmem:[#allocation18_spill] sm:$0xff] }
 0x2b1   : > { %v1702_v50 = vmul.f32 %v5429_v20, %v7297_v59  ;;  %6097 = vmatmul.mubr.msk.bf16.gmra.mxu1 %vm276_vm0, %v3627_v8  ;;  %v3004_v60 = vmul.f32 %v2972_v45, %v7539_v16  ;;  %v3005_v11 = vmul.f32 %v2973_v5, %v7541_v23  ;;  %v1703_v42 = vmul.f32 %v5430_v26, %v10637_v35  ;;  %v10640_v59 = vld [vmem:[#allocation26_spill] sm:$0xff] }
 0x2b2   : > { %10635 = vst [vmem:[#allocation61_spill] sm:$0xff] %v7545_v37  ;;  %10636 = vst [vmem:[#allocation62_spill] sm:$0xff] %v7549_v53  ;;  %v5557_v61 = vadd.f32 -1.5, %v10638_v22  ;;  %v10639_v36 = vpack.c.bf16 %v7463_v6, %v7459_v49  ;;  %v1718_v4 = vmul.f32 %v1686_v39, %v7545_v37  ;;  %v1719_v32 = vmul.f32 %v1687_v43, %v7549_v53  ;;  %v10645_v6 = vld [vmem:[#allocation19_spill] sm:$0xff]  ;;  %v10646_v39 = vld [vmem:[#allocation28_spill] sm:$0xff] }
 0x2b3   : > { %v5558_v33 = vadd.f32 -1.5, %v10640_v59  ;;  %v5669_v44 = vadd.f32 -0.6666667, %v10641_v21  ;;  %v3020_v45 = vadd.f32 %v3004_v60, %v2988_v30  ;;  %v3021_v47 = vadd.f32 %v3005_v11, %v2989_v19  ;;  %v10647_v19 = vld [vmem:[#allocation8_spill] sm:$0xff]  ;;  %v10648_v60 = vld [vmem:[#allocation15_spill] sm:$0xff] }
 0x2b4   : > { %6124 = vmatprep.mubr.msk.bf16.mxu1 %vm276_vm0, %v10639_v36  ;;  %v2406_v5 = vsub.f32 1.5, %v5557_v61  ;;  %v2422_v20 = vmul.f32 %v5557_v61, %v10642_v3  ;;  %v7566_v26 = vadd.f32 %v1718_v4, %v1702_v50  ;;  %v7568_v8 = vadd.f32 %v1719_v32, %v1703_v42  ;;  %v10653_v32 = vld [vmem:[#allocation20_spill] sm:$0xff] }
 0x2b5   : > { %v2407_v49 = vsub.f32 1.5, %v5558_v33  ;;  %v2423_v35 = vmul.f32 %v5558_v33, %v10645_v6  ;;  %v3915_v36 = vpack.c.bf16 %v3021_v47, %v3020_v45  ;;  %v5670_v22 = vadd.f32 -0.6666667, %v10646_v39  ;;  %v10657_v47 = vld [vmem:[#allocation38_spill] sm:$0xff]  ;;  %v10659_v3 = vld [vmem:[#allocation40_spill] sm:$0xff]  ;;  %v10677_v39 = vld [vmem:[#allocation91_spill] sm:$0xff] }
 0x2b6   : > { %10643 = vst [vmem:[#allocation64_spill] sm:$0xff] %v7566_v26  ;;  %10644 = vst [vmem:[#allocation65_spill] sm:$0xff] %v7568_v8  ;;  %v3046_v43 = vsub.f32 1.3333334, %v5669_v44  ;;  %v3062_v59 = vmul.f32 %v5669_v44, %v7348_v27  ;;  %v2438_v21 = vmul.f32 %v2406_v5, %v7566_v26  ;;  %vm872_vm6 = vcmp.ge.f32.partialorder %v10647_v19, 0.2 }
 0x2b7   : > { %v2439_v30 = vmul.f32 %v2407_v49, %v7568_v8  ;;  %vm873_vm7 = vcmp.ge.f32.partialorder %v10648_v60, 0.2  ;;  %6112 = vmatprep.mubr.msk.bf16.mxu0 %vm276_vm0, %v3915_v36  ;;  %v3047_v50 = vsub.f32 1.3333334, %v5670_v22  ;;  %v3063_v11 = vmul.f32 %v5670_v22, %v7351_v18  ;;  %v10655_v44 = vld [vmem:[#allocation21_spill] sm:$0xff]  ;;  %v10658_v22 = vld [vmem:[#allocation39_spill] sm:$0xff] }
 0x2b8   : > { %v7580_v42 = vsel %vm872_vm6, 1.0, %v10449_v62  ;;  %v7583_v61 = vsel %vm873_vm7, 1.0, %v10449_v62  ;;  %v7585_v27 = vadd.f32 %v2438_v21, %v2422_v20  ;;  %v5431_v18 = vadd.f32 -4.0, %v10657_v47 }
 0x2b9   : > { %10649 = vst [vmem:[#allocation66_spill] sm:$0xff] %v7580_v42  ;;  %10650 = vst [vmem:[#allocation67_spill] sm:$0xff] %v7583_v61  ;;  %v7587_v4 = vadd.f32 %v2439_v30, %v2423_v35  ;;  %v7591_v33 = vsub.f32 %v10653_v32, %v7580_v42  ;;  %v7595_v45 = vsub.f32 %v10655_v44, %v7583_v61  ;;  %v5432_v5 = vadd.f32 -4.0, %v10658_v22  ;;  %v10660_v44 = vld [vmem:[#allocation22_spill] sm:$0xff] }
 0x2ba   : > { %10651 = vst [vmem:[#allocation75_spill] sm:$0xff] %v7585_v27  ;;  %v5559_v49 = vadd.f32 -1.5, %v10659_v3  ;;  %v5560_v6 = vadd.f32 -1.5, %v10581_v0  ;;  %v3078_v21 = vmul.f32 %v3046_v43, %v7585_v27  ;;  %v5671_v35 = vadd.f32 -0.6666667, %v10584_v9 }
 0x2bb   : > { %10652 = vst [vmem:[#allocation76_spill] sm:$0xff] %v7587_v4  ;;  %10654 = vst [vmem:[#allocation77_spill] sm:$0xff] %v7591_v33  ;;  %v3079_v20 = vmul.f32 %v3047_v50, %v7587_v4  ;;  %v5672_v36 = vadd.f32 -0.6666667, %v10585_v15  ;;  %v1688_v30 = vsub.f32 2.0, %v5431_v18  ;;  %v1689_v32 = vsub.f32 2.0, %v5432_v5 }
 0x2bc   : > { %10656 = vst [vmem:[#allocation78_spill] sm:$0xff] %v7595_v45  ;;  %v1704_v61 = vmul.f32 %v5431_v18, %v10660_v44  ;;  %v1705_v47 = vmul.f32 %v5432_v5, %v7339_v48  ;;  %v3094_v42 = vadd.f32 %v3078_v21, %v3062_v59  ;;  %v2408_v60 = vsub.f32 1.5, %v5559_v49  ;;  %v10667_v5 = vld [vmem:[#allocation83_spill] sm:$0xff] }
 0x2bd   : > { %v3095_v22 = vadd.f32 %v3079_v20, %v3063_v11  ;;  %v2409_v3 = vsub.f32 1.5, %v5560_v6  ;;  %v1720_v0 = vmul.f32 %v1688_v30, %v7591_v33  ;;  %v1721_v43 = vmul.f32 %v1689_v32, %v7595_v45  ;;  %v10668_v20 = vld [vmem:[#allocation84_spill] sm:$0xff] }
 0x2be   : > { %v2424_v50 = vmul.f32 %v5559_v49, %v7360_v25  ;;  %v2425_v9 = vmul.f32 %v5560_v6, %v7362_v52  ;;  %v3048_v15 = vsub.f32 1.3333334, %v5671_v35  ;;  %v3049_v19 = vsub.f32 1.3333334, %v5672_v36  ;;  %v10663_v52 = vld [vmem:[#allocation86_spill] sm:$0xff]  ;;  %v10672_v32 = vld [vmem:[#allocation88_spill] sm:$0xff] }
 0x2bf   : > { %v4074_v4 = vpack.c.bf16 %v3095_v22, %v3094_v42  ;;  %v3064_v27 = vmul.f32 %v5671_v35, %v7373_v41  ;;  %v7612_v18 = vadd.f32 %v1720_v0, %v1704_v61  ;;  %v7614_v48 = vadd.f32 %v1721_v43, %v1705_v47  ;;  %v10664_v42 = vld [vmem:[#allocation87_spill] sm:$0xff] }
 0x2c0   : > { %v3065_v59 = vmul.f32 %v5672_v36, %v7379_v38  ;;  %vm830_vm8 = vcmp.ge.f32.partialorder %v10549_v58, -0.2  ;;  %vm831_vm9 = vcmp.ge.f32.partialorder %v10550_v40, -0.2  ;;  %v5421_v11 = vadd.f32 -3.0, %v10663_v52  ;;  %v10665_v38 = vld [vmem:[#allocation82_spill] sm:$0xff] }
 0x2c1   : > { %10661 = vst [vmem:[#allocation17_spill] sm:$0xff] %v7612_v18  ;;  %10662 = vst [vmem:[#allocation18_spill] sm:$0xff] %v7614_v48  ;;  %6125 = vmatmul.mubr.msk.bf16.vlgmr.msra.gmra.mxu1 %vm276_vm0, %v4074_v4  ;;  %v7621_v25 = vsel %vm830_vm8, 1.0, %v10449_v62  ;;  %v5422_v22 = vadd.f32 -3.0, %v10664_v42  ;;  %v2440_v0 = vmul.f32 %v2408_v60, %v7612_v18  ;;  %v2441_v41 = vmul.f32 %v2409_v3, %v7614_v48  ;;  %v10666_v4 = vld [vmem:[#allocation29_spill] sm:$0xff] }
 0x2c2   : > { %v7628_v61 = vsel %vm831_vm9, 1.0, %v10449_v62  ;;  %v7632_v47 = vsub.f32 %v10665_v38, %v7621_v25  ;;  %6161 = vmatpush3.bf16.msra.mxu1 %v10666_v4  ;;  %v1614_v6 = vsub.f32 2.0, %v5421_v11  ;;  %v1630_v35 = vmul.f32 %v5421_v11, %v10668_v20  ;;  %v10671_v36 = vld [vmem:[#allocation85_spill] sm:$0xff] }
 0x2c3   : > { %v7637_v49 = vsub.f32 %v10667_v5, %v7628_v61  ;;  %v1615_v21 = vsub.f32 2.0, %v5422_v22  ;;  %v7640_v60 = vadd.f32 %v2440_v0, %v2424_v50  ;;  %v7642_v3 = vadd.f32 %v2441_v41, %v2425_v9  ;;  %v10673_v4 = vld [vmem:[#allocation89_spill] sm:$0xff]  ;;  %v10674_v5 = vld [vmem:[#allocation90_spill] sm:$0xff]  ;;  %v10675_v0 = vld [vmem:[#allocation92_spill] sm:$0xff] }
 0x2c4   : > { %v1631_v30 = vmul.f32 %v5422_v22, %v10671_v36  ;;  %v5549_v44 = vadd.f32 -1.0, %v10672_v32  ;;  %v1646_v43 = vmul.f32 %v1614_v6, %v7632_v47  ;;  %v5550_v48 = vadd.f32 -1.0, %v10673_v4  ;;  %v10676_v36 = vld [vmem:[#allocation93_spill] sm:$0xff] }
 0x2c5   : > { %10669 = vst [vmem:[#allocation19_spill] sm:$0xff] %v7640_v60  ;;  %10670 = vst [vmem:[#allocation20_spill] sm:$0xff] %v7642_v3  ;;  %v1647_v38 = vmul.f32 %v1615_v21, %v7637_v49  ;;  %v5661_v18 = vadd.f32 -0.33333334, %v10674_v5  ;;  %v3080_v45 = vmul.f32 %v3048_v15, %v7640_v60  ;;  %v3081_v11 = vmul.f32 %v3049_v19, %v7642_v3  ;;  %v10678_v19 = vld [vmem:[#allocation94_spill] sm:$0xff]  ;;  %v10688_v60 = vld [vmem:[#allocation100_spill] sm:$0xff] }
 0x2c6   : > { %v2334_v50 = vsub.f32 1.5, %v5549_v44  ;;  %v2350_v9 = vmul.f32 %v5549_v44, %v10675_v0  ;;  %v7653_v41 = vadd.f32 %v1646_v43, %v1630_v35  ;;  %v2335_v20 = vsub.f32 1.5, %v5550_v48 }
 0x2c7   : > { %v7655_v22 = vadd.f32 %v1647_v38, %v1631_v30  ;;  %v2351_v6 = vmul.f32 %v5550_v48, %v10676_v36  ;;  %v3096_v33 = vadd.f32 %v3080_v45, %v3064_v27  ;;  %v3097_v21 = vadd.f32 %v3081_v11, %v3065_v59  ;;  %v10679_v30 = vld [vmem:[#allocation95_spill] sm:$0xff] }
 0x2c8   : > { %v5662_v8 = vadd.f32 -0.33333334, %v10677_v39  ;;  %v2974_v26 = vsub.f32 1.3333334, %v5661_v18  ;;  %v2366_v53 = vmul.f32 %v2334_v50, %v7653_v41  ;;  %v2990_v3 = vmul.f32 %v5661_v18, %v10678_v19  ;;  %v10681_v18 = vld [vmem:[#allocation96_spill] sm:$0xff] }
 0x2c9   : > { %v2367_v15 = vmul.f32 %v2335_v20, %v7655_v22  ;;  %vm832_vm10 = vcmp.ge.f32.partialorder %v6990_v13, -0.2  ;;  %v4075_v35 = vpack.c.bf16 %v3097_v21, %v3096_v33  ;;  %vm833_vm11 = vcmp.ge.f32.partialorder %v6993_v28, -0.2  ;;  %v10684_v50 = vld [vmem:[#allocation104_spill] sm:$0xff] }
 0x2ca   : > { %v2975_v44 = vsub.f32 1.3333334, %v5662_v8  ;;  %v2991_v43 = vmul.f32 %v5662_v8, %v10679_v30  ;;  %v7665_v48 = vadd.f32 %v2366_v53, %v2350_v9  ;;  %v7670_v45 = vsel %vm832_vm10, 1.0, %v10449_v62  ;;  %v10682_v8 = vld [vmem:[#allocation97_spill] sm:$0xff]  ;;  %v6271_v9 = vld [vmem:[%s9894_s3 + $0x50] sm:$0xff]  }
 0x2cb   : > { %v7667_v27 = vadd.f32 %v2367_v15, %v2351_v6  ;;  %v7673_v59 = vsel %vm833_vm11, 1.0, %v10449_v62  ;;  %6128 = vmatprep.mubr.msk.bf16.mxu1 %vm276_vm0, %v4075_v35  ;;  %v7678_v33 = vsub.f32 %v10681_v18, %v7670_v45  ;;  %v10683_v53 = vld [vmem:[#allocation101_spill] sm:$0xff]  ;;  %v5424_v0 = vadd.f32 -3.0, %v10684_v50  ;;  %v10685_v6 = vld [vmem:[#allocation102_spill] sm:$0xff]  ;;  %v10687_v18 = vld [vmem:[#allocation99_spill] sm:$0xff]  ;;  %6162 = vmatprep.subr.bf16.mxu1 %v6271_v9 }
 0x2cc   : > { %10680 = vst [vmem:[#allocation21_spill] sm:$0xff] %v7673_v59  ;;  %v7682_v38 = vsub.f32 %v10682_v8, %v7673_v59  ;;  %v5423_v11 = vadd.f32 -3.0, %v10683_v53  ;;  %v3006_v20 = vmul.f32 %v2974_v26, %v7665_v48  ;;  %v5551_v21 = vadd.f32 -1.0, %v10685_v6  ;;  %v10686_v15 = vld [vmem:[#allocation105_spill] sm:$0xff]  ;;  %6163 = vmatpush3.bf16.msra.mxu1 %v6271_v9  ;;  %v10690_v6 = vld [vmem:[#allocation108_spill] sm:$0xff]  ;;  %v10691_v53 = vld [vmem:[#allocation103_spill] sm:$0xff] }
 0x2cd   : > { %v3007_v36 = vmul.f32 %v2975_v44, %v7667_v27  ;;  %v5552_v19 = vadd.f32 -1.0, %v10686_v15  ;;  %v1617_v30 = vsub.f32 2.0, %v5424_v0  ;;  %v1633_v37 = vmul.f32 %v5424_v0, %v10688_v60  ;;  %v10697_v9 = vld [vmem:[#allocation110_spill] sm:$0xff] }
 0x2ce   : > { %v1616_v35 = vsub.f32 2.0, %v5423_v11  ;;  %v1632_v8 = vmul.f32 %v5423_v11, %v10687_v18  ;;  %v3022_v31 = vadd.f32 %v3006_v20, %v2990_v3  ;;  %v2336_v51 = vsub.f32 1.5, %v5551_v21  ;;  %v10692_v11 = vld [vmem:[#allocation106_spill] sm:$0xff] }
 0x2cf   : > { %v3023_v29 = vadd.f32 %v3007_v36, %v2991_v43  ;;  %v2337_v55 = vsub.f32 1.5, %v5552_v19  ;;  %v1649_v44 = vmul.f32 %v1617_v30, %v7682_v38  ;;  %v2352_v2 = vmul.f32 %v5551_v21, %v10689_v10 }
 0x2d0   : > { %v1648_v26 = vmul.f32 %v1616_v35, %v7678_v33  ;;  %v2353_v15 = vmul.f32 %v5552_v19, %v10690_v6  ;;  %v5663_v59 = vadd.f32 -0.33333334, %v10691_v53  ;;  %v5664_v18 = vadd.f32 -0.33333334, %v10692_v11  ;;  %v10701_v35 = vld [vmem:[#allocation54_spill] sm:$0xff] }
 0x2d1   : > { %v3916_v50 = vpack.c.bf16 %v3023_v29, %v3022_v31  ;;  %vm874_vm12 = vcmp.ge.f32.partialorder %v6508_v57, 0.2  ;;  %v7704_v3 = vadd.f32 %v1649_v44, %v1633_v37  ;;  %vm875_vm13 = vcmp.ge.f32.partialorder %v6520_v1, 0.2  ;;  %v10696_v29 = vld [vmem:[#allocation109_spill] sm:$0xff]  ;;  %v10704_v44 = vld [vmem:[#allocation55_spill] sm:$0xff] }
 0x2d2   : > { %v7702_v60 = vadd.f32 %v1648_v26, %v1632_v8  ;;  %v7708_v43 = vsel %vm874_vm12, 1.0, %v10449_v62  ;;  %v2976_v10 = vsub.f32 1.3333334, %v5663_v59  ;;  %v2977_v0 = vsub.f32 1.3333334, %v5664_v18  ;;  %v10703_v8 = vld [vmem:[#allocation57_spill] sm:$0xff] }
 0x2d3   : > { %10694 = vst [vmem:[#allocation82_spill] sm:$0xff] %v7704_v3  ;;  %10695 = vst [vmem:[#allocation29_spill] sm:$0xff] %v7708_v43  ;;  %6113 = vmatmul.mubr.msk.bf16.gmra.mxu0 %vm276_vm0, %v3916_v50  ;;  %v2992_v31 = vmul.f32 %v5663_v59, %v10696_v29  ;;  %v2993_v20 = vmul.f32 %v5664_v18, %v10697_v9  ;;  %v2369_v6 = vmul.f32 %v2337_v55, %v7704_v3  ;;  %v10705_v9 = vld [vmem:[#allocation44_spill] sm:$0xff] }
 0x2d4   : > { %10693 = vst [vmem:[#allocation22_spill] sm:$0xff] %v7702_v60  ;;  %v2368_v36 = vmul.f32 %v2336_v51, %v7702_v60  ;;  %v7716_v37 = vsel %vm875_vm13, 1.0, %v10449_v62  ;;  %v7720_v21 = vsub.f32 %v7438_v14, %v7708_v43  ;;  %v5433_v19 = vadd.f32 -4.0, %v10595_v24  ;;  %v10709_v60 = vld [vmem:[#allocation58_spill] sm:$0xff] }
 0x2d5   : > { %10698 = vst [vmem:[#allocation83_spill] sm:$0xff] %v7716_v37  ;;  %v7724_v50 = vsub.f32 %v7441_v54, %v7716_v37  ;;  %v5434_v59 = vadd.f32 -4.0, %v10599_v34  ;;  %v5561_v30 = vadd.f32 -1.5, %v10701_v35  ;;  %v7731_v55 = vadd.f32 %v2369_v6, %v2353_v15  ;;  %v10706_v54 = vld [vmem:[#allocation46_spill] sm:$0xff] }
 0x2d6   : > { %10699 = vst [vmem:[#allocation84_spill] sm:$0xff] %v7720_v21  ;;  %v7729_v51 = vadd.f32 %v2368_v36, %v2352_v2  ;;  %v5562_v26 = vadd.f32 -1.5, %v10703_v8  ;;  %v5673_v18 = vadd.f32 -0.6666667, %v10704_v44  ;;  %v1690_v14 = vsub.f32 2.0, %v5433_v19  ;;  %v10707_v36 = vld [vmem:[#allocation74_spill] sm:$0xff] }
 0x2d7   : > { %10700 = vst [vmem:[#allocation85_spill] sm:$0xff] %v7724_v50  ;;  %10702 = vst [vmem:[#allocation92_spill] sm:$0xff] %v7731_v55  ;;  %v1691_v29 = vsub.f32 2.0, %v5434_v59  ;;  %v1706_v43 = vmul.f32 %v5433_v19, %v10705_v9  ;;  %v1707_v37 = vmul.f32 %v5434_v59, %v10706_v54  ;;  %v3009_v34 = vmul.f32 %v2977_v0, %v7731_v55  ;;  %v10708_v8 = vld [vmem:[#allocation47_spill] sm:$0xff]  ;;  %v10713_v55 = vld [vmem:[#allocation33_spill] sm:$0xff] }
 0x2d8   : > { %v3008_v24 = vmul.f32 %v2976_v10, %v7729_v51  ;;  %v2410_v1 = vsub.f32 1.5, %v5561_v30  ;;  %v2411_v35 = vsub.f32 1.5, %v5562_v26  ;;  %v1722_v2 = vmul.f32 %v1690_v14, %v7720_v21  ;;  %v10712_v0 = vld [vmem:[#allocation51_spill] sm:$0xff] }
 0x2d9   : > { %v1723_v15 = vmul.f32 %v1691_v29, %v7724_v50  ;;  %v2426_v6 = vmul.f32 %v5561_v30, %v10707_v36  ;;  %v2427_v44 = vmul.f32 %v5562_v26, %v10708_v8  ;;  %v3025_v3 = vadd.f32 %v3009_v34, %v2993_v20  ;;  %v10714_v29 = vld [vmem:[#allocation52_spill] sm:$0xff]  ;;  %v10715_v30 = vld [vmem:[#allocation49_spill] sm:$0xff] }
 0x2da   : > { %v3024_v57 = vadd.f32 %v3008_v24, %v2992_v31  ;;  %v5674_v19 = vadd.f32 -0.6666667, %v10709_v60  ;;  %v3050_v9 = vsub.f32 1.3333334, %v5673_v18  ;;  %v7744_v59 = vadd.f32 %v1722_v2, %v1706_v43  ;;  %v10718_v20 = vld [vmem:[#allocation48_spill] sm:$0xff]  ;;  %v10723_v26 = vld [vmem:[#allocation69_spill] sm:$0xff] }
 0x2db   : > { %v7746_v10 = vadd.f32 %v1723_v15, %v1707_v37  ;;  %v3066_v54 = vmul.f32 %v5673_v18, %v10712_v0  ;;  %vm876_vm14 = vcmp.ge.f32.partialorder %v10713_v55, 0.2  ;;  %vm877_vm15 = vcmp.ge.f32.partialorder %v10715_v30, 0.2  ;;  %v10722_v8 = vld [vmem:[#allocation68_spill] sm:$0xff]  ;;  %v10726_v15 = vld [vmem:[#allocation70_spill] sm:$0xff] }
 0x2dc   : > { %10710 = vst [vmem:[#allocation93_spill] sm:$0xff] %v7744_v59  ;;  %v3917_v14 = vpack.c.bf16 %v3025_v3, %v3024_v57  ;;  %v3051_v21 = vsub.f32 1.3333334, %v5674_v19  ;;  %v3067_v50 = vmul.f32 %v5674_v19, %v10714_v29  ;;  %v2442_v24 = vmul.f32 %v2410_v1, %v7744_v59  ;;  %v10720_v3 = vld [vmem:[#allocation50_spill] sm:$0xff]  ;;  %v10727_v19 = vld [vmem:[#allocation71_spill] sm:$0xff]  ;;  %v10728_v30 = vld [vmem:[#allocation72_spill] sm:$0xff] }
 0x2dd   : > { %10711 = vst [vmem:[#allocation94_spill] sm:$0xff] %v7746_v10  ;;  %v2443_v34 = vmul.f32 %v2411_v35, %v7746_v10  ;;  %v7755_v31 = vsel %vm876_vm14, 1.0, %v10449_v62  ;;  %v7758_v43 = vsel %vm877_vm15, 1.0, %v10449_v62  ;;  %v5435_v1 = vadd.f32 -4.0, %v10722_v8 }
 0x2de   : > { %10716 = vst [vmem:[#allocation95_spill] sm:$0xff] %v7755_v31  ;;  %10717 = vst [vmem:[#allocation96_spill] sm:$0xff] %v7758_v43  ;;  %6116 = vmatprep.mubr.msk.bf16.mxu0 %vm276_vm0, %v3917_v14  ;;  %v7763_v57 = vsub.f32 %v10718_v20, %v7755_v31  ;;  %v7767_v37 = vsub.f32 %v10720_v3, %v7758_v43  ;;  %v5436_v35 = vadd.f32 -4.0, %v10723_v26  ;;  %v5563_v36 = vadd.f32 -1.5, %v10726_v15 }
 0x2df   : > { %v7771_v18 = vadd.f32 %v2442_v24, %v2426_v6  ;;  %v7773_v2 = vadd.f32 %v2443_v34, %v2427_v44  ;;  %v5564_v0 = vadd.f32 -1.5, %v10727_v19  ;;  %v1692_v14 = vsub.f32 2.0, %v5435_v1 }
 0x2e0   : > { %10719 = vst [vmem:[#allocation97_spill] sm:$0xff] %v7763_v57  ;;  %10721 = vst [vmem:[#allocation99_spill] sm:$0xff] %v7767_v37  ;;  %v1693_v29 = vsub.f32 2.0, %v5436_v35  ;;  %v1708_v20 = vmul.f32 %v5435_v1, %v7495_v56  ;;  %v1709_v31 = vmul.f32 %v5436_v35, %v7499_v63  ;;  %v2412_v8 = vsub.f32 1.5, %v5563_v36  ;;  %v10729_v1 = vld [vmem:[#allocation73_spill] sm:$0xff] }
 0x2e1   : > { %10724 = vst [vmem:[#allocation100_spill] sm:$0xff] %v7771_v18  ;;  %10725 = vst [vmem:[#allocation107_spill] sm:$0xff] %v7773_v2  ;;  %v3082_v3 = vmul.f32 %v3050_v9, %v7771_v18  ;;  %v3083_v43 = vmul.f32 %v3051_v21, %v7773_v2  ;;  %v2413_v26 = vsub.f32 1.5, %v5564_v0  ;;  %v1724_v6 = vmul.f32 %v1692_v14, %v7763_v57  ;;  %v10744_v2 = vld [vmem:[#allocation117_spill] sm:$0xff] }
 0x2e2   : > { %v1725_v44 = vmul.f32 %v1693_v29, %v7767_v37  ;;  %v2428_v24 = vmul.f32 %v5563_v36, %v7517_v12  ;;  %v2429_v34 = vmul.f32 %v5564_v0, %v7519_v7  ;;  %v5675_v56 = vadd.f32 -0.6666667, %v10728_v30  ;;  %v10734_v0 = vld [vmem:[#allocation118_spill] sm:$0xff]  ;;  %v10743_v37 = vld [vmem:[#allocation121_spill] sm:$0xff] }
 0x2e3   : > { %v3098_v19 = vadd.f32 %v3082_v3, %v3066_v54  ;;  %v3099_v15 = vadd.f32 %v3083_v43, %v3067_v50  ;;  %v5676_v63 = vadd.f32 -0.6666667, %v10729_v1  ;;  %v7787_v35 = vadd.f32 %v1724_v6, %v1708_v20  ;;  %v10739_v6 = vld [vmem:[#allocation116_spill] sm:$0xff] }
 0x2e4   : > { %v7789_v9 = vadd.f32 %v1725_v44, %v1709_v31  ;;  %vm834_vm1 = vcmp.ge.f32.partialorder %v6987_v46, -0.2  ;;  %vm835_vm2 = vcmp.ge.f32.partialorder %v7094_v17, -0.2  ;;  %v3052_v14 = vsub.f32 1.3333334, %v5675_v56 }
 0x2e5   : > { %10730 = vst [vmem:[#allocation108_spill] sm:$0xff] %v7787_v35  ;;  %v4076_v21 = vpack.c.bf16 %v3099_v15, %v3098_v19  ;;  %v3053_v29 = vsub.f32 1.3333334, %v5676_v63  ;;  %v3068_v12 = vmul.f32 %v5675_v56, %v7539_v16  ;;  %v2444_v7 = vmul.f32 %v2412_v8, %v7787_v35  ;;  %v10732_v15 = vld [vmem:[#allocation111_spill] sm:$0xff] }
 0x2e6   : > { %10731 = vst [vmem:[#allocation109_spill] sm:$0xff] %v7789_v9  ;;  %v2445_v50 = vmul.f32 %v2413_v26, %v7789_v9  ;;  %v3069_v54 = vmul.f32 %v5676_v63, %v7541_v23  ;;  %v7798_v43 = vsel %vm834_vm1, 1.0, %v10449_v62  ;;  %v7802_v31 = vsel %vm835_vm2, 1.0, %v10449_v62  ;;  %v10733_v19 = vld [vmem:[#allocation115_spill] sm:$0xff]  ;;  %v10737_v23 = vld [vmem:[#allocation112_spill] sm:$0xff] }
 0x2e7   : > { %6129 = vmatmul.mubr.msk.bf16.gmra.mxu1 %vm276_vm0, %v4076_v21  ;;  %v7806_v36 = vsub.f32 %v10732_v15, %v7798_v43  ;;  %v5425_v16 = vadd.f32 -3.0, %v10733_v19  ;;  %v5426_v8 = vadd.f32 -3.0, %v10734_v0  ;;  %v7810_v20 = vadd.f32 %v2444_v7, %v2428_v24  ;;  %v10740_v21 = vld [vmem:[#allocation113_spill] sm:$0xff]  ;;  %v10741_v15 = vld [vmem:[#allocation114_spill] sm:$0xff]  ;;  %v10742_v24 = vld [vmem:[#allocation119_spill] sm:$0xff] }
 0x2e8   : > { %v7812_v26 = vadd.f32 %v2445_v50, %v2429_v34  ;;  %v7816_v3 = vsub.f32 %v10737_v23, %v7802_v31  ;;  %v5553_v44 = vadd.f32 -1.0, %v10739_v6  ;;  %v5554_v7 = vadd.f32 -1.0, %v10742_v24 }
 0x2e9   : > { %10735 = vst [vmem:[#allocation110_spill] sm:$0xff] %v7810_v20  ;;  %v1618_v56 = vsub.f32 2.0, %v5425_v16  ;;  %v1619_v63 = vsub.f32 2.0, %v5426_v8  ;;  %v1634_v9 = vmul.f32 %v5425_v16, %v10740_v21  ;;  %v1635_v35 = vmul.f32 %v5426_v8, %v10741_v15  ;;  %v10745_v21 = vld [vmem:[#allocation122_spill] sm:$0xff] }
 0x2ea   : > { %10736 = vst [vmem:[#allocation44_spill] sm:$0xff] %v7812_v26  ;;  %10738 = vst [vmem:[#allocation46_spill] sm:$0xff] %v7816_v3  ;;  %v3084_v1 = vmul.f32 %v3052_v14, %v7810_v20  ;;  %v3085_v30 = vmul.f32 %v3053_v29, %v7812_v26  ;;  %v2338_v34 = vsub.f32 1.5, %v5553_v44  ;;  %v2354_v57 = vmul.f32 %v5553_v44, %v10743_v37  ;;  %v10748_v29 = vld [vmem:[#allocation120_spill] sm:$0xff]  ;;  %v10756_v44 = vld [vmem:[#allocation10_spill] sm:$0xff] }
 0x2eb   : > { %v1650_v50 = vmul.f32 %v1618_v56, %v7806_v36  ;;  %v1651_v23 = vmul.f32 %v1619_v63, %v7816_v3  ;;  %v5665_v55 = vadd.f32 -0.33333334, %v10744_v2  ;;  %v2339_v16 = vsub.f32 1.5, %v5554_v7  ;;  %v10749_v56 = vld [vmem:[#allocation123_spill] sm:$0xff]  ;;  %v10751_v37 = vld [vmem:[#allocation4_spill] sm:$0xff] }
 0x2ec   : > { %v3100_v18 = vadd.f32 %v3084_v1, %v3068_v12  ;;  %v3101_v60 = vadd.f32 %v3085_v30, %v3069_v54  ;;  %v2355_v8 = vmul.f32 %v5554_v7, %v10745_v21  ;;  %v5666_v26 = vadd.f32 -0.33333334, %v10748_v29  ;;  %v10750_v63 = vld [vmem:[#allocation3_spill] sm:$0xff]  ;;  %v10752_v54 = vld [vmem:[#allocation124_spill] sm:$0xff] }
 0x2ed   : > { %v7829_v15 = vadd.f32 %v1650_v50, %v1634_v9  ;;  %v7831_v14 = vadd.f32 %v1651_v23, %v1635_v35  ;;  %v2978_v20 = vsub.f32 1.3333334, %v5665_v55  ;;  %v2994_v59 = vmul.f32 %v5665_v55, %v10749_v56  ;;  %v10755_v55 = vld [vmem:[#allocation7_spill] sm:$0xff]  ;;  %v10759_v23 = vld [vmem:[#allocation30_spill] sm:$0xff] }
 0x2ee   : > { %v4077_v10 = vpack.c.bf16 %v3101_v60, %v3100_v18  ;;  %vm916_vm3 = vcmp.ge.f32.partialorder %v10750_v63, 0.6  ;;  %vm917_vm4 = vcmp.ge.f32.partialorder %v10751_v37, 0.6  ;;  %v2979_v12 = vsub.f32 1.3333334, %v5666_v26 }
 0x2ef   : > { %10746 = vst [vmem:[#allocation74_spill] sm:$0xff] %v7829_v15  ;;  %10747 = vst [vmem:[#allocation47_spill] sm:$0xff] %v7831_v14  ;;  %v2370_v1 = vmul.f32 %v2338_v34, %v7829_v15  ;;  %v2371_v30 = vmul.f32 %v2339_v16, %v7831_v14  ;;  %v2995_v9 = vmul.f32 %v5666_v26, %v10752_v54  ;;  %v7842_v35 = vsel %vm916_vm3, 1.0, %v10449_v62  ;;  %v10763_v54 = vld [vmem:[#allocation32_spill] sm:$0xff]  ;;  %v10764_v63 = vld [vmem:[#allocation34_spill] sm:$0xff] }
 0x2f0   : > { %6132 = vmatprep.mubr.msk.bf16.mxu1 %vm276_vm0, %v4077_v10  ;;  %10753 = vst [vmem:[#allocation51_spill] sm:$0xff] %v7842_v35  ;;  %v7845_v60 = vsel %vm917_vm4, 1.0, %v10449_v62  ;;  %v5443_v18 = vadd.f32 -5.0, %v10755_v55  ;;  %v5444_v7 = vadd.f32 -5.0, %v10756_v44  ;;  %v7855_v16 = vsub.f32 %v10759_v23, %v7842_v35  ;;  %v10761_v10 = vld [vmem:[#allocation31_spill] sm:$0xff]  ;;  %v10768_v14 = vld [vmem:[#allocation14_spill] sm:$0xff] }
 0x2f1   : > { %10754 = vst [vmem:[#allocation52_spill] sm:$0xff] %v7845_v60  ;;  %v7849_v50 = vadd.f32 %v2370_v1, %v2354_v57  ;;  %v7851_v34 = vadd.f32 %v2371_v30, %v2355_v8  ;;  %v7859_v26 = vsub.f32 %v10761_v10, %v7845_v60  ;;  %v10765_v8 = vld [vmem:[#allocation11_spill] sm:$0xff]  ;;  %v10766_v30 = vld [vmem:[#allocation13_spill] sm:$0xff]  ;;  %v10767_v10 = vld [vmem:[#allocation12_spill] sm:$0xff]  ;;  %v5684_v15 = vadd.f32 -1.0, %v10768_v14 }
 0x2f2   : > { %10760 = vst [vmem:[#allocation111_spill] sm:$0xff] %v7855_v16  ;;  %v1764_v21 = vsub.f32 2.0, %v5443_v18  ;;  %v1765_v56 = vsub.f32 2.0, %v5444_v7  ;;  %v1780_v37 = vmul.f32 %v5443_v18, %v10763_v54  ;;  %v1781_v55 = vmul.f32 %v5444_v7, %v10764_v63 }
 0x2f3   : > { %10757 = vst [vmem:[#allocation48_spill] sm:$0xff] %v7849_v50  ;;  %10758 = vst [vmem:[#allocation50_spill] sm:$0xff] %v7851_v34  ;;  %v3010_v44 = vmul.f32 %v2978_v20, %v7849_v50  ;;  %v3011_v57 = vmul.f32 %v2979_v12, %v7851_v34  ;;  %v5571_v1 = vadd.f32 -2.0, %v10765_v8  ;;  %v5572_v29 = vadd.f32 -2.0, %v10766_v30  ;;  %v10769_v12 = vld [vmem:[#allocation35_spill] sm:$0xff]  ;;  %v10770_v34 = vld [vmem:[#allocation36_spill] sm:$0xff] }
 0x2f4   : > { %10762 = vst [vmem:[#allocation112_spill] sm:$0xff] %v7859_v26  ;;  %v1796_v23 = vmul.f32 %v1764_v21, %v7855_v16  ;;  %v1797_v35 = vmul.f32 %v1765_v56, %v7859_v26  ;;  %v5683_v60 = vadd.f32 -1.0, %v10767_v10  ;;  %v3125_v16 = vsub.f32 1.3333334, %v5684_v15  ;;  %v10771_v56 = vld [vmem:[#allocation37_spill] sm:$0xff] }
 0x2f5   : > { %v3026_v3 = vadd.f32 %v3010_v44, %v2994_v59  ;;  %v3027_v18 = vadd.f32 %v3011_v57, %v2995_v9  ;;  %v2484_v54 = vsub.f32 1.5, %v5571_v1  ;;  %v2485_v63 = vsub.f32 1.5, %v5572_v29  ;;  %v10772_v9 = vld [vmem:[#allocation45_spill] sm:$0xff] }
 0x2f6   : > { %v7871_v7 = vadd.f32 %v1796_v23, %v1780_v37  ;;  %v7873_v20 = vadd.f32 %v1797_v35, %v1781_v55  ;;  %v2500_v8 = vmul.f32 %v5571_v1, %v10769_v12  ;;  %v2501_v30 = vmul.f32 %v5572_v29, %v10770_v34 }
 0x2f7   : > { %v3918_v50 = vpack.c.bf16 %v3027_v18, %v3026_v3  ;;  %v3124_v21 = vsub.f32 1.3333334, %v5683_v60  ;;  %v3140_v26 = vmul.f32 %v5683_v60, %v10771_v56  ;;  %v3141_v44 = vmul.f32 %v5684_v15, %v10772_v9 }
 0x2f8   : > { %v2516_v10 = vmul.f32 %v2484_v54, %v7871_v7  ;;  %v2517_v59 = vmul.f32 %v2485_v63, %v7873_v20  ;;  %vm878_vm5 = vcmp.ge.f32.partialorder %v10549_v58, 0.2  ;;  %vm879_vm6 = vcmp.ge.f32.partialorder %v10550_v40, 0.2  ;;  %v10825_v58 = vld [vmem:[#allocation17_spill] sm:$0xff] }
 0x2f9   : > { %6117 = vmatmul.mubr.msk.bf16.gmra.mxu0 %vm276_vm0, %v3918_v50  ;;  %v7885_v37 = vsel %vm878_vm5, 1.0, %v10449_v62  ;;  %v5437_v3 = vadd.f32 -4.0, %v10663_v52  ;;  %v5438_v29 = vadd.f32 -4.0, %v10664_v42  ;;  %v7894_v55 = vsel %vm879_vm6, 1.0, %v10449_v62 }
 0x2fa   : > { %10773 = vst [vmem:[#allocation113_spill] sm:$0xff] %v7885_v37  ;;  %v7889_v35 = vadd.f32 %v2516_v10, %v2500_v8  ;;  %v7891_v60 = vadd.f32 %v2517_v59, %v2501_v30  ;;  %10774 = vst [vmem:[#allocation114_spill] sm:$0xff] %v7894_v55  ;;  %v7898_v15 = vsub.f32 %v7621_v25, %v7885_v37  ;;  %v5565_v10 = vadd.f32 -1.5, %v10672_v32 }
 0x2fb   : > { %v7902_v50 = vsub.f32 %v7628_v61, %v7894_v55  ;;  %v1694_v34 = vsub.f32 2.0, %v5437_v3  ;;  %v1695_v57 = vsub.f32 2.0, %v5438_v29  ;;  %v1710_v1 = vmul.f32 %v5437_v3, %v7632_v47 }
 0x2fc   : > { %10775 = vst [vmem:[#allocation121_spill] sm:$0xff] %v7898_v15  ;;  %v3156_v8 = vmul.f32 %v3124_v21, %v7889_v35  ;;  %v3157_v30 = vmul.f32 %v3125_v16, %v7891_v60  ;;  %v1711_v23 = vmul.f32 %v5438_v29, %v7637_v49  ;;  %v5566_v54 = vadd.f32 -1.5, %v10673_v4 }
 0x2fd   : > { %10776 = vst [vmem:[#allocation122_spill] sm:$0xff] %v7902_v50  ;;  %v1726_v18 = vmul.f32 %v1694_v34, %v7898_v15  ;;  %v1727_v25 = vmul.f32 %v1695_v57, %v7902_v50  ;;  %v5677_v61 = vadd.f32 -0.6666667, %v10674_v5  ;;  %v2414_v56 = vsub.f32 1.5, %v5565_v10  ;;  %v10824_v15 = vld [vmem:[#allocation78_spill] sm:$0xff] }
 0x2fe   : > { %v3172_v63 = vadd.f32 %v3156_v8, %v3140_v26  ;;  %v3173_v12 = vadd.f32 %v3157_v30, %v3141_v44  ;;  %v2430_v47 = vmul.f32 %v5565_v10, %v7653_v41  ;;  %v2415_v49 = vsub.f32 1.5, %v5566_v54 }
 0x2ff   : > { %v7914_v21 = vadd.f32 %v1726_v18, %v1710_v1  ;;  %v7916_v16 = vadd.f32 %v1727_v25, %v1711_v23  ;;  %v2431_v59 = vmul.f32 %v5566_v54, %v7655_v22  ;;  %v5678_v3 = vadd.f32 -0.6666667, %v10677_v39  ;;  %v10784_v23 = vld [vmem:[#allocation21_spill] sm:$0xff]  ;;  %v10787_v25 = vld [vmem:[#allocation104_spill] sm:$0xff] }
 0x300   : > { %v4235_v9 = vpack.c.bf16 %v3173_v12, %v3172_v63  ;;  %v3054_v29 = vsub.f32 1.3333334, %v5677_v61  ;;  %v3070_v34 = vmul.f32 %v5677_v61, %v7665_v48  ;;  %vm880_vm7 = vcmp.ge.f32.partialorder %v6990_v13, 0.2  ;;  %v10786_v18 = vld [vmem:[#allocation101_spill] sm:$0xff]  ;;  %v10788_v61 = vld [vmem:[#allocation102_spill] sm:$0xff] }
 0x301   : > { %10777 = vst [vmem:[#allocation123_spill] sm:$0xff] %v7914_v21  ;;  %10778 = vst [vmem:[#allocation124_spill] sm:$0xff] %v7916_v16  ;;  %v2446_v57 = vmul.f32 %v2414_v56, %v7914_v21  ;;  %v2447_v26 = vmul.f32 %v2415_v49, %v7916_v16  ;;  %vm881_vm8 = vcmp.ge.f32.partialorder %v6993_v28, 0.2  ;;  %v3055_v41 = vsub.f32 1.3333334, %v5678_v3 }
 0x302   : > { %6144 = vmatprep.mubr.msk.bf16.mxu0 %vm276_vm0, %v4235_v9  ;;  %v3071_v44 = vmul.f32 %v5678_v3, %v7667_v27  ;;  %v7928_v22 = vsel %vm880_vm7, 1.0, %v10449_v62  ;;  %v7931_v1 = vsel %vm881_vm8, 1.0, %v10449_v62  ;;  %v5439_v27 = vadd.f32 -4.0, %v10786_v18  ;;  %v10789_v12 = vld [vmem:[#allocation105_spill] sm:$0xff]  ;;  %v10810_v21 = vld [vmem:[#allocation28_spill] sm:$0xff] }
 0x303   : > { %10779 = vst [vmem:[#allocation30_spill] sm:$0xff] %v7928_v22  ;;  %10780 = vst [vmem:[#allocation31_spill] sm:$0xff] %v7931_v1  ;;  %v7933_v48 = vadd.f32 %v2446_v57, %v2430_v47  ;;  %v7935_v8 = vadd.f32 %v2447_v26, %v2431_v59  ;;  %v7939_v30 = vsub.f32 %v7670_v45, %v7928_v22  ;;  %v5440_v54 = vadd.f32 -4.0, %v10787_v25  ;;  %v10791_v22 = vld [vmem:[#allocation82_spill] sm:$0xff] }
 0x304   : > { %v7943_v10 = vsub.f32 %v10784_v23, %v7931_v1  ;;  %v5567_v63 = vadd.f32 -1.5, %v10788_v61  ;;  %v5568_v56 = vadd.f32 -1.5, %v10789_v12  ;;  %v5679_v59 = vadd.f32 -0.6666667, %v10691_v53  ;;  %v10790_v1 = vld [vmem:[#allocation22_spill] sm:$0xff] }
 0x305   : > { %10781 = vst [vmem:[#allocation32_spill] sm:$0xff] %v7933_v48  ;;  %10782 = vst [vmem:[#allocation34_spill] sm:$0xff] %v7935_v8  ;;  %v3086_v47 = vmul.f32 %v3054_v29, %v7933_v48  ;;  %v3087_v49 = vmul.f32 %v3055_v41, %v7935_v8  ;;  %v5680_v45 = vadd.f32 -0.6666667, %v10692_v11  ;;  %v1696_v9 = vsub.f32 2.0, %v5439_v27 }
 0x306   : > { %10783 = vst [vmem:[#allocation35_spill] sm:$0xff] %v7939_v30  ;;  %10785 = vst [vmem:[#allocation36_spill] sm:$0xff] %v7943_v10  ;;  %v1697_v3 = vsub.f32 2.0, %v5440_v54  ;;  %v1712_v57 = vmul.f32 %v5439_v27, %v7678_v33  ;;  %v1713_v26 = vmul.f32 %v5440_v54, %v7682_v38  ;;  %v2416_v18 = vsub.f32 1.5, %v5567_v63  ;;  %v10795_v27 = vld [vmem:[#allocation2_spill] sm:$0xff]  ;;  %v10796_v54 = vld [vmem:[#allocation5_spill] sm:$0xff] }
 0x307   : > { %v3102_v23 = vadd.f32 %v3086_v47, %v3070_v34  ;;  %v3103_v25 = vadd.f32 %v3087_v49, %v3071_v44  ;;  %v2417_v61 = vsub.f32 1.5, %v5568_v56  ;;  %v1728_v12 = vmul.f32 %v1696_v9, %v7939_v30  ;;  %v10794_v34 = vld [vmem:[#allocation92_spill] sm:$0xff]  ;;  %v10799_v49 = vld [vmem:[#allocation59_spill] sm:$0xff] }
 0x308   : > { %v1729_v29 = vmul.f32 %v1697_v3, %v7943_v10  ;;  %v2432_v41 = vmul.f32 %v5567_v63, %v10790_v1  ;;  %v2433_v53 = vmul.f32 %v5568_v56, %v10791_v22  ;;  %v3056_v11 = vsub.f32 1.3333334, %v5679_v59  ;;  %v10797_v22 = vld [vmem:[#allocation23_spill] sm:$0xff]  ;;  %v10798_v63 = vld [vmem:[#allocation24_spill] sm:$0xff]  ;;  %v10806_v10 = vld [vmem:[#allocation26_spill] sm:$0xff] }
 0x309   : > { %v4078_v28 = vpack.c.bf16 %v3103_v25, %v3102_v23  ;;  %v3057_v8 = vsub.f32 1.3333334, %v5680_v45  ;;  %v3072_v13 = vmul.f32 %v5679_v59, %v7729_v51  ;;  %v7960_v33 = vadd.f32 %v1728_v12, %v1712_v57  ;;  %v10801_v57 = vld [vmem:[#allocation61_spill] sm:$0xff] }
 0x30a   : > { %v7962_v38 = vadd.f32 %v1729_v29, %v1713_v26  ;;  %v3073_v44 = vmul.f32 %v5680_v45, %v10794_v34  ;;  %vm918_vm9 = vcmp.ge.f32.partialorder %v10795_v27, 0.6  ;;  %vm919_vm10 = vcmp.ge.f32.partialorder %v10796_v54, 0.6  ;;  %v10805_v34 = vld [vmem:[#allocation25_spill] sm:$0xff] }
 0x30b   : > { %10792 = vst [vmem:[#allocation37_spill] sm:$0xff] %v7960_v33  ;;  %6133 = vmatmul.mubr.msk.bf16.gmra.mxu1 %vm276_vm0, %v4078_v28  ;;  %v7969_v1 = vsel %vm918_vm9, 1.0, %v10449_v62  ;;  %v5445_v25 = vadd.f32 -5.0, %v10797_v22  ;;  %v5446_v56 = vadd.f32 -5.0, %v10798_v63  ;;  %v2448_v51 = vmul.f32 %v2416_v18, %v7960_v33  ;;  %v10800_v28 = vld [vmem:[#allocation60_spill] sm:$0xff] }
 0x30c   : > { %10793 = vst [vmem:[#allocation45_spill] sm:$0xff] %v7962_v38  ;;  %v2449_v12 = vmul.f32 %v2417_v61, %v7962_v38  ;;  %v7976_v47 = vsel %vm919_vm10, 1.0, %v10449_v62  ;;  %v7980_v59 = vsub.f32 %v10799_v49, %v7969_v1  ;;  %v10804_v61 = vld [vmem:[#allocation62_spill] sm:$0xff]  ;;  %v5573_v38 = vadd.f32 -2.0, %v10805_v34 }
 0x30d   : > { %v7984_v45 = vsub.f32 %v10800_v28, %v7976_v47  ;;  %v1766_v9 = vsub.f32 2.0, %v5445_v25  ;;  %v1767_v3 = vsub.f32 2.0, %v5446_v56  ;;  %v1782_v26 = vmul.f32 %v5445_v25, %v10801_v57  ;;  %v10807_v28 = vld [vmem:[#allocation27_spill] sm:$0xff] }
 0x30e   : > { %v7987_v23 = vadd.f32 %v2448_v51, %v2432_v41  ;;  %v7989_v18 = vadd.f32 %v2449_v12, %v2433_v53  ;;  %v1783_v29 = vmul.f32 %v5446_v56, %v10804_v61  ;;  %v5574_v30 = vadd.f32 -2.0, %v10806_v10  ;;  %v10808_v51 = vld [vmem:[#allocation64_spill] sm:$0xff]  ;;  %v10809_v61 = vld [vmem:[#allocation65_spill] sm:$0xff] }
 0x30f   : > { %v1798_v33 = vmul.f32 %v1766_v9, %v7980_v59  ;;  %v1799_v49 = vmul.f32 %v1767_v3, %v7984_v45  ;;  %v5685_v48 = vadd.f32 -1.0, %v10807_v28  ;;  %v2486_v41 = vsub.f32 1.5, %v5573_v38 }
 0x310   : > { %10802 = vst [vmem:[#allocation21_spill] sm:$0xff] %v7987_v23  ;;  %10803 = vst [vmem:[#allocation22_spill] sm:$0xff] %v7989_v18  ;;  %v3088_v39 = vmul.f32 %v3056_v11, %v7987_v23  ;;  %v3089_v25 = vmul.f32 %v3057_v8, %v7989_v18  ;;  %v2502_v53 = vmul.f32 %v5573_v38, %v10808_v51  ;;  %v2487_v57 = vsub.f32 1.5, %v5574_v30  ;;  %v10811_v8 = vld [vmem:[#allocation75_spill] sm:$0xff]  ;;  %v10812_v23 = vld [vmem:[#allocation8_spill] sm:$0xff] }
 0x311   : > { %v8000_v12 = vadd.f32 %v1798_v33, %v1782_v26  ;;  %v8002_v56 = vadd.f32 %v1799_v49, %v1783_v29  ;;  %v2503_v9 = vmul.f32 %v5574_v30, %v10809_v61  ;;  %v5686_v5 = vadd.f32 -1.0, %v10810_v21  ;;  %v10813_v26 = vld [vmem:[#allocation76_spill] sm:$0xff]  ;;  %v10814_v49 = vld [vmem:[#allocation15_spill] sm:$0xff] }
 0x312   : > { %v3104_v16 = vadd.f32 %v3088_v39, %v3072_v13  ;;  %v3105_v3 = vadd.f32 %v3089_v25, %v3073_v44  ;;  %v3126_v4 = vsub.f32 1.3333334, %v5685_v48  ;;  %v3142_v18 = vmul.f32 %v5685_v48, %v10811_v8  ;;  %v10817_v48 = vld [vmem:[#allocation66_spill] sm:$0xff]  ;;  %v10820_v51 = vld [vmem:[#allocation39_spill] sm:$0xff]  ;;  %v10822_v8 = vld [vmem:[#allocation41_spill] sm:$0xff] }
 0x313   : > { %v2518_v32 = vmul.f32 %v2486_v41, %v8000_v12  ;;  %v2519_v11 = vmul.f32 %v2487_v57, %v8002_v56  ;;  %vm920_vm11 = vcmp.ge.f32.partialorder %v10812_v23, 0.6  ;;  %v3127_v38 = vsub.f32 1.3333334, %v5686_v5  ;;  %v8036_v57 = vld [vmem:[%s9894_s3 + $0x78] sm:$0xff]  }
 0x314   : > { %v4079_v33 = vpack.c.bf16 %v3105_v3, %v3104_v16  ;;  %v3143_v29 = vmul.f32 %v5686_v5, %v10813_v26  ;;  %vm921_vm12 = vcmp.ge.f32.partialorder %v10814_v49, 0.6  ;;  %v8017_v39 = vsel %vm920_vm11, 1.0, %v10449_v62  ;;  %v10818_v5 = vld [vmem:[#allocation67_spill] sm:$0xff]  ;;  %v10821_v3 = vld [vmem:[#allocation40_spill] sm:$0xff]  ;;  %6200 = vmatprep.subr.bf16.mxu1 %v8036_v57 }
 0x315   : > { %v8012_v30 = vadd.f32 %v2518_v32, %v2502_v53  ;;  %v8014_v13 = vadd.f32 %v2519_v11, %v2503_v9  ;;  %10815 = vst [vmem:[#allocation82_spill] sm:$0xff] %v8017_v39  ;;  %v8020_v44 = vsel %vm921_vm12, 1.0, %v10449_v62  ;;  %v8025_v16 = vsub.f32 %v10817_v48, %v8017_v39  ;;  %v10819_v32 = vld [vmem:[#allocation38_spill] sm:$0xff] }
 0x316   : > { %10816 = vst [vmem:[#allocation92_spill] sm:$0xff] %v8020_v44  ;;  %6136 = vmatprep.mubr.msk.bf16.mxu1 %vm276_vm0, %v4079_v33  ;;  %v8029_v25 = vsub.f32 %v10818_v5, %v8020_v44  ;;  %v5447_v41 = vadd.f32 -5.0, %v10819_v32  ;;  %v5448_v53 = vadd.f32 -5.0, %v10820_v51  ;;  %v5575_v11 = vadd.f32 -2.0, %v10821_v3  ;;  %v10823_v5 = vld [vmem:[#allocation77_spill] sm:$0xff]  ;;  %v10826_v51 = vld [vmem:[#allocation18_spill] sm:$0xff] }
 0x317   : > { %v3158_v61 = vmul.f32 %v3126_v4, %v8012_v30  ;;  %v3159_v9 = vmul.f32 %v3127_v38, %v8014_v13  ;;  %v5576_v33 = vadd.f32 -2.0, %v10822_v8  ;;  %v10827_v44 = vld [vmem:[#allocation42_spill] sm:$0xff]  ;;  %vm882_vm13 = vcmp.ge.f32.partialorder %v6987_v46, 0.2 }
 0x318   : > { %v1768_v26 = vsub.f32 2.0, %v5447_v41  ;;  %v1769_v48 = vsub.f32 2.0, %v5448_v53  ;;  %v1784_v50 = vmul.f32 %v5447_v41, %v10823_v5  ;;  %v1785_v55 = vmul.f32 %v5448_v53, %v10824_v15  ;;  %v10828_v41 = vld [vmem:[#allocation43_spill] sm:$0xff]  ;;  %v6272_v15 = vld [vmem:[%s9894_s3 + $0x60] sm:$0xff]  }
 0x319   : > { %v3174_v37 = vadd.f32 %v3158_v61, %v3142_v18  ;;  %v3175_v42 = vadd.f32 %v3159_v9, %v3143_v29  ;;  %v2488_v52 = vsub.f32 1.5, %v5575_v11  ;;  %v2489_v40 = vsub.f32 1.5, %v5576_v33  ;;  %v10831_v61 = vld [vmem:[#allocation20_spill] sm:$0xff] }
 0x31a   : > { %v1800_v4 = vmul.f32 %v1768_v26, %v8025_v16  ;;  %v1801_v38 = vmul.f32 %v1769_v48, %v8029_v25  ;;  %v2504_v3 = vmul.f32 %v5575_v11, %v10825_v58  ;;  %v2505_v8 = vmul.f32 %v5576_v33, %v10826_v51  ;;  %v10830_v51 = vld [vmem:[#allocation19_spill] sm:$0xff] }
 0x31b   : > { %v4236_v32 = vpack.c.bf16 %v3175_v42, %v3174_v37  ;;  %v5687_v39 = vadd.f32 -1.0, %v10827_v44  ;;  %v5688_v5 = vadd.f32 -1.0, %v10828_v41  ;;  %vm883_vm14 = vcmp.ge.f32.partialorder %v7094_v17, 0.2 }
 0x31c   : > { %v8055_v18 = vadd.f32 %v1800_v4, %v1784_v50  ;;  %v8057_v29 = vadd.f32 %v1801_v38, %v1785_v55  ;;  %v8061_v58 = vsel %vm882_vm13, 1.0, %v10449_v62  ;;  %v6342_v50 = vld [vmem:[%s9894_s3 + $0x68] sm:$0xff]   ;;  %v8072_v33 = vsel %vm883_vm14, 1.0, %v10449_v62 }
 0x31d   : > { %10829 = vst [vmem:[#allocation59_spill] sm:$0xff] %v8061_v58  ;;  %6145 = vmatmul.mubr.msk.bf16.vlgmr.msra.gmra.mxu0 %vm276_vm0, %v4236_v32  ;;  %v3128_v42 = vsub.f32 1.3333334, %v5687_v39  ;;  %v3129_v37 = vsub.f32 1.3333334, %v5688_v5  ;;  %v3144_v53 = vmul.f32 %v5687_v39, %v10830_v51  ;;  %v3145_v9 = vmul.f32 %v5688_v5, %v10831_v61  ;;  %10832 = vst [vmem:[#allocation60_spill] sm:$0xff] %v8072_v33 }
 0x31e   : > { %6181 = vmatpush3.bf16.msra.mxu0 %v6342_v50  ;;  %v2520_v55 = vmul.f32 %v2488_v52, %v8055_v18  ;;  %v2521_v11 = vmul.f32 %v2489_v40, %v8057_v29  ;;  %v8076_v32 = vsub.f32 %v7798_v43, %v8061_v58  ;;  %v8080_v39 = vsub.f32 %v7802_v31, %v8072_v33  ;;  %v10835_v61 = vld [vmem:[#allocation46_spill] sm:$0xff] }
 0x31f   : > { %v5441_v26 = vadd.f32 -4.0, %v10733_v19  ;;  %v5442_v48 = vadd.f32 -4.0, %v10734_v0  ;;  %v5569_v4 = vadd.f32 -1.5, %v10739_v6  ;;  %6182 = vmatprep.subr.bf16.mxu0 %v6272_v15  ;;  %v5570_v38 = vadd.f32 -1.5, %v10742_v24 }
 0x320   : > { %10833 = vst [vmem:[#allocation61_spill] sm:$0xff] %v8076_v32  ;;  %10834 = vst [vmem:[#allocation62_spill] sm:$0xff] %v8080_v39  ;;  %v8085_v52 = vadd.f32 %v2520_v55, %v2504_v3  ;;  %v8087_v40 = vadd.f32 %v2521_v11, %v2505_v8  ;;  %v5681_v43 = vadd.f32 -0.6666667, %v10744_v2  ;;  %v10836_v55 = vld [vmem:[#allocation74_spill] sm:$0xff]  ;;  %v10837_v2 = vld [vmem:[#allocation47_spill] sm:$0xff] }
 0x321   : > { %v1698_v5 = vsub.f32 2.0, %v5441_v26  ;;  %v1699_v51 = vsub.f32 2.0, %v5442_v48  ;;  %v1714_v31 = vmul.f32 %v5441_v26, %v7806_v36  ;;  %v1715_v50 = vmul.f32 %v5442_v48, %v10835_v61  ;;  %v10838_v36 = vld [vmem:[#allocation120_spill] sm:$0xff] }
 0x322   : > { %v3160_v33 = vmul.f32 %v3128_v42, %v8085_v52  ;;  %v3161_v0 = vmul.f32 %v3129_v37, %v8087_v40  ;;  %v2418_v6 = vsub.f32 1.5, %v5569_v4  ;;  %v2419_v19 = vsub.f32 1.5, %v5570_v38  ;;  %6183 = vmatpush3.bf16.msra.mxu0 %v6272_v15  ;;  %v10841_v37 = vld [vmem:[#allocation48_spill] sm:$0xff]  ;;  %v10842_v15 = vld [vmem:[#allocation3_spill] sm:$0xff] }
 0x323   : > { %v1730_v3 = vmul.f32 %v1698_v5, %v8076_v32  ;;  %v1731_v8 = vmul.f32 %v1699_v51, %v8080_v39  ;;  %v2434_v11 = vmul.f32 %v5569_v4, %v10836_v55  ;;  %v2435_v24 = vmul.f32 %v5570_v38, %v10837_v2  ;;  %v10843_v51 = vld [vmem:[#allocation50_spill] sm:$0xff]  ;;  %v10844_v4 = vld [vmem:[#allocation4_spill] sm:$0xff] }
 0x324   : > { %v3176_v58 = vadd.f32 %v3160_v33, %v3144_v53  ;;  %v3177_v17 = vadd.f32 %v3161_v0, %v3145_v9  ;;  %v5682_v26 = vadd.f32 -0.6666667, %v10838_v36  ;;  %v3058_v48 = vsub.f32 1.3333334, %v5681_v43  ;;  %v10847_v33 = vld [vmem:[#allocation51_spill] sm:$0xff] }
 0x325   : > { %v8100_v61 = vadd.f32 %v1730_v3, %v1714_v31  ;;  %v8102_v42 = vadd.f32 %v1731_v8, %v1715_v50  ;;  %v3074_v46 = vmul.f32 %v5681_v43, %v10841_v37  ;;  %vm964_vm15 = vcmp.ge.f32.partialorder %v10842_v15, 1.0  ;;  %v10851_v43 = vld [vmem:[#allocation7_spill] sm:$0xff]  ;;  %v10852_v31 = vld [vmem:[#allocation10_spill] sm:$0xff] }
 0x326   : > { %v4237_v5 = vpack.c.bf16 %v3177_v17, %v3176_v58  ;;  %v3059_v32 = vsub.f32 1.3333334, %v5682_v26  ;;  %v3075_v39 = vmul.f32 %v5682_v26, %v10843_v51  ;;  %vm965_vm1 = vcmp.ge.f32.partialorder %v10844_v4, 1.0  ;;  %v10849_v58 = vld [vmem:[#allocation52_spill] sm:$0xff]  ;;  %v10855_v8 = vld [vmem:[#allocation11_spill] sm:$0xff]  ;;  %v10856_v26 = vld [vmem:[#allocation13_spill] sm:$0xff] }
 0x327   : > { %10839 = vst [vmem:[#allocation64_spill] sm:$0xff] %v8100_v61  ;;  %10840 = vst [vmem:[#allocation65_spill] sm:$0xff] %v8102_v42  ;;  %v2450_v2 = vmul.f32 %v2418_v6, %v8100_v61  ;;  %v2451_v0 = vmul.f32 %v2419_v19, %v8102_v42  ;;  %v8111_v53 = vsel %vm964_vm15, 1.0, %v10449_v62  ;;  %v8114_v9 = vsel %vm965_vm1, 1.0, %v10449_v62  ;;  %v10858_v4 = vld [vmem:[#allocation112_spill] sm:$0xff]  ;;  %v10877_v36 = vld [vmem:[#allocation55_spill] sm:$0xff] }
 0x328   : > { %10845 = vst [vmem:[#allocation75_spill] sm:$0xff] %v8111_v53  ;;  %10846 = vst [vmem:[#allocation76_spill] sm:$0xff] %v8114_v9  ;;  %6148 = vmatprep.mubr.msk.bf16.mxu0 %vm276_vm0, %v4237_v5  ;;  %v8119_v17 = vsub.f32 %v10847_v33, %v8111_v53  ;;  %v8123_v38 = vsub.f32 %v10849_v58, %v8114_v9  ;;  %v5459_v6 = vadd.f32 -6.0, %v10851_v43  ;;  %v5460_v19 = vadd.f32 -6.0, %v10852_v31  ;;  %v10857_v33 = vld [vmem:[#allocation111_spill] sm:$0xff] }
 0x329   : > { %v8127_v50 = vadd.f32 %v2450_v2, %v2434_v11  ;;  %v8129_v3 = vadd.f32 %v2451_v0, %v2435_v24  ;;  %v5587_v55 = vadd.f32 -2.5, %v10855_v8  ;;  %v5588_v37 = vadd.f32 -2.5, %v10856_v26  ;;  %v6274_v58 = vld [vmem:[%s9894_s3 + $0x88] sm:$0xff]  }
 0x32a   : > { %10848 = vst [vmem:[#allocation66_spill] sm:$0xff] %v8119_v17  ;;  %10850 = vst [vmem:[#allocation67_spill] sm:$0xff] %v8123_v38  ;;  %v1844_v5 = vsub.f32 2.0, %v5459_v6  ;;  %v1845_v51 = vsub.f32 2.0, %v5460_v19  ;;  %v1860_v53 = vmul.f32 %v5459_v6, %v10857_v33  ;;  %v1861_v15 = vmul.f32 %v5460_v19, %v10858_v4  ;;  %6220 = vmatprep.subr.bf16.mxu0 %v6274_v58  ;;  %v10859_v33 = vld [vmem:[#allocation12_spill] sm:$0xff] }
 0x32b   : > { %10853 = vst [vmem:[#allocation77_spill] sm:$0xff] %v8127_v50  ;;  %10854 = vst [vmem:[#allocation78_spill] sm:$0xff] %v8129_v3  ;;  %v3090_v9 = vmul.f32 %v3058_v48, %v8127_v50  ;;  %v3091_v11 = vmul.f32 %v3059_v32, %v8129_v3  ;;  %v2564_v24 = vsub.f32 1.5, %v5587_v55  ;;  %v2565_v2 = vsub.f32 1.5, %v5588_v37  ;;  %v10862_v3 = vld [vmem:[#allocation6_spill] sm:$0xff] }
 0x32c   : > { %v1876_v0 = vmul.f32 %v1844_v5, %v8119_v17  ;;  %v1877_v26 = vmul.f32 %v1845_v51, %v8123_v38  ;;  %v2580_v8 = vmul.f32 %v5587_v55, %v7871_v7  ;;  %v2581_v6 = vmul.f32 %v5588_v37, %v7873_v20  ;;  %v10863_v5 = vld [vmem:[#allocation9_spill] sm:$0xff] }
 0x32d   : > { %v3106_v4 = vadd.f32 %v3090_v9, %v3074_v46  ;;  %v3107_v19 = vadd.f32 %v3091_v11, %v3075_v39  ;;  %v5699_v31 = vadd.f32 -1.3333334, %v10859_v33  ;;  %v5700_v43 = vadd.f32 -1.3333334, %v10768_v14  ;;  %v10864_v55 = vld [vmem:[#allocation29_spill] sm:$0xff] }
 0x32e   : > { %v8146_v48 = vadd.f32 %v1876_v0, %v1860_v53  ;;  %v8148_v32 = vadd.f32 %v1877_v26, %v1861_v15  ;;  %vm922_vm2 = vcmp.ge.f32.partialorder %v10862_v3, 0.6  ;;  %vm923_vm3 = vcmp.ge.f32.partialorder %v10863_v5, 0.6  ;;  %v10866_v37 = vld [vmem:[#allocation53_spill] sm:$0xff] }
 0x32f   : > { %v4080_v51 = vpack.c.bf16 %v3107_v19, %v3106_v4  ;;  %v3204_v38 = vsub.f32 1.3333334, %v5699_v31  ;;  %v3205_v7 = vsub.f32 1.3333334, %v5700_v43  ;;  %v3220_v20 = vmul.f32 %v5699_v31, %v7889_v35  ;;  %v10867_v31 = vld [vmem:[#allocation56_spill] sm:$0xff]  ;;  %v10876_v17 = vld [vmem:[#allocation93_spill] sm:$0xff] }
 0x330   : > { %10860 = vst [vmem:[#allocation17_spill] sm:$0xff] %v8146_v48  ;;  %10861 = vst [vmem:[#allocation18_spill] sm:$0xff] %v8148_v32  ;;  %v2596_v46 = vmul.f32 %v2564_v24, %v8146_v48  ;;  %v2597_v39 = vmul.f32 %v2565_v2, %v8148_v32  ;;  %v3221_v9 = vmul.f32 %v5700_v43, %v7891_v60  ;;  %v8157_v53 = vsel %vm922_vm2, 1.0, %v10449_v62  ;;  %v10870_v60 = vld [vmem:[#allocation83_spill] sm:$0xff]  ;;  %v10872_v2 = vld [vmem:[#allocation54_spill] sm:$0xff] }
 0x331   : > { %6137 = vmatmul.mubr.msk.bf16.gmra.mxu1 %vm276_vm0, %v4080_v51  ;;  %v8161_v15 = vsel %vm923_vm3, 1.0, %v10449_v62  ;;  %v8165_v26 = vsub.f32 %v10864_v55, %v8157_v53  ;;  %v5449_v35 = vadd.f32 -5.0, %v10866_v37  ;;  %v5450_v58 = vadd.f32 -5.0, %v10867_v31  ;;  %v10873_v51 = vld [vmem:[#allocation84_spill] sm:$0xff]  ;;  %v10874_v55 = vld [vmem:[#allocation85_spill] sm:$0xff] }
 0x332   : > { %v8169_v11 = vadd.f32 %v2596_v46, %v2580_v8  ;;  %v8171_v24 = vadd.f32 %v2597_v39, %v2581_v6  ;;  %v8175_v43 = vsub.f32 %v10870_v60, %v8161_v15  ;;  %v5577_v0 = vadd.f32 -2.0, %v10872_v2  ;;  %v10875_v8 = vld [vmem:[#allocation57_spill] sm:$0xff] }
 0x333   : > { %10865 = vst [vmem:[#allocation19_spill] sm:$0xff] %v8165_v26  ;;  %v1770_v4 = vsub.f32 2.0, %v5449_v35  ;;  %v1771_v19 = vsub.f32 2.0, %v5450_v58  ;;  %v1786_v32 = vmul.f32 %v5449_v35, %v10873_v51  ;;  %v1787_v48 = vmul.f32 %v5450_v58, %v10874_v55  ;;  %v10878_v51 = vld [vmem:[#allocation94_spill] sm:$0xff] }
 0x334   : > { %10868 = vst [vmem:[#allocation20_spill] sm:$0xff] %v8169_v11  ;;  %10869 = vst [vmem:[#allocation46_spill] sm:$0xff] %v8171_v24  ;;  %v3236_v14 = vmul.f32 %v3204_v38, %v8169_v11  ;;  %v3237_v33 = vmul.f32 %v3205_v7, %v8171_v24  ;;  %v5578_v46 = vadd.f32 -2.0, %v10875_v8  ;;  %v2490_v6 = vsub.f32 1.5, %v5577_v0  ;;  %v10881_v7 = vld [vmem:[#allocation58_spill] sm:$0xff] }
 0x335   : > { %10871 = vst [vmem:[#allocation74_spill] sm:$0xff] %v8175_v43  ;;  %v1802_v39 = vmul.f32 %v1770_v4, %v8165_v26  ;;  %v1803_v60 = vmul.f32 %v1771_v19, %v8175_v43  ;;  %v2506_v50 = vmul.f32 %v5577_v0, %v10876_v17  ;;  %v5689_v42 = vadd.f32 -1.0, %v10877_v36  ;;  %v10882_v4 = vld [vmem:[#allocation100_spill] sm:$0xff]  ;;  %v10883_v19 = vld [vmem:[#allocation33_spill] sm:$0xff] }
 0x336   : > { %v3252_v61 = vadd.f32 %v3236_v14, %v3220_v20  ;;  %v3253_v2 = vadd.f32 %v3237_v33, %v3221_v9  ;;  %v2491_v35 = vsub.f32 1.5, %v5578_v46  ;;  %v2507_v58 = vmul.f32 %v5578_v46, %v10878_v51  ;;  %v10884_v17 = vld [vmem:[#allocation49_spill] sm:$0xff]  ;;  %v10885_v9 = vld [vmem:[#allocation107_spill] sm:$0xff] }
 0x337   : > { %v8188_v55 = vadd.f32 %v1802_v39, %v1786_v32  ;;  %v8190_v38 = vadd.f32 %v1803_v60, %v1787_v48  ;;  %v5690_v24 = vadd.f32 -1.0, %v10881_v7  ;;  %v3130_v11 = vsub.f32 1.3333334, %v5689_v42  ;;  %v10889_v0 = vld [vmem:[#allocation69_spill] sm:$0xff]  ;;  %v10892_v60 = vld [vmem:[#allocation95_spill] sm:$0xff] }
 0x338   : > { %v4397_v8 = vpack.c.bf16 %v3253_v2, %v3252_v61  ;;  %v3146_v26 = vmul.f32 %v5689_v42, %v10882_v4  ;;  %vm924_vm4 = vcmp.ge.f32.partialorder %v10883_v19, 0.6  ;;  %vm925_vm5 = vcmp.ge.f32.partialorder %v10884_v17, 0.6  ;;  %v10888_v42 = vld [vmem:[#allocation68_spill] sm:$0xff]  ;;  %v10897_v19 = vld [vmem:[#allocation99_spill] sm:$0xff] }
 0x339   : > { %10879 = vst [vmem:[#allocation47_spill] sm:$0xff] %v8188_v55  ;;  %10880 = vst [vmem:[#allocation48_spill] sm:$0xff] %v8190_v38  ;;  %v2522_v14 = vmul.f32 %v2490_v6, %v8188_v55  ;;  %v2523_v33 = vmul.f32 %v2491_v35, %v8190_v38  ;;  %v3131_v20 = vsub.f32 1.3333334, %v5690_v24  ;;  %v3147_v32 = vmul.f32 %v5690_v24, %v10885_v9  ;;  %v10894_v24 = vld [vmem:[#allocation96_spill] sm:$0xff]  ;;  %v10896_v9 = vld [vmem:[#allocation97_spill] sm:$0xff] }
 0x33a   : > { %6164 = vmatprep.mubr.msk.bf16.mxu1 %vm276_vm0, %v4397_v8  ;;  %v8201_v48 = vsel %vm924_vm4, 1.0, %v10449_v62  ;;  %v8204_v61 = vsel %vm925_vm5, 1.0, %v10449_v62  ;;  %v5451_v2 = vadd.f32 -5.0, %v10888_v42  ;;  %v5452_v46 = vadd.f32 -5.0, %v10889_v0  ;;  %v10901_v38 = vld [vmem:[#allocation73_spill] sm:$0xff] }
 0x33b   : > { %10886 = vst [vmem:[#allocation50_spill] sm:$0xff] %v8201_v48  ;;  %10887 = vst [vmem:[#allocation51_spill] sm:$0xff] %v8204_v61  ;;  %v8208_v39 = vadd.f32 %v2522_v14, %v2506_v50  ;;  %v8210_v6 = vadd.f32 %v2523_v33, %v2507_v58  ;;  %v8214_v35 = vsub.f32 %v10892_v60, %v8201_v48  ;;  %v10898_v58 = vld [vmem:[#allocation70_spill] sm:$0xff]  ;;  %v10899_v33 = vld [vmem:[#allocation71_spill] sm:$0xff]  ;;  %v5692_v55 = vadd.f32 -1.0, %v10901_v38 }
 0x33c   : > { %v8218_v8 = vsub.f32 %v10894_v24, %v8204_v61  ;;  %v1772_v51 = vsub.f32 2.0, %v5451_v2  ;;  %v1773_v4 = vsub.f32 2.0, %v5452_v46  ;;  %v1788_v17 = vmul.f32 %v5451_v2, %v10896_v9  ;;  %v10900_v24 = vld [vmem:[#allocation72_spill] sm:$0xff] }
 0x33d   : > { %10890 = vst [vmem:[#allocation52_spill] sm:$0xff] %v8208_v39  ;;  %10891 = vst [vmem:[#allocation111_spill] sm:$0xff] %v8210_v6  ;;  %v1789_v42 = vmul.f32 %v5452_v46, %v10897_v19  ;;  %v3162_v0 = vmul.f32 %v3130_v11, %v8208_v39  ;;  %v3163_v50 = vmul.f32 %v3131_v20, %v8210_v6  ;;  %v5579_v14 = vadd.f32 -2.0, %v10898_v58  ;;  %v10902_v20 = vld [vmem:[#allocation108_spill] sm:$0xff]  ;;  %v10903_v6 = vld [vmem:[#allocation109_spill] sm:$0xff] }
 0x33e   : > { %10893 = vst [vmem:[#allocation112_spill] sm:$0xff] %v8214_v35  ;;  %10895 = vst [vmem:[#allocation29_spill] sm:$0xff] %v8218_v8  ;;  %v5580_v7 = vadd.f32 -2.0, %v10899_v33  ;;  %v1804_v60 = vmul.f32 %v1772_v51, %v8214_v35  ;;  %v1805_v48 = vmul.f32 %v1773_v4, %v8218_v8  ;;  %v5691_v61 = vadd.f32 -1.0, %v10900_v24  ;;  %v10904_v4 = vld [vmem:[#allocation110_spill] sm:$0xff] }
 0x33f   : > { %v3178_v43 = vadd.f32 %v3162_v0, %v3146_v26  ;;  %v3179_v2 = vadd.f32 %v3163_v50, %v3147_v32  ;;  %v2492_v9 = vsub.f32 1.5, %v5579_v14  ;;  %v2508_v58 = vmul.f32 %v5579_v14, %v10902_v20  ;;  %v10905_v32 = vld [vmem:[#allocation44_spill] sm:$0xff] }
 0x340   : > { %v2493_v19 = vsub.f32 1.5, %v5580_v7  ;;  %v8230_v46 = vadd.f32 %v1804_v60, %v1788_v17  ;;  %v8232_v11 = vadd.f32 %v1805_v48, %v1789_v42  ;;  %v2509_v33 = vmul.f32 %v5580_v7, %v10903_v6 }
 0x341   : > { %v4238_v39 = vpack.c.bf16 %v3179_v2, %v3178_v43  ;;  %v3132_v51 = vsub.f32 1.3333334, %v5691_v61  ;;  %v3133_v35 = vsub.f32 1.3333334, %v5692_v55  ;;  %v3148_v8 = vmul.f32 %v5691_v61, %v10904_v4 }
 0x342   : > { %v2524_v24 = vmul.f32 %v2492_v9, %v8230_v46  ;;  %v2525_v26 = vmul.f32 %v2493_v19, %v8232_v11  ;;  %v3149_v0 = vmul.f32 %v5692_v55, %v10905_v32  ;;  %vm966_vm6 = vcmp.ge.f32.partialorder %v10795_v27, 1.0 }
 0x343   : > { %6149 = vmatmul.mubr.msk.bf16.gmra.mxu0 %vm276_vm0, %v4238_v39  ;;  %vm967_vm7 = vcmp.ge.f32.partialorder %v10796_v54, 1.0  ;;  %v8244_v17 = vsel %vm966_vm6, 1.0, %v10449_v62  ;;  %v5461_v43 = vadd.f32 -6.0, %v10797_v22  ;;  %v5462_v7 = vadd.f32 -6.0, %v10798_v63  ;;  %v10954_v63 = vld [vmem:[#allocation37_spill] sm:$0xff] }
 0x344   : > { %10906 = vst [vmem:[#allocation83_spill] sm:$0xff] %v8244_v17  ;;  %v8248_v48 = vadd.f32 %v2524_v24, %v2508_v58  ;;  %v8250_v61 = vadd.f32 %v2525_v26, %v2509_v33  ;;  %v8253_v42 = vsel %vm967_vm7, 1.0, %v10449_v62  ;;  %v8257_v55 = vsub.f32 %v7969_v1, %v8244_v17  ;;  %v10955_v54 = vld [vmem:[#allocation45_spill] sm:$0xff] }
 0x345   : > { %10907 = vst [vmem:[#allocation84_spill] sm:$0xff] %v8253_v42  ;;  %v8261_v39 = vsub.f32 %v7976_v47, %v8253_v42  ;;  %v1846_v6 = vsub.f32 2.0, %v5461_v43  ;;  %v1847_v50 = vsub.f32 2.0, %v5462_v7  ;;  %v1862_v14 = vmul.f32 %v5461_v43, %v7980_v59 }
 0x346   : > { %10908 = vst [vmem:[#allocation85_spill] sm:$0xff] %v8257_v55  ;;  %v3164_v58 = vmul.f32 %v3132_v51, %v8248_v48  ;;  %v3165_v33 = vmul.f32 %v3133_v35, %v8250_v61  ;;  %v1863_v60 = vmul.f32 %v5462_v7, %v7984_v45  ;;  %v5589_v24 = vadd.f32 -2.5, %v10805_v34 }
 0x347   : > { %10909 = vst [vmem:[#allocation93_spill] sm:$0xff] %v8261_v39  ;;  %v1878_v2 = vmul.f32 %v1846_v6, %v8257_v55  ;;  %v1879_v1 = vmul.f32 %v1847_v50, %v8261_v39  ;;  %v5590_v9 = vadd.f32 -2.5, %v10806_v10  ;;  %v5701_v47 = vadd.f32 -1.3333334, %v10807_v28  ;;  %v10953_v10 = vld [vmem:[#allocation36_spill] sm:$0xff] }
 0x348   : > { %v3180_v19 = vadd.f32 %v3164_v58, %v3148_v8  ;;  %v3181_v20 = vadd.f32 %v3165_v33, %v3149_v0  ;;  %v2566_v4 = vsub.f32 1.5, %v5589_v24  ;;  %v2582_v59 = vmul.f32 %v5589_v24, %v8000_v12  ;;  %v10916_v33 = vld [vmem:[#allocation82_spill] sm:$0xff]  ;;  %v10918_v24 = vld [vmem:[#allocation92_spill] sm:$0xff] }
 0x349   : > { %v8273_v51 = vadd.f32 %v1878_v2, %v1862_v14  ;;  %v8275_v35 = vadd.f32 %v1879_v1, %v1863_v60  ;;  %v2567_v45 = vsub.f32 1.5, %v5590_v9  ;;  %v2583_v26 = vmul.f32 %v5590_v9, %v8002_v56  ;;  %v10920_v1 = vld [vmem:[#allocation38_spill] sm:$0xff]  ;;  %v10921_v9 = vld [vmem:[#allocation39_spill] sm:$0xff] }
 0x34a   : > { %v4239_v32 = vpack.c.bf16 %v3181_v20, %v3180_v19  ;;  %v5702_v43 = vadd.f32 -1.3333334, %v10810_v21  ;;  %v3206_v7 = vsub.f32 1.3333334, %v5701_v47  ;;  %v3222_v6 = vmul.f32 %v5701_v47, %v8012_v30  ;;  %v10922_v19 = vld [vmem:[#allocation40_spill] sm:$0xff] }
 0x34b   : > { %10910 = vst [vmem:[#allocation94_spill] sm:$0xff] %v8273_v51  ;;  %10911 = vst [vmem:[#allocation100_spill] sm:$0xff] %v8275_v35  ;;  %v2598_v50 = vmul.f32 %v2566_v4, %v8273_v51  ;;  %v2599_v8 = vmul.f32 %v2567_v45, %v8275_v35  ;;  %vm968_vm8 = vcmp.ge.f32.partialorder %v10812_v23, 1.0  ;;  %vm969_vm9 = vcmp.ge.f32.partialorder %v10814_v49, 1.0  ;;  %v10923_v4 = vld [vmem:[#allocation41_spill] sm:$0xff] }
 0x34c   : > { %6152 = vmatprep.mubr.msk.bf16.mxu0 %vm276_vm0, %v4239_v32  ;;  %v3207_v12 = vsub.f32 1.3333334, %v5702_v43  ;;  %v3223_v0 = vmul.f32 %v5702_v43, %v8014_v13  ;;  %v8287_v56 = vsel %vm968_vm8, 1.0, %v10449_v62  ;;  %v8290_v14 = vsel %vm969_vm9, 1.0, %v10449_v62 }
 0x34d   : > { %10912 = vst [vmem:[#allocation107_spill] sm:$0xff] %v8287_v56  ;;  %10913 = vst [vmem:[#allocation95_spill] sm:$0xff] %v8290_v14  ;;  %v8292_v30 = vadd.f32 %v2598_v50, %v2582_v59  ;;  %v8294_v58 = vadd.f32 %v2599_v8, %v2583_v26  ;;  %v8298_v60 = vsub.f32 %v10916_v33, %v8287_v56  ;;  %v5463_v13 = vadd.f32 -6.0, %v10920_v1 }
 0x34e   : > { %v8302_v2 = vsub.f32 %v10918_v24, %v8290_v14  ;;  %v5464_v47 = vadd.f32 -6.0, %v10921_v9  ;;  %v5591_v20 = vadd.f32 -2.5, %v10922_v19  ;;  %v5592_v45 = vadd.f32 -2.5, %v10923_v4 }
 0x34f   : > { %10914 = vst [vmem:[#allocation96_spill] sm:$0xff] %v8292_v30  ;;  %10915 = vst [vmem:[#allocation97_spill] sm:$0xff] %v8294_v58  ;;  %v3238_v59 = vmul.f32 %v3206_v7, %v8292_v30  ;;  %v3239_v26 = vmul.f32 %v3207_v12, %v8294_v58  ;;  %v5703_v32 = vadd.f32 -1.3333334, %v10827_v44  ;;  %v5704_v43 = vadd.f32 -1.3333334, %v10828_v41 }
 0x350   : > { %10917 = vst [vmem:[#allocation99_spill] sm:$0xff] %v8298_v60  ;;  %10919 = vst [vmem:[#allocation108_spill] sm:$0xff] %v8302_v2  ;;  %v1848_v50 = vsub.f32 2.0, %v5463_v13  ;;  %v1849_v8 = vsub.f32 2.0, %v5464_v47  ;;  %v1864_v33 = vmul.f32 %v5463_v13, %v8025_v16  ;;  %v1865_v24 = vmul.f32 %v5464_v47, %v8029_v25  ;;  %v10927_v13 = vld [vmem:[#allocation63_spill] sm:$0xff] }
 0x351   : > { %v3254_v1 = vadd.f32 %v3238_v59, %v3222_v6  ;;  %v3255_v9 = vadd.f32 %v3239_v26, %v3223_v0  ;;  %v2568_v14 = vsub.f32 1.5, %v5591_v20  ;;  %v2569_v19 = vsub.f32 1.5, %v5592_v45  ;;  %v10926_v0 = vld [vmem:[#allocation16_spill] sm:$0xff]  ;;  %v10941_v30 = vld [vmem:[#allocation91_spill] sm:$0xff] }
 0x352   : > { %v1880_v4 = vmul.f32 %v1848_v50, %v8298_v60  ;;  %v1881_v7 = vmul.f32 %v1849_v8, %v8302_v2  ;;  %v2584_v12 = vmul.f32 %v5591_v20, %v8055_v18  ;;  %v2585_v44 = vmul.f32 %v5592_v45, %v8057_v29  ;;  %v10928_v29 = vld [vmem:[#allocation86_spill] sm:$0xff] }
 0x353   : > { %v4398_v56 = vpack.c.bf16 %v3255_v9, %v3254_v1  ;;  %v3208_v41 = vsub.f32 1.3333334, %v5703_v32  ;;  %v3209_v49 = vsub.f32 1.3333334, %v5704_v43  ;;  %v3224_v58 = vmul.f32 %v5703_v32, %v8085_v52  ;;  %v10929_v9 = vld [vmem:[#allocation87_spill] sm:$0xff]  ;;  %v10935_v8 = vld [vmem:[#allocation122_spill] sm:$0xff] }
 0x354   : > { %v8319_v16 = vadd.f32 %v1880_v4, %v1864_v33  ;;  %v8321_v25 = vadd.f32 %v1881_v7, %v1865_v24  ;;  %v3225_v6 = vmul.f32 %v5704_v43, %v8087_v40  ;;  %vm926_vm10 = vcmp.ge.f32.partialorder %v10926_v0, 0.6  ;;  %v10930_v40 = vld [vmem:[#allocation113_spill] sm:$0xff]  ;;  %v10936_v24 = vld [vmem:[#allocation88_spill] sm:$0xff] }
 0x355   : > { %6165 = vmatmul.mubr.msk.bf16.vlgmr.msra.gmra.mxu1 %vm276_vm0, %v4398_v56  ;;  %vm927_vm11 = vcmp.ge.f32.partialorder %v10927_v13, 0.6  ;;  %v8328_v18 = vsel %vm926_vm10, 1.0, %v10449_v62  ;;  %v5453_v1 = vadd.f32 -5.0, %v10928_v29  ;;  %v5454_v47 = vadd.f32 -5.0, %v10929_v9  ;;  %v10931_v56 = vld [vmem:[#allocation114_spill] sm:$0xff] }
 0x356   : > { %10924 = vst [vmem:[#allocation109_spill] sm:$0xff] %v8319_v16  ;;  %10925 = vst [vmem:[#allocation110_spill] sm:$0xff] %v8321_v25  ;;  %v2600_v52 = vmul.f32 %v2568_v14, %v8319_v16  ;;  %v2601_v20 = vmul.f32 %v2569_v19, %v8321_v25  ;;  %v8335_v4 = vsel %vm927_vm11, 1.0, %v10449_v62  ;;  %v8339_v45 = vsub.f32 %v10930_v40, %v8328_v18  ;;  %v10932_v43 = vld [vmem:[#allocation121_spill] sm:$0xff] }
 0x357   : > { %6201 = vmatpush3.bf16.msra.mxu1 %v8036_v57  ;;  %v8344_v59 = vsub.f32 %v10931_v56, %v8335_v4  ;;  %v1774_v26 = vsub.f32 2.0, %v5453_v1  ;;  %v1775_v32 = vsub.f32 2.0, %v5454_v47  ;;  %v1790_v50 = vmul.f32 %v5453_v1, %v10932_v43  ;;  %v10937_v25 = vld [vmem:[#allocation89_spill] sm:$0xff]  ;;  %v10938_v56 = vld [vmem:[#allocation90_spill] sm:$0xff] }
 0x358   : > { %v8347_v14 = vadd.f32 %v2600_v52, %v2584_v12  ;;  %v8349_v19 = vadd.f32 %v2601_v20, %v2585_v44  ;;  %v1791_v33 = vmul.f32 %v5454_v47, %v10935_v8  ;;  %v5581_v7 = vadd.f32 -2.0, %v10936_v24  ;;  %v10939_v52 = vld [vmem:[#allocation123_spill] sm:$0xff]  ;;  %v10940_v8 = vld [vmem:[#allocation124_spill] sm:$0xff] }
 0x359   : > { %v1806_v40 = vmul.f32 %v1774_v26, %v8339_v45  ;;  %v1807_v57 = vmul.f32 %v1775_v32, %v8344_v59  ;;  %v5582_v16 = vadd.f32 -2.0, %v10937_v25  ;;  %v5693_v2 = vadd.f32 -1.0, %v10938_v56 }
 0x35a   : > { %10933 = vst [vmem:[#allocation44_spill] sm:$0xff] %v8347_v14  ;;  %10934 = vst [vmem:[#allocation82_spill] sm:$0xff] %v8349_v19  ;;  %v3240_v60 = vmul.f32 %v3208_v41, %v8347_v14  ;;  %v3241_v1 = vmul.f32 %v3209_v49, %v8349_v19  ;;  %v2494_v12 = vsub.f32 1.5, %v5581_v7  ;;  %v2510_v44 = vmul.f32 %v5581_v7, %v10939_v52  ;;  %v10942_v49 = vld [vmem:[#allocation32_spill] sm:$0xff] }
 0x35b   : > { %v8360_v20 = vadd.f32 %v1806_v40, %v1790_v50  ;;  %v8362_v47 = vadd.f32 %v1807_v57, %v1791_v33  ;;  %v2495_v43 = vsub.f32 1.5, %v5582_v16  ;;  %v2511_v26 = vmul.f32 %v5582_v16, %v10940_v8  ;;  %v10943_v14 = vld [vmem:[#allocation80_spill] sm:$0xff]  ;;  %v10944_v33 = vld [vmem:[#allocation34_spill] sm:$0xff]  ;;  %v10945_v57 = vld [vmem:[#allocation81_spill] sm:$0xff] }
 0x35c   : > { %v3256_v23 = vadd.f32 %v3240_v60, %v3224_v58  ;;  %v3257_v32 = vadd.f32 %v3241_v1, %v3225_v6  ;;  %v5694_v21 = vadd.f32 -1.0, %v10941_v30  ;;  %v3134_v35 = vsub.f32 1.3333334, %v5693_v2  ;;  %v10949_v52 = vld [vmem:[#allocation104_spill] sm:$0xff] }
 0x35d   : > { %v2526_v51 = vmul.f32 %v2494_v12, %v8360_v20  ;;  %v2527_v41 = vmul.f32 %v2495_v43, %v8362_v47  ;;  %v3150_v19 = vmul.f32 %v5693_v2, %v10942_v49  ;;  %vm928_vm12 = vcmp.ge.f32.partialorder %v10943_v14, 0.6  ;;  %v10946_v2 = vld [vmem:[#allocation30_spill] sm:$0xff]  ;;  %v6275_v43 = vld [vmem:[%s9894_s3 + $0x70] sm:$0xff]   ;;  %v10951_v49 = vld [vmem:[#allocation105_spill] sm:$0xff] }
 0x35e   : > { %v4399_v50 = vpack.c.bf16 %v3257_v32, %v3256_v23  ;;  %v3135_v7 = vsub.f32 1.3333334, %v5694_v21  ;;  %v3151_v40 = vmul.f32 %v5694_v21, %v10944_v33  ;;  %vm929_vm13 = vcmp.ge.f32.partialorder %v10945_v57, 0.6  ;;  %v10947_v21 = vld [vmem:[#allocation31_spill] sm:$0xff]  ;;  %v10950_v32 = vld [vmem:[#allocation102_spill] sm:$0xff]  ;;  %6202 = vmatprep.subr.bf16.mxu1 %v6275_v43 }
 0x35f   : > { %v8372_v16 = vadd.f32 %v2526_v51, %v2510_v44  ;;  %v8374_v58 = vadd.f32 %v2527_v41, %v2511_v26  ;;  %v8377_v60 = vsel %vm928_vm12, 1.0, %v10449_v62  ;;  %v8380_v6 = vsel %vm929_vm13, 1.0, %v10449_v62  ;;  %v10948_v51 = vld [vmem:[#allocation101_spill] sm:$0xff]  ;;  %6203 = vmatpush3.bf16.msra.mxu1 %v6275_v43 }
 0x360   : > { %6168 = vmatprep.mubr.msk.bf16.mxu1 %vm276_vm0, %v4399_v50  ;;  %v8385_v23 = vsub.f32 %v10946_v2, %v8377_v60  ;;  %v8389_v1 = vsub.f32 %v10947_v21, %v8380_v6  ;;  %v5455_v12 = vadd.f32 -5.0, %v10948_v51  ;;  %v5456_v44 = vadd.f32 -5.0, %v10949_v52  ;;  %v10952_v21 = vld [vmem:[#allocation35_spill] sm:$0xff] }
 0x361   : > { %v3166_v8 = vmul.f32 %v3134_v35, %v8372_v16  ;;  %v3167_v26 = vmul.f32 %v3135_v7, %v8374_v58  ;;  %v5583_v41 = vadd.f32 -2.0, %v10950_v32  ;;  %v5584_v50 = vadd.f32 -2.0, %v10951_v49  ;;  %v10956_v32 = vld [vmem:[#allocation103_spill] sm:$0xff] }
 0x362   : > { %v1776_v33 = vsub.f32 2.0, %v5455_v12  ;;  %v1777_v2 = vsub.f32 2.0, %v5456_v44  ;;  %v1792_v28 = vmul.f32 %v5455_v12, %v10952_v21  ;;  %v1793_v34 = vmul.f32 %v5456_v44, %v10953_v10  ;;  %v10957_v12 = vld [vmem:[#allocation106_spill] sm:$0xff] }
 0x363   : > { %v3182_v39 = vadd.f32 %v3166_v8, %v3150_v19  ;;  %v3183_v55 = vadd.f32 %v3167_v26, %v3151_v40  ;;  %v2496_v42 = vsub.f32 1.5, %v5583_v41  ;;  %v2497_v17 = vsub.f32 1.5, %v5584_v50  ;;  %v10961_v44 = vld [vmem:[#allocation22_spill] sm:$0xff] }
 0x364   : > { %v1808_v35 = vmul.f32 %v1776_v33, %v8385_v23  ;;  %v1809_v7 = vmul.f32 %v1777_v2, %v8389_v1  ;;  %v2512_v22 = vmul.f32 %v5583_v41, %v10954_v63  ;;  %v2513_v27 = vmul.f32 %v5584_v50, %v10955_v54  ;;  %v10965_v50 = vld [vmem:[#allocation54_spill] sm:$0xff]  ;;  %v10967_v2 = vld [vmem:[#allocation57_spill] sm:$0xff] }
 0x365   : > { %v4240_v49 = vpack.c.bf16 %v3183_v55, %v3182_v39  ;;  %v5695_v52 = vadd.f32 -1.0, %v10956_v32  ;;  %v5696_v21 = vadd.f32 -1.0, %v10957_v12  ;;  %vm970_vm14 = vcmp.ge.f32.partialorder %v10862_v3, 1.0  ;;  %v10960_v55 = vld [vmem:[#allocation21_spill] sm:$0xff] }
 0x366   : > { %v8409_v10 = vadd.f32 %v1808_v35, %v1792_v28  ;;  %v8411_v19 = vadd.f32 %v1809_v7, %v1793_v34  ;;  %vm971_vm15 = vcmp.ge.f32.partialorder %v10863_v5, 1.0  ;;  %v8415_v40 = vsel %vm970_vm14, 1.0, %v10449_v62 }
 0x367   : > { %10959 = vst [vmem:[#allocation113_spill] sm:$0xff] %v8415_v40  ;;  %6153 = vmatmul.mubr.msk.bf16.gmra.mxu0 %vm276_vm0, %v4240_v49  ;;  %v3136_v63 = vsub.f32 1.3333334, %v5695_v52  ;;  %v3137_v54 = vsub.f32 1.3333334, %v5696_v21  ;;  %v3152_v39 = vmul.f32 %v5695_v52, %v10960_v55  ;;  %v3153_v43 = vmul.f32 %v5696_v21, %v10961_v44  ;;  %v10968_v55 = vld [vmem:[#allocation19_spill] sm:$0xff] }
 0x368   : > { %10958 = vst [vmem:[#allocation92_spill] sm:$0xff] %v8411_v19  ;;  %v2528_v8 = vmul.f32 %v2496_v42, %v8409_v10  ;;  %v2529_v28 = vmul.f32 %v2497_v17, %v8411_v19  ;;  %v8423_v34 = vsel %vm971_vm15, 1.0, %v10449_v62  ;;  %v8427_v26 = vsub.f32 %v8157_v53, %v8415_v40  ;;  %v10972_v19 = vld [vmem:[#allocation58_spill] sm:$0xff] }
 0x369   : > { %10962 = vst [vmem:[#allocation114_spill] sm:$0xff] %v8423_v34  ;;  %v8431_v41 = vsub.f32 %v8161_v15, %v8423_v34  ;;  %v5465_v49 = vadd.f32 -6.0, %v10866_v37  ;;  %v5466_v52 = vadd.f32 -6.0, %v10867_v31  ;;  %v5593_v33 = vadd.f32 -2.5, %v10965_v50  ;;  %v10969_v15 = vld [vmem:[#allocation74_spill] sm:$0xff] }
 0x36a   : > { %10963 = vst [vmem:[#allocation121_spill] sm:$0xff] %v8427_v26  ;;  %v8436_v42 = vadd.f32 %v2528_v8, %v2512_v22  ;;  %v8438_v17 = vadd.f32 %v2529_v28, %v2513_v27  ;;  %v5594_v35 = vadd.f32 -2.5, %v10967_v2  ;;  %v5705_v7 = vadd.f32 -1.3333334, %v10877_v36  ;;  %v10970_v8 = vld [vmem:[#allocation47_spill] sm:$0xff]  ;;  %v10971_v2 = vld [vmem:[#allocation48_spill] sm:$0xff] }
 0x36b   : > { %10964 = vst [vmem:[#allocation122_spill] sm:$0xff] %v8431_v41  ;;  %v1850_v53 = vsub.f32 2.0, %v5465_v49  ;;  %v1851_v21 = vsub.f32 2.0, %v5466_v52  ;;  %v1866_v44 = vmul.f32 %v5465_v49, %v10968_v55  ;;  %v1867_v34 = vmul.f32 %v5466_v52, %v10969_v15 }
 0x36c   : > { %10966 = vst [vmem:[#allocation123_spill] sm:$0xff] %v8438_v17  ;;  %v3168_v37 = vmul.f32 %v3136_v63, %v8436_v42  ;;  %v3169_v31 = vmul.f32 %v3137_v54, %v8438_v17  ;;  %v2570_v40 = vsub.f32 1.5, %v5593_v33  ;;  %v2571_v50 = vsub.f32 1.5, %v5594_v35  ;;  %v10975_v54 = vld [vmem:[#allocation52_spill] sm:$0xff]  ;;  %v10976_v17 = vld [vmem:[#allocation33_spill] sm:$0xff] }
 0x36d   : > { %v1882_v22 = vmul.f32 %v1850_v53, %v8427_v26  ;;  %v1883_v27 = vmul.f32 %v1851_v21, %v8431_v41  ;;  %v2586_v28 = vmul.f32 %v5593_v33, %v10970_v8  ;;  %v2587_v36 = vmul.f32 %v5594_v35, %v10971_v2  ;;  %v10977_v21 = vld [vmem:[#allocation111_spill] sm:$0xff]  ;;  %v10978_v33 = vld [vmem:[#allocation49_spill] sm:$0xff]  ;;  %v10985_v35 = vld [vmem:[#allocation68_spill] sm:$0xff] }
 0x36e   : > { %v3184_v5 = vadd.f32 %v3168_v37, %v3152_v39  ;;  %v3185_v3 = vadd.f32 %v3169_v31, %v3153_v43  ;;  %v5706_v49 = vadd.f32 -1.3333334, %v10972_v19  ;;  %v3210_v55 = vsub.f32 1.3333334, %v5705_v7  ;;  %v10993_v19 = vld [vmem:[#allocation72_spill] sm:$0xff] }
 0x36f   : > { %v8451_v52 = vadd.f32 %v1882_v22, %v1866_v44  ;;  %v8453_v63 = vadd.f32 %v1883_v27, %v1867_v34  ;;  %v3226_v15 = vmul.f32 %v5705_v7, %v10975_v54  ;;  %vm972_vm1 = vcmp.ge.f32.partialorder %v10976_v17, 1.0  ;;  %v10981_v34 = vld [vmem:[#allocation50_spill] sm:$0xff]  ;;  %v10986_v7 = vld [vmem:[#allocation69_spill] sm:$0xff] }
 0x370   : > { %v4241_v53 = vpack.c.bf16 %v3185_v3, %v3184_v5  ;;  %v3211_v26 = vsub.f32 1.3333334, %v5706_v49  ;;  %v3227_v41 = vmul.f32 %v5706_v49, %v10977_v21  ;;  %vm973_vm2 = vcmp.ge.f32.partialorder %v10978_v33, 1.0  ;;  %v10983_v5 = vld [vmem:[#allocation51_spill] sm:$0xff]  ;;  %v10989_v27 = vld [vmem:[#allocation70_spill] sm:$0xff]  ;;  %v10992_v33 = vld [vmem:[#allocation29_spill] sm:$0xff] }
 0x371   : > { %10973 = vst [vmem:[#allocation124_spill] sm:$0xff] %v8451_v52  ;;  %10974 = vst [vmem:[#allocation32_spill] sm:$0xff] %v8453_v63  ;;  %v2602_v37 = vmul.f32 %v2570_v40, %v8451_v52  ;;  %v2603_v31 = vmul.f32 %v2571_v50, %v8453_v63  ;;  %v8462_v39 = vsel %vm972_vm1, 1.0, %v10449_v62  ;;  %v8465_v43 = vsel %vm973_vm2, 1.0, %v10449_v62  ;;  %v10990_v49 = vld [vmem:[#allocation71_spill] sm:$0xff] }
 0x372   : > { %10979 = vst [vmem:[#allocation34_spill] sm:$0xff] %v8462_v39  ;;  %10980 = vst [vmem:[#allocation30_spill] sm:$0xff] %v8465_v43  ;;  %6156 = vmatprep.mubr.msk.bf16.mxu0 %vm276_vm0, %v4241_v53  ;;  %v8470_v3 = vsub.f32 %v10981_v34, %v8462_v39  ;;  %v8474_v2 = vsub.f32 %v10983_v5, %v8465_v43  ;;  %v5467_v40 = vadd.f32 -6.0, %v10985_v35  ;;  %v5468_v50 = vadd.f32 -6.0, %v10986_v7  ;;  %v10991_v34 = vld [vmem:[#allocation112_spill] sm:$0xff] }
 0x373   : > { %v8478_v44 = vadd.f32 %v2602_v37, %v2586_v28  ;;  %v8480_v22 = vadd.f32 %v2603_v31, %v2587_v36  ;;  %v5595_v8 = vadd.f32 -2.5, %v10989_v27  ;;  %v5596_v54 = vadd.f32 -2.5, %v10990_v49 }
 0x374   : > { %10982 = vst [vmem:[#allocation31_spill] sm:$0xff] %v8470_v3  ;;  %10984 = vst [vmem:[#allocation35_spill] sm:$0xff] %v8474_v2  ;;  %v1852_v53 = vsub.f32 2.0, %v5467_v40  ;;  %v1853_v21 = vsub.f32 2.0, %v5468_v50  ;;  %v1868_v39 = vmul.f32 %v5467_v40, %v10991_v34  ;;  %v1869_v17 = vmul.f32 %v5468_v50, %v10992_v33  ;;  %v10997_v34 = vld [vmem:[#allocation98_spill] sm:$0xff] }
 0x375   : > { %10987 = vst [vmem:[#allocation36_spill] sm:$0xff] %v8478_v44  ;;  %10988 = vst [vmem:[#allocation37_spill] sm:$0xff] %v8480_v22  ;;  %v3242_v5 = vmul.f32 %v3210_v55, %v8478_v44  ;;  %v3243_v43 = vmul.f32 %v3211_v26, %v8480_v22  ;;  %v2572_v35 = vsub.f32 1.5, %v5595_v8  ;;  %v2573_v7 = vsub.f32 1.5, %v5596_v54  ;;  %v10996_v26 = vld [vmem:[#allocation79_spill] sm:$0xff]  ;;  %v11011_v44 = vld [vmem:[#allocation117_spill] sm:$0xff] }
 0x376   : > { %v1884_v28 = vmul.f32 %v1852_v53, %v8470_v3  ;;  %v1885_v36 = vmul.f32 %v1853_v21, %v8474_v2  ;;  %v2588_v37 = vmul.f32 %v5595_v8, %v8230_v46  ;;  %v2589_v31 = vmul.f32 %v5596_v54, %v8232_v11  ;;  %v11000_v8 = vld [vmem:[#allocation115_spill] sm:$0xff]  ;;  %v11010_v3 = vld [vmem:[#allocation64_spill] sm:$0xff] }
 0x377   : > { %v3258_v49 = vadd.f32 %v3242_v5, %v3226_v15  ;;  %v3259_v27 = vadd.f32 %v3243_v43, %v3227_v41  ;;  %v5707_v40 = vadd.f32 -1.3333334, %v10993_v19  ;;  %v5708_v33 = vadd.f32 -1.3333334, %v10901_v38  ;;  %v10998_v43 = vld [vmem:[#allocation59_spill] sm:$0xff] }
 0x378   : > { %v8494_v50 = vadd.f32 %v1884_v28, %v1868_v39  ;;  %v8496_v55 = vadd.f32 %v1885_v36, %v1869_v17  ;;  %vm930_vm3 = vcmp.ge.f32.partialorder %v10996_v26, 0.6  ;;  %vm931_vm4 = vcmp.ge.f32.partialorder %v10997_v34, 0.6  ;;  %v11006_v28 = vld [vmem:[#allocation116_spill] sm:$0xff] }
 0x379   : > { %v4400_v53 = vpack.c.bf16 %v3259_v27, %v3258_v49  ;;  %v3212_v21 = vsub.f32 1.3333334, %v5707_v40  ;;  %v3213_v2 = vsub.f32 1.3333334, %v5708_v33  ;;  %v3228_v46 = vmul.f32 %v5707_v40, %v8248_v48  ;;  %v11001_v49 = vld [vmem:[#allocation118_spill] sm:$0xff] }
 0x37a   : > { %10994 = vst [vmem:[#allocation45_spill] sm:$0xff] %v8494_v50  ;;  %10995 = vst [vmem:[#allocation21_spill] sm:$0xff] %v8496_v55  ;;  %v2604_v11 = vmul.f32 %v2572_v35, %v8494_v50  ;;  %v2605_v41 = vmul.f32 %v2573_v7, %v8496_v55  ;;  %v3229_v15 = vmul.f32 %v5708_v33, %v8250_v61  ;;  %v8505_v39 = vsel %vm930_vm3, 1.0, %v10449_v62  ;;  %v11004_v61 = vld [vmem:[#allocation60_spill] sm:$0xff] }
 0x37b   : > { %6169 = vmatmul.mubr.msk.bf16.gmra.mxu1 %vm276_vm0, %v4400_v53  ;;  %v8509_v17 = vsel %vm931_vm4, 1.0, %v10449_v62  ;;  %v8513_v27 = vsub.f32 %v10998_v43, %v8505_v39  ;;  %v5457_v48 = vadd.f32 -5.0, %v11000_v8  ;;  %v5458_v35 = vadd.f32 -5.0, %v11001_v49  ;;  %v11007_v53 = vld [vmem:[#allocation61_spill] sm:$0xff]  ;;  %v11008_v43 = vld [vmem:[#allocation62_spill] sm:$0xff] }
 0x37c   : > { %v8517_v54 = vadd.f32 %v2604_v11, %v2588_v37  ;;  %v8519_v7 = vadd.f32 %v2605_v41, %v2589_v31  ;;  %v8523_v5 = vsub.f32 %v11004_v61, %v8509_v17  ;;  %v5585_v36 = vadd.f32 -2.0, %v11006_v28  ;;  %v11009_v37 = vld [vmem:[#allocation119_spill] sm:$0xff] }
 0x37d   : > { %10999 = vst [vmem:[#allocation22_spill] sm:$0xff] %v8513_v27  ;;  %v1778_v40 = vsub.f32 2.0, %v5457_v48  ;;  %v1779_v33 = vsub.f32 2.0, %v5458_v35  ;;  %v1794_v55 = vmul.f32 %v5457_v48, %v11007_v53  ;;  %v1795_v50 = vmul.f32 %v5458_v35, %v11008_v43  ;;  %v11012_v53 = vld [vmem:[#allocation65_spill] sm:$0xff] }
 0x37e   : > { %11002 = vst [vmem:[#allocation19_spill] sm:$0xff] %v8517_v54  ;;  %11003 = vst [vmem:[#allocation74_spill] sm:$0xff] %v8519_v7  ;;  %v3244_v38 = vmul.f32 %v3212_v21, %v8517_v54  ;;  %v3245_v19 = vmul.f32 %v3213_v2, %v8519_v7  ;;  %v5586_v11 = vadd.f32 -2.0, %v11009_v37  ;;  %v2498_v31 = vsub.f32 1.5, %v5585_v36  ;;  %v11015_v2 = vld [vmem:[#allocation120_spill] sm:$0xff] }
 0x37f   : > { %11005 = vst [vmem:[#allocation47_spill] sm:$0xff] %v8523_v5  ;;  %v1810_v41 = vmul.f32 %v1778_v40, %v8513_v27  ;;  %v1811_v61 = vmul.f32 %v1779_v33, %v8523_v5  ;;  %v2514_v22 = vmul.f32 %v5585_v36, %v11010_v3  ;;  %v5697_v63 = vadd.f32 -1.0, %v11011_v44  ;;  %v11016_v40 = vld [vmem:[#allocation77_spill] sm:$0xff]  ;;  %v11017_v33 = vld [vmem:[#allocation3_spill] sm:$0xff]  ;;  %v11018_v3 = vld [vmem:[#allocation4_spill] sm:$0xff] }
 0x380   : > { %v3260_v52 = vadd.f32 %v3244_v38, %v3228_v46  ;;  %v3261_v28 = vadd.f32 %v3245_v19, %v3229_v15  ;;  %v2499_v48 = vsub.f32 1.5, %v5586_v11  ;;  %v2515_v35 = vmul.f32 %v5586_v11, %v11012_v53  ;;  %v11019_v15 = vld [vmem:[#allocation78_spill] sm:$0xff] }
 0x381   : > { %v8536_v43 = vadd.f32 %v1810_v41, %v1794_v55  ;;  %v8538_v21 = vadd.f32 %v1811_v61, %v1795_v50  ;;  %v5698_v7 = vadd.f32 -1.0, %v11015_v2  ;;  %v3138_v54 = vsub.f32 1.3333334, %v5697_v63  ;;  %v11023_v36 = vld [vmem:[#allocation10_spill] sm:$0xff]  ;;  %v11026_v61 = vld [vmem:[#allocation75_spill] sm:$0xff] }
 0x382   : > { %v4401_v37 = vpack.c.bf16 %v3261_v28, %v3260_v52  ;;  %v3154_v27 = vmul.f32 %v5697_v63, %v11016_v40  ;;  %vm1012_vm5 = vcmp.ge.f32.partialorder %v11017_v33, 1.4  ;;  %vm1013_vm6 = vcmp.ge.f32.partialorder %v11018_v3, 1.4  ;;  %v11022_v63 = vld [vmem:[#allocation7_spill] sm:$0xff] }
 0x383   : > { %11013 = vst [vmem:[#allocation48_spill] sm:$0xff] %v8536_v43  ;;  %11014 = vst [vmem:[#allocation52_spill] sm:$0xff] %v8538_v21  ;;  %v2530_v38 = vmul.f32 %v2498_v31, %v8536_v43  ;;  %v2531_v19 = vmul.f32 %v2499_v48, %v8538_v21  ;;  %v3139_v46 = vsub.f32 1.3333334, %v5698_v7  ;;  %v3155_v55 = vmul.f32 %v5698_v7, %v11019_v15  ;;  %v11028_v7 = vld [vmem:[#allocation76_spill] sm:$0xff]  ;;  %v11030_v15 = vld [vmem:[#allocation66_spill] sm:$0xff] }
 0x384   : > { %6172 = vmatprep.mubr.msk.bf16.mxu1 %vm276_vm0, %v4401_v37  ;;  %v8549_v50 = vsel %vm1012_vm5, 1.0, %v10449_v62  ;;  %v8552_v52 = vsel %vm1013_vm6, 1.0, %v10449_v62  ;;  %v5475_v28 = vadd.f32 -7.0, %v11022_v63  ;;  %v5476_v11 = vadd.f32 -7.0, %v11023_v36  ;;  %v11031_v33 = vld [vmem:[#allocation67_spill] sm:$0xff]  ;;  %v11035_v21 = vld [vmem:[#allocation14_spill] sm:$0xff] }
 0x385   : > { %11020 = vst [vmem:[#allocation111_spill] sm:$0xff] %v8549_v50  ;;  %11021 = vst [vmem:[#allocation50_spill] sm:$0xff] %v8552_v52  ;;  %v8556_v41 = vadd.f32 %v2530_v38, %v2514_v22  ;;  %v8558_v31 = vadd.f32 %v2531_v19, %v2515_v35  ;;  %v8562_v48 = vsub.f32 %v11026_v61, %v8549_v50  ;;  %v11032_v35 = vld [vmem:[#allocation11_spill] sm:$0xff]  ;;  %v11033_v19 = vld [vmem:[#allocation13_spill] sm:$0xff]  ;;  %v5716_v43 = vadd.f32 -1.6666666, %v11035_v21 }
 0x386   : > { %v8566_v37 = vsub.f32 %v11028_v7, %v8552_v52  ;;  %v1924_v53 = vsub.f32 2.0, %v5475_v28  ;;  %v1925_v40 = vsub.f32 2.0, %v5476_v11  ;;  %v1940_v3 = vmul.f32 %v5475_v28, %v11030_v15  ;;  %v11034_v7 = vld [vmem:[#allocation12_spill] sm:$0xff] }
 0x387   : > { %11024 = vst [vmem:[#allocation51_spill] sm:$0xff] %v8556_v41  ;;  %11025 = vst [vmem:[#allocation112_spill] sm:$0xff] %v8558_v31  ;;  %v1941_v63 = vmul.f32 %v5476_v11, %v11031_v33  ;;  %v3170_v36 = vmul.f32 %v3138_v54, %v8556_v41  ;;  %v3171_v22 = vmul.f32 %v3139_v46, %v8558_v31  ;;  %v5603_v38 = vadd.f32 -3.0, %v11032_v35  ;;  %v11036_v46 = vld [vmem:[#allocation17_spill] sm:$0xff]  ;;  %v11037_v31 = vld [vmem:[#allocation18_spill] sm:$0xff] }
 0x388   : > { %11027 = vst [vmem:[#allocation29_spill] sm:$0xff] %v8562_v48  ;;  %11029 = vst [vmem:[#allocation59_spill] sm:$0xff] %v8566_v37  ;;  %v5604_v2 = vadd.f32 -3.0, %v11033_v19  ;;  %v1956_v61 = vmul.f32 %v1924_v53, %v8562_v48  ;;  %v1957_v50 = vmul.f32 %v1925_v40, %v8566_v37  ;;  %v5715_v52 = vadd.f32 -1.6666666, %v11034_v7  ;;  %v11038_v40 = vld [vmem:[#allocation20_spill] sm:$0xff] }
 0x389   : > { %v3186_v5 = vadd.f32 %v3170_v36, %v3154_v27  ;;  %v3187_v28 = vadd.f32 %v3171_v22, %v3155_v55  ;;  %v2644_v15 = vsub.f32 1.5, %v5603_v38  ;;  %v2660_v35 = vmul.f32 %v5603_v38, %v11036_v46  ;;  %v11039_v55 = vld [vmem:[#allocation46_spill] sm:$0xff] }
 0x38a   : > { %v2645_v33 = vsub.f32 1.5, %v5604_v2  ;;  %v8578_v11 = vadd.f32 %v1956_v61, %v1940_v3  ;;  %v8580_v54 = vadd.f32 %v1957_v50, %v1941_v63  ;;  %v2661_v19 = vmul.f32 %v5604_v2, %v11037_v31 }
 0x38b   : > { %v4242_v41 = vpack.c.bf16 %v3187_v28, %v3186_v5  ;;  %v3284_v53 = vsub.f32 1.3333334, %v5715_v52  ;;  %v3285_v48 = vsub.f32 1.3333334, %v5716_v43  ;;  %v3300_v37 = vmul.f32 %v5715_v52, %v11038_v40 }
 0x38c   : > { %v2676_v7 = vmul.f32 %v2644_v15, %v8578_v11  ;;  %v2677_v27 = vmul.f32 %v2645_v33, %v8580_v54  ;;  %v3301_v36 = vmul.f32 %v5716_v43, %v11039_v55  ;;  %vm974_vm7 = vcmp.ge.f32.partialorder %v10926_v0, 1.0 }
 0x38d   : > { %6157 = vmatmul.mubr.msk.bf16.gmra.mxu0 %vm276_vm0, %v4242_v41  ;;  %vm975_vm8 = vcmp.ge.f32.partialorder %v10927_v13, 1.0  ;;  %v8592_v3 = vsel %vm974_vm7, 1.0, %v10449_v62  ;;  %v5469_v5 = vadd.f32 -6.0, %v10928_v29  ;;  %v5470_v2 = vadd.f32 -6.0, %v10929_v9  ;;  %v11087_v9 = vld [vmem:[#allocation109_spill] sm:$0xff]  ;;  %v11088_v29 = vld [vmem:[#allocation110_spill] sm:$0xff] }
 0x38e   : > { %11040 = vst [vmem:[#allocation60_spill] sm:$0xff] %v8592_v3  ;;  %v8596_v50 = vadd.f32 %v2676_v7, %v2660_v35  ;;  %v8598_v52 = vadd.f32 %v2677_v27, %v2661_v19  ;;  %v8601_v63 = vsel %vm975_vm8, 1.0, %v10449_v62  ;;  %v8605_v43 = vsub.f32 %v8328_v18, %v8592_v3 }
 0x38f   : > { %11041 = vst [vmem:[#allocation61_spill] sm:$0xff] %v8601_v63  ;;  %v8609_v41 = vsub.f32 %v8335_v4, %v8601_v63  ;;  %v1854_v31 = vsub.f32 2.0, %v5469_v5  ;;  %v1855_v22 = vsub.f32 2.0, %v5470_v2  ;;  %v1870_v38 = vmul.f32 %v5469_v5, %v8339_v45 }
 0x390   : > { %11042 = vst [vmem:[#allocation62_spill] sm:$0xff] %v8605_v43  ;;  %v3316_v35 = vmul.f32 %v3284_v53, %v8596_v50  ;;  %v3317_v19 = vmul.f32 %v3285_v48, %v8598_v52  ;;  %v1871_v61 = vmul.f32 %v5470_v2, %v8344_v59  ;;  %v5597_v7 = vadd.f32 -2.5, %v10936_v24 }
 0x391   : > { %11043 = vst [vmem:[#allocation64_spill] sm:$0xff] %v8609_v41  ;;  %v1886_v28 = vmul.f32 %v1854_v31, %v8605_v43  ;;  %v1887_v18 = vmul.f32 %v1855_v22, %v8609_v41  ;;  %v5598_v15 = vadd.f32 -2.5, %v10937_v25  ;;  %v5709_v4 = vadd.f32 -1.3333334, %v10938_v56  ;;  %v11086_v25 = vld [vmem:[#allocation108_spill] sm:$0xff] }
 0x392   : > { %v3332_v33 = vadd.f32 %v3316_v35, %v3300_v37  ;;  %v3333_v46 = vadd.f32 %v3317_v19, %v3301_v36  ;;  %v2574_v40 = vsub.f32 1.5, %v5597_v7  ;;  %v2590_v45 = vmul.f32 %v5597_v7, %v8360_v20  ;;  %v11052_v7 = vld [vmem:[#allocation104_spill] sm:$0xff] }
 0x393   : > { %v8621_v53 = vadd.f32 %v1886_v28, %v1870_v38  ;;  %v8623_v48 = vadd.f32 %v1887_v18, %v1871_v61  ;;  %v2575_v59 = vsub.f32 1.5, %v5598_v15  ;;  %v2591_v27 = vmul.f32 %v5598_v15, %v8362_v47  ;;  %v11053_v18 = vld [vmem:[#allocation102_spill] sm:$0xff] }
 0x394   : > { %v4559_v55 = vpack.c.bf16 %v3333_v46, %v3332_v33  ;;  %v5710_v5 = vadd.f32 -1.3333334, %v10941_v30  ;;  %v3214_v2 = vsub.f32 1.3333334, %v5709_v4  ;;  %v3230_v31 = vmul.f32 %v5709_v4, %v8372_v16  ;;  %v11054_v4 = vld [vmem:[#allocation105_spill] sm:$0xff] }
 0x395   : > { %11044 = vst [vmem:[#allocation65_spill] sm:$0xff] %v8621_v53  ;;  %11045 = vst [vmem:[#allocation77_spill] sm:$0xff] %v8623_v48  ;;  %v2606_v22 = vmul.f32 %v2574_v40, %v8621_v53  ;;  %v2607_v37 = vmul.f32 %v2575_v59, %v8623_v48  ;;  %vm976_vm9 = vcmp.ge.f32.partialorder %v10943_v14, 1.0  ;;  %vm977_vm10 = vcmp.ge.f32.partialorder %v10945_v57, 1.0 }
 0x396   : > { %6184 = vmatprep.mubr.msk.bf16.mxu0 %vm276_vm0, %v4559_v55  ;;  %v3215_v20 = vsub.f32 1.3333334, %v5710_v5  ;;  %v3231_v36 = vmul.f32 %v5710_v5, %v8374_v58  ;;  %v8635_v47 = vsel %vm976_vm9, 1.0, %v10449_v62  ;;  %v8638_v38 = vsel %vm977_vm10, 1.0, %v10449_v62 }
 0x397   : > { %11046 = vst [vmem:[#allocation78_spill] sm:$0xff] %v8635_v47  ;;  %11047 = vst [vmem:[#allocation75_spill] sm:$0xff] %v8638_v38  ;;  %v8640_v16 = vadd.f32 %v2606_v22, %v2590_v45  ;;  %v8642_v35 = vadd.f32 %v2607_v37, %v2591_v27  ;;  %v8646_v19 = vsub.f32 %v8377_v60, %v8635_v47  ;;  %v5471_v58 = vadd.f32 -6.0, %v10948_v51 }
 0x398   : > { %v8650_v61 = vsub.f32 %v8380_v6, %v8638_v38  ;;  %v5472_v28 = vadd.f32 -6.0, %v11052_v7  ;;  %v5599_v15 = vadd.f32 -2.5, %v11053_v18  ;;  %v5600_v33 = vadd.f32 -2.5, %v11054_v4  ;;  %v11055_v7 = vld [vmem:[#allocation92_spill] sm:$0xff] }
 0x399   : > { %11048 = vst [vmem:[#allocation76_spill] sm:$0xff] %v8640_v16  ;;  %11049 = vst [vmem:[#allocation66_spill] sm:$0xff] %v8642_v35  ;;  %v3246_v46 = vmul.f32 %v3214_v2, %v8640_v16  ;;  %v3247_v40 = vmul.f32 %v3215_v20, %v8642_v35  ;;  %v5711_v45 = vadd.f32 -1.3333334, %v10956_v32  ;;  %v5712_v60 = vadd.f32 -1.3333334, %v10957_v12 }
 0x39a   : > { %11050 = vst [vmem:[#allocation67_spill] sm:$0xff] %v8646_v19  ;;  %11051 = vst [vmem:[#allocation17_spill] sm:$0xff] %v8650_v61  ;;  %v1856_v59 = vsub.f32 2.0, %v5471_v58  ;;  %v1857_v27 = vsub.f32 2.0, %v5472_v28  ;;  %v1872_v6 = vmul.f32 %v5471_v58, %v8385_v23  ;;  %v1873_v55 = vmul.f32 %v5472_v28, %v8389_v1  ;;  %v11059_v58 = vld [vmem:[#allocation2_spill] sm:$0xff]  ;;  %v11060_v28 = vld [vmem:[#allocation5_spill] sm:$0xff] }
 0x39b   : > { %v3262_v5 = vadd.f32 %v3246_v46, %v3230_v31  ;;  %v3263_v22 = vadd.f32 %v3247_v40, %v3231_v36  ;;  %v2576_v37 = vsub.f32 1.5, %v5599_v15  ;;  %v2577_v18 = vsub.f32 1.5, %v5600_v33  ;;  %v11058_v31 = vld [vmem:[#allocation123_spill] sm:$0xff]  ;;  %v11074_v16 = vld [vmem:[#allocation28_spill] sm:$0xff] }
 0x39c   : > { %v1888_v4 = vmul.f32 %v1856_v59, %v8646_v19  ;;  %v1889_v2 = vmul.f32 %v1857_v27, %v8650_v61  ;;  %v2592_v20 = vmul.f32 %v5599_v15, %v8409_v10  ;;  %v2593_v32 = vmul.f32 %v5600_v33, %v11055_v7  ;;  %v11061_v7 = vld [vmem:[#allocation23_spill] sm:$0xff]  ;;  %v11062_v33 = vld [vmem:[#allocation24_spill] sm:$0xff]  ;;  %v11070_v61 = vld [vmem:[#allocation26_spill] sm:$0xff] }
 0x39d   : > { %v4402_v51 = vpack.c.bf16 %v3263_v22, %v3262_v5  ;;  %v3216_v12 = vsub.f32 1.3333334, %v5711_v45  ;;  %v3217_v38 = vsub.f32 1.3333334, %v5712_v60  ;;  %v3232_v47 = vmul.f32 %v5711_v45, %v8436_v42  ;;  %v11063_v45 = vld [vmem:[#allocation83_spill] sm:$0xff] }
 0x39e   : > { %v8667_v23 = vadd.f32 %v1888_v4, %v1872_v6  ;;  %v8669_v1 = vadd.f32 %v1889_v2, %v1873_v55  ;;  %v3233_v36 = vmul.f32 %v5712_v60, %v11058_v31  ;;  %vm1014_vm11 = vcmp.ge.f32.partialorder %v11059_v58, 1.4  ;;  %v11065_v55 = vld [vmem:[#allocation85_spill] sm:$0xff] }
 0x39f   : > { %6173 = vmatmul.mubr.msk.bf16.gmra.mxu1 %vm276_vm0, %v4402_v51  ;;  %vm1015_vm12 = vcmp.ge.f32.partialorder %v11060_v28, 1.4  ;;  %v8676_v10 = vsel %vm1014_vm11, 1.0, %v10449_v62  ;;  %v5477_v15 = vadd.f32 -7.0, %v11061_v7  ;;  %v5478_v46 = vadd.f32 -7.0, %v11062_v33  ;;  %v11064_v51 = vld [vmem:[#allocation84_spill] sm:$0xff] }
 0x3a0   : > { %11056 = vst [vmem:[#allocation18_spill] sm:$0xff] %v8667_v23  ;;  %11057 = vst [vmem:[#allocation20_spill] sm:$0xff] %v8669_v1  ;;  %v2608_v42 = vmul.f32 %v2576_v37, %v8667_v23  ;;  %v2609_v4 = vmul.f32 %v2577_v18, %v8669_v1  ;;  %v8683_v40 = vsel %vm1015_vm12, 1.0, %v10449_v62  ;;  %v8687_v60 = vsub.f32 %v11063_v45, %v8676_v10  ;;  %v11068_v18 = vld [vmem:[#allocation93_spill] sm:$0xff] }
 0x3a1   : > { %v8691_v59 = vsub.f32 %v11064_v51, %v8683_v40  ;;  %v1926_v27 = vsub.f32 2.0, %v5477_v15  ;;  %v1927_v6 = vsub.f32 2.0, %v5478_v46  ;;  %v1942_v5 = vmul.f32 %v5477_v15, %v11065_v55  ;;  %v11069_v31 = vld [vmem:[#allocation25_spill] sm:$0xff]  ;;  %v11071_v51 = vld [vmem:[#allocation27_spill] sm:$0xff] }
 0x3a2   : > { %v8694_v22 = vadd.f32 %v2608_v42, %v2592_v20  ;;  %v8696_v37 = vadd.f32 %v2609_v4, %v2593_v32  ;;  %v1943_v2 = vmul.f32 %v5478_v46, %v11068_v18  ;;  %v5605_v1 = vadd.f32 -3.0, %v11069_v31  ;;  %v11072_v42 = vld [vmem:[#allocation94_spill] sm:$0xff]  ;;  %v11073_v18 = vld [vmem:[#allocation100_spill] sm:$0xff] }
 0x3a3   : > { %v1958_v23 = vmul.f32 %v1926_v27, %v8687_v60  ;;  %v1959_v45 = vmul.f32 %v1927_v6, %v8691_v59  ;;  %v5606_v19 = vadd.f32 -3.0, %v11070_v61  ;;  %v5717_v57 = vadd.f32 -1.6666666, %v11071_v51 }
 0x3a4   : > { %11066 = vst [vmem:[#allocation46_spill] sm:$0xff] %v8694_v22  ;;  %11067 = vst [vmem:[#allocation92_spill] sm:$0xff] %v8696_v37  ;;  %v3248_v35 = vmul.f32 %v3216_v12, %v8694_v22  ;;  %v3249_v15 = vmul.f32 %v3217_v38, %v8696_v37  ;;  %v2646_v20 = vsub.f32 1.5, %v5605_v1  ;;  %v2662_v32 = vmul.f32 %v5605_v1, %v11072_v42  ;;  %v11075_v38 = vld [vmem:[#allocation96_spill] sm:$0xff]  ;;  %v11082_v42 = vld [vmem:[#allocation39_spill] sm:$0xff] }
 0x3a5   : > { %v8707_v4 = vadd.f32 %v1958_v23, %v1942_v5  ;;  %v8709_v46 = vadd.f32 %v1959_v45, %v1943_v2  ;;  %v2647_v55 = vsub.f32 1.5, %v5606_v19  ;;  %v2663_v27 = vmul.f32 %v5606_v19, %v11073_v18  ;;  %v11076_v22 = vld [vmem:[#allocation8_spill] sm:$0xff]  ;;  %v11077_v5 = vld [vmem:[#allocation97_spill] sm:$0xff]  ;;  %v11078_v45 = vld [vmem:[#allocation15_spill] sm:$0xff] }
 0x3a6   : > { %v3264_v14 = vadd.f32 %v3248_v35, %v3232_v47  ;;  %v3265_v6 = vadd.f32 %v3249_v15, %v3233_v36  ;;  %v5718_v30 = vadd.f32 -1.6666666, %v11074_v16  ;;  %v3286_v48 = vsub.f32 1.3333334, %v5717_v57 }
 0x3a7   : > { %v2678_v53 = vmul.f32 %v2646_v20, %v8707_v4  ;;  %v2679_v12 = vmul.f32 %v2647_v55, %v8709_v46  ;;  %v3302_v37 = vmul.f32 %v5717_v57, %v11075_v38  ;;  %vm1016_vm13 = vcmp.ge.f32.partialorder %v11076_v22, 1.4  ;;  %v11079_v57 = vld [vmem:[#allocation107_spill] sm:$0xff] }
 0x3a8   : > { %v4403_v23 = vpack.c.bf16 %v3265_v6, %v3264_v14  ;;  %v3287_v1 = vsub.f32 1.3333334, %v5718_v30  ;;  %v3303_v2 = vmul.f32 %v5718_v30, %v11077_v5  ;;  %vm1017_vm14 = vcmp.ge.f32.partialorder %v11078_v45, 1.4  ;;  %v11080_v30 = vld [vmem:[#allocation95_spill] sm:$0xff] }
 0x3a9   : > { %v8719_v19 = vadd.f32 %v2678_v53, %v2662_v32  ;;  %v8721_v47 = vadd.f32 %v2679_v12, %v2663_v27  ;;  %v8724_v35 = vsel %vm1016_vm13, 1.0, %v10449_v62  ;;  %v8727_v36 = vsel %vm1017_vm14, 1.0, %v10449_v62  ;;  %v11081_v53 = vld [vmem:[#allocation38_spill] sm:$0xff]  ;;  %v11083_v27 = vld [vmem:[#allocation40_spill] sm:$0xff]  ;;  %v11084_v12 = vld [vmem:[#allocation41_spill] sm:$0xff] }
 0x3aa   : > { %6176 = vmatprep.mubr.msk.bf16.mxu1 %vm276_vm0, %v4403_v23  ;;  %v8732_v14 = vsub.f32 %v11079_v57, %v8724_v35  ;;  %v8736_v15 = vsub.f32 %v11080_v30, %v8727_v36  ;;  %v5479_v20 = vadd.f32 -7.0, %v11081_v53  ;;  %v5480_v32 = vadd.f32 -7.0, %v11082_v42  ;;  %v11085_v57 = vld [vmem:[#allocation99_spill] sm:$0xff] }
 0x3ab   : > { %v3318_v55 = vmul.f32 %v3286_v48, %v8719_v19  ;;  %v3319_v18 = vmul.f32 %v3287_v1, %v8721_v47  ;;  %v5607_v6 = vadd.f32 -3.0, %v11083_v27  ;;  %v5608_v38 = vadd.f32 -3.0, %v11084_v12  ;;  %v11089_v12 = vld [vmem:[#allocation42_spill] sm:$0xff]  ;;  %v11090_v42 = vld [vmem:[#allocation43_spill] sm:$0xff] }
 0x3ac   : > { %v1928_v23 = vsub.f32 2.0, %v5479_v20  ;;  %v1929_v5 = vsub.f32 2.0, %v5480_v32  ;;  %v1944_v56 = vmul.f32 %v5479_v20, %v11085_v57  ;;  %v1945_v24 = vmul.f32 %v5480_v32, %v11086_v25  ;;  %v6276_v25 = vld [vmem:[%s9894_s3 + $0x80] sm:$0xff]   ;;  %v11092_v20 = vld [vmem:[#allocation44_spill] sm:$0xff]  ;;  %v11099_v57 = vld [vmem:[#allocation119_spill] sm:$0xff] }
 0x3ad   : > { %v3334_v30 = vadd.f32 %v3318_v55, %v3302_v37  ;;  %v3335_v41 = vadd.f32 %v3319_v18, %v3303_v2  ;;  %v2648_v43 = vsub.f32 1.5, %v5607_v6  ;;  %v2649_v63 = vsub.f32 1.5, %v5608_v38  ;;  %v11093_v55 = vld [vmem:[#allocation82_spill] sm:$0xff] }
 0x3ae   : > { %v1960_v3 = vmul.f32 %v1928_v23, %v8732_v14  ;;  %v1961_v48 = vmul.f32 %v1929_v5, %v8736_v15  ;;  %v2664_v1 = vmul.f32 %v5607_v6, %v11087_v9  ;;  %v2665_v13 = vmul.f32 %v5608_v38, %v11088_v29  ;;  %v11097_v23 = vld [vmem:[#allocation116_spill] sm:$0xff] }
 0x3af   : > { %v4560_v0 = vpack.c.bf16 %v3335_v41, %v3334_v30  ;;  %v5719_v27 = vadd.f32 -1.6666666, %v11089_v12  ;;  %v5720_v53 = vadd.f32 -1.6666666, %v11090_v42  ;;  %vm978_vm15 = vcmp.ge.f32.partialorder %v10996_v26, 1.0 }
 0x3b0   : > { %v8756_v37 = vadd.f32 %v1960_v3, %v1944_v56  ;;  %v8758_v2 = vadd.f32 %v1961_v48, %v1945_v24  ;;  %vm979_vm1 = vcmp.ge.f32.partialorder %v10997_v34, 1.0  ;;  %v8762_v9 = vsel %vm978_vm15, 1.0, %v10449_v62  ;;  %v6343_v56 = vld [vmem:[%s9894_s3 + $0x88] sm:$0xff]  }
 0x3b1   : > { %11091 = vst [vmem:[#allocation123_spill] sm:$0xff] %v8762_v9  ;;  %6185 = vmatmul.mubr.msk.bf16.vlgmr.msra.gmra.mxu0 %vm276_vm0, %v4560_v0  ;;  %v3288_v29 = vsub.f32 1.3333334, %v5719_v27  ;;  %v3289_v41 = vsub.f32 1.3333334, %v5720_v53  ;;  %v3304_v32 = vmul.f32 %v5719_v27, %v11092_v20  ;;  %v3305_v18 = vmul.f32 %v5720_v53, %v11093_v55  ;;  %v11100_v55 = vld [vmem:[#allocation22_spill] sm:$0xff] }
 0x3b2   : > { %6221 = vmatpush3.bf16.msra.mxu0 %v6343_v56  ;;  %v2680_v24 = vmul.f32 %v2648_v43, %v8756_v37  ;;  %v2681_v3 = vmul.f32 %v2649_v63, %v8758_v2  ;;  %v8773_v6 = vsel %vm979_vm1, 1.0, %v10449_v62  ;;  %v8777_v0 = vsub.f32 %v8505_v39, %v8762_v9  ;;  %v11101_v56 = vld [vmem:[#allocation47_spill] sm:$0xff] }
 0x3b3   : > { %11094 = vst [vmem:[#allocation83_spill] sm:$0xff] %v8773_v6  ;;  %v8781_v27 = vsub.f32 %v8509_v17, %v8773_v6  ;;  %v5473_v53 = vadd.f32 -6.0, %v11000_v8  ;;  %v5474_v38 = vadd.f32 -6.0, %v11001_v49  ;;  %v5601_v5 = vadd.f32 -2.5, %v11097_v23  ;;  %6222 = vmatprep.subr.bf16.mxu0 %v6276_v25 }
 0x3b4   : > { %11095 = vst [vmem:[#allocation84_spill] sm:$0xff] %v8777_v0  ;;  %v8786_v43 = vadd.f32 %v2680_v24, %v2664_v1  ;;  %v8788_v63 = vadd.f32 %v2681_v3, %v2665_v13  ;;  %v5602_v30 = vadd.f32 -2.5, %v11099_v57  ;;  %v5713_v39 = vadd.f32 -1.3333334, %v11011_v44  ;;  %v11102_v24 = vld [vmem:[#allocation48_spill] sm:$0xff] }
 0x3b5   : > { %11096 = vst [vmem:[#allocation85_spill] sm:$0xff] %v8781_v27  ;;  %v1858_v48 = vsub.f32 2.0, %v5473_v53  ;;  %v1859_v20 = vsub.f32 2.0, %v5474_v38  ;;  %v1874_v17 = vmul.f32 %v5473_v53, %v11100_v55  ;;  %v1875_v6 = vmul.f32 %v5474_v38, %v11101_v56  ;;  %v11103_v44 = vld [vmem:[#allocation52_spill] sm:$0xff] }
 0x3b6   : > { %11098 = vst [vmem:[#allocation93_spill] sm:$0xff] %v8788_v63  ;;  %v3320_v8 = vmul.f32 %v3288_v29, %v8786_v43  ;;  %v3321_v49 = vmul.f32 %v3289_v41, %v8788_v63  ;;  %v2578_v23 = vsub.f32 1.5, %v5601_v5  ;;  %v2579_v9 = vsub.f32 1.5, %v5602_v30  ;;  %6223 = vmatpush3.bf16.msra.mxu0 %v6276_v25  ;;  %v11104_v53 = vld [vmem:[#allocation120_spill] sm:$0xff]  ;;  %v11107_v41 = vld [vmem:[#allocation51_spill] sm:$0xff] }
 0x3b7   : > { %v1890_v13 = vmul.f32 %v1858_v48, %v8777_v0  ;;  %v1891_v1 = vmul.f32 %v1859_v20, %v8781_v27  ;;  %v2594_v3 = vmul.f32 %v5601_v5, %v11102_v24  ;;  %v2595_v57 = vmul.f32 %v5602_v30, %v11103_v44  ;;  %v11108_v25 = vld [vmem:[#allocation3_spill] sm:$0xff]  ;;  %v11109_v20 = vld [vmem:[#allocation112_spill] sm:$0xff] }
 0x3b8   : > { %v3336_v34 = vadd.f32 %v3320_v8, %v3304_v32  ;;  %v3337_v26 = vadd.f32 %v3321_v49, %v3305_v18  ;;  %v5714_v55 = vadd.f32 -1.3333334, %v11104_v53  ;;  %v3218_v38 = vsub.f32 1.3333334, %v5713_v39  ;;  %v11110_v5 = vld [vmem:[#allocation4_spill] sm:$0xff]  ;;  %v11113_v18 = vld [vmem:[#allocation111_spill] sm:$0xff] }
 0x3b9   : > { %v8801_v56 = vadd.f32 %v1890_v13, %v1874_v17  ;;  %v8803_v29 = vadd.f32 %v1891_v1, %v1875_v6  ;;  %v3234_v63 = vmul.f32 %v5713_v39, %v11107_v41  ;;  %vm1060_vm2 = vcmp.ge.f32.partialorder %v11108_v25, 1.8  ;;  %v11117_v30 = vld [vmem:[#allocation7_spill] sm:$0xff]  ;;  %v11118_v39 = vld [vmem:[#allocation10_spill] sm:$0xff]  ;;  %v11125_v53 = vld [vmem:[#allocation12_spill] sm:$0xff] }
 0x3ba   : > { %v4561_v48 = vpack.c.bf16 %v3337_v26, %v3336_v34  ;;  %v3219_v0 = vsub.f32 1.3333334, %v5714_v55  ;;  %v3235_v27 = vmul.f32 %v5714_v55, %v11109_v20  ;;  %vm1061_vm3 = vcmp.ge.f32.partialorder %v11110_v5, 1.8  ;;  %v11115_v34 = vld [vmem:[#allocation50_spill] sm:$0xff]  ;;  %v11121_v1 = vld [vmem:[#allocation11_spill] sm:$0xff] }
 0x3bb   : > { %11105 = vst [vmem:[#allocation94_spill] sm:$0xff] %v8801_v56  ;;  %11106 = vst [vmem:[#allocation100_spill] sm:$0xff] %v8803_v29  ;;  %v2610_v44 = vmul.f32 %v2578_v23, %v8801_v56  ;;  %v2611_v8 = vmul.f32 %v2579_v9, %v8803_v29  ;;  %v8812_v49 = vsel %vm1060_vm2, 1.0, %v10449_v62  ;;  %v8815_v32 = vsel %vm1061_vm3, 1.0, %v10449_v62  ;;  %v11122_v55 = vld [vmem:[#allocation13_spill] sm:$0xff]  ;;  %v11124_v5 = vld [vmem:[#allocation59_spill] sm:$0xff] }
 0x3bc   : > { %11111 = vst [vmem:[#allocation96_spill] sm:$0xff] %v8812_v49  ;;  %11112 = vst [vmem:[#allocation97_spill] sm:$0xff] %v8815_v32  ;;  %6188 = vmatprep.mubr.msk.bf16.mxu0 %vm276_vm0, %v4561_v48  ;;  %v8820_v26 = vsub.f32 %v11113_v18, %v8812_v49  ;;  %v8824_v6 = vsub.f32 %v11115_v34, %v8815_v32  ;;  %v5491_v23 = vadd.f32 -8.0, %v11117_v30  ;;  %v5492_v9 = vadd.f32 -8.0, %v11118_v39  ;;  %v11123_v18 = vld [vmem:[#allocation29_spill] sm:$0xff] }
 0x3bd   : > { %v8828_v17 = vadd.f32 %v2610_v44, %v2594_v3  ;;  %v8830_v13 = vadd.f32 %v2611_v8, %v2595_v57  ;;  %v5619_v24 = vadd.f32 -3.5, %v11121_v1  ;;  %v5620_v41 = vadd.f32 -3.5, %v11122_v55 }
 0x3be   : > { %11114 = vst [vmem:[#allocation107_spill] sm:$0xff] %v8820_v26  ;;  %11116 = vst [vmem:[#allocation95_spill] sm:$0xff] %v8824_v6  ;;  %v2004_v48 = vsub.f32 2.0, %v5491_v23  ;;  %v2005_v20 = vsub.f32 2.0, %v5492_v9  ;;  %v2020_v49 = vmul.f32 %v5491_v23, %v11123_v18  ;;  %v2021_v25 = vmul.f32 %v5492_v9, %v11124_v5  ;;  %v11129_v18 = vld [vmem:[#allocation9_spill] sm:$0xff] }
 0x3bf   : > { %11119 = vst [vmem:[#allocation99_spill] sm:$0xff] %v8828_v17  ;;  %11120 = vst [vmem:[#allocation108_spill] sm:$0xff] %v8830_v13  ;;  %v3250_v34 = vmul.f32 %v3218_v38, %v8828_v17  ;;  %v3251_v32 = vmul.f32 %v3219_v0, %v8830_v13  ;;  %v2724_v30 = vsub.f32 1.5, %v5619_v24  ;;  %v2725_v39 = vsub.f32 1.5, %v5620_v41  ;;  %v11128_v0 = vld [vmem:[#allocation6_spill] sm:$0xff]  ;;  %v11143_v17 = vld [vmem:[#allocation55_spill] sm:$0xff] }
 0x3c0   : > { %v2036_v3 = vmul.f32 %v2004_v48, %v8820_v26  ;;  %v2037_v57 = vmul.f32 %v2005_v20, %v8824_v6  ;;  %v2740_v44 = vmul.f32 %v5619_v24, %v8578_v11  ;;  %v2741_v8 = vmul.f32 %v5620_v41, %v8580_v54  ;;  %v11132_v24 = vld [vmem:[#allocation53_spill] sm:$0xff]  ;;  %v11142_v26 = vld [vmem:[#allocation124_spill] sm:$0xff] }
 0x3c1   : > { %v3266_v55 = vadd.f32 %v3250_v34, %v3234_v63  ;;  %v3267_v1 = vadd.f32 %v3251_v32, %v3235_v27  ;;  %v5731_v23 = vadd.f32 -2.0, %v11125_v53  ;;  %v5732_v5 = vadd.f32 -2.0, %v11035_v21  ;;  %v11130_v32 = vld [vmem:[#allocation113_spill] sm:$0xff] }
 0x3c2   : > { %v8844_v9 = vadd.f32 %v2036_v3, %v2020_v49  ;;  %v8846_v38 = vadd.f32 %v2037_v57, %v2021_v25  ;;  %vm1018_vm4 = vcmp.ge.f32.partialorder %v11128_v0, 1.4  ;;  %vm1019_vm5 = vcmp.ge.f32.partialorder %v11129_v18, 1.4  ;;  %v11138_v3 = vld [vmem:[#allocation54_spill] sm:$0xff] }
 0x3c3   : > { %v4404_v48 = vpack.c.bf16 %v3267_v1, %v3266_v55  ;;  %v3364_v20 = vsub.f32 1.3333334, %v5731_v23  ;;  %v3365_v6 = vsub.f32 1.3333334, %v5732_v5  ;;  %v3380_v11 = vmul.f32 %v5731_v23, %v8596_v50  ;;  %v11133_v55 = vld [vmem:[#allocation56_spill] sm:$0xff] }
 0x3c4   : > { %11126 = vst [vmem:[#allocation109_spill] sm:$0xff] %v8844_v9  ;;  %11127 = vst [vmem:[#allocation110_spill] sm:$0xff] %v8846_v38  ;;  %v2756_v54 = vmul.f32 %v2724_v30, %v8844_v9  ;;  %v2757_v27 = vmul.f32 %v2725_v39, %v8846_v38  ;;  %v3381_v63 = vmul.f32 %v5732_v5, %v8598_v52  ;;  %v8855_v49 = vsel %vm1018_vm4, 1.0, %v10449_v62  ;;  %v11136_v52 = vld [vmem:[#allocation114_spill] sm:$0xff] }
 0x3c5   : > { %6177 = vmatmul.mubr.msk.bf16.gmra.mxu1 %vm276_vm0, %v4404_v48  ;;  %v8859_v25 = vsel %vm1019_vm5, 1.0, %v10449_v62  ;;  %v8863_v1 = vsub.f32 %v11130_v32, %v8855_v49  ;;  %v5481_v50 = vadd.f32 -7.0, %v11132_v24  ;;  %v5482_v30 = vadd.f32 -7.0, %v11133_v55  ;;  %v11139_v48 = vld [vmem:[#allocation121_spill] sm:$0xff]  ;;  %v11140_v32 = vld [vmem:[#allocation122_spill] sm:$0xff] }
 0x3c6   : > { %v8867_v41 = vadd.f32 %v2756_v54, %v2740_v44  ;;  %v8869_v39 = vadd.f32 %v2757_v27, %v2741_v8  ;;  %v8873_v34 = vsub.f32 %v11136_v52, %v8859_v25  ;;  %v5609_v57 = vadd.f32 -3.0, %v11138_v3  ;;  %v11141_v44 = vld [vmem:[#allocation57_spill] sm:$0xff] }
 0x3c7   : > { %11131 = vst [vmem:[#allocation44_spill] sm:$0xff] %v8863_v1  ;;  %v1930_v23 = vsub.f32 2.0, %v5481_v50  ;;  %v1931_v5 = vsub.f32 2.0, %v5482_v30  ;;  %v1946_v38 = vmul.f32 %v5481_v50, %v11139_v48  ;;  %v1947_v9 = vmul.f32 %v5482_v30, %v11140_v32  ;;  %v11144_v48 = vld [vmem:[#allocation32_spill] sm:$0xff] }
 0x3c8   : > { %11134 = vst [vmem:[#allocation82_spill] sm:$0xff] %v8867_v41  ;;  %11135 = vst [vmem:[#allocation22_spill] sm:$0xff] %v8869_v39  ;;  %v3396_v21 = vmul.f32 %v3364_v20, %v8867_v41  ;;  %v3397_v53 = vmul.f32 %v3365_v6, %v8869_v39  ;;  %v5610_v54 = vadd.f32 -3.0, %v11141_v44  ;;  %v2650_v8 = vsub.f32 1.5, %v5609_v57  ;;  %v11147_v6 = vld [vmem:[#allocation58_spill] sm:$0xff] }
 0x3c9   : > { %11137 = vst [vmem:[#allocation47_spill] sm:$0xff] %v8873_v34  ;;  %v1962_v27 = vmul.f32 %v1930_v23, %v8863_v1  ;;  %v1963_v52 = vmul.f32 %v1931_v5, %v8873_v34  ;;  %v2666_v13 = vmul.f32 %v5609_v57, %v11142_v26  ;;  %v5721_v29 = vadd.f32 -1.6666666, %v11143_v17  ;;  %v11148_v23 = vld [vmem:[#allocation36_spill] sm:$0xff]  ;;  %v11149_v5 = vld [vmem:[#allocation33_spill] sm:$0xff] }
 0x3ca   : > { %v3412_v56 = vadd.f32 %v3396_v21, %v3380_v11  ;;  %v3413_v3 = vadd.f32 %v3397_v53, %v3381_v63  ;;  %v2651_v50 = vsub.f32 1.5, %v5610_v54  ;;  %v2667_v30 = vmul.f32 %v5610_v54, %v11144_v48  ;;  %v11150_v26 = vld [vmem:[#allocation49_spill] sm:$0xff] }
 0x3cb   : > { %v8886_v32 = vadd.f32 %v1962_v27, %v1946_v38  ;;  %v8888_v20 = vadd.f32 %v1963_v52, %v1947_v9  ;;  %v5722_v39 = vadd.f32 -1.6666666, %v11147_v6  ;;  %v3290_v41 = vsub.f32 1.3333334, %v5721_v29  ;;  %v11151_v63 = vld [vmem:[#allocation37_spill] sm:$0xff]  ;;  %v11158_v52 = vld [vmem:[#allocation34_spill] sm:$0xff] }
 0x3cc   : > { %v4721_v44 = vpack.c.bf16 %v3413_v3, %v3412_v56  ;;  %v3306_v1 = vmul.f32 %v5721_v29, %v11148_v23  ;;  %vm1020_vm6 = vcmp.ge.f32.partialorder %v11149_v5, 1.4  ;;  %vm1021_vm7 = vcmp.ge.f32.partialorder %v11150_v26, 1.4  ;;  %v11154_v29 = vld [vmem:[#allocation68_spill] sm:$0xff]  ;;  %v11155_v57 = vld [vmem:[#allocation69_spill] sm:$0xff] }
 0x3cd   : > { %11145 = vst [vmem:[#allocation48_spill] sm:$0xff] %v8886_v32  ;;  %11146 = vst [vmem:[#allocation52_spill] sm:$0xff] %v8888_v20  ;;  %v2682_v21 = vmul.f32 %v2650_v8, %v8886_v32  ;;  %v2683_v53 = vmul.f32 %v2651_v50, %v8888_v20  ;;  %v3291_v11 = vsub.f32 1.3333334, %v5722_v39  ;;  %v3307_v38 = vmul.f32 %v5722_v39, %v11151_v63  ;;  %v11160_v39 = vld [vmem:[#allocation30_spill] sm:$0xff]  ;;  %v11162_v63 = vld [vmem:[#allocation31_spill] sm:$0xff] }
 0x3ce   : > { %6204 = vmatprep.mubr.msk.bf16.mxu1 %vm276_vm0, %v4721_v44  ;;  %v8899_v9 = vsel %vm1020_vm6, 1.0, %v10449_v62  ;;  %v8902_v56 = vsel %vm1021_vm7, 1.0, %v10449_v62  ;;  %v5483_v3 = vadd.f32 -7.0, %v11154_v29  ;;  %v5484_v54 = vadd.f32 -7.0, %v11155_v57  ;;  %v11163_v5 = vld [vmem:[#allocation35_spill] sm:$0xff]  ;;  %v11167_v20 = vld [vmem:[#allocation73_spill] sm:$0xff] }
 0x3cf   : > { %11152 = vst [vmem:[#allocation51_spill] sm:$0xff] %v8899_v9  ;;  %11153 = vst [vmem:[#allocation112_spill] sm:$0xff] %v8902_v56  ;;  %v8906_v27 = vadd.f32 %v2682_v21, %v2666_v13  ;;  %v8908_v8 = vadd.f32 %v2683_v53, %v2667_v30  ;;  %v8912_v50 = vsub.f32 %v11158_v52, %v8899_v9  ;;  %v11164_v30 = vld [vmem:[#allocation70_spill] sm:$0xff]  ;;  %v11165_v53 = vld [vmem:[#allocation71_spill] sm:$0xff]  ;;  %v5724_v32 = vadd.f32 -1.6666666, %v11167_v20 }
 0x3d0   : > { %v8916_v44 = vsub.f32 %v11160_v39, %v8902_v56  ;;  %v1932_v48 = vsub.f32 2.0, %v5483_v3  ;;  %v1933_v23 = vsub.f32 2.0, %v5484_v54  ;;  %v1948_v26 = vmul.f32 %v5483_v3, %v11162_v63  ;;  %v11166_v39 = vld [vmem:[#allocation72_spill] sm:$0xff] }
 0x3d1   : > { %11156 = vst [vmem:[#allocation111_spill] sm:$0xff] %v8906_v27  ;;  %11157 = vst [vmem:[#allocation50_spill] sm:$0xff] %v8908_v8  ;;  %v1949_v29 = vmul.f32 %v5484_v54, %v11163_v5  ;;  %v3322_v57 = vmul.f32 %v3290_v41, %v8906_v27  ;;  %v3323_v13 = vmul.f32 %v3291_v11, %v8908_v8  ;;  %v5611_v21 = vadd.f32 -3.0, %v11164_v30  ;;  %v11168_v11 = vld [vmem:[#allocation45_spill] sm:$0xff] }
 0x3d2   : > { %11159 = vst [vmem:[#allocation29_spill] sm:$0xff] %v8912_v50  ;;  %11161 = vst [vmem:[#allocation59_spill] sm:$0xff] %v8916_v44  ;;  %v5612_v6 = vadd.f32 -3.0, %v11165_v53  ;;  %v1964_v52 = vmul.f32 %v1932_v48, %v8912_v50  ;;  %v1965_v9 = vmul.f32 %v1933_v23, %v8916_v44  ;;  %v5723_v56 = vadd.f32 -1.6666666, %v11166_v39  ;;  %v11169_v8 = vld [vmem:[#allocation21_spill] sm:$0xff] }
 0x3d3   : > { %v3338_v34 = vadd.f32 %v3322_v57, %v3306_v1  ;;  %v3339_v3 = vadd.f32 %v3323_v13, %v3307_v38  ;;  %v2652_v63 = vsub.f32 1.5, %v5611_v21  ;;  %v2668_v30 = vmul.f32 %v5611_v21, %v11168_v11  ;;  %v11170_v23 = vld [vmem:[#allocation19_spill] sm:$0xff]  ;;  %v11171_v38 = vld [vmem:[#allocation74_spill] sm:$0xff] }
 0x3d4   : > { %v2653_v5 = vsub.f32 1.5, %v5612_v6  ;;  %v8928_v54 = vadd.f32 %v1964_v52, %v1948_v26  ;;  %v8930_v41 = vadd.f32 %v1965_v9, %v1949_v29  ;;  %v2669_v53 = vmul.f32 %v5612_v6, %v11169_v8 }
 0x3d5   : > { %v4562_v27 = vpack.c.bf16 %v3339_v3, %v3338_v34  ;;  %v3292_v48 = vsub.f32 1.3333334, %v5723_v56  ;;  %v3293_v50 = vsub.f32 1.3333334, %v5724_v32  ;;  %v3308_v44 = vmul.f32 %v5723_v56, %v11170_v23 }
 0x3d6   : > { %v2684_v39 = vmul.f32 %v2652_v63, %v8928_v54  ;;  %v2685_v1 = vmul.f32 %v2653_v5, %v8930_v41  ;;  %v3309_v57 = vmul.f32 %v5724_v32, %v11171_v38  ;;  %vm1062_vm8 = vcmp.ge.f32.partialorder %v11059_v58, 1.8 }
 0x3d7   : > { %6189 = vmatmul.mubr.msk.bf16.gmra.mxu0 %vm276_vm0, %v4562_v27  ;;  %vm1063_vm9 = vcmp.ge.f32.partialorder %v11060_v28, 1.8  ;;  %v8942_v26 = vsel %vm1062_vm8, 1.0, %v10449_v62  ;;  %v5493_v34 = vadd.f32 -8.0, %v11061_v7  ;;  %v5494_v6 = vadd.f32 -8.0, %v11062_v33  ;;  %v11219_v33 = vld [vmem:[#allocation18_spill] sm:$0xff] }
 0x3d8   : > { %11172 = vst [vmem:[#allocation113_spill] sm:$0xff] %v8942_v26  ;;  %v8946_v9 = vadd.f32 %v2684_v39, %v2668_v30  ;;  %v8948_v56 = vadd.f32 %v2685_v1, %v2669_v53  ;;  %v8951_v29 = vsel %vm1063_vm9, 1.0, %v10449_v62  ;;  %v8955_v32 = vsub.f32 %v8676_v10, %v8942_v26  ;;  %v11220_v7 = vld [vmem:[#allocation20_spill] sm:$0xff] }
 0x3d9   : > { %11173 = vst [vmem:[#allocation114_spill] sm:$0xff] %v8951_v29  ;;  %v8959_v27 = vsub.f32 %v8683_v40, %v8951_v29  ;;  %v2006_v8 = vsub.f32 2.0, %v5493_v34  ;;  %v2007_v13 = vsub.f32 2.0, %v5494_v6  ;;  %v2022_v21 = vmul.f32 %v5493_v34, %v8687_v60 }
 0x3da   : > { %11174 = vst [vmem:[#allocation121_spill] sm:$0xff] %v8955_v32  ;;  %v3324_v30 = vmul.f32 %v3292_v48, %v8946_v9  ;;  %v3325_v53 = vmul.f32 %v3293_v50, %v8948_v56  ;;  %v2023_v52 = vmul.f32 %v5494_v6, %v8691_v59  ;;  %v5621_v39 = vadd.f32 -3.5, %v11069_v31 }
 0x3db   : > { %11175 = vst [vmem:[#allocation122_spill] sm:$0xff] %v8959_v27  ;;  %v2038_v3 = vmul.f32 %v2006_v8, %v8955_v32  ;;  %v2039_v10 = vmul.f32 %v2007_v13, %v8959_v27  ;;  %v5622_v63 = vadd.f32 -3.5, %v11070_v61  ;;  %v5733_v40 = vadd.f32 -2.0, %v11071_v51  ;;  %v11218_v61 = vld [vmem:[#allocation17_spill] sm:$0xff] }
 0x3dc   : > { %v3340_v5 = vadd.f32 %v3324_v30, %v3308_v44  ;;  %v3341_v11 = vadd.f32 %v3325_v53, %v3309_v57  ;;  %v2726_v23 = vsub.f32 1.5, %v5621_v39  ;;  %v2742_v60 = vmul.f32 %v5621_v39, %v8707_v4  ;;  %v11184_v39 = vld [vmem:[#allocation38_spill] sm:$0xff] }
 0x3dd   : > { %v8971_v48 = vadd.f32 %v2038_v3, %v2022_v21  ;;  %v8973_v50 = vadd.f32 %v2039_v10, %v2023_v52  ;;  %v2727_v59 = vsub.f32 1.5, %v5622_v63  ;;  %v2743_v1 = vmul.f32 %v5622_v63, %v8709_v46  ;;  %v11185_v3 = vld [vmem:[#allocation39_spill] sm:$0xff]  ;;  %v11186_v63 = vld [vmem:[#allocation40_spill] sm:$0xff] }
 0x3de   : > { %v4563_v38 = vpack.c.bf16 %v3341_v11, %v3340_v5  ;;  %v5734_v34 = vadd.f32 -2.0, %v11074_v16  ;;  %v3366_v6 = vsub.f32 1.3333334, %v5733_v40  ;;  %v3382_v8 = vmul.f32 %v5733_v40, %v8719_v19  ;;  %v11187_v5 = vld [vmem:[#allocation41_spill] sm:$0xff] }
 0x3df   : > { %11176 = vst [vmem:[#allocation124_spill] sm:$0xff] %v8971_v48  ;;  %11177 = vst [vmem:[#allocation32_spill] sm:$0xff] %v8973_v50  ;;  %v2758_v13 = vmul.f32 %v2726_v23, %v8971_v48  ;;  %v2759_v44 = vmul.f32 %v2727_v59, %v8973_v50  ;;  %vm1064_vm10 = vcmp.ge.f32.partialorder %v11076_v22, 1.8  ;;  %vm1065_vm11 = vcmp.ge.f32.partialorder %v11078_v45, 1.8 }
 0x3e0   : > { %6192 = vmatprep.mubr.msk.bf16.mxu0 %vm276_vm0, %v4563_v38  ;;  %v3367_v4 = vsub.f32 1.3333334, %v5734_v34  ;;  %v3383_v57 = vmul.f32 %v5734_v34, %v8721_v47  ;;  %v8985_v46 = vsel %vm1064_vm10, 1.0, %v10449_v62  ;;  %v8988_v21 = vsel %vm1065_vm11, 1.0, %v10449_v62 }
 0x3e1   : > { %11178 = vst [vmem:[#allocation36_spill] sm:$0xff] %v8985_v46  ;;  %11179 = vst [vmem:[#allocation37_spill] sm:$0xff] %v8988_v21  ;;  %v8990_v19 = vadd.f32 %v2758_v13, %v2742_v60  ;;  %v8992_v30 = vadd.f32 %v2759_v44, %v2743_v1  ;;  %v8996_v53 = vsub.f32 %v8724_v35, %v8985_v46  ;;  %v5495_v47 = vadd.f32 -8.0, %v11184_v39 }
 0x3e2   : > { %v9000_v52 = vsub.f32 %v8727_v36, %v8988_v21  ;;  %v5496_v10 = vadd.f32 -8.0, %v11185_v3  ;;  %v5623_v40 = vadd.f32 -3.5, %v11186_v63  ;;  %v5624_v11 = vadd.f32 -3.5, %v11187_v5 }
 0x3e3   : > { %11180 = vst [vmem:[#allocation34_spill] sm:$0xff] %v8990_v19  ;;  %11181 = vst [vmem:[#allocation30_spill] sm:$0xff] %v8992_v30  ;;  %v3398_v23 = vmul.f32 %v3366_v6, %v8990_v19  ;;  %v3399_v60 = vmul.f32 %v3367_v4, %v8992_v30  ;;  %v5735_v59 = vadd.f32 -2.0, %v11089_v12  ;;  %v5736_v35 = vadd.f32 -2.0, %v11090_v42  ;;  %v11206_v19 = vld [vmem:[#allocation91_spill] sm:$0xff] }
 0x3e4   : > { %11182 = vst [vmem:[#allocation31_spill] sm:$0xff] %v8996_v53  ;;  %11183 = vst [vmem:[#allocation35_spill] sm:$0xff] %v9000_v52  ;;  %v2008_v1 = vsub.f32 2.0, %v5495_v47  ;;  %v2009_v38 = vsub.f32 2.0, %v5496_v10  ;;  %v2024_v36 = vmul.f32 %v5495_v47, %v8732_v14  ;;  %v2025_v34 = vmul.f32 %v5496_v10, %v8736_v15  ;;  %v11191_v47 = vld [vmem:[#allocation16_spill] sm:$0xff]  ;;  %v11192_v10 = vld [vmem:[#allocation63_spill] sm:$0xff] }
 0x3e5   : > { %v3414_v13 = vadd.f32 %v3398_v23, %v3382_v8  ;;  %v3415_v44 = vadd.f32 %v3399_v60, %v3383_v57  ;;  %v2728_v3 = vsub.f32 1.5, %v5623_v40  ;;  %v2729_v63 = vsub.f32 1.5, %v5624_v11  ;;  %v11190_v8 = vld [vmem:[#allocation93_spill] sm:$0xff] }
 0x3e6   : > { %v2040_v5 = vmul.f32 %v2008_v1, %v8996_v53  ;;  %v2041_v6 = vmul.f32 %v2009_v38, %v9000_v52  ;;  %v2744_v4 = vmul.f32 %v5623_v40, %v8756_v37  ;;  %v2745_v12 = vmul.f32 %v5624_v11, %v8758_v2  ;;  %v11193_v2 = vld [vmem:[#allocation86_spill] sm:$0xff]  ;;  %v11194_v11 = vld [vmem:[#allocation87_spill] sm:$0xff]  ;;  %v11202_v52 = vld [vmem:[#allocation89_spill] sm:$0xff] }
 0x3e7   : > { %v4722_v39 = vpack.c.bf16 %v3415_v44, %v3414_v13  ;;  %v3368_v42 = vsub.f32 1.3333334, %v5735_v59  ;;  %v3369_v21 = vsub.f32 1.3333334, %v5736_v35  ;;  %v3384_v46 = vmul.f32 %v5735_v59, %v8786_v43  ;;  %v11195_v59 = vld [vmem:[#allocation60_spill] sm:$0xff] }
 0x3e8   : > { %v9017_v14 = vadd.f32 %v2040_v5, %v2024_v36  ;;  %v9019_v15 = vadd.f32 %v2041_v6, %v2025_v34  ;;  %v3385_v57 = vmul.f32 %v5736_v35, %v11190_v8  ;;  %vm1022_vm12 = vcmp.ge.f32.partialorder %v11191_v47, 1.4  ;;  %v11197_v34 = vld [vmem:[#allocation62_spill] sm:$0xff]  ;;  %v11201_v8 = vld [vmem:[#allocation88_spill] sm:$0xff] }
 0x3e9   : > { %6205 = vmatmul.mubr.msk.bf16.vlgmr.msra.gmra.mxu1 %vm276_vm0, %v4722_v39  ;;  %vm1023_vm13 = vcmp.ge.f32.partialorder %v11192_v10, 1.4  ;;  %v9026_v37 = vsel %vm1022_vm12, 1.0, %v10449_v62  ;;  %v5485_v40 = vadd.f32 -7.0, %v11193_v2  ;;  %v5486_v23 = vadd.f32 -7.0, %v11194_v11  ;;  %v11196_v39 = vld [vmem:[#allocation61_spill] sm:$0xff] }
 0x3ea   : > { %11188 = vst [vmem:[#allocation45_spill] sm:$0xff] %v9017_v14  ;;  %11189 = vst [vmem:[#allocation21_spill] sm:$0xff] %v9019_v15  ;;  %v2760_v43 = vmul.f32 %v2728_v3, %v9017_v14  ;;  %v2761_v5 = vmul.f32 %v2729_v63, %v9019_v15  ;;  %v9033_v60 = vsel %vm1023_vm13, 1.0, %v10449_v62  ;;  %v9037_v35 = vsub.f32 %v11195_v59, %v9026_v37  ;;  %v11200_v63 = vld [vmem:[#allocation64_spill] sm:$0xff] }
 0x3eb   : > { %v9041_v1 = vsub.f32 %v11196_v39, %v9033_v60  ;;  %v1934_v38 = vsub.f32 2.0, %v5485_v40  ;;  %v1935_v36 = vsub.f32 2.0, %v5486_v23  ;;  %v1950_v13 = vmul.f32 %v5485_v40, %v11197_v34  ;;  %v11203_v39 = vld [vmem:[#allocation90_spill] sm:$0xff] }
 0x3ec   : > { %v9044_v44 = vadd.f32 %v2760_v43, %v2744_v4  ;;  %v9046_v3 = vadd.f32 %v2761_v5, %v2745_v12  ;;  %v1951_v6 = vmul.f32 %v5486_v23, %v11200_v63  ;;  %v5613_v15 = vadd.f32 -3.0, %v11201_v8  ;;  %v11204_v43 = vld [vmem:[#allocation65_spill] sm:$0xff] }
 0x3ed   : > { %v1966_v14 = vmul.f32 %v1934_v38, %v9037_v35  ;;  %v1967_v59 = vmul.f32 %v1935_v36, %v9041_v1  ;;  %v5614_v53 = vadd.f32 -3.0, %v11202_v52  ;;  %v5725_v45 = vadd.f32 -1.6666666, %v11203_v39  ;;  %v11205_v63 = vld [vmem:[#allocation77_spill] sm:$0xff] }
 0x3ee   : > { %11198 = vst [vmem:[#allocation19_spill] sm:$0xff] %v9044_v44  ;;  %11199 = vst [vmem:[#allocation74_spill] sm:$0xff] %v9046_v3  ;;  %v3400_v30 = vmul.f32 %v3368_v42, %v9044_v44  ;;  %v3401_v40 = vmul.f32 %v3369_v21, %v9046_v3  ;;  %v2654_v4 = vsub.f32 1.5, %v5613_v15  ;;  %v2670_v12 = vmul.f32 %v5613_v15, %v11204_v43  ;;  %v11207_v21 = vld [vmem:[#allocation76_spill] sm:$0xff] }
 0x3ef   : > { %v9057_v5 = vadd.f32 %v1966_v14, %v1950_v13  ;;  %v9059_v23 = vadd.f32 %v1967_v59, %v1951_v6  ;;  %v2655_v34 = vsub.f32 1.5, %v5614_v53  ;;  %v2671_v38 = vmul.f32 %v5614_v53, %v11205_v63  ;;  %v11208_v44 = vld [vmem:[#allocation80_spill] sm:$0xff]  ;;  %v11209_v13 = vld [vmem:[#allocation66_spill] sm:$0xff]  ;;  %v11210_v59 = vld [vmem:[#allocation81_spill] sm:$0xff] }
 0x3f0   : > { %v3416_v22 = vadd.f32 %v3400_v30, %v3384_v46  ;;  %v3417_v36 = vadd.f32 %v3401_v40, %v3385_v57  ;;  %v5726_v16 = vadd.f32 -1.6666666, %v11206_v19  ;;  %v3294_v50 = vsub.f32 1.3333334, %v5725_v45  ;;  %v11214_v43 = vld [vmem:[#allocation104_spill] sm:$0xff] }
 0x3f1   : > { %v2686_v48 = vmul.f32 %v2654_v4, %v9057_v5  ;;  %v2687_v42 = vmul.f32 %v2655_v34, %v9059_v23  ;;  %v3310_v3 = vmul.f32 %v5725_v45, %v11207_v21  ;;  %vm1024_vm14 = vcmp.ge.f32.partialorder %v11208_v44, 1.4  ;;  %v11211_v45 = vld [vmem:[#allocation78_spill] sm:$0xff] }
 0x3f2   : > { %v4723_v14 = vpack.c.bf16 %v3417_v36, %v3416_v22  ;;  %v3295_v15 = vsub.f32 1.3333334, %v5726_v16  ;;  %v3311_v6 = vmul.f32 %v5726_v16, %v11209_v13  ;;  %vm1025_vm15 = vcmp.ge.f32.partialorder %v11210_v59, 1.4  ;;  %v11212_v16 = vld [vmem:[#allocation75_spill] sm:$0xff] }
 0x3f3   : > { %v9069_v53 = vadd.f32 %v2686_v48, %v2670_v12  ;;  %v9071_v46 = vadd.f32 %v2687_v42, %v2671_v38  ;;  %v9074_v30 = vsel %vm1024_vm14, 1.0, %v10449_v62  ;;  %v9077_v57 = vsel %vm1025_vm15, 1.0, %v10449_v62  ;;  %v11213_v48 = vld [vmem:[#allocation101_spill] sm:$0xff]  ;;  %v11215_v38 = vld [vmem:[#allocation102_spill] sm:$0xff] }
 0x3f4   : > { %6208 = vmatprep.mubr.msk.bf16.mxu1 %vm276_vm0, %v4723_v14  ;;  %v9082_v22 = vsub.f32 %v11211_v45, %v9074_v30  ;;  %v9086_v40 = vsub.f32 %v11212_v16, %v9077_v57  ;;  %v5487_v4 = vadd.f32 -7.0, %v11213_v48  ;;  %v5488_v12 = vadd.f32 -7.0, %v11214_v43  ;;  %v11216_v42 = vld [vmem:[#allocation105_spill] sm:$0xff]  ;;  %v11217_v45 = vld [vmem:[#allocation67_spill] sm:$0xff]  ;;  %v11222_v43 = vld [vmem:[#allocation106_spill] sm:$0xff] }
 0x3f5   : > { %v3326_v34 = vmul.f32 %v3294_v50, %v9069_v53  ;;  %v3327_v63 = vmul.f32 %v3295_v15, %v9071_v46  ;;  %v5615_v36 = vadd.f32 -3.0, %v11215_v38  ;;  %v5616_v21 = vadd.f32 -3.0, %v11216_v42  ;;  %v11221_v42 = vld [vmem:[#allocation103_spill] sm:$0xff] }
 0x3f6   : > { %v1936_v14 = vsub.f32 2.0, %v5487_v4  ;;  %v1937_v13 = vsub.f32 2.0, %v5488_v12  ;;  %v1952_v51 = vmul.f32 %v5487_v4, %v11217_v45  ;;  %v1953_v31 = vmul.f32 %v5488_v12, %v11218_v61  ;;  %v11225_v12 = vld [vmem:[#allocation92_spill] sm:$0xff] }
 0x3f7   : > { %v3342_v16 = vadd.f32 %v3326_v34, %v3310_v3  ;;  %v3343_v27 = vadd.f32 %v3327_v63, %v3311_v6  ;;  %v2656_v32 = vsub.f32 1.5, %v5615_v36  ;;  %v2657_v29 = vsub.f32 1.5, %v5616_v21 }
 0x3f8   : > { %v1968_v26 = vmul.f32 %v1936_v14, %v9082_v22  ;;  %v1969_v50 = vmul.f32 %v1937_v13, %v9086_v40  ;;  %v2672_v15 = vmul.f32 %v5615_v36, %v11219_v33  ;;  %v2673_v28 = vmul.f32 %v5616_v21, %v11220_v7  ;;  %v11231_v14 = vld [vmem:[#allocation57_spill] sm:$0xff] }
 0x3f9   : > { %v4564_v58 = vpack.c.bf16 %v3343_v27, %v3342_v16  ;;  %v5727_v38 = vadd.f32 -1.6666666, %v11221_v42  ;;  %v5728_v48 = vadd.f32 -1.6666666, %v11222_v43  ;;  %vm1066_vm1 = vcmp.ge.f32.partialorder %v11128_v0, 1.8 }
 0x3fa   : > { %v9103_v61 = vadd.f32 %v1968_v26, %v1952_v51  ;;  %v9105_v3 = vadd.f32 %v1969_v50, %v1953_v31  ;;  %vm1067_vm2 = vcmp.ge.f32.partialorder %v11129_v18, 1.8  ;;  %v9109_v6 = vsel %vm1066_vm1, 1.0, %v10449_v62  ;;  %v11224_v27 = vld [vmem:[#allocation46_spill] sm:$0xff]  ;;  %v11232_v50 = vld [vmem:[#allocation44_spill] sm:$0xff] }
 0x3fb   : > { %11223 = vst [vmem:[#allocation93_spill] sm:$0xff] %v9109_v6  ;;  %6193 = vmatmul.mubr.msk.bf16.gmra.mxu0 %vm276_vm0, %v4564_v58  ;;  %v3296_v33 = vsub.f32 1.3333334, %v5727_v38  ;;  %v3297_v7 = vsub.f32 1.3333334, %v5728_v48  ;;  %v3312_v4 = vmul.f32 %v5727_v38, %v11224_v27  ;;  %v3313_v34 = vmul.f32 %v5728_v48, %v11225_v12  ;;  %v11229_v48 = vld [vmem:[#allocation54_spill] sm:$0xff] }
 0x3fc   : > { %v2688_v63 = vmul.f32 %v2656_v32, %v9103_v61  ;;  %v2689_v51 = vmul.f32 %v2657_v29, %v9105_v3  ;;  %v9117_v31 = vsel %vm1067_vm2, 1.0, %v10449_v62  ;;  %v9121_v26 = vsub.f32 %v8855_v49, %v9109_v6  ;;  %v11236_v0 = vld [vmem:[#allocation58_spill] sm:$0xff] }
 0x3fd   : > { %11226 = vst [vmem:[#allocation16_spill] sm:$0xff] %v9117_v31  ;;  %v9125_v58 = vsub.f32 %v8859_v25, %v9117_v31  ;;  %v5497_v36 = vadd.f32 -8.0, %v11132_v24  ;;  %v5498_v38 = vadd.f32 -8.0, %v11133_v55  ;;  %v5625_v21 = vadd.f32 -3.5, %v11229_v48  ;;  %v11233_v25 = vld [vmem:[#allocation47_spill] sm:$0xff] }
 0x3fe   : > { %11227 = vst [vmem:[#allocation63_spill] sm:$0xff] %v9121_v26  ;;  %v9130_v32 = vadd.f32 %v2688_v63, %v2672_v15  ;;  %v9132_v29 = vadd.f32 %v2689_v51, %v2673_v28  ;;  %v5626_v13 = vadd.f32 -3.5, %v11231_v14  ;;  %v5737_v45 = vadd.f32 -2.0, %v11143_v17  ;;  %v11234_v63 = vld [vmem:[#allocation48_spill] sm:$0xff] }
 0x3ff   : > { %11228 = vst [vmem:[#allocation86_spill] sm:$0xff] %v9125_v58  ;;  %v2010_v49 = vsub.f32 2.0, %v5497_v36  ;;  %v2011_v16 = vsub.f32 2.0, %v5498_v38  ;;  %v2026_v27 = vmul.f32 %v5497_v36, %v11232_v50  ;;  %v2027_v12 = vmul.f32 %v5498_v38, %v11233_v25  ;;  %v11235_v14 = vld [vmem:[#allocation52_spill] sm:$0xff] }
 0x400   : > { %11230 = vst [vmem:[#allocation87_spill] sm:$0xff] %v9132_v29  ;;  %v3328_v24 = vmul.f32 %v3296_v33, %v9130_v32  ;;  %v3329_v55 = vmul.f32 %v3297_v7, %v9132_v29  ;;  %v2730_v31 = vsub.f32 1.5, %v5625_v21  ;;  %v2731_v48 = vsub.f32 1.5, %v5626_v13  ;;  %v11239_v7 = vld [vmem:[#allocation111_spill] sm:$0xff]  ;;  %v11240_v29 = vld [vmem:[#allocation33_spill] sm:$0xff] }
 0x401   : > { %v2042_v15 = vmul.f32 %v2010_v49, %v9121_v26  ;;  %v2043_v28 = vmul.f32 %v2011_v16, %v9125_v58  ;;  %v2746_v51 = vmul.f32 %v5625_v21, %v11234_v63  ;;  %v2747_v17 = vmul.f32 %v5626_v13, %v11235_v14  ;;  %v11241_v16 = vld [vmem:[#allocation50_spill] sm:$0xff]  ;;  %v11242_v21 = vld [vmem:[#allocation49_spill] sm:$0xff]  ;;  %v11245_v14 = vld [vmem:[#allocation51_spill] sm:$0xff] }
 0x402   : > { %v3344_v6 = vadd.f32 %v3328_v24, %v3312_v4  ;;  %v3345_v18 = vadd.f32 %v3329_v55, %v3313_v34  ;;  %v5738_v36 = vadd.f32 -2.0, %v11236_v0  ;;  %v3370_v50 = vsub.f32 1.3333334, %v5737_v45  ;;  %v11286_v0 = vld [vmem:[#allocation94_spill] sm:$0xff] }
 0x403   : > { %v9145_v38 = vadd.f32 %v2042_v15, %v2026_v27  ;;  %v9147_v33 = vadd.f32 %v2043_v28, %v2027_v12  ;;  %v3386_v25 = vmul.f32 %v5737_v45, %v11239_v7  ;;  %vm1068_vm3 = vcmp.ge.f32.partialorder %v11240_v29, 1.8  ;;  %v11249_v45 = vld [vmem:[#allocation68_spill] sm:$0xff]  ;;  %v11250_v27 = vld [vmem:[#allocation69_spill] sm:$0xff]  ;;  %v11253_v28 = vld [vmem:[#allocation70_spill] sm:$0xff] }
 0x404   : > { %v4565_v49 = vpack.c.bf16 %v3345_v18, %v3344_v6  ;;  %v3371_v26 = vsub.f32 1.3333334, %v5738_v36  ;;  %v3387_v58 = vmul.f32 %v5738_v36, %v11241_v16  ;;  %vm1069_vm4 = vcmp.ge.f32.partialorder %v11242_v21, 1.8  ;;  %v11247_v6 = vld [vmem:[#allocation112_spill] sm:$0xff]  ;;  %v11254_v36 = vld [vmem:[#allocation71_spill] sm:$0xff] }
 0x405   : > { %11237 = vst [vmem:[#allocation60_spill] sm:$0xff] %v9145_v38  ;;  %11238 = vst [vmem:[#allocation61_spill] sm:$0xff] %v9147_v33  ;;  %v2762_v24 = vmul.f32 %v2730_v31, %v9145_v38  ;;  %v2763_v55 = vmul.f32 %v2731_v48, %v9147_v33  ;;  %v9156_v4 = vsel %vm1068_vm3, 1.0, %v10449_v62  ;;  %v9159_v34 = vsel %vm1069_vm4, 1.0, %v10449_v62  ;;  %v11256_v21 = vld [vmem:[#allocation59_spill] sm:$0xff] }
 0x406   : > { %11243 = vst [vmem:[#allocation62_spill] sm:$0xff] %v9156_v4  ;;  %11244 = vst [vmem:[#allocation64_spill] sm:$0xff] %v9159_v34  ;;  %6196 = vmatprep.mubr.msk.bf16.mxu0 %vm276_vm0, %v4565_v49  ;;  %v9164_v18 = vsub.f32 %v11245_v14, %v9156_v4  ;;  %v9168_v13 = vsub.f32 %v11247_v6, %v9159_v34  ;;  %v5499_v31 = vadd.f32 -8.0, %v11249_v45  ;;  %v5500_v48 = vadd.f32 -8.0, %v11250_v27  ;;  %v11255_v14 = vld [vmem:[#allocation29_spill] sm:$0xff]  ;;  %v9180_v6 = vpop.f32.mrf.mxu0  ;;  %v9182_v34 = vpop.f32.mrf.mxu1 }
 0x407   : > { %v9172_v12 = vadd.f32 %v2762_v24, %v2746_v51  ;;  %v9174_v15 = vadd.f32 %v2763_v55, %v2747_v17  ;;  %v5627_v63 = vadd.f32 -3.5, %v11253_v28  ;;  %v5628_v7 = vadd.f32 -3.5, %v11254_v36  ;;  %11257 = vst [vmem:[#allocation77_spill] sm:$0xff] %v9180_v6  ;;  %11258 = vst [vmem:[#allocation91_spill] sm:$0xff] %v9182_v34  ;;  %v11261_v6 = vld [vmem:[#allocation72_spill] sm:$0xff] }
 0x408   : > { %11246 = vst [vmem:[#allocation88_spill] sm:$0xff] %v9164_v18  ;;  %11248 = vst [vmem:[#allocation89_spill] sm:$0xff] %v9168_v13  ;;  %v2012_v49 = vsub.f32 2.0, %v5499_v31  ;;  %v2013_v16 = vsub.f32 2.0, %v5500_v48  ;;  %v2028_v4 = vmul.f32 %v5499_v31, %v11255_v14  ;;  %v2029_v29 = vmul.f32 %v5500_v48, %v11256_v21  ;;  %v9190_v14 = vpop.f32.mrf.mxu0  ;;  %v9192_v21 = vpop.f32.mrf.mxu1 }
 0x409   : > { %11251 = vst [vmem:[#allocation90_spill] sm:$0xff] %v9172_v12  ;;  %11252 = vst [vmem:[#allocation65_spill] sm:$0xff] %v9174_v15  ;;  %v3402_v27 = vmul.f32 %v3370_v50, %v9172_v12  ;;  %v3403_v51 = vmul.f32 %v3371_v26, %v9174_v15  ;;  %v2732_v17 = vsub.f32 1.5, %v5627_v63  ;;  %v2733_v24 = vsub.f32 1.5, %v5628_v7 }
 0x40a   : > { %v2044_v55 = vmul.f32 %v2012_v49, %v9164_v18  ;;  %v2045_v36 = vmul.f32 %v2013_v16, %v9168_v13  ;;  %v2748_v28 = vmul.f32 %v5627_v63, %v8928_v54  ;;  %v2749_v31 = vmul.f32 %v5628_v7, %v8930_v41  ;;  %11259 = vst [vmem:[#allocation76_spill] sm:$0xff] %v9190_v14  ;;  %v11264_v49 = vld [vmem:[#allocation79_spill] sm:$0xff]  ;;  %v11265_v16 = vld [vmem:[#allocation98_spill] sm:$0xff]  ;;  %v9202_v54 = vpop.f32.mrf.mxu0  ;;  %v9204_v41 = vpop.f32.mrf.mxu1 }
 0x40b   : > { %11260 = vst [vmem:[#allocation80_spill] sm:$0xff] %v9192_v21  ;;  %v3418_v48 = vadd.f32 %v3402_v27, %v3386_v25  ;;  %v3419_v34 = vadd.f32 %v3403_v51, %v3387_v58  ;;  %v5739_v50 = vadd.f32 -2.0, %v11261_v6  ;;  %v5740_v26 = vadd.f32 -2.0, %v11167_v20  ;;  %11266 = vst [vmem:[#allocation78_spill] sm:$0xff] %v9202_v54 }
 0x40c   : > { %v9196_v45 = vadd.f32 %v2044_v55, %v2028_v4  ;;  %v9198_v15 = vadd.f32 %v2045_v36, %v2029_v29  ;;  %vm1026_vm5 = vcmp.ge.f32.partialorder %v11264_v49, 1.4  ;;  %vm1027_vm6 = vcmp.ge.f32.partialorder %v11265_v16, 1.4  ;;  %11267 = vst [vmem:[#allocation75_spill] sm:$0xff] %v9204_v41  ;;  %v9213_v51 = vpop.f32.mrf.mxu0  ;;  %v9215_v55 = vpop.f32.mrf.mxu1 }
 0x40d   : > { %v4724_v63 = vpack.c.bf16 %v3419_v34, %v3418_v48  ;;  %v3372_v7 = vsub.f32 1.3333334, %v5739_v50  ;;  %v3373_v25 = vsub.f32 1.3333334, %v5740_v26  ;;  %v3388_v58 = vmul.f32 %v5739_v50, %v8946_v9  ;;  %11268 = vst [vmem:[#allocation67_spill] sm:$0xff] %v9213_v51  ;;  %11269 = vst [vmem:[#allocation17_spill] sm:$0xff] %v9215_v55 }
 0x40e   : > { %11262 = vst [vmem:[#allocation66_spill] sm:$0xff] %v9196_v45  ;;  %11263 = vst [vmem:[#allocation81_spill] sm:$0xff] %v9198_v15  ;;  %v2764_v27 = vmul.f32 %v2732_v17, %v9196_v45  ;;  %v2765_v4 = vmul.f32 %v2733_v24, %v9198_v15  ;;  %v3389_v29 = vmul.f32 %v5740_v26, %v8948_v56  ;;  %v9211_v36 = vsel %vm1026_vm5, 1.0, %v10449_v62  ;;  %v11270_v9 = vld [vmem:[#allocation123_spill] sm:$0xff]  ;;  %v11273_v50 = vld [vmem:[#allocation118_spill] sm:$0xff]  ;;  %v9236_v21 = vpop.f32.mrf.mxu0  ;;  %v9238_v14 = vpop.f32.mrf.mxu1 }
 0x40f   : > { %6209 = vmatmul.mubr.msk.bf16.gmra.mxu1 %vm276_vm0, %v4724_v63  ;;  %v9219_v34 = vsel %vm1027_vm6, 1.0, %v10449_v62  ;;  %v9223_v48 = vsub.f32 %v11270_v9, %v9211_v36  ;;  %v11272_v17 = vld [vmem:[#allocation115_spill] sm:$0xff]  ;;  %v5490_v56 = vadd.f32 -7.0, %v11273_v50  ;;  %v11278_v63 = vld [vmem:[#allocation116_spill] sm:$0xff]  ;;  %11279 = vst [vmem:[#allocation44_spill] sm:$0xff] %v9236_v21  ;;  %11280 = vst [vmem:[#allocation47_spill] sm:$0xff] %v9238_v14 }
 0x410   : > { %v5489_v24 = vadd.f32 -7.0, %v11272_v17  ;;  %v9227_v26 = vadd.f32 %v2764_v27, %v2748_v28  ;;  %v9229_v41 = vadd.f32 %v2765_v4, %v2749_v31  ;;  %v11276_v51 = vld [vmem:[#allocation83_spill] sm:$0xff]  ;;  %v5617_v54 = vadd.f32 -3.0, %v11278_v63  ;;  %v11281_v15 = vld [vmem:[#allocation84_spill] sm:$0xff]  ;;  %v11282_v45 = vld [vmem:[#allocation85_spill] sm:$0xff]  ;;  %v9245_v18 = vpop.f32.mrf.mxu0  ;;  %v9247_v12 = vpop.f32.mrf.mxu1 }
 0x411   : > { %11271 = vst [vmem:[#allocation18_spill] sm:$0xff] %v9223_v48  ;;  %v9233_v55 = vsub.f32 %v11276_v51, %v9219_v34  ;;  %v1939_v20 = vsub.f32 2.0, %v5490_v56  ;;  %v1955_v13 = vmul.f32 %v5490_v56, %v11282_v45  ;;  %v11283_v27 = vld [vmem:[#allocation119_spill] sm:$0xff]  ;;  %11284 = vst [vmem:[#allocation48_spill] sm:$0xff] %v9245_v18  ;;  %v11319_v63 = vld [vmem:[#allocation110_spill] sm:$0xff] }
 0x412   : > { %11274 = vst [vmem:[#allocation20_spill] sm:$0xff] %v9227_v26  ;;  %11275 = vst [vmem:[#allocation46_spill] sm:$0xff] %v9229_v41  ;;  %v1938_v9 = vsub.f32 2.0, %v5489_v24  ;;  %v1954_v6 = vmul.f32 %v5489_v24, %v11281_v15  ;;  %v3404_v28 = vmul.f32 %v3372_v7, %v9227_v26  ;;  %v3405_v31 = vmul.f32 %v3373_v25, %v9229_v41  ;;  %v11287_v15 = vld [vmem:[#allocation117_spill] sm:$0xff]  ;;  %v11288_v26 = vld [vmem:[#allocation100_spill] sm:$0xff]  ;;  %v9254_v41 = vpop.f32.mrf.mxu0  ;;  %v9256_v38 = vpop.f32.mrf.mxu1 }
 0x413   : > { %11277 = vst [vmem:[#allocation92_spill] sm:$0xff] %v9233_v55  ;;  %v5618_v4 = vadd.f32 -3.0, %v11283_v27  ;;  %v2658_v51 = vsub.f32 1.5, %v5617_v54  ;;  %11285 = vst [vmem:[#allocation52_spill] sm:$0xff] %v9247_v12  ;;  %v1971_v14 = vmul.f32 %v1939_v20, %v9233_v55  ;;  %v2674_v33 = vmul.f32 %v5617_v54, %v11286_v0  ;;  %v11294_v0 = vld [vmem:[#allocation99_spill] sm:$0xff]  ;;  %v11315_v27 = vld [vmem:[#allocation14_spill] sm:$0xff] }
 0x414   : > { %v1970_v21 = vmul.f32 %v1938_v9, %v9223_v48  ;;  %v5729_v24 = vadd.f32 -1.6666666, %v11287_v15  ;;  %v3420_v45 = vadd.f32 %v3404_v28, %v3388_v58  ;;  %v3421_v56 = vadd.f32 %v3405_v31, %v3389_v29  ;;  %11289 = vst [vmem:[#allocation111_spill] sm:$0xff] %v9254_v41  ;;  %11290 = vst [vmem:[#allocation50_spill] sm:$0xff] %v9256_v38  ;;  %v11293_v9 = vld [vmem:[#allocation120_spill] sm:$0xff]  ;;  %v11295_v15 = vld [vmem:[#allocation3_spill] sm:$0xff]  ;;  %v9266_v29 = vpop.f32.mrf.mxu0 }
 0x415   : > { %v2659_v7 = vsub.f32 1.5, %v5618_v4  ;;  %v2675_v25 = vmul.f32 %v5618_v4, %v11288_v26  ;;  %v9260_v12 = vadd.f32 %v1971_v14, %v1955_v13  ;;  %v5730_v48 = vadd.f32 -1.6666666, %v11293_v9  ;;  %v11296_v58 = vld [vmem:[#allocation4_spill] sm:$0xff]  ;;  %11297 = vst [vmem:[#allocation29_spill] sm:$0xff] %v9266_v29  ;;  %v9268_v26 = vpop.f32.mrf.mxu1  ;;  %v11308_v41 = vld [vmem:[#allocation107_spill] sm:$0xff] }
 0x416   : > { %v9258_v18 = vadd.f32 %v1970_v21, %v1954_v6  ;;  %v3298_v20 = vsub.f32 1.3333334, %v5729_v24  ;;  %v4725_v55 = vpack.c.bf16 %v3421_v56, %v3420_v45  ;;  %v3314_v54 = vmul.f32 %v5729_v24, %v11294_v0  ;;  %11298 = vst [vmem:[#allocation59_spill] sm:$0xff] %v9268_v26  ;;  %v11299_v14 = vld [vmem:[#allocation108_spill] sm:$0xff]  ;;  %v11301_v45 = vld [vmem:[#allocation10_spill] sm:$0xff]  ;;  %v9278_v0 = vpop.f32.mrf.mxu0 }
 0x417   : > { %11292 = vst [vmem:[#allocation112_spill] sm:$0xff] %v9260_v12  ;;  %vm1108_vm7 = vcmp.ge.f32.partialorder %v11295_v15, 2.2  ;;  %vm1109_vm8 = vcmp.ge.f32.partialorder %v11296_v58, 2.2  ;;  %v2691_v6 = vmul.f32 %v2659_v7, %v9260_v12  ;;  %v3315_v21 = vmul.f32 %v5730_v48, %v11299_v14  ;;  %v11300_v15 = vld [vmem:[#allocation7_spill] sm:$0xff]  ;;  %v9280_v58 = vpop.f32.mrf.mxu1 }
 0x418   : > { %11291 = vst [vmem:[#allocation51_spill] sm:$0xff] %v9258_v18  ;;  %v2690_v28 = vmul.f32 %v2658_v51, %v9258_v18  ;;  %v3299_v13 = vsub.f32 1.3333334, %v5730_v48  ;;  %6212 = vmatprep.mubr.msk.bf16.mxu1 %vm276_vm0, %v4725_v55  ;;  %v5347_v31 = vsel %vm1108_vm7, 1.0, %v10449_v62  ;;  %v5348_v4 = vsel %vm1109_vm8, 1.0, %v10449_v62  ;;  %11302 = vst [vmem:[#allocation79_spill] sm:$0xff] %v9278_v0  ;;  %v9290_v18 = vpop.f32.mrf.mxu0 }
 0x419   : > { %v5507_v24 = vadd.f32 -9.0, %v11300_v15  ;;  %v5508_v56 = vadd.f32 -9.0, %v11301_v45  ;;  %11303 = vst [vmem:[#allocation98_spill] sm:$0xff] %v9280_v58  ;;  %v9284_v7 = vadd.f32 %v2691_v6, %v2675_v25  ;;  %v11306_v26 = vld [vmem:[#allocation96_spill] sm:$0xff]  ;;  %v11307_v14 = vld [vmem:[#allocation97_spill] sm:$0xff]  ;;  %v11309_v12 = vld [vmem:[#allocation95_spill] sm:$0xff]  ;;  %v9292_v45 = vpop.f32.mrf.mxu1 }
 0x41a   : > { %v9282_v51 = vadd.f32 %v2690_v28, %v2674_v33  ;;  %v1316_v48 = vsub.f32 %v11306_v26, %v5347_v31  ;;  %v1317_v55 = vsub.f32 %v11307_v14, %v5348_v4  ;;  %11310 = vst [vmem:[#allocation118_spill] sm:$0xff] %v9290_v18  ;;  %11311 = vst [vmem:[#allocation83_spill] sm:$0xff] %v9292_v45  ;;  %v11312_v25 = vld [vmem:[#allocation11_spill] sm:$0xff]  ;;  %v11313_v6 = vld [vmem:[#allocation13_spill] sm:$0xff]  ;;  %vm1070_vm9 = vcmp.ge.f32.partialorder %v11191_v47, 1.8 }
 0x41b   : > { %11305 = vst [vmem:[#allocation115_spill] sm:$0xff] %v9284_v7  ;;  %v2084_v29 = vsub.f32 2.0, %v5507_v24  ;;  %v2085_v38 = vsub.f32 2.0, %v5508_v56  ;;  %v2100_v9 = vmul.f32 %v5507_v24, %v11308_v41  ;;  %v2101_v15 = vmul.f32 %v5508_v56, %v11309_v12  ;;  %v11314_v14 = vld [vmem:[#allocation12_spill] sm:$0xff]  ;;  %v9300_v24 = vpop.f32.mrf.mxu0  ;;  %v9302_v12 = vpop.f32.mrf.mxu1 }
 0x41c   : > { %11304 = vst [vmem:[#allocation123_spill] sm:$0xff] %v9282_v51  ;;  %v3330_v58 = vmul.f32 %v3298_v20, %v9282_v51  ;;  %v3331_v33 = vmul.f32 %v3299_v13, %v9284_v7  ;;  %v5635_v28 = vadd.f32 -4.0, %v11312_v25  ;;  %v5636_v26 = vadd.f32 -4.0, %v11313_v6  ;;  %11316 = vst [vmem:[#allocation84_spill] sm:$0xff] %v9300_v24  ;;  %v11318_v7 = vld [vmem:[#allocation109_spill] sm:$0xff] }
 0x41d   : > { %v2116_v31 = vmul.f32 %v2084_v29, %v1316_v48  ;;  %v2117_v4 = vmul.f32 %v2085_v38, %v1317_v55  ;;  %v5747_v0 = vadd.f32 -2.3333333, %v11314_v14  ;;  %v5748_v41 = vadd.f32 -2.3333333, %v11315_v27  ;;  %11317 = vst [vmem:[#allocation85_spill] sm:$0xff] %v9302_v12  ;;  %v9306_v29 = vpop.f32.mrf.mxu0  ;;  %v9308_v38 = vpop.f32.mrf.mxu1  ;;  %v11322_v14 = vld [vmem:[#allocation82_spill] sm:$0xff] }
 0x41e   : > { %v3346_v56 = vadd.f32 %v3330_v58, %v3314_v54  ;;  %v3347_v45 = vadd.f32 %v3331_v33, %v3315_v21  ;;  %v2804_v18 = vsub.f32 1.5, %v5635_v28  ;;  %v2805_v20 = vsub.f32 1.5, %v5636_v26  ;;  %11320 = vst [vmem:[#allocation94_spill] sm:$0xff] %v9306_v29  ;;  %11321 = vst [vmem:[#allocation100_spill] sm:$0xff] %v9308_v38  ;;  %v11323_v21 = vld [vmem:[#allocation22_spill] sm:$0xff] }
 0x41f   : > { %v2132_v51 = vadd.f32 %v2116_v31, %v2100_v9  ;;  %v2133_v13 = vadd.f32 %v2117_v4, %v2101_v15  ;;  %v2820_v25 = vmul.f32 %v5635_v28, %v11318_v7  ;;  %v2821_v6 = vmul.f32 %v5636_v26, %v11319_v63  ;;  %v9313_v9 = vpop.f32.mrf.mxu0  ;;  %v9315_v7 = vpop.f32.mrf.mxu1 }
 0x420   : > { %v4566_v48 = vpack.c.bf16 %v3347_v45, %v3346_v56  ;;  %v3444_v27 = vsub.f32 1.3333334, %v5747_v0  ;;  %v3445_v55 = vsub.f32 1.3333334, %v5748_v41  ;;  %v3460_v24 = vmul.f32 %v5747_v0, %v11322_v14  ;;  %11324 = vst [vmem:[#allocation99_spill] sm:$0xff] %v9313_v9  ;;  %11325 = vst [vmem:[#allocation3_spill] sm:$0xff] %v9315_v7 }
 0x421   : > { %v2836_v12 = vmul.f32 %v2804_v18, %v2132_v51  ;;  %v2837_v54 = vmul.f32 %v2805_v20, %v2133_v13  ;;  %v3461_v58 = vmul.f32 %v5748_v41, %v11323_v21  ;;  %vm1071_vm10 = vcmp.ge.f32.partialorder %v11192_v10, 1.8  ;;  %v9331_v28 = vpop.f32.mrf.mxu0  ;;  %v9333_v26 = vpop.f32.mrf.mxu1 }
 0x422   : > { %6197 = vmatmul.mubr.msk.bf16.gmra.mxu0 %vm276_vm0, %v4566_v48  ;;  %v9320_v63 = vsel %vm1070_vm9, 1.0, %v10449_v62  ;;  %v5501_v15 = vadd.f32 -8.0, %v11193_v2  ;;  %v5502_v18 = vadd.f32 -8.0, %v11194_v11  ;;  %v9325_v45 = vsel %vm1071_vm10, 1.0, %v10449_v62  ;;  %11326 = vst [vmem:[#allocation4_spill] sm:$0xff] %v9331_v28  ;;  %11327 = vst [vmem:[#allocation108_spill] sm:$0xff] %v9333_v26 }
 0x423   : > { %v2852_v0 = vadd.f32 %v2836_v12, %v2820_v25  ;;  %v2853_v51 = vadd.f32 %v2837_v54, %v2821_v6  ;;  %v9329_v33 = vsub.f32 %v9026_v37, %v9320_v63  ;;  %v9337_v31 = vsub.f32 %v9033_v60, %v9325_v45  ;;  %v9342_v37 = vpop.f32.mrf.mxu0  ;;  %v9344_v6 = vpop.f32.mrf.mxu1 }
 0x424   : > { %v2014_v4 = vsub.f32 2.0, %v5501_v15  ;;  %v2015_v41 = vsub.f32 2.0, %v5502_v18  ;;  %v2030_v12 = vmul.f32 %v5501_v15, %v9037_v35  ;;  %v2031_v13 = vmul.f32 %v5502_v18, %v9041_v1  ;;  %11328 = vst [vmem:[#allocation7_spill] sm:$0xff] %v9342_v37  ;;  %11329 = vst [vmem:[#allocation10_spill] sm:$0xff] %v9344_v6 }
 0x425   : > { %v3476_v56 = vmul.f32 %v3444_v27, %v2852_v0  ;;  %v3477_v20 = vmul.f32 %v3445_v55, %v2853_v51  ;;  %v5629_v25 = vadd.f32 -3.5, %v11201_v8  ;;  %v5630_v60 = vadd.f32 -3.5, %v11202_v52  ;;  %v9351_v1 = vpop.f32.mrf.mxu0  ;;  %v9353_v15 = vpop.f32.mrf.mxu1 }
 0x426   : > { %v2046_v48 = vmul.f32 %v2014_v4, %v9329_v33  ;;  %v2047_v14 = vmul.f32 %v2015_v41, %v9337_v31  ;;  %v5741_v54 = vadd.f32 -2.0, %v11203_v39  ;;  %11330 = vst [vmem:[#allocation96_spill] sm:$0xff] %v9351_v1  ;;  %11331 = vst [vmem:[#allocation97_spill] sm:$0xff] %v9353_v15  ;;  %v5742_v38 = vadd.f32 -2.0, %v11206_v19 }
 0x427   : > { %v3492_v21 = vadd.f32 %v3476_v56, %v3460_v24  ;;  %v3493_v35 = vadd.f32 %v3477_v20, %v3461_v58  ;;  %v2734_v27 = vsub.f32 1.5, %v5629_v25  ;;  %v2750_v55 = vmul.f32 %v5629_v25, %v9057_v5  ;;  %v9362_v58 = vpop.f32.mrf.mxu0  ;;  %v9364_v5 = vpop.f32.mrf.mxu1 }
 0x428   : > { %v9355_v18 = vadd.f32 %v2046_v48, %v2030_v12  ;;  %v9357_v0 = vadd.f32 %v2047_v14, %v2031_v13  ;;  %v2735_v51 = vsub.f32 1.5, %v5630_v60  ;;  %v2751_v4 = vmul.f32 %v5630_v60, %v9059_v23  ;;  %11332 = vst [vmem:[#allocation107_spill] sm:$0xff] %v9362_v58  ;;  %11333 = vst [vmem:[#allocation95_spill] sm:$0xff] %v9364_v5  ;;  %v11339_v5 = vld [vmem:[#allocation105_spill] sm:$0xff] }
 0x429   : > { %v4883_v41 = vpack.c.bf16 %v3493_v35, %v3492_v21  ;;  %v3374_v29 = vsub.f32 1.3333334, %v5741_v54  ;;  %v3390_v24 = vmul.f32 %v5741_v54, %v9069_v53  ;;  %vm1072_vm11 = vcmp.ge.f32.partialorder %v11208_v44, 1.8  ;;  %v9378_v25 = vpop.f32.mrf.mxu0  ;;  %v9380_v48 = vpop.f32.mrf.mxu1  ;;  %v11337_v35 = vld [vmem:[#allocation104_spill] sm:$0xff] }
 0x42a   : > { %v2766_v56 = vmul.f32 %v2734_v27, %v9355_v18  ;;  %v2767_v12 = vmul.f32 %v2735_v51, %v9357_v0  ;;  %vm1073_vm12 = vcmp.ge.f32.partialorder %v11210_v59, 1.8  ;;  %v3375_v23 = vsub.f32 1.3333334, %v5742_v38  ;;  %11334 = vst [vmem:[#allocation11_spill] sm:$0xff] %v9378_v25  ;;  %11335 = vst [vmem:[#allocation13_spill] sm:$0xff] %v9380_v48 }
 0x42b   : > { %6224 = vmatprep.mubr.msk.bf16.mxu0 %vm276_vm0, %v4883_v41  ;;  %v3391_v20 = vmul.f32 %v5742_v38, %v9071_v46  ;;  %v9373_v13 = vsel %vm1072_vm11, 1.0, %v10449_v62  ;;  %v9376_v53 = vsel %vm1073_vm12, 1.0, %v10449_v62  ;;  %v11336_v38 = vld [vmem:[#allocation101_spill] sm:$0xff]  ;;  %v5504_v27 = vadd.f32 -8.0, %v11337_v35  ;;  %v11338_v51 = vld [vmem:[#allocation102_spill] sm:$0xff] }
 0x42c   : > { %v9382_v14 = vadd.f32 %v2766_v56, %v2750_v55  ;;  %v9384_v60 = vadd.f32 %v2767_v12, %v2751_v4  ;;  %v9388_v54 = vsub.f32 %v9074_v30, %v9373_v13  ;;  %v9392_v46 = vsub.f32 %v9077_v57, %v9376_v53  ;;  %v9398_v55 = vpop.f32.mrf.mxu0  ;;  %v9400_v4 = vpop.f32.mrf.mxu1 }
 0x42d   : > { %v5503_v21 = vadd.f32 -8.0, %v11336_v38  ;;  %v5631_v41 = vadd.f32 -3.5, %v11338_v51  ;;  %v5632_v48 = vadd.f32 -3.5, %v11339_v5  ;;  %11340 = vst [vmem:[#allocation12_spill] sm:$0xff] %v9398_v55  ;;  %11341 = vst [vmem:[#allocation14_spill] sm:$0xff] %v9400_v4  ;;  %v5743_v12 = vadd.f32 -2.0, %v11221_v42 }
 0x42e   : > { %v3406_v56 = vmul.f32 %v3374_v29, %v9382_v14  ;;  %v3407_v30 = vmul.f32 %v3375_v23, %v9384_v60  ;;  %v5744_v57 = vadd.f32 -2.0, %v11222_v43  ;;  %v2017_v58 = vsub.f32 2.0, %v5504_v27  ;;  %v9408_v26 = vpop.f32.mrf.mxu0  ;;  %v9410_v28 = vpop.f32.mrf.mxu1 }
 0x42f   : > { %v2016_v25 = vsub.f32 2.0, %v5503_v21  ;;  %v2032_v6 = vmul.f32 %v5503_v21, %v9082_v22  ;;  %v2033_v37 = vmul.f32 %v5504_v27, %v9086_v40  ;;  %11342 = vst [vmem:[#allocation109_spill] sm:$0xff] %v9408_v26  ;;  %11343 = vst [vmem:[#allocation110_spill] sm:$0xff] %v9410_v28  ;;  %v2736_v15 = vsub.f32 1.5, %v5631_v41  ;;  %v11363_v28 = vld [vmem:[#allocation25_spill] sm:$0xff] }
 0x430   : > { %v3422_v55 = vadd.f32 %v3406_v56, %v3390_v24  ;;  %v3423_v4 = vadd.f32 %v3407_v30, %v3391_v20  ;;  %v2737_v29 = vsub.f32 1.5, %v5632_v48  ;;  %v2049_v1 = vmul.f32 %v2017_v58, %v9392_v46  ;;  %v9416_v43 = vpop.f32.mrf.mxu0  ;;  %v9418_v22 = vpop.f32.mrf.mxu1  ;;  %v11349_v58 = vld [vmem:[#allocation2_spill] sm:$0xff] }
 0x431   : > { %v2048_v23 = vmul.f32 %v2016_v25, %v9388_v54  ;;  %v2752_v7 = vmul.f32 %v5631_v41, %v9103_v61  ;;  %v2753_v9 = vmul.f32 %v5632_v48, %v9105_v3  ;;  %11344 = vst [vmem:[#allocation82_spill] sm:$0xff] %v9416_v43  ;;  %11345 = vst [vmem:[#allocation22_spill] sm:$0xff] %v9418_v22  ;;  %v3376_v21 = vsub.f32 1.3333334, %v5743_v12  ;;  %v11348_v25 = vld [vmem:[#allocation87_spill] sm:$0xff]  ;;  %v11352_v48 = vld [vmem:[#allocation5_spill] sm:$0xff] }
 0x432   : > { %v4726_v40 = vpack.c.bf16 %v3423_v4, %v3422_v55  ;;  %v3377_v27 = vsub.f32 1.3333334, %v5744_v57  ;;  %v3392_v24 = vmul.f32 %v5743_v12, %v9130_v32  ;;  %v9423_v56 = vadd.f32 %v2049_v1, %v2033_v37  ;;  %v9427_v61 = vpop.f32.mrf.mxu0  ;;  %v9429_v3 = vpop.f32.mrf.mxu1  ;;  %v11353_v55 = vld [vmem:[#allocation23_spill] sm:$0xff] }
 0x433   : > { %v9421_v20 = vadd.f32 %v2048_v23, %v2032_v6  ;;  %v3393_v30 = vmul.f32 %v5744_v57, %v11348_v25  ;;  %vm1110_vm13 = vcmp.ge.f32.partialorder %v11349_v58, 2.2  ;;  %11350 = vst [vmem:[#allocation102_spill] sm:$0xff] %v9427_v61  ;;  %11351 = vst [vmem:[#allocation105_spill] sm:$0xff] %v9429_v3  ;;  %vm1111_vm14 = vcmp.ge.f32.partialorder %v11352_v48, 2.2 }
 0x434   : > { %11347 = vst [vmem:[#allocation104_spill] sm:$0xff] %v9423_v56  ;;  %6213 = vmatmul.mubr.msk.bf16.gmra.mxu1 %vm276_vm0, %v4726_v40  ;;  %v5349_v41 = vsel %vm1110_vm13, 1.0, %v10449_v62  ;;  %v5509_v32 = vadd.f32 -9.0, %v11353_v55  ;;  %v11354_v6 = vld [vmem:[#allocation24_spill] sm:$0xff]  ;;  %v2769_v1 = vmul.f32 %v2737_v29, %v9423_v56  ;;  %v5350_v12 = vsel %vm1111_vm14, 1.0, %v10449_v62  ;;  %v11355_v57 = vld [vmem:[#allocation113_spill] sm:$0xff]  ;;  %v9440_v25 = vpop.f32.mrf.mxu0  ;;  %v9442_v58 = vpop.f32.mrf.mxu1 }
 0x435   : > { %11346 = vst [vmem:[#allocation101_spill] sm:$0xff] %v9421_v20  ;;  %v5510_v4 = vadd.f32 -9.0, %v11354_v6  ;;  %v2768_v37 = vmul.f32 %v2736_v15, %v9421_v20  ;;  %v1318_v23 = vsub.f32 %v11355_v57, %v5349_v41  ;;  %11356 = vst [vmem:[#allocation87_spill] sm:$0xff] %v9440_v25  ;;  %v11358_v40 = vld [vmem:[#allocation114_spill] sm:$0xff]  ;;  %v11359_v61 = vld [vmem:[#allocation121_spill] sm:$0xff]  ;;  %v5637_v26 = vadd.f32 -4.0, %v11363_v28 }
 0x436   : > { %11357 = vst [vmem:[#allocation2_spill] sm:$0xff] %v9442_v58  ;;  %v1319_v48 = vsub.f32 %v11358_v40, %v5350_v12  ;;  %v2086_v3 = vsub.f32 2.0, %v5509_v32  ;;  %v2102_v55 = vmul.f32 %v5509_v32, %v11359_v61  ;;  %v9448_v6 = vadd.f32 %v2769_v1, %v2753_v9  ;;  %v11362_v15 = vld [vmem:[#allocation122_spill] sm:$0xff]  ;;  %v9452_v56 = vpop.f32.mrf.mxu0  ;;  %v9454_v41 = vpop.f32.mrf.mxu1  ;;  %v11367_v40 = vld [vmem:[#allocation27_spill] sm:$0xff]  ;;  %v11368_v32 = vld [vmem:[#allocation124_spill] sm:$0xff] }
 0x437   : > { %v2087_v22 = vsub.f32 2.0, %v5510_v4  ;;  %v9446_v43 = vadd.f32 %v2768_v37, %v2752_v7  ;;  %v2103_v29 = vmul.f32 %v5510_v4, %v11362_v15  ;;  %11364 = vst [vmem:[#allocation24_spill] sm:$0xff] %v9452_v56  ;;  %11365 = vst [vmem:[#allocation113_spill] sm:$0xff] %v9454_v41  ;;  %v11366_v25 = vld [vmem:[#allocation26_spill] sm:$0xff]  ;;  %v5749_v20 = vadd.f32 -2.3333333, %v11367_v40 }
 0x438   : > { %11361 = vst [vmem:[#allocation23_spill] sm:$0xff] %v9448_v6  ;;  %v2118_v57 = vmul.f32 %v2086_v3, %v1318_v23  ;;  %v5638_v12 = vadd.f32 -4.0, %v11366_v25  ;;  %v3409_v7 = vmul.f32 %v3377_v27, %v9448_v6  ;;  %v2806_v9 = vsub.f32 1.5, %v5637_v26  ;;  %v9461_v4 = vpop.f32.mrf.mxu0  ;;  %v9463_v28 = vpop.f32.mrf.mxu1  ;;  %v11371_v3 = vld [vmem:[#allocation32_spill] sm:$0xff] }
 0x439   : > { %11360 = vst [vmem:[#allocation5_spill] sm:$0xff] %v9446_v43  ;;  %v2119_v58 = vmul.f32 %v2087_v22, %v1319_v48  ;;  %v3408_v61 = vmul.f32 %v3376_v21, %v9446_v43  ;;  %v2822_v37 = vmul.f32 %v5637_v26, %v11368_v32  ;;  %11369 = vst [vmem:[#allocation114_spill] sm:$0xff] %v9461_v4  ;;  %v11372_v48 = vld [vmem:[#allocation28_spill] sm:$0xff]  ;;  %v3446_v56 = vsub.f32 1.3333334, %v5749_v20  ;;  %v11375_v32 = vld [vmem:[#allocation34_spill] sm:$0xff] }
 0x43a   : > { %11370 = vst [vmem:[#allocation121_spill] sm:$0xff] %v9463_v28  ;;  %v2134_v1 = vadd.f32 %v2118_v57, %v2102_v55  ;;  %v2807_v41 = vsub.f32 1.5, %v5638_v12  ;;  %v2823_v22 = vmul.f32 %v5638_v12, %v11371_v3  ;;  %v3425_v25 = vadd.f32 %v3409_v7, %v3393_v30  ;;  %v9467_v21 = vpop.f32.mrf.mxu0  ;;  %v9469_v27 = vpop.f32.mrf.mxu1  ;;  %v11376_v43 = vld [vmem:[#allocation8_spill] sm:$0xff]  ;;  %v11378_v12 = vld [vmem:[#allocation15_spill] sm:$0xff] }
 0x43b   : > { %v2135_v15 = vadd.f32 %v2119_v58, %v2103_v29  ;;  %v3424_v23 = vadd.f32 %v3408_v61, %v3392_v24  ;;  %v5750_v40 = vadd.f32 -2.3333333, %v11372_v48  ;;  %11373 = vst [vmem:[#allocation122_spill] sm:$0xff] %v9467_v21  ;;  %11374 = vst [vmem:[#allocation25_spill] sm:$0xff] %v9469_v27  ;;  %v3462_v4 = vmul.f32 %v5749_v20, %v11375_v32  ;;  %v11377_v29 = vld [vmem:[#allocation30_spill] sm:$0xff]  ;;  %v11381_v20 = vld [vmem:[#allocation36_spill] sm:$0xff] }
 0x43c   : > { %v2838_v6 = vmul.f32 %v2806_v9, %v2134_v1  ;;  %vm1112_vm15 = vcmp.ge.f32.partialorder %v11376_v43, 2.2  ;;  %vm1113_vm1 = vcmp.ge.f32.partialorder %v11378_v12, 2.2  ;;  %v9475_v24 = vpop.f32.mrf.mxu0  ;;  %v9479_v9 = vpop.f32.mrf.mxu1  ;;  %v11387_v32 = vld [vmem:[#allocation41_spill] sm:$0xff]  ;;  %v11388_v27 = vld [vmem:[#allocation31_spill] sm:$0xff] }
 0x43d   : > { %v2839_v26 = vmul.f32 %v2807_v41, %v2135_v15  ;;  %v4727_v55 = vpack.c.bf16 %v3425_v25, %v3424_v23  ;;  %v3447_v58 = vsub.f32 1.3333334, %v5750_v40  ;;  %v3463_v57 = vmul.f32 %v5750_v40, %v11377_v29  ;;  %11379 = vst [vmem:[#allocation26_spill] sm:$0xff] %v9475_v24  ;;  %11380 = vst [vmem:[#allocation27_spill] sm:$0xff] %v9479_v9  ;;  %v11382_v41 = vld [vmem:[#allocation37_spill] sm:$0xff]  ;;  %v11383_v15 = vld [vmem:[#allocation38_spill] sm:$0xff] }
 0x43e   : > { %v2854_v30 = vadd.f32 %v2838_v6, %v2822_v37  ;;  %v5351_v7 = vsel %vm1112_vm15, 1.0, %v10449_v62  ;;  %v5352_v3 = vsel %vm1113_vm1, 1.0, %v10449_v62  ;;  %v5511_v23 = vadd.f32 -9.0, %v11383_v15  ;;  %v11384_v25 = vld [vmem:[#allocation39_spill] sm:$0xff]  ;;  %v9486_v40 = vpop.f32.mrf.mxu0  ;;  %v11394_v21 = vld [vmem:[#allocation42_spill] sm:$0xff] }
 0x43f   : > { %v2855_v61 = vadd.f32 %v2839_v26, %v2823_v22  ;;  %6216 = vmatprep.mubr.msk.bf16.mxu1 %vm276_vm0, %v4727_v55  ;;  %v1320_v43 = vsub.f32 %v11381_v20, %v5351_v7  ;;  %v1321_v1 = vsub.f32 %v11382_v41, %v5352_v3  ;;  %v5512_v48 = vadd.f32 -9.0, %v11384_v25  ;;  %11385 = vst [vmem:[#allocation124_spill] sm:$0xff] %v9486_v40  ;;  %v11386_v22 = vld [vmem:[#allocation40_spill] sm:$0xff]  ;;  %v11389_v24 = vld [vmem:[#allocation35_spill] sm:$0xff]  ;;  %v9494_v25 = vpop.f32.mrf.mxu1 }
 0x440   : > { %v3478_v6 = vmul.f32 %v3446_v56, %v2854_v30  ;;  %v5639_v26 = vadd.f32 -4.0, %v11386_v22  ;;  %v5640_v29 = vadd.f32 -4.0, %v11387_v32  ;;  %v2088_v12 = vsub.f32 2.0, %v5511_v23  ;;  %v9492_v28 = vpop.f32.mrf.mxu0  ;;  %11391 = vst [vmem:[#allocation28_spill] sm:$0xff] %v9494_v25  ;;  %v11392_v30 = vld [vmem:[#allocation45_spill] sm:$0xff] }
 0x441   : > { %v3479_v37 = vmul.f32 %v3447_v58, %v2855_v61  ;;  %v2089_v9 = vsub.f32 2.0, %v5512_v48  ;;  %v2104_v55 = vmul.f32 %v5511_v23, %v11388_v27  ;;  %v2105_v7 = vmul.f32 %v5512_v48, %v11389_v24  ;;  %11390 = vst [vmem:[#allocation32_spill] sm:$0xff] %v9492_v28  ;;  %v11393_v22 = vld [vmem:[#allocation21_spill] sm:$0xff]  ;;  %v11395_v27 = vld [vmem:[#allocation43_spill] sm:$0xff] }
 0x442   : > { %v3494_v20 = vadd.f32 %v3478_v6, %v3462_v4  ;;  %v2808_v41 = vsub.f32 1.5, %v5639_v26  ;;  %v2809_v15 = vsub.f32 1.5, %v5640_v29  ;;  %v2120_v56 = vmul.f32 %v2088_v12, %v1320_v43  ;;  %v11398_v6 = vld [vmem:[#allocation74_spill] sm:$0xff] }
 0x443   : > { %v3495_v3 = vadd.f32 %v3479_v37, %v3463_v57  ;;  %v2121_v58 = vmul.f32 %v2089_v9, %v1321_v1  ;;  %v2824_v61 = vmul.f32 %v5639_v26, %v11392_v30  ;;  %v2825_v32 = vmul.f32 %v5640_v29, %v11393_v22  ;;  %v11397_v1 = vld [vmem:[#allocation19_spill] sm:$0xff]  ;;  %v9510_v26 = vpop.f32.mrf.mxu1  ;;  %v11406_v22 = vld [vmem:[#allocation117_spill] sm:$0xff] }
 0x444   : > { %v5751_v42 = vadd.f32 -2.3333333, %v11394_v21  ;;  %v5752_v23 = vadd.f32 -2.3333333, %v11395_v27  ;;  %vm1074_vm2 = vcmp.ge.f32.partialorder %v11264_v49, 1.8  ;;  %v2136_v4 = vadd.f32 %v2120_v56, %v2104_v55  ;;  %v9508_v21 = vpop.f32.mrf.mxu0 }
 0x445   : > { %v4884_v40 = vpack.c.bf16 %v3495_v3, %v3494_v20  ;;  %v2137_v57 = vadd.f32 %v2121_v58, %v2105_v7  ;;  %vm1075_vm3 = vcmp.ge.f32.partialorder %v11265_v16, 1.8  ;;  %v9503_v24 = vsel %vm1074_vm2, 1.0, %v10449_v62  ;;  %11399 = vst [vmem:[#allocation8_spill] sm:$0xff] %v9508_v21  ;;  %11400 = vst [vmem:[#allocation30_spill] sm:$0xff] %v9510_v26  ;;  %v11404_v3 = vld [vmem:[#allocation116_spill] sm:$0xff]  ;;  %v9532_v25 = vpop.f32.mrf.mxu1 }
 0x446   : > { %11396 = vst [vmem:[#allocation34_spill] sm:$0xff] %v9503_v24  ;;  %v3448_v9 = vsub.f32 1.3333334, %v5751_v42  ;;  %v3449_v43 = vsub.f32 1.3333334, %v5752_v23  ;;  %v3464_v48 = vmul.f32 %v5751_v42, %v11397_v1  ;;  %v3465_v37 = vmul.f32 %v5752_v23, %v11398_v6  ;;  %v11408_v1 = vld [vmem:[#allocation92_spill] sm:$0xff] }
 0x447   : > { %6225 = vmatmul.mubr.msk.bf16.vlgmr.msra.gmra.mxu0 %vm276_vm0, %v4884_v40  ;;  %v2840_v29 = vmul.f32 %v2808_v41, %v2136_v4  ;;  %v2841_v12 = vmul.f32 %v2809_v15, %v2137_v57  ;;  %v9513_v55 = vsel %vm1075_vm3, 1.0, %v10449_v62  ;;  %v9517_v7 = vsub.f32 %v9211_v36, %v9503_v24  ;;  %v11405_v15 = vld [vmem:[#allocation119_spill] sm:$0xff]  ;;  %v11407_v36 = vld [vmem:[#allocation18_spill] sm:$0xff]  ;;  %11410 = vst [vmem:[#allocation39_spill] sm:$0xff] %v9532_v25 }
 0x448   : > { %11401 = vst [vmem:[#allocation15_spill] sm:$0xff] %v9513_v55  ;;  %v9521_v40 = vsub.f32 %v9219_v34, %v9513_v55  ;;  %v5505_v42 = vadd.f32 -8.0, %v11272_v17  ;;  %v5506_v20 = vadd.f32 -8.0, %v11273_v50  ;;  %v5633_v56 = vadd.f32 -3.5, %v11404_v3  ;;  %v9530_v34 = vpop.f32.mrf.mxu0  ;;  %v11436_v3 = vld [vmem:[#allocation58_spill] sm:$0xff] }
 0x449   : > { %11402 = vst [vmem:[#allocation36_spill] sm:$0xff] %v9517_v7  ;;  %v2856_v58 = vadd.f32 %v2840_v29, %v2824_v61  ;;  %v2857_v41 = vadd.f32 %v2841_v12, %v2825_v32  ;;  %v5634_v30 = vadd.f32 -3.5, %v11405_v15  ;;  %v5745_v27 = vadd.f32 -2.0, %v11406_v22  ;;  %11409 = vst [vmem:[#allocation38_spill] sm:$0xff] %v9530_v34  ;;  %v11411_v29 = vld [vmem:[#allocation51_spill] sm:$0xff]  ;;  %v11412_v22 = vld [vmem:[#allocation112_spill] sm:$0xff] }
 0x44a   : > { %11403 = vst [vmem:[#allocation37_spill] sm:$0xff] %v9521_v40  ;;  %v2018_v23 = vsub.f32 2.0, %v5505_v42  ;;  %v2019_v4 = vsub.f32 2.0, %v5506_v20  ;;  %v2034_v57 = vmul.f32 %v5505_v42, %v11407_v36  ;;  %v2035_v6 = vmul.f32 %v5506_v20, %v11408_v1  ;;  %v11413_v36 = vld [vmem:[#allocation120_spill] sm:$0xff] }
 0x44b   : > { %v3480_v26 = vmul.f32 %v3448_v9, %v2856_v58  ;;  %v3481_v21 = vmul.f32 %v3449_v43, %v2857_v41  ;;  %v2738_v28 = vsub.f32 1.5, %v5633_v56  ;;  %v2739_v55 = vsub.f32 1.5, %v5634_v30  ;;  %v11416_v9 = vld [vmem:[#allocation123_spill] sm:$0xff]  ;;  %v11417_v58 = vld [vmem:[#allocation6_spill] sm:$0xff]  ;;  %v9545_v41 = vpop.f32.mrf.mxu0 }
 0x44c   : > { %v2050_v61 = vmul.f32 %v2018_v23, %v9517_v7  ;;  %v2051_v32 = vmul.f32 %v2019_v4, %v9521_v40  ;;  %v2754_v12 = vmul.f32 %v5633_v56, %v11411_v29  ;;  %v2755_v24 = vmul.f32 %v5634_v30, %v11412_v22  ;;  %11418 = vst [vmem:[#allocation31_spill] sm:$0xff] %v9545_v41  ;;  %v9547_v23 = vpop.f32.mrf.mxu1  ;;  %v11420_v30 = vld [vmem:[#allocation115_spill] sm:$0xff] }
 0x44d   : > { %v3496_v15 = vadd.f32 %v3480_v26, %v3464_v48  ;;  %v3497_v42 = vadd.f32 %v3481_v21, %v3465_v37  ;;  %v5746_v20 = vadd.f32 -2.0, %v11413_v36  ;;  %v3378_v1 = vsub.f32 1.3333334, %v5745_v27  ;;  %11419 = vst [vmem:[#allocation35_spill] sm:$0xff] %v9547_v23  ;;  %v11421_v37 = vld [vmem:[#allocation9_spill] sm:$0xff]  ;;  %v9566_v23 = vpop.f32.mrf.mxu0  ;;  %v11435_v40 = vld [vmem:[#allocation55_spill] sm:$0xff] }
 0x44e   : > { %v9539_v34 = vadd.f32 %v2050_v61, %v2034_v57  ;;  %v9541_v25 = vadd.f32 %v2051_v32, %v2035_v6  ;;  %v3394_v43 = vmul.f32 %v5745_v27, %v11416_v9  ;;  %vm1114_vm4 = vcmp.ge.f32.partialorder %v11417_v58, 2.2  ;;  %v11422_v57 = vld [vmem:[#allocation93_spill] sm:$0xff]  ;;  %v11423_v61 = vld [vmem:[#allocation16_spill] sm:$0xff]  ;;  %11429 = vst [vmem:[#allocation21_spill] sm:$0xff] %v9566_v23  ;;  %v9568_v41 = vpop.f32.mrf.mxu1 }
 0x44f   : > { %v4885_v56 = vpack.c.bf16 %v3497_v42, %v3496_v15  ;;  %v3379_v4 = vsub.f32 1.3333334, %v5746_v20  ;;  %v3395_v48 = vmul.f32 %v5746_v20, %v11420_v30  ;;  %vm1115_vm5 = vcmp.ge.f32.partialorder %v11421_v37, 2.2  ;;  %v11424_v15 = vld [vmem:[#allocation53_spill] sm:$0xff]  ;;  %v11425_v42 = vld [vmem:[#allocation56_spill] sm:$0xff] }
 0x450   : > { %11414 = vst [vmem:[#allocation40_spill] sm:$0xff] %v9539_v34  ;;  %11415 = vst [vmem:[#allocation41_spill] sm:$0xff] %v9541_v25  ;;  %v2770_v21 = vmul.f32 %v2738_v28, %v9539_v34  ;;  %v2771_v26 = vmul.f32 %v2739_v55, %v9541_v25  ;;  %v5353_v22 = vsel %vm1114_vm4, 1.0, %v10449_v62  ;;  %v5354_v27 = vsel %vm1115_vm5, 1.0, %v10449_v62  ;;  %v11427_v28 = vld [vmem:[#allocation54_spill] sm:$0xff]  ;;  %v11428_v30 = vld [vmem:[#allocation57_spill] sm:$0xff] }
 0x451   : > { %6228 = vmatprep.mubr.msk.bf16.mxu0 %vm276_vm0, %v4885_v56  ;;  %v1322_v6 = vsub.f32 %v11422_v57, %v5353_v22  ;;  %v1323_v32 = vsub.f32 %v11423_v61, %v5354_v27  ;;  %v5513_v29 = vadd.f32 -9.0, %v11424_v15  ;;  %v5514_v20 = vadd.f32 -9.0, %v11425_v42  ;;  %11430 = vst [vmem:[#allocation42_spill] sm:$0xff] %v9568_v41  ;;  %v11431_v57 = vld [vmem:[#allocation63_spill] sm:$0xff]  ;;  %v11432_v61 = vld [vmem:[#allocation86_spill] sm:$0xff]  ;;  %v11433_v25 = vld [vmem:[#allocation60_spill] sm:$0xff] }
 0x452   : > { %v9560_v9 = vadd.f32 %v2770_v21, %v2754_v12  ;;  %v9562_v58 = vadd.f32 %v2771_v26, %v2755_v24  ;;  %v5641_v55 = vadd.f32 -4.0, %v11427_v28  ;;  %v5642_v37 = vadd.f32 -4.0, %v11428_v30  ;;  %v11434_v34 = vld [vmem:[#allocation61_spill] sm:$0xff] }
 0x453   : > { %v2090_v56 = vsub.f32 2.0, %v5513_v29  ;;  %v2091_v22 = vsub.f32 2.0, %v5514_v20  ;;  %v2106_v27 = vmul.f32 %v5513_v29, %v11431_v57  ;;  %v2107_v15 = vmul.f32 %v5514_v20, %v11432_v61  ;;  %v9578_v57 = vpop.f32.mrf.mxu0  ;;  %v9580_v20 = vpop.f32.mrf.mxu1  ;;  %v11439_v61 = vld [vmem:[#allocation33_spill] sm:$0xff] }
 0x454   : > { %11426 = vst [vmem:[#allocation45_spill] sm:$0xff] %v9562_v58  ;;  %v3410_v42 = vmul.f32 %v3378_v1, %v9560_v9  ;;  %v3411_v12 = vmul.f32 %v3379_v4, %v9562_v58  ;;  %v2810_v24 = vsub.f32 1.5, %v5641_v55  ;;  %v2811_v21 = vsub.f32 1.5, %v5642_v37  ;;  %11437 = vst [vmem:[#allocation43_spill] sm:$0xff] %v9578_v57 }
 0x455   : > { %v2122_v26 = vmul.f32 %v2090_v56, %v1322_v6  ;;  %v2123_v28 = vmul.f32 %v2091_v22, %v1323_v32  ;;  %v2826_v30 = vmul.f32 %v5641_v55, %v11433_v25  ;;  %v2827_v23 = vmul.f32 %v5642_v37, %v11434_v34  ;;  %11438 = vst [vmem:[#allocation19_spill] sm:$0xff] %v9580_v20  ;;  %v11440_v6 = vld [vmem:[#allocation49_spill] sm:$0xff]  ;;  %v11441_v34 = vld [vmem:[#allocation90_spill] sm:$0xff]  ;;  %v11452_v20 = vld [vmem:[#allocation71_spill] sm:$0xff] }
 0x456   : > { %v3426_v36 = vadd.f32 %v3410_v42, %v3394_v43  ;;  %v3427_v41 = vadd.f32 %v3411_v12, %v3395_v48  ;;  %v5753_v7 = vadd.f32 -2.3333333, %v11435_v40  ;;  %v5754_v29 = vadd.f32 -2.3333333, %v11436_v3  ;;  %v11442_v40 = vld [vmem:[#allocation65_spill] sm:$0xff]  ;;  %v11444_v42 = vld [vmem:[#allocation68_spill] sm:$0xff] }
 0x457   : > { %v2138_v1 = vadd.f32 %v2122_v26, %v2106_v27  ;;  %v2139_v4 = vadd.f32 %v2123_v28, %v2107_v15  ;;  %vm1116_vm6 = vcmp.ge.f32.partialorder %v11439_v61, 2.2  ;;  %vm1117_vm7 = vcmp.ge.f32.partialorder %v11440_v6, 2.2  ;;  %v11443_v27 = vld [vmem:[#allocation62_spill] sm:$0xff]  ;;  %v11445_v26 = vld [vmem:[#allocation69_spill] sm:$0xff]  ;;  %v9594_v28 = vpop.f32.mrf.mxu1 }
 0x458   : > { %v4728_v32 = vpack.c.bf16 %v3427_v41, %v3426_v36  ;;  %v3450_v25 = vsub.f32 1.3333334, %v5753_v7  ;;  %v3451_v55 = vsub.f32 1.3333334, %v5754_v29  ;;  %v3466_v43 = vmul.f32 %v5753_v7, %v11441_v34  ;;  %v9592_v41 = vpop.f32.mrf.mxu0  ;;  %11447 = vst [vmem:[#allocation18_spill] sm:$0xff] %v9594_v28  ;;  %v11453_v28 = vld [vmem:[#allocation66_spill] sm:$0xff] }
 0x459   : > { %v2842_v48 = vmul.f32 %v2810_v24, %v2138_v1  ;;  %v2843_v37 = vmul.f32 %v2811_v21, %v2139_v4  ;;  %v3467_v56 = vmul.f32 %v5754_v29, %v11442_v40  ;;  %v5355_v3 = vsel %vm1116_vm6, 1.0, %v10449_v62  ;;  %11446 = vst [vmem:[#allocation74_spill] sm:$0xff] %v9592_v41  ;;  %v11448_v21 = vld [vmem:[#allocation64_spill] sm:$0xff]  ;;  %v11449_v1 = vld [vmem:[#allocation70_spill] sm:$0xff]  ;;  %v11451_v40 = vld [vmem:[#allocation89_spill] sm:$0xff] }
 0x45a   : > { %6217 = vmatmul.mubr.msk.bf16.gmra.mxu1 %vm276_vm0, %v4728_v32  ;;  %v5356_v22 = vsel %vm1117_vm7, 1.0, %v10449_v62  ;;  %v1324_v15 = vsub.f32 %v11443_v27, %v5355_v3  ;;  %v5515_v12 = vadd.f32 -9.0, %v11444_v42  ;;  %v5516_v36 = vadd.f32 -9.0, %v11445_v26  ;;  %v11450_v32 = vld [vmem:[#allocation88_spill] sm:$0xff] }
 0x45b   : > { %v2858_v7 = vadd.f32 %v2842_v48, %v2826_v30  ;;  %v2859_v24 = vadd.f32 %v2843_v37, %v2827_v23  ;;  %v1325_v29 = vsub.f32 %v11448_v21, %v5356_v22  ;;  %v5643_v4 = vadd.f32 -4.0, %v11449_v1  ;;  %v11454_v23 = vld [vmem:[#allocation72_spill] sm:$0xff]  ;;  %v9603_v37 = vpop.f32.mrf.mxu0  ;;  %v9605_v22 = vpop.f32.mrf.mxu1 }
 0x45c   : > { %v2092_v61 = vsub.f32 2.0, %v5515_v12  ;;  %v2093_v6 = vsub.f32 2.0, %v5516_v36  ;;  %v2108_v34 = vmul.f32 %v5515_v12, %v11450_v32  ;;  %v2109_v3 = vmul.f32 %v5516_v36, %v11451_v40  ;;  %v11455_v32 = vld [vmem:[#allocation81_spill] sm:$0xff] }
 0x45d   : > { %v3482_v27 = vmul.f32 %v3450_v25, %v2858_v7  ;;  %v3483_v42 = vmul.f32 %v3451_v55, %v2859_v24  ;;  %v5644_v26 = vadd.f32 -4.0, %v11452_v20  ;;  %v2812_v57 = vsub.f32 1.5, %v5643_v4  ;;  %v11456_v7 = vld [vmem:[#allocation73_spill] sm:$0xff]  ;;  %v9613_v40 = vpop.f32.mrf.mxu0 }
 0x45e   : > { %v2124_v41 = vmul.f32 %v2092_v61, %v1324_v15  ;;  %v2125_v58 = vmul.f32 %v2093_v6, %v1325_v29  ;;  %v2828_v30 = vmul.f32 %v5643_v4, %v11453_v28  ;;  %v5755_v48 = vadd.f32 -2.3333333, %v11454_v23  ;;  %v11457_v29 = vld [vmem:[#allocation20_spill] sm:$0xff] }
 0x45f   : > { %v3498_v21 = vadd.f32 %v3482_v27, %v3466_v43  ;;  %v3499_v1 = vadd.f32 %v3483_v42, %v3467_v56  ;;  %v2813_v12 = vsub.f32 1.5, %v5644_v26  ;;  %v2829_v36 = vmul.f32 %v5644_v26, %v11455_v32  ;;  %v11458_v43 = vld [vmem:[#allocation46_spill] sm:$0xff]  ;;  %v9615_v27 = vpop.f32.mrf.mxu1 }
 0x460   : > { %v2140_v25 = vadd.f32 %v2124_v41, %v2108_v34  ;;  %v2141_v55 = vadd.f32 %v2125_v58, %v2109_v3  ;;  %v5756_v20 = vadd.f32 -2.3333333, %v11456_v7  ;;  %v3452_v24 = vsub.f32 1.3333334, %v5755_v48 }
 0x461   : > { %v4886_v15 = vpack.c.bf16 %v3499_v1, %v3498_v21  ;;  %v3468_v61 = vmul.f32 %v5755_v48, %v11457_v29  ;;  %vm1118_vm8 = vcmp.ge.f32.partialorder %v11191_v47, 2.2  ;;  %vm1119_vm9 = vcmp.ge.f32.partialorder %v11192_v10, 2.2 }
 0x462   : > { %v2844_v28 = vmul.f32 %v2812_v57, %v2140_v25  ;;  %v2845_v4 = vmul.f32 %v2813_v12, %v2141_v55  ;;  %v3453_v6 = vsub.f32 1.3333334, %v5756_v20  ;;  %v3469_v56 = vmul.f32 %v5756_v20, %v11458_v43  ;;  %v9628_v25 = vpop.f32.mrf.mxu0 }
 0x463   : > { %6229 = vmatmul.mubr.msk.bf16.gmra.mxu0 %vm276_vm0, %v4886_v15  ;;  %v5357_v58 = vsel %vm1118_vm8, 1.0, %v10449_v62  ;;  %v5358_v41 = vsel %vm1119_vm9, 1.0, %v10449_v62  ;;  %v5517_v34 = vadd.f32 -9.0, %v11193_v2  ;;  %v5518_v47 = vadd.f32 -9.0, %v11194_v11  ;;  %v9630_v11 = vpop.f32.mrf.mxu1 }
 0x464   : > { %v2860_v10 = vadd.f32 %v2844_v28, %v2828_v30  ;;  %v2861_v57 = vadd.f32 %v2845_v4, %v2829_v36  ;;  %v1326_v3 = vsub.f32 %v9320_v63, %v5357_v58  ;;  %v1327_v42 = vsub.f32 %v9325_v45, %v5358_v41 }
 0x465   : > { %v2094_v26 = vsub.f32 2.0, %v5517_v34  ;;  %v2095_v23 = vsub.f32 2.0, %v5518_v47  ;;  %v2110_v48 = vmul.f32 %v5517_v34, %v9329_v33  ;;  %v2111_v21 = vmul.f32 %v5518_v47, %v9337_v31 }
 0x466   : > { %v3484_v1 = vmul.f32 %v3452_v24, %v2860_v10  ;;  %v3485_v12 = vmul.f32 %v3453_v6, %v2861_v57  ;;  %v5645_v32 = vadd.f32 -4.0, %v11201_v8  ;;  %v5646_v2 = vadd.f32 -4.0, %v11202_v52  ;;  %v9637_v6 = vpop.f32.mrf.mxu0 }
 0x467   : > { %v2126_v30 = vmul.f32 %v2094_v26, %v1326_v3  ;;  %v2127_v63 = vmul.f32 %v2095_v23, %v1327_v42  ;;  %v5757_v45 = vadd.f32 -2.3333333, %v11203_v39  ;;  %v5758_v36 = vadd.f32 -2.3333333, %v11206_v19  ;;  %v9639_v39 = vpop.f32.mrf.mxu1 }
 0x468   : > { %v3500_v55 = vadd.f32 %v3484_v1, %v3468_v61  ;;  %v3501_v33 = vadd.f32 %v3485_v12, %v3469_v56  ;;  %v2814_v7 = vsub.f32 1.5, %v5645_v32  ;;  %v2815_v31 = vsub.f32 1.5, %v5646_v2  ;;  %v9652_v57 = vpop.f32.mrf.mxu0 }
 0x469   : > { %v2142_v20 = vadd.f32 %v2126_v30, %v2110_v48  ;;  %v2143_v24 = vadd.f32 %v2127_v63, %v2111_v21  ;;  %v2830_v8 = vmul.f32 %v5645_v32, %v9355_v18  ;;  %v2831_v52 = vmul.f32 %v5646_v2, %v9357_v0  ;;  %v11459_v48 = vld [vmem:[#allocation103_spill] sm:$0xff] }
 0x46a   : > { %v4887_v15 = vpack.c.bf16 %v3501_v33, %v3500_v55  ;;  %v3454_v29 = vsub.f32 1.3333334, %v5757_v45  ;;  %v3455_v28 = vsub.f32 1.3333334, %v5758_v36  ;;  %v3470_v4 = vmul.f32 %v5757_v45, %v9382_v14  ;;  %v11461_v45 = vld [vmem:[#allocation104_spill] sm:$0xff]  ;;  %v9662_v55 = vpop.f32.mrf.mxu0  ;;  %v11462_v33 = vld [vmem:[#allocation106_spill] sm:$0xff] }
 0x46b   : > { %v2846_v19 = vmul.f32 %v2814_v7, %v2142_v20  ;;  %v2847_v61 = vmul.f32 %v2815_v31, %v2143_v24  ;;  %v3471_v43 = vmul.f32 %v5758_v36, %v9384_v60  ;;  %vm1120_vm10 = vcmp.ge.f32.partialorder %v11208_v44, 2.2 }
 0x46c   : > { %6232 = vmatprep.mubr.msk.bf16.mxu0 %vm276_vm0, %v4887_v15  ;;  %vm1121_vm11 = vcmp.ge.f32.partialorder %v11210_v59, 2.2  ;;  %v5359_v18 = vsel %vm1120_vm10, 1.0, %v10449_v62  ;;  %v5519_v0 = vadd.f32 -9.0, %v11336_v38  ;;  %v5520_v14 = vadd.f32 -9.0, %v11337_v35  ;;  %v9654_v59 = vpop.f32.mrf.mxu1  ;;  %v11464_v15 = vld [vmem:[#allocation23_spill] sm:$0xff] }
 0x46d   : > { %v2862_v56 = vadd.f32 %v2846_v19, %v2830_v8  ;;  %v2863_v58 = vadd.f32 %v2847_v61, %v2831_v52  ;;  %v5360_v41 = vsel %vm1121_vm11, 1.0, %v10449_v62  ;;  %v1328_v34 = vsub.f32 %v9373_v13, %v5359_v18  ;;  %v11463_v8 = vld [vmem:[#allocation5_spill] sm:$0xff] }
 0x46e   : > { %v1329_v60 = vsub.f32 %v9376_v53, %v5360_v41  ;;  %v2096_v47 = vsub.f32 2.0, %v5519_v0  ;;  %v2097_v44 = vsub.f32 2.0, %v5520_v14  ;;  %v2112_v10 = vmul.f32 %v5519_v0, %v9388_v54  ;;  %v11460_v54 = vld [vmem:[#allocation101_spill] sm:$0xff]  ;;  %v11466_v41 = vld [vmem:[#allocation119_spill] sm:$0xff] }
 0x46f   : > { %v3486_v3 = vmul.f32 %v3454_v29, %v2862_v56  ;;  %v3487_v38 = vmul.f32 %v3455_v28, %v2863_v58  ;;  %v2113_v35 = vmul.f32 %v5520_v14, %v9392_v46  ;;  %v5647_v42 = vadd.f32 -4.0, %v11338_v51  ;;  %v9664_v46 = vpop.f32.mrf.mxu1  ;;  %v11465_v56 = vld [vmem:[#allocation116_spill] sm:$0xff] }
 0x470   : > { %v2128_v26 = vmul.f32 %v2096_v47, %v1328_v34  ;;  %v2129_v23 = vmul.f32 %v2097_v44, %v1329_v60  ;;  %v5648_v13 = vadd.f32 -4.0, %v11339_v5  ;;  %v5759_v53 = vadd.f32 -2.3333333, %v11459_v48  ;;  %v11467_v60 = vld [vmem:[#allocation34_spill] sm:$0xff]  ;;  %v11468_v44 = vld [vmem:[#allocation15_spill] sm:$0xff]  ;;  %v11471_v48 = vld [vmem:[#allocation37_spill] sm:$0xff] }
 0x471   : > { %v3502_v21 = vadd.f32 %v3486_v3, %v3470_v4  ;;  %v3503_v1 = vadd.f32 %v3487_v38, %v3471_v43  ;;  %v2816_v12 = vsub.f32 1.5, %v5647_v42  ;;  %v2832_v32 = vmul.f32 %v5647_v42, %v11460_v54  ;;  %v9674_v43 = vpop.f32.mrf.mxu0  ;;  %v9676_v18 = vpop.f32.mrf.mxu1  ;;  %v11469_v42 = vld [vmem:[#allocation117_spill] sm:$0xff] }
 0x472   : > { %v2144_v2 = vadd.f32 %v2128_v26, %v2112_v10  ;;  %v2145_v30 = vadd.f32 %v2129_v23, %v2113_v35  ;;  %v2817_v63 = vsub.f32 1.5, %v5648_v13  ;;  %v2833_v36 = vmul.f32 %v5648_v13, %v11461_v45 }
 0x473   : > { %v4888_v51 = vpack.c.bf16 %v3503_v1, %v3502_v21  ;;  %v5760_v7 = vadd.f32 -2.3333333, %v11462_v33  ;;  %vm1122_vm12 = vcmp.ge.f32.partialorder %v11264_v49, 2.2  ;;  %vm1123_vm13 = vcmp.ge.f32.partialorder %v11265_v16, 2.2  ;;  %v9685_v23 = vpop.f32.mrf.mxu0 }
 0x474   : > { %v2848_v5 = vmul.f32 %v2816_v12, %v2144_v2  ;;  %v2849_v31 = vmul.f32 %v2817_v63, %v2145_v30  ;;  %v3456_v20 = vsub.f32 1.3333334, %v5759_v53  ;;  %v3472_v52 = vmul.f32 %v5759_v53, %v11463_v8  ;;  %v11472_v2 = vld [vmem:[#allocation120_spill] sm:$0xff]  ;;  %v11474_v33 = vld [vmem:[#allocation41_spill] sm:$0xff] }
 0x475   : > { %6233 = vmatmul.mubr.msk.bf16.gmra.mxu0 %vm276_vm0, %v4888_v51  ;;  %v3457_v24 = vsub.f32 1.3333334, %v5760_v7  ;;  %v3473_v29 = vmul.f32 %v5760_v7, %v11464_v15  ;;  %v5361_v19 = vsel %vm1122_vm12, 1.0, %v10449_v62  ;;  %v5362_v61 = vsel %vm1123_vm13, 1.0, %v10449_v62 }
 0x476   : > { %v2864_v28 = vadd.f32 %v2848_v5, %v2832_v32  ;;  %v2865_v4 = vadd.f32 %v2849_v31, %v2833_v36  ;;  %v5521_v49 = vadd.f32 -9.0, %v11272_v17  ;;  %v5522_v16 = vadd.f32 -9.0, %v11273_v50  ;;  %v9687_v17 = vpop.f32.mrf.mxu1  ;;  %v11470_v50 = vld [vmem:[#allocation36_spill] sm:$0xff]  ;;  %v9695_v5 = vpop.f32.mrf.mxu0 }
 0x477   : > { %v5649_v58 = vadd.f32 -4.0, %v11465_v56  ;;  %v5650_v34 = vadd.f32 -4.0, %v11466_v41  ;;  %v1330_v47 = vsub.f32 %v11467_v60, %v5361_v19  ;;  %v1331_v10 = vsub.f32 %v11468_v44, %v5362_v61  ;;  %v11473_v36 = vld [vmem:[#allocation40_spill] sm:$0xff]  ;;  %v11476_v44 = vld [vmem:[#allocation99_spill] sm:$0xff] }
 0x478   : > { %v3488_v0 = vmul.f32 %v3456_v20, %v2864_v28  ;;  %v3489_v14 = vmul.f32 %v3457_v24, %v2865_v4  ;;  %v2098_v3 = vsub.f32 2.0, %v5521_v49  ;;  %v2099_v62 = vsub.f32 2.0, %v5522_v16  ;;  %v9697_v31 = vpop.f32.mrf.mxu1  ;;  %v11475_v4 = vld [vmem:[#allocation45_spill] sm:$0xff]  ;;  %v6158_v61 = vpop.f32.mrf.mxu0 }
 0x479   : > { %v5761_v26 = vadd.f32 -2.3333333, %v11469_v42  ;;  %v2114_v13 = vmul.f32 %v5521_v49, %v11470_v50  ;;  %v2115_v53 = vmul.f32 %v5522_v16, %v11471_v48  ;;  %v2818_v54 = vsub.f32 1.5, %v5649_v58  ;;  %v11481_v42 = vld [vmem:[#allocation108_spill] sm:$0xff]  ;;  %v11482_v50 = vld [vmem:[#allocation7_spill] sm:$0xff] }
 0x47a   : > { %v3504_v38 = vadd.f32 %v3488_v0, %v3472_v52  ;;  %v3505_v35 = vadd.f32 %v3489_v14, %v3473_v29  ;;  %v2130_v21 = vmul.f32 %v2098_v3, %v1330_v47  ;;  %v2131_v1 = vmul.f32 %v2099_v62, %v1331_v10  ;;  %v9701_v49 = vpop.f32.mrf.mxu1  ;;  %v11477_v10 = vld [vmem:[#allocation3_spill] sm:$0xff]  ;;  %v11479_v62 = vld [vmem:[#allocation97_spill] sm:$0xff] }
 0x47b   : > { %v2819_v32 = vsub.f32 1.5, %v5650_v34  ;;  %v5762_v30 = vadd.f32 -2.3333333, %v11472_v2  ;;  %v2834_v51 = vmul.f32 %v5649_v58, %v11473_v36  ;;  %v2835_v7 = vmul.f32 %v5650_v34, %v11474_v33  ;;  %v4366_v58 = vpop.f32.mrf.mxu0  ;;  %v11488_v36 = vld [vmem:[#allocation30_spill] sm:$0xff] }
 0x47c   : > { %v4889_v12 = vpack.c.bf16 %v3505_v35, %v3504_v38  ;;  %v2146_v63 = vadd.f32 %v2130_v21, %v2114_v13  ;;  %v2147_v45 = vadd.f32 %v2131_v1, %v2115_v53  ;;  %v3458_v8 = vsub.f32 1.3333334, %v5761_v26  ;;  %v11480_v35 = vld [vmem:[#allocation4_spill] sm:$0xff]  ;;  %v11483_v13 = vld [vmem:[#allocation10_spill] sm:$0xff]  ;;  %v11485_v1 = vld [vmem:[#allocation31_spill] sm:$0xff] }
 0x47d   : > { %v3459_v52 = vsub.f32 1.3333334, %v5762_v30  ;;  %v3474_v28 = vmul.f32 %v5761_v26, %v9560_v9  ;;  %v3475_v19 = vmul.f32 %v5762_v30, %v11475_v4  ;;  %v6159_v47 = vpop.f32.mrf.mxu0  ;;  %v3905_v3 = vadd.f32 %v11477_v10, %v11476_v44  ;;  %v11478_v9 = vld [vmem:[#allocation96_spill] sm:$0xff]  ;;  %v11487_v30 = vld [vmem:[#allocation38_spill] sm:$0xff] }
 0x47e   : > { %6236 = vmatprep.mubr.msk.bf16.mxu0 %vm276_vm0, %v4889_v12  ;;  %v2850_v20 = vmul.f32 %v2818_v54, %v2146_v63  ;;  %v2851_v24 = vmul.f32 %v2819_v32, %v2147_v45  ;;  %v3900_v38 = vadd.f32 %v11479_v62, %v11478_v9  ;;  %v3897_v26 = vadd.f32 %v11481_v42, %v11480_v35  ;;  %v11484_v53 = vld [vmem:[#allocation32_spill] sm:$0xff]  ;;  %v11489_v33 = vld [vmem:[#allocation42_spill] sm:$0xff] }
 0x47f   : > { %v3908_v48 = vadd.f32 %v11483_v13, %v11482_v50  ;;  %v4071_v21 = vadd.f32 %v11484_v53, %v3905_v3  ;;  %v11486_v32 = vld [vmem:[#allocation8_spill] sm:$0xff]  ;;  %v4369_v45 = vpop.f32.mrf.mxu0 }
 0x480   : > { %v2866_v15 = vadd.f32 %v2850_v20, %v2834_v51  ;;  %v2867_v29 = vadd.f32 %v2851_v24, %v2835_v7  ;;  %v4070_v12 = vadd.f32 %v11485_v1, %v3900_v38  ;;  %v4069_v2 = vadd.f32 %v11486_v32, %v3897_v26  ;;  %v11490_v20 = vld [vmem:[#allocation39_spill] sm:$0xff]  ;;  %v11492_v1 = vld [vmem:[#allocation77_spill] sm:$0xff]  ;;  %v11494_v32 = vld [vmem:[#allocation76_spill] sm:$0xff] }
 0x481   : > { %v4072_v63 = vadd.f32 %v11487_v30, %v3908_v48  ;;  %v4233_v51 = vadd.f32 %v11488_v36, %v4071_v21 }
 0x482   : > { %v3490_v16 = vmul.f32 %v3458_v8, %v2866_v15  ;;  %v3491_v0 = vmul.f32 %v3459_v52, %v2867_v29  ;;  %v4232_v7 = vadd.f32 %v11489_v33, %v4070_v12  ;;  %v4231_v24 = vadd.f32 %v11490_v20, %v4069_v2  ;;  %v11491_v8 = vld [vmem:[#allocation35_spill] sm:$0xff]  ;;  %v11495_v2 = vld [vmem:[#allocation80_spill] sm:$0xff] }
 0x483   : > { %v4234_v52 = vadd.f32 %v11491_v8, %v4072_v63  ;;  %v4395_v15 = vadd.f32 %v6158_v61, %v4233_v51  ;;  %v11493_v12 = vld [vmem:[#allocation91_spill] sm:$0xff]  ;;  %v3849_v30 = vadd.f32 %v11495_v2, %v11494_v32  ;;  %v11497_v51 = vld [vmem:[#allocation78_spill] sm:$0xff] }
 0x484   : > { %v3506_v14 = vadd.f32 %v3490_v16, %v3474_v28  ;;  %v3507_v56 = vadd.f32 %v3491_v0, %v3475_v19  ;;  %v4394_v29 = vadd.f32 %v4369_v45, %v4232_v7  ;;  %v4393_v4 = vadd.f32 %v4366_v58, %v4231_v24  ;;  %v11496_v63 = vld [vmem:[#allocation107_spill] sm:$0xff] }
 0x485   : > { %v6178_v41 = vpop.f32.mrf.mxu1  ;;  %v4396_v19 = vadd.f32 %v6159_v47, %v4234_v52  ;;  %v11498_v33 = vld [vmem:[#allocation75_spill] sm:$0xff] }
 0x486   : > { %v4890_v34 = vpack.c.bf16 %v3507_v56, %v3506_v14  ;;  %v4557_v16 = vadd.f32 %v6178_v41, %v4395_v15  ;;  %v3860_v7 = vadd.f32 %v11498_v33, %v11497_v51  ;;  %v11499_v20 = vld [vmem:[#allocation11_spill] sm:$0xff]  ;;  %v11512_v33 = vld [vmem:[#allocation18_spill] sm:$0xff] }
 0x487   : > { %v4528_v60 = vpop.f32.mrf.mxu1  ;;  %v4057_v24 = vadd.f32 %v11499_v20, %v3849_v30  ;;  %v11500_v8 = vld [vmem:[#allocation95_spill] sm:$0xff]  ;;  %v11510_v30 = vld [vmem:[#allocation110_spill] sm:$0xff] }
 0x488   : > { %6237 = vmatmul.mubr.msk.bf16.gmra.mxu0 %vm276_vm0, %v4890_v34  ;;  %v4555_v0 = vadd.f32 %v4528_v60, %v4393_v4  ;;  %v6186_v34 = vpop.f32.mrf.mxu0  ;;  %v11501_v15 = vld [vmem:[#allocation67_spill] sm:$0xff]  ;;  %v11503_v4 = vld [vmem:[#allocation12_spill] sm:$0xff]  ;;  %vm5065_vm0 = vcmask 130048  }
 0x489   : > { %v6179_v54 = vpop.f32.mrf.mxu1  ;;  %v11509_v32 = vld [vmem:[#allocation19_spill] sm:$0xff] }
 0x48a   : > { %v4558_v14 = vadd.f32 %v6179_v54, %v4396_v19  ;;  %v4642_v44 = vpop.f32.mrf.mxu0  ;;  %v3857_v54 = vadd.f32 %v11493_v12, %v11492_v1  ;;  %v4060_v19 = vadd.f32 %v11503_v4, %v3860_v7  ;;  %v11508_v12 = vld [vmem:[#allocation43_spill] sm:$0xff] }
 0x48b   : > { %v4531_v28 = vpop.f32.mrf.mxu1 }
 0x48c   : > { %v4556_v56 = vadd.f32 %v4531_v28, %v4394_v29  ;;  %v6187_v10 = vpop.f32.mrf.mxu0  ;;  %v4059_v45 = vadd.f32 %v11496_v63, %v3857_v54  ;;  %v11502_v29 = vld [vmem:[#allocation17_spill] sm:$0xff] }
 0x48d   : > { %v3852_v28 = vadd.f32 %v11502_v29, %v11501_v15 }
 0x48e   : > { %v4645_v3 = vpop.f32.mrf.mxu0  ;;  %v4221_v52 = vadd.f32 %v11500_v8, %v4059_v45  ;;  %v11511_v45 = vld [vmem:[#allocation74_spill] sm:$0xff] }
 0x497   : > { %v9720_v9 = vpop.f32.mrf.mxu0 }
 0x499   : > { %v9722_v62 = vpop.f32.mrf.mxu0 }
 0x49b   : > { %v9724_v38 = vpop.f32.mrf.mxu0 }
 0x49d   : > { %v9726_v35 = vpop.f32.mrf.mxu0 }
 0x4a9   : > { %v6206_v36 = vpop.f32.mrf.mxu1 }
 0x4bb   : > { %v9728_v61 = vpop.f32.mrf.mxu0 }
 0x4bd   : > { %v9730_v58 = vpop.f32.mrf.mxu0 }
 0x4bf   : > { %v9732_v41 = vpop.f32.mrf.mxu0 }
 0x4c1   : > { %v9734_v60 = vpop.f32.mrf.mxu0 }
 0x4e2   : > { %v6198_v47 = vpop.f32.mrf.mxu0 }
 0x4e3   : > { %v9736_v42 = vadd.f32 %v6198_v47, %v4557_v16  ;;  %v11504_v16 = vld [vmem:[#allocation13_spill] sm:$0xff]  ;;  %v4804_v47 = vpop.f32.mrf.mxu1 }
 0x4e4   : > { %v4690_v26 = vpop.f32.mrf.mxu0 }
 0x4e5   : > { %v9738_v50 = vadd.f32 %v4690_v26, %v4555_v0  ;;  %v4219_v0 = vadd.f32 %v11504_v16, %v4057_v24  ;;  %v11506_v26 = vld [vmem:[#allocation109_spill] sm:$0xff]  ;;  %v6207_v24 = vpop.f32.mrf.mxu1 }
 0x4e6   : > { %v6199_v13 = vpop.f32.mrf.mxu0 }
 0x4e7   : > { %v9740_v48 = vadd.f32 %v6199_v13, %v4558_v14  ;;  %v11505_v14 = vld [vmem:[#allocation21_spill] sm:$0xff]  ;;  %v4058_v13 = vadd.f32 %v11506_v26, %v3852_v28  ;;  %v4381_v54 = vadd.f32 %v11508_v12, %v4219_v0  ;;  %v9770_v28 = vld [vmem:[%s9895_s4 + $0x2] ss:$0 sm:$0xff]  ;;  %v11513_v12 = vld [vmem:[#allocation44_spill] sm:$0xff] }
 0x4e8   : > { %v4693_v53 = vpop.f32.mrf.mxu0 }
 0x4e9   : > { %v9742_v21 = vadd.f32 %v4693_v53, %v4556_v56  ;;  %v4383_v56 = vadd.f32 %v11505_v14, %v4221_v52  ;;  %v11507_v53 = vld [vmem:[#allocation14_spill] sm:$0xff]  ;;  %v4220_v63 = vadd.f32 %v11510_v30, %v4058_v13  ;;  %v4543_v7 = vadd.f32 %v11512_v33, %v4381_v54  ;;  %v11514_v54 = vld [vmem:[#allocation47_spill] sm:$0xff]  ;;  %v11516_v30 = vld [vmem:[#allocation52_spill] sm:$0xff] }
 0x4ea   : > { %v4222_v1 = vadd.f32 %v11507_v53, %v4060_v19 }
 0x4eb   : > { %v4545_v2 = vadd.f32 %v11509_v32, %v4383_v56  ;;  %v4382_v8 = vadd.f32 %v9603_v37, %v4220_v63  ;;  %v4705_v15 = vadd.f32 %v4642_v44, %v4543_v7  ;;  %v4807_v37 = vpop.f32.mrf.mxu1  ;;  %v3873_v32 = vadd.f32 %v11514_v54, %v11513_v12  ;;  %v11518_v7 = vld [vmem:[#allocation111_spill] sm:$0xff] }
 0x4ec   : > { %v4384_v51 = vadd.f32 %v11511_v45, %v4222_v1  ;;  %v11517_v45 = vld [vmem:[#allocation82_spill] sm:$0xff] }
 0x4ed   : > { %v4707_v20 = vadd.f32 %v6186_v34, %v4545_v2  ;;  %v4544_v19 = vadd.f32 %v9615_v27, %v4382_v8  ;;  %v4867_v0 = vadd.f32 %v4804_v47, %v4705_v15  ;;  %v11515_v2 = vld [vmem:[#allocation48_spill] sm:$0xff]  ;;  %v6210_v33 = vpop.f32.mrf.mxu1  ;;  %v11520_v8 = vld [vmem:[#allocation102_spill] sm:$0xff] }
 0x4ee   : > { %v4546_v52 = vadd.f32 %v9605_v22, %v4384_v51  ;;  %v3865_v63 = vadd.f32 %v11516_v30, %v11515_v2  ;;  %v4063_v51 = vadd.f32 %v11517_v45, %v3873_v32  ;;  %v11521_v15 = vld [vmem:[#allocation22_spill] sm:$0xff] }
 0x4ef   : > { %v4869_v29 = vadd.f32 %v6206_v36, %v4707_v20  ;;  %v4706_v34 = vadd.f32 %v4645_v3, %v4544_v19  ;;  %v11519_v20 = vld [vmem:[#allocation50_spill] sm:$0xff]  ;;  %v11523_v19 = vld [vmem:[#allocation59_spill] sm:$0xff] }
 0x4f0   : > { %v4708_v16 = vadd.f32 %v6187_v10, %v4546_v52  ;;  %v4061_v52 = vadd.f32 %v11520_v8, %v3865_v63 }
 0x4f1   : > { %v4868_v56 = vadd.f32 %v4807_v37, %v4706_v34  ;;  %v11525_v37 = vld [vmem:[#allocation105_spill] sm:$0xff] }
 0x4f2   : > { %v4870_v44 = vadd.f32 %v6207_v24, %v4708_v16  ;;  %v3876_v24 = vadd.f32 %v11519_v20, %v11518_v7 }
 0x507   : > { %v6226_v4 = vpop.f32.mrf.mxu0 }
 0x508   : > { %v5031_v14 = vadd.f32 %v6226_v4, %v4869_v29  ;;  %v4225_v29 = vadd.f32 %v11521_v15, %v4063_v51  ;;  %v11522_v4 = vld [vmem:[#allocation29_spill] sm:$0xff]  ;;  %v11531_v15 = vld [vmem:[#allocation118_spill] sm:$0xff] }
 0x509   : > { %v4966_v22 = vpop.f32.mrf.mxu0  ;;  %v3868_v16 = vadd.f32 %v11523_v19, %v11522_v4  ;;  %v11533_v4 = vld [vmem:[#allocation114_spill] sm:$0xff] }
 0x50a   : > { %v5051_v27 = vadd.f32 %v9770_v28, %v5031_v14  ;;  %v5029_v10 = vadd.f32 %v4966_v22, %v4867_v0  ;;  %v11524_v0 = vld [vmem:[#allocation87_spill] sm:$0xff]  ;;  %v4223_v22 = vadd.f32 %v11525_v37, %v4061_v52  ;;  %v4387_v34 = vadd.f32 %v9613_v40, %v4225_v29  ;;  %v11534_v37 = vld [vmem:[#allocation84_spill] sm:$0xff] }
 0x50b   : > { %v6227_v36 = vpop.f32.mrf.mxu0  ;;  %v4064_v14 = vadd.f32 %v11524_v0, %v3876_v24  ;;  %v11530_v24 = vld [vmem:[#allocation98_spill] sm:$0xff]  ;;  %v11532_v29 = vld [vmem:[#allocation83_spill] sm:$0xff] }
 0x50c   : > { %5068 = vst.msk [vmem:[%s9778_s19 + $0x10] sm:$0xff] %vm5065_vm0, %v5051_v27  ;;  %v5049_v47 = vadd.f32 %v9770_v28, %v5029_v10  ;;  %v5032_v26 = vadd.f32 %v6227_v36, %v4870_v44  ;;  %v4820_v44 = vpop.f32.mrf.mxu1  ;;  %v11526_v27 = vld [vmem:[#allocation24_spill] sm:$0xff]  ;;  %v11527_v36 = vld [vmem:[#allocation2_spill] sm:$0xff] }
 0x50d   : > { %v4969_v13 = vpop.f32.mrf.mxu0  ;;  %v4062_v10 = vadd.f32 %v11526_v27, %v3868_v16 }
 0x50e   : > { %5066 = vst.msk [vmem:[%s9778_s19] sm:$0xff] %vm5065_vm0, %v5049_v47  ;;  %v5052_v53 = vadd.f32 %v9770_v28, %v5032_v26  ;;  %v5030_v1 = vadd.f32 %v4969_v13, %v4868_v56  ;;  %v4226_v56 = vadd.f32 %v11527_v36, %v4064_v14  ;;  %v4385_v47 = vadd.f32 %v9628_v25, %v4223_v22  ;;  %v11528_v13 = vld [vmem:[#allocation113_spill] sm:$0xff]  ;;  %v6211_v54 = vpop.f32.mrf.mxu1 }
 0x50f   : > { %v4549_v26 = vadd.f32 %v9630_v11, %v4387_v34  ;;  %v11535_v22 = vld [vmem:[#allocation85_spill] sm:$0xff] }
 0x510   : > { %5069 = vst.msk [vmem:[%s9778_s19 + $0x18] sm:$0xff] %vm5065_vm0, %v5052_v53  ;;  %v5050_v3 = vadd.f32 %v9770_v28, %v5030_v1  ;;  %v4224_v53 = vadd.f32 %v11528_v13, %v4062_v10  ;;  %v4388_v1 = vadd.f32 %v9637_v6, %v4226_v56  ;;  %v3892_v34 = vadd.f32 %v11535_v22, %v11534_v37  ;;  %v11537_v10 = vld [vmem:[#allocation121_spill] sm:$0xff] }
 0x511   : > { %v4711_v12 = vadd.f32 %v9720_v9, %v4549_v26  ;;  %v11539_v26 = vld [vmem:[#allocation100_spill] sm:$0xff] }
 0x512   : > { %5067 = vst.msk [vmem:[%s9778_s19 + $0x8] sm:$0xff] %vm5065_vm0, %v5050_v3  ;;  %v4547_v3 = vadd.f32 %v9639_v39, %v4385_v47  ;;  %v4386_v40 = vadd.f32 %v9652_v57, %v4224_v53  ;;  %v4550_v32 = vadd.f32 %v9654_v59, %v4388_v1  ;;  %v4823_v39 = vpop.f32.mrf.mxu1  ;;  %v11538_v47 = vld [vmem:[#allocation94_spill] sm:$0xff] }
 0x513   : > { %v4873_v30 = vadd.f32 %v6210_v33, %v4711_v12  ;;  %v3884_v13 = vadd.f32 %v11539_v26, %v11538_v47  ;;  %v11540_v53 = vld [vmem:[#allocation26_spill] sm:$0xff] }
 0x514   : > { %v4709_v2 = vadd.f32 %v9722_v62, %v4547_v3  ;;  %v4548_v11 = vadd.f32 %v9664_v46, %v4386_v40  ;;  %v4712_v63 = vadd.f32 %v9724_v38, %v4550_v32  ;;  %v11529_v62 = vld [vmem:[#allocation79_spill] sm:$0xff]  ;;  %v6214_v14 = vpop.f32.mrf.mxu1  ;;  %v4068_v1 = vadd.f32 %v11540_v53, %v3892_v34  ;;  %v11541_v3 = vld [vmem:[#allocation25_spill] sm:$0xff]  ;;  %v11542_v32 = vld [vmem:[#allocation124_spill] sm:$0xff] }
 0x515   : > { %v3889_v33 = vadd.f32 %v11530_v24, %v11529_v62 }
 0x516   : > { %v4871_v45 = vadd.f32 %v4820_v44, %v4709_v2  ;;  %v4710_v9 = vadd.f32 %v9726_v35, %v4548_v11  ;;  %v4874_v7 = vadd.f32 %v6211_v54, %v4712_v63  ;;  %v3881_v35 = vadd.f32 %v11532_v29, %v11531_v15  ;;  %v11536_v44 = vld [vmem:[#allocation122_spill] sm:$0xff]  ;;  %v4836_v40 = vpop.f32.mrf.mxu1 }
 0x517   : > { %v4067_v19 = vadd.f32 %v11533_v4, %v3889_v33  ;;  %v4066_v2 = vadd.f32 %v11542_v32, %v3884_v13 }
 0x518   : > { %v4872_v8 = vadd.f32 %v4823_v39, %v4710_v9  ;;  %v4065_v27 = vadd.f32 %v11536_v44, %v3881_v35 }
 0x519   : > { %v4229_v36 = vadd.f32 %v11537_v10, %v4067_v19 }
 0x51a   : > { %v4227_v12 = vadd.f32 %v11541_v3, %v4065_v27 }
 0x51b   : > { %v4391_v54 = vadd.f32 %v9662_v55, %v4229_v36  ;;  %v6215_v55 = vpop.f32.mrf.mxu1 }
 0x51c   : > { %v4389_v11 = vadd.f32 %v9674_v43, %v4227_v12 }
 0x51d   : > { %v4553_v63 = vadd.f32 %v9676_v18, %v4391_v54 }
 0x51f   : > { %v4715_v9 = vadd.f32 %v9728_v61, %v4553_v63 }
 0x523   : > { %v6230_v25 = vpop.f32.mrf.mxu0 }
 0x524   : > { %v5035_v6 = vadd.f32 %v6230_v25, %v4873_v30  ;;  %v11543_v30 = vld [vmem:[#allocation27_spill] sm:$0xff] }
 0x525   : > { %v4982_v51 = vpop.f32.mrf.mxu0  ;;  %v4230_v25 = vadd.f32 %v11543_v30, %v4068_v1 }
 0x526   : > { %v5055_v57 = vadd.f32 %v9770_v28, %v5035_v6  ;;  %v5033_v59 = vadd.f32 %v4982_v51, %v4871_v45  ;;  %v11544_v45 = vld [vmem:[#allocation28_spill] sm:$0xff]  ;;  %v4551_v51 = vadd.f32 %v9687_v17, %v4389_v11  ;;  %v4839_v17 = vpop.f32.mrf.mxu1 }
 0x527   : > { %v6231_v20 = vpop.f32.mrf.mxu0  ;;  %v4228_v6 = vadd.f32 %v11544_v45, %v4066_v2  ;;  %v4392_v39 = vadd.f32 %v9685_v23, %v4230_v25 }
 0x528   : > { %5072 = vst.msk [vmem:[%s9778_s19 + $0x30] sm:$0xff] %vm5065_vm0, %v5055_v57  ;;  %v5053_v46 = vadd.f32 %v9770_v28, %v5033_v59  ;;  %v5036_v38 = vadd.f32 %v6231_v20, %v4874_v7  ;;  %v4713_v59 = vadd.f32 %v9730_v58, %v4551_v51  ;;  %v4877_v20 = vadd.f32 %v6214_v14, %v4715_v9  ;;  %v6218_v29 = vpop.f32.mrf.mxu1 }
 0x529   : > { %v4985_v52 = vpop.f32.mrf.mxu0  ;;  %v4390_v7 = vadd.f32 %v9695_v5, %v4228_v6  ;;  %v4554_v57 = vadd.f32 %v9697_v31, %v4392_v39  ;;  %v4881_v19 = vadd.f32 %v6218_v29, %v9736_v42 }
 0x52a   : > { %5070 = vst.msk [vmem:[%s9778_s19 + $0x20] sm:$0xff] %vm5065_vm0, %v5053_v46  ;;  %v5056_v16 = vadd.f32 %v9770_v28, %v5036_v38  ;;  %v5034_v0 = vadd.f32 %v4985_v52, %v4872_v8  ;;  %v4875_v23 = vadd.f32 %v4836_v40, %v4713_v59  ;;  %v4852_v35 = vpop.f32.mrf.mxu1 }
 0x52b   : > { %v4552_v18 = vadd.f32 %v9701_v49, %v4390_v7  ;;  %v4716_v62 = vadd.f32 %v9732_v41, %v4554_v57 }
 0x52c   : > { %5073 = vst.msk [vmem:[%s9778_s19 + $0x38] sm:$0xff] %vm5065_vm0, %v5056_v16  ;;  %v5054_v56 = vadd.f32 %v9770_v28, %v5034_v0  ;;  %v6219_v4 = vpop.f32.mrf.mxu1  ;;  %v4879_v0 = vadd.f32 %v4852_v35, %v9738_v50 }
 0x52d   : > { %v4714_v33 = vadd.f32 %v9734_v60, %v4552_v18  ;;  %v4878_v5 = vadd.f32 %v6215_v55, %v4716_v62  ;;  %v4882_v34 = vadd.f32 %v6219_v4, %v9740_v48 }
 0x52e   : > { %5071 = vst.msk [vmem:[%s9778_s19 + $0x28] sm:$0xff] %vm5065_vm0, %v5054_v56  ;;  %v4855_v37 = vpop.f32.mrf.mxu1 }
 0x52f   : > { %v4876_v46 = vadd.f32 %v4839_v17, %v4714_v33  ;;  %v4880_v36 = vadd.f32 %v4855_v37, %v9742_v21 }
 0x535   : > { %v6234_v43 = vpop.f32.mrf.mxu0 }
 0x536   : > { %v5039_v24 = vadd.f32 %v6234_v43, %v4877_v20 }
 0x537   : > { %v4998_v61 = vpop.f32.mrf.mxu0 }
 0x538   : > { %v5059_v31 = vadd.f32 %v9770_v28, %v5039_v24  ;;  %v5037_v8 = vadd.f32 %v4998_v61, %v4875_v23 }
 0x539   : > { %v6235_v58 = vpop.f32.mrf.mxu0 }
 0x53a   : > { %5076 = vst.msk [vmem:[%s9778_s19 + $0x50] sm:$0xff] %vm5065_vm0, %v5059_v31  ;;  %v5057_v49 = vadd.f32 %v9770_v28, %v5037_v8  ;;  %v5040_v38 = vadd.f32 %v6235_v58, %v4878_v5 }
 0x53b   : > { %v5001_v41 = vpop.f32.mrf.mxu0 }
 0x53c   : > { %5074 = vst.msk [vmem:[%s9778_s19 + $0x40] sm:$0xff] %vm5065_vm0, %v5057_v49  ;;  %v5060_v52 = vadd.f32 %v9770_v28, %v5040_v38  ;;  %v5038_v15 = vadd.f32 %v5001_v41, %v4876_v46 }
 0x53e   : > { %5077 = vst.msk [vmem:[%s9778_s19 + $0x58] sm:$0xff] %vm5065_vm0, %v5060_v52  ;;  %v5058_v60 = vadd.f32 %v9770_v28, %v5038_v15 }
 0x540   : > { %5075 = vst.msk [vmem:[%s9778_s19 + $0x48] sm:$0xff] %vm5065_vm0, %v5058_v60 }
 0x548   : > { %v6238_v16 = vpop.f32.mrf.mxu0 }
 0x549   : > { %v5043_v14 = vadd.f32 %v6238_v16, %v4881_v19 }
 0x54a   : > { %v5014_v22 = vpop.f32.mrf.mxu0 }
 0x54b   : > { %v5063_v44 = vadd.f32 %v9770_v28, %v5043_v14  ;;  %v5041_v27 = vadd.f32 %v5014_v22, %v4879_v0 }
 0x54c   : > { %v6239_v10 = vpop.f32.mrf.mxu0 }
 0x54d   : > { %5080 = vst.msk [vmem:[%s9778_s19 + $0x70] sm:$0xff] %vm5065_vm0, %v5063_v44  ;;  %v5061_v42 = vadd.f32 %v9770_v28, %v5041_v27  ;;  %v5044_v56 = vadd.f32 %v6239_v10, %v4882_v34 }
 0x54e   : > { %v5017_v47 = vpop.f32.mrf.mxu0 }
 0x54f   : > { %5078 = vst.msk [vmem:[%s9778_s19 + $0x60] sm:$0xff] %vm5065_vm0, %v5061_v42  ;;  %v5064_v50 = vadd.f32 %v9770_v28, %v5044_v56  ;;  %v5042_v26 = vadd.f32 %v5017_v47, %v4880_v36 }
 0x551   : > { %5081 = vst.msk [vmem:[%s9778_s19 + $0x78] sm:$0xff] %vm5065_vm0, %v5064_v50  ;;  %v5062_v48 = vadd.f32 %v9770_v28, %v5042_v26 }
 0x553   : > { %5079 = vst.msk [vmem:[%s9778_s19 + $0x68] sm:$0xff] %vm5065_vm0, %v5062_v48 }
 0x554 PF: > { %s15_s18 = sadd.s32 1, %s6350_s18  }
 0x555   : > { %p12_p4 = scmp.ge.s32.totalorder %s15_s18, 4  }
 0x557   :  { %14 = sbr.rel (!%p12_p4) target bundleno = 1 (0x1), region = 78 }

</bundles_post_ra>
